<compile_context>
chip_gen: v5e
topology: v5e:2x2
jax: 0.10.0
libtpu: 0.0.40
codegen_flags: <defaults>
</compile_context>

<pallas_src>
import jax
import jax.numpy as jnp
import numpy as np
from jax.experimental import pallas as pl
from jax.experimental.pallas import tpu as pltpu


# ---------------------------------------------------------------------------
# Weight preparation (done ONCE at init, never re-traced per forward)
# ---------------------------------------------------------------------------
def _shuffle_inv_perm(c, g):
    """Inverse permutation of ChannelShuffle(c, g)  (shuffled[k] = orig[perm[k]])."""
    cpg = c // g
    perm = np.array([(k % g) * cpg + (k // g) for k in range(c)], dtype=np.int64)
    return np.argsort(perm)


def _dense_weight(w, scale, groups, perm_in=None):
    """Grouped (C_out, C_in//g, K, K) conv weight -> dense (C_out, K*K*C_in).

    - block-diagonal across groups (zeros elsewhere)
    - optional input-channel permutation folded in (ChannelShuffle fusion)
    - BN scale folded into the rows
    Column ordering is tap-major / channel-minor, matching the in-kernel tap
    concatenation order.
    """
    c_out, cin_g, k, _ = w.shape
    taps = k * k
    cout_g = c_out // groups
    c_in = cin_g * groups
    wr = jnp.transpose(w, (2, 3, 0, 1)).reshape(taps, c_out, cin_g)
    dense = jnp.zeros((taps, c_out, c_in), jnp.float32)
    for g in range(groups):
        dense = dense.at[:, g * cout_g:(g + 1) * cout_g,
                         g * cin_g:(g + 1) * cin_g].set(
            wr[:, g * cout_g:(g + 1) * cout_g, :])
    if perm_in is not None:
        dense = dense[:, :, perm_in]              # fold ChannelShuffle into the weight
    dense = dense * scale.reshape(1, c_out, 1)    # fold BN scale into the weight
    return jnp.transpose(dense, (1, 0, 2)).reshape(c_out, taps * c_in)


def _tap_masks(h, w):
    """(9, H*W) f32 validity masks for the 3x3 zero-padded neighbourhood taps."""
    hw = h * w
    rows = np.arange(hw) // w
    cols = np.arange(hw) % w
    m = np.zeros((9, hw), np.float32)
    t = 0
    for di in (-1, 0, 1):
        for dj in (-1, 0, 1):
            m[t] = ((rows + di >= 0) & (rows + di < h) &
                    (cols + dj >= 0) & (cols + dj < w)).astype(np.float32)
            t += 1
    return m


# ---------------------------------------------------------------------------
# The fused Pallas kernel
# ---------------------------------------------------------------------------
def _make_block_kernel(num_layers, w_sz, lane_len, inter_c, identity_residual,
                       mxu_dtype, tap_dtype):
    def silu(v):
        return v * jax.nn.sigmoid(v)          # f32 epilogue (EUP sigmoid)

    def mm(w, a):
        # MXU matmul, f32 accumulation (single dot, K = taps*C_in).
        return jnp.dot(w, a, preferred_element_type=jnp.float32)

    def to_mxu(a):
        return a if a.dtype == mxu_dtype else a.astype(mxu_dtype)

    def kernel(x_ref, mb_ref, ms_ref,
               wskip_ref, bskip_ref, wfirst_ref, bfirst_ref,
               w1_ref, b1_ref, w2_ref, b2_ref, wmerge_ref, bmerge_ref, *rest):
        if identity_residual:
            o_ref, cat_ref = rest
        else:
            wres_ref, bres_ref, o_ref, cat_ref = rest

        def taps3x3(a, m_ref):
            # a: (C, L); m_ref: (9, C, L) pre-replicated border masks, same dtype
            # as a (no sublane broadcast per multiply).  Rolls are over the whole
            # packed lane axis; the masks zero every wrapped (including
            # cross-image) tap, so lane-packing the batch stays correct.
            parts = []
            t = 0
            for di in (-1, 0, 1):
                for dj in (-1, 0, 1):
                    d = di * w_sz + dj
                    if d == 0:
                        parts.append(a)        # center tap: mask is all ones -> skip mul
                    else:
                        shifted = pltpu.roll(a, shift=(-d) % lane_len, axis=1)
                        parts.append(shifted * m_ref[t])
                    t += 1
            return jnp.concatenate(parts, axis=0)

        x = x_ref[...]                          # (C_in, L) f32
        x_lo = to_mxu(x)                        # hoisted cast, shared by 3 matmuls

        # residual branch
        r = x if identity_residual else (mm(wres_ref[...], x_lo) + bres_ref[...])

        # skip path -> straight into the concat scratch at its final offset
        skip = silu(mm(wskip_ref[...], x_lo) + bskip_ref[...])
        cat_ref[0:inter_c, :] = to_mxu(skip)

        # first layer (1x1 grouped conv, BN folded, SiLU)
        h = silu(mm(wfirst_ref[...], x_lo) + bfirst_ref[...]).astype(tap_dtype)

        # intermediate layers: 3x3 -> (ChannelShuffle folded into w2) -> 3x3
        for l in range(num_layers):             # static unroll
            t1 = to_mxu(taps3x3(h, mb_ref))                  # (9*inter_c, L)
            a1 = silu(mm(w1_ref[l], t1) + b1_ref[l])         # f32, inter_c//2 rows
            t2 = to_mxu(taps3x3(a1, ms_ref))                 # f32 build (72 rows), 1 cast
            h = silu(mm(w2_ref[l], t2) + b2_ref[l]).astype(tap_dtype)
            cat_ref[inter_c * (l + 1):inter_c * (l + 2), :] = to_mxu(h)

        # merge 1x1 on the VMEM-resident concat -> SiLU -> residual add
        y = silu(mm(wmerge_ref[...], cat_ref[...]) + bmerge_ref[...]) + r
        o_ref[...] = y.astype(o_ref.dtype)

    return kernel


def _default_tap_dtype():
    # bf16 tap build only where the VPU has a native bf16 path (v6e / v7x).
    try:
        kind = jax.devices()[0].device_kind.lower()
    except Exception:
        return jnp.float32
    return jnp.bfloat16 if ("v6" in kind or "v7" in kind) else jnp.float32


def _pick_batch_tile(n, hw, target_lanes=1024):
    """Largest divisor of n with tile lane-width <= target (>=1)."""
    bt = max(1, min(n, target_lanes // max(hw, 1)))
    while n % bt:
        bt -= 1
    return bt


def custom_block_apply(x, params, mxu_dtype=jnp.bfloat16, tap_dtype=None):
    """x: (N, C_in, H, W) f32 -> (N, C_out, H, W) f32."""
    n, c_in, h, w = x.shape
    hw = h * w
    pk = params["packed"]
    num_layers = int(pk["w1"].shape[0])
    out_c = int(pk["wmerge"].shape[0])
    inter_c = int(pk["wskip"].shape[0])
    identity = params["identity_residual"]

    if tap_dtype is None:
        tap_dtype = _default_tap_dtype()
    if tap_dtype == jnp.bfloat16 and inter_c % 16 != 0:
        tap_dtype = jnp.float32           # keep bf16 sublane tiles clean

    b_tile = _pick_batch_tile(n, hw)      # images packed along the lane axis
    lane_len = b_tile * hw
    n_steps = n // b_tile

    kernel = _make_block_kernel(num_layers, w, lane_len, inter_c, identity,
                                mxu_dtype, tap_dtype)

    # pre-replicated (no per-use sublane broadcast) + batch-tiled border masks
    base = _tap_masks(h, w)                                   # np (9, hw) f32
    def rep_masks(c, dt):
        return jnp.asarray(np.tile(base[:, None, :], (1, c, b_tile))).astype(dt)
    mb = rep_masks(inter_c, tap_dtype)          # for the 16-channel tap build
    ms = rep_masks(inter_c // 2, jnp.float32)   # 8-channel tap build stays f32

    names = ["wskip", "bskip", "wfirst", "bfirst", "w1", "b1",
             "w2", "b2", "wmerge", "bmerge"]
    if not identity:
        names += ["wres", "bres"]
    # weights to the MXU dtype (bf16 in production); biases stay f32
    consts = [pk[k].astype(mxu_dtype) if k.startswith("w") else pk[k]
              for k in names]

    # lane-pack the batch: (N, C, H, W) -> (C, N*HW)
    x2d = jnp.transpose(x, (1, 0, 2, 3)).reshape(c_in, n * hw)

    def const_spec(a):
        nd = a.ndim
        return pl.BlockSpec(tuple(a.shape), lambda i, nd=nd: (0,) * nd)

    in_specs = ([pl.BlockSpec((c_in, lane_len), lambda i: (0, i)),
                 const_spec(mb), const_spec(ms)]
                + [const_spec(a) for a in consts])

    out = pl.pallas_call(
        kernel,
        out_shape=jax.ShapeDtypeStruct((out_c, n * hw), jnp.float32),
        grid=(n_steps,),
        in_specs=in_specs,
        out_specs=pl.BlockSpec((out_c, lane_len), lambda i: (0, i)),
        scratch_shapes=[pltpu.VMEM((inter_c * (num_layers + 1), lane_len),
                                   mxu_dtype)],
        compiler_params=pltpu.CompilerParams(
            dimension_semantics=("parallel",)),
    )(x2d, mb, ms, *consts)

    return jnp.transpose(out.reshape(out_c, n, h, w), (1, 0, 2, 3))


# ---------------------------------------------------------------------------
# Parameter init (raw params for the reference + packed weights for the kernel)
# ---------------------------------------------------------------------------
def channel_shuffle(x, c, g):
    n, ch, h, w = x.shape
    cpg = c // g
    return x.reshape(n, g, cpg, h, w).transpose(0, 2, 1, 3, 4).reshape(n, ch, h, w)


# TODO(synk): training-mode BatchNorm (running-stat updates) has no kernel
# equivalent here; eval-mode BN is folded into the conv weights/bias.
def _fold_bn(conv_b, gamma, beta, mean, var, eps=1e-5):
    s = gamma / jnp.sqrt(var + eps)
    b = s * (conv_b - mean) + beta
    return s, b


def init_conv_bn(key, c_in, c_out, k, groups, with_bn=True):
    kw, kb, kg, kbeta = jax.random.split(key, 4)
    fan_in = (c_in // groups) * k * k
    w = jax.random.normal(kw, (c_out, c_in // groups, k, k), jnp.float32)
    w = w * (1.0 / np.sqrt(fan_in))
    conv_b = 0.05 * jax.random.normal(kb, (c_out,), jnp.float32)
    if with_bn:
        # eval-mode BatchNorm with fresh running stats (mean=0, var=1)
        gamma = 1.0 + 0.1 * jax.random.normal(kg, (c_out,), jnp.float32)
        beta = 0.1 * jax.random.normal(kbeta, (c_out,), jnp.float32)
        mean = jnp.zeros((c_out,), jnp.float32)
        var = jnp.ones((c_out,), jnp.float32)
        scale, bias = _fold_bn(conv_b, gamma, beta, mean, var)
    else:
        scale, bias = jnp.ones((c_out,), jnp.float32), conv_b
    return dict(w=w, scale=scale, bias=bias, groups=groups, ksize=k)


def init_custom_block(key, in_channels, out_channels, num_layers=4, groups=8):
    inter_c = out_channels // 2
    identity = in_channels == out_channels
    keys = jax.random.split(key, 4 + num_layers)
    params = {
        "inter_c": inter_c,
        "identity_residual": identity,
        "skip": init_conv_bn(keys[0], in_channels, inter_c, 1, groups),
        "first": init_conv_bn(keys[1], in_channels, inter_c, 1, groups),
        "merge": init_conv_bn(keys[2], inter_c * (num_layers + 1), out_channels, 1, groups),
        "residual": (None if identity else
                     init_conv_bn(keys[3], in_channels, out_channels, 1, groups,
                                  with_bn=False)),
        "layers": [],
    }
    for i in range(num_layers):
        k1, k2 = jax.random.split(keys[4 + i])
        params["layers"].append({
            "conv1": init_conv_bn(k1, inter_c, inter_c // 2, 3, inter_c // 4),
            "conv2": init_conv_bn(k2, inter_c // 2, inter_c, 3, inter_c // 8),
        })

    # ---- pack weights for the fused kernel (dense block-diag, BN scale and
    #      ChannelShuffle folded).  Kept in f32 here; cast to the MXU dtype at
    #      apply time (single tiny host-side cast). ----
    def pack(p, perm_in=None):
        wd = _dense_weight(p["w"], p["scale"], p["groups"], perm_in)
        return wd, p["bias"].reshape(-1, 1).astype(jnp.float32)

    inv_perm = _shuffle_inv_perm(inter_c // 2, inter_c // 4)
    wskip, bskip = pack(params["skip"])
    wfirst, bfirst = pack(params["first"])
    wmerge, bmerge = pack(params["merge"])
    w1s, b1s, w2s, b2s = [], [], [], []
    for lp in params["layers"]:
        wd1, bb1 = pack(lp["conv1"])
        wd2, bb2 = pack(lp["conv2"], perm_in=inv_perm)   # shuffle folded into w2
        w1s.append(wd1); b1s.append(bb1); w2s.append(wd2); b2s.append(bb2)

    packed = {
        "wskip": wskip, "bskip": bskip, "wfirst": wfirst, "bfirst": bfirst,
        "w1": jnp.stack(w1s), "b1": jnp.stack(b1s),
        "w2": jnp.stack(w2s), "b2": jnp.stack(b2s),
        "wmerge": wmerge, "bmerge": bmerge,
    }
    if not identity:
        wres, bres = pack(params["residual"])
        packed["wres"] = wres
        packed["bres"] = bres
    params["packed"] = packed
    return params


# ---------------------------------------------------------------------------
# Pure-JAX reference (lax.conv, f32, HIGHEST precision) for correctness checking
# ---------------------------------------------------------------------------
def _ref_conv_bn_act(x, p, act, residual=None):
    pad = p["ksize"] // 2
    y = jax.lax.conv_general_dilated(
        x, p["w"], window_strides=(1, 1),
        padding=[(pad, pad), (pad, pad)],
        dimension_numbers=("NCHW", "OIHW", "NCHW"),
        feature_group_count=p["groups"],
        precision=jax.lax.Precision.HIGHEST)
    y = y * p["scale"][None, :, None, None] + p["bias"][None, :, None, None]
    if act:
        y = y * jax.nn.sigmoid(y)
    if residual is not None:
        y = y + residual
    return y


def custom_block_ref(x, params):
    inter_c = params["inter_c"]
    if params["identity_residual"]:
        r = x
    else:
        r = _ref_conv_bn_act(x, params["residual"], act=False)
    xs = [_ref_conv_bn_act(x, params["skip"], act=True)]
    h = _ref_conv_bn_act(x, params["first"], act=True)
    for lp in params["layers"]:
        h1 = _ref_conv_bn_act(h, lp["conv1"], act=True)
        h1 = channel_shuffle(h1, inter_c // 2, inter_c // 4)
        h = _ref_conv_bn_act(h1, lp["conv2"], act=True)
        xs.append(h)
    cat = jnp.concatenate(xs, axis=1)
    return _ref_conv_bn_act(cat, params["merge"], act=True, residual=r)


# ---------------------------------------------------------------------------
if __name__ == "__main__":
    key = jax.random.PRNGKey(0)

    configs = [
        # conv-residual path (in != out channels)
        dict(in_channels=16, out_channels=32, num_layers=4, groups=8,
             batch=2, height=16, width=16),
        # identity-residual path (in == out channels)
        dict(in_channels=32, out_channels=32, num_layers=2, groups=8,
             batch=2, height=16, width=16),
    ]

    for cfg in configs:
        key, pkey, xkey = jax.random.split(key, 3)
        params = init_custom_block(pkey, cfg["in_channels"], cfg["out_channels"],
                                   cfg["num_layers"], cfg["groups"])
        x = jax.random.normal(
            xkey, (cfg["batch"], cfg["in_channels"], cfg["height"], cfg["width"]),
            jnp.float32)

        out = jax.block_until_ready(custom_block_apply(x, params))
        ref = jax.block_until_ready(custom_block_ref(x, params))

        assert out.shape == (cfg["batch"], cfg["out_channels"],
                             cfg["height"], cfg["width"])
        out_np, ref_np = np.asarray(out), np.asarray(ref)
        # elementwise tolerance accounts for bf16 MXU operands (f32 accumulation)
        # chained through ~10 matmuls; structural bugs would show O(1) errors.
        np.testing.assert_allclose(out_np, ref_np, rtol=5e-2, atol=5e-2)
        # tighter global check so bf16 noise cannot hide per-channel bugs
        rel = np.linalg.norm(out_np - ref_np) / np.linalg.norm(ref_np)
        assert rel < 2e-2, f"relative L2 error too large: {rel}"

    print("KERNEL_OK")
</pallas_src>

<mosaic_0001>
module attributes {stable_mosaic.version = 11 : i64} {
  func.func @kernel(%arg0: i32, %arg1: memref<16x512xf32, #tpu.memory_space<vmem>>, %arg2: memref<9x16x512xf32, #tpu.memory_space<vmem>>, %arg3: memref<9x8x512xf32, #tpu.memory_space<vmem>>, %arg4: memref<16x16xbf16, #tpu.memory_space<vmem>>, %arg5: memref<16x1xf32, #tpu.memory_space<vmem>>, %arg6: memref<16x16xbf16, #tpu.memory_space<vmem>>, %arg7: memref<16x1xf32, #tpu.memory_space<vmem>>, %arg8: memref<4x8x144xbf16, #tpu.memory_space<vmem>>, %arg9: memref<4x8x1xf32, #tpu.memory_space<vmem>>, %arg10: memref<4x16x72xbf16, #tpu.memory_space<vmem>>, %arg11: memref<4x16x1xf32, #tpu.memory_space<vmem>>, %arg12: memref<32x80xbf16, #tpu.memory_space<vmem>>, %arg13: memref<32x1xf32, #tpu.memory_space<vmem>>, %arg14: memref<32x16xbf16, #tpu.memory_space<vmem>>, %arg15: memref<32x1xf32, #tpu.memory_space<vmem>>, %arg16: memref<32x512xf32, #tpu.memory_space<vmem>>, %arg17: memref<80x512xbf16, #tpu.memory_space<vmem>>) attributes {dimension_semantics = [#tpu.dimension_semantics<parallel>], iteration_bounds = array<i64: 1>, scalar_prefetch = 0 : i64, scratch_operands = 1 : i64, tpu.core_type = #tpu.core_type<tc>, window_params = [{transform_indices = @transform_0, window_bounds = array<i64: 16, 512>}, {pipeline_mode = #tpu.pipeline_mode<synchronous>, transform_indices = @transform_1, window_bounds = array<i64: 9, 16, 512>}, {pipeline_mode = #tpu.pipeline_mode<synchronous>, transform_indices = @transform_2, window_bounds = array<i64: 9, 8, 512>}, {pipeline_mode = #tpu.pipeline_mode<synchronous>, transform_indices = @transform_3, window_bounds = array<i64: 16, 16>}, {pipeline_mode = #tpu.pipeline_mode<synchronous>, transform_indices = @transform_4, window_bounds = array<i64: 16, 1>}, {pipeline_mode = #tpu.pipeline_mode<synchronous>, transform_indices = @transform_5, window_bounds = array<i64: 16, 16>}, {pipeline_mode = #tpu.pipeline_mode<synchronous>, transform_indices = @transform_6, window_bounds = array<i64: 16, 1>}, {pipeline_mode = #tpu.pipeline_mode<synchronous>, transform_indices = @transform_7, window_bounds = array<i64: 4, 8, 144>}, {pipeline_mode = #tpu.pipeline_mode<synchronous>, transform_indices = @transform_8, window_bounds = array<i64: 4, 8, 1>}, {pipeline_mode = #tpu.pipeline_mode<synchronous>, transform_indices = @transform_9, window_bounds = array<i64: 4, 16, 72>}, {pipeline_mode = #tpu.pipeline_mode<synchronous>, transform_indices = @transform_10, window_bounds = array<i64: 4, 16, 1>}, {pipeline_mode = #tpu.pipeline_mode<synchronous>, transform_indices = @transform_11, window_bounds = array<i64: 32, 80>}, {pipeline_mode = #tpu.pipeline_mode<synchronous>, transform_indices = @transform_12, window_bounds = array<i64: 32, 1>}, {pipeline_mode = #tpu.pipeline_mode<synchronous>, transform_indices = @transform_13, window_bounds = array<i64: 32, 16>}, {pipeline_mode = #tpu.pipeline_mode<synchronous>, transform_indices = @transform_14, window_bounds = array<i64: 32, 1>}, {transform_indices = @transform_15, window_bounds = array<i64: 32, 512>}]} {
    %c0 = arith.constant 0 : index
    %c0_0 = arith.constant 0 : index
    %0 = vector.load %arg1[%c0, %c0_0] : memref<16x512xf32, #tpu.memory_space<vmem>>, vector<16x512xf32>
    %1 = arith.truncf %0 : vector<16x512xf32> to vector<16x512xbf16>
    %c0_1 = arith.constant 0 : index
    %c0_2 = arith.constant 0 : index
    %2 = vector.load %arg14[%c0_1, %c0_2] : memref<32x16xbf16, #tpu.memory_space<vmem>>, vector<32x16xbf16>
    %cst = arith.constant dense<0.000000e+00> : vector<32x512xf32>
    %3 = tpu.matmul %2, %1, %cst {dimension_numbers = #tpu.dot_dimension_numbers<[1], [0], [0], [1], [0, 0, 1, 1], [], []>} : vector<32x16xbf16>, vector<16x512xbf16>, vector<32x512xf32> -> vector<32x512xf32>
    %c0_3 = arith.constant 0 : index
    %c0_4 = arith.constant 0 : index
    %4 = vector.load %arg15[%c0_3, %c0_4] : memref<32x1xf32, #tpu.memory_space<vmem>>, vector<32x1xf32>
    %5 = vector.broadcast %4 : vector<32x1xf32> to vector<32x512xf32>
    %6 = arith.addf %3, %5 : vector<32x512xf32>
    %c0_5 = arith.constant 0 : index
    %c0_6 = arith.constant 0 : index
    %7 = vector.load %arg4[%c0_5, %c0_6] : memref<16x16xbf16, #tpu.memory_space<vmem>>, vector<16x16xbf16>
    %cst_7 = arith.constant dense<0.000000e+00> : vector<16x512xf32>
    %8 = tpu.matmul %7, %1, %cst_7 {dimension_numbers = #tpu.dot_dimension_numbers<[1], [0], [0], [1], [0, 0, 1, 1], [], []>} : vector<16x16xbf16>, vector<16x512xbf16>, vector<16x512xf32> -> vector<16x512xf32>
    %c0_8 = arith.constant 0 : index
    %c0_9 = arith.constant 0 : index
    %9 = vector.load %arg5[%c0_8, %c0_9] : memref<16x1xf32, #tpu.memory_space<vmem>>, vector<16x1xf32>
    %10 = vector.broadcast %9 : vector<16x1xf32> to vector<16x512xf32>
    %11 = arith.addf %8, %10 : vector<16x512xf32>
    %12 = arith.negf %11 : vector<16x512xf32>
    %13 = math.exp %12 : vector<16x512xf32>
    %cst_10 = arith.constant 1.000000e+00 : f32
    %14 = vector.broadcast %cst_10 : f32 to vector<16x512xf32>
    %15 = arith.addf %14, %13 : vector<16x512xf32>
    %16 = arith.divf %14, %15 : vector<16x512xf32>
    %17 = arith.mulf %11, %16 : vector<16x512xf32>
    %18 = arith.truncf %17 : vector<16x512xf32> to vector<16x512xbf16>
    %c0_11 = arith.constant 0 : index
    %c0_12 = arith.constant 0 : index
    %19 = vector.load %arg17[%c0_11, %c0_12] : memref<80x512xbf16, #tpu.memory_space<vmem>>, vector<16x512xbf16>
    tpu.vector_store %arg17[%c0_11, %c0_12], %18 {strides = array<i32>} : memref<80x512xbf16, #tpu.memory_space<vmem>>, vector<16x512xbf16>,
    %c0_13 = arith.constant 0 : index
    %c0_14 = arith.constant 0 : index
    %20 = vector.load %arg6[%c0_13, %c0_14] : memref<16x16xbf16, #tpu.memory_space<vmem>>, vector<16x16xbf16>
    %cst_15 = arith.constant dense<0.000000e+00> : vector<16x512xf32>
    %21 = tpu.matmul %20, %1, %cst_15 {dimension_numbers = #tpu.dot_dimension_numbers<[1], [0], [0], [1], [0, 0, 1, 1], [], []>} : vector<16x16xbf16>, vector<16x512xbf16>, vector<16x512xf32> -> vector<16x512xf32>
    %c0_16 = arith.constant 0 : index
    %c0_17 = arith.constant 0 : index
    %22 = vector.load %arg7[%c0_16, %c0_17] : memref<16x1xf32, #tpu.memory_space<vmem>>, vector<16x1xf32>
    %23 = vector.broadcast %22 : vector<16x1xf32> to vector<16x512xf32>
    %24 = arith.addf %21, %23 : vector<16x512xf32>
    %25 = arith.negf %24 : vector<16x512xf32>
    %26 = math.exp %25 : vector<16x512xf32>
    %cst_18 = arith.constant 1.000000e+00 : f32
    %27 = vector.broadcast %cst_18 : f32 to vector<16x512xf32>
    %28 = arith.addf %27, %26 : vector<16x512xf32>
    %29 = arith.divf %27, %28 : vector<16x512xf32>
    %30 = arith.mulf %24, %29 : vector<16x512xf32>
    %c17_i32 = arith.constant 17 : i32
    %31 = tpu.dynamic_rotate %30 by %c17_i32 dim 1 : vector<16x512xf32>, i32 -> vector<16x512xf32>
    %c0_19 = arith.constant 0 : index
    %c0_20 = arith.constant 0 : index
    %c0_21 = arith.constant 0 : index
    %32 = vector.load %arg2[%c0_19, %c0_20, %c0_21] : memref<9x16x512xf32, #tpu.memory_space<vmem>>, vector<1x16x512xf32>
    %33 = vector.shape_cast %32 : vector<1x16x512xf32> to vector<16x512xf32>
    %34 = arith.mulf %31, %33 : vector<16x512xf32>
    %c16_i32 = arith.constant 16 : i32
    %35 = tpu.dynamic_rotate %30 by %c16_i32 dim 1 : vector<16x512xf32>, i32 -> vector<16x512xf32>
    %c1 = arith.constant 1 : index
    %c0_22 = arith.constant 0 : index
    %c0_23 = arith.constant 0 : index
    %36 = vector.load %arg2[%c1, %c0_22, %c0_23] : memref<9x16x512xf32, #tpu.memory_space<vmem>>, vector<1x16x512xf32>
    %37 = vector.shape_cast %36 : vector<1x16x512xf32> to vector<16x512xf32>
    %38 = arith.mulf %35, %37 : vector<16x512xf32>
    %c15_i32 = arith.constant 15 : i32
    %39 = tpu.dynamic_rotate %30 by %c15_i32 dim 1 : vector<16x512xf32>, i32 -> vector<16x512xf32>
    %c2 = arith.constant 2 : index
    %c0_24 = arith.constant 0 : index
    %c0_25 = arith.constant 0 : index
    %40 = vector.load %arg2[%c2, %c0_24, %c0_25] : memref<9x16x512xf32, #tpu.memory_space<vmem>>, vector<1x16x512xf32>
    %41 = vector.shape_cast %40 : vector<1x16x512xf32> to vector<16x512xf32>
    %42 = arith.mulf %39, %41 : vector<16x512xf32>
    %c1_i32 = arith.constant 1 : i32
    %43 = tpu.dynamic_rotate %30 by %c1_i32 dim 1 : vector<16x512xf32>, i32 -> vector<16x512xf32>
    %c3 = arith.constant 3 : index
    %c0_26 = arith.constant 0 : index
    %c0_27 = arith.constant 0 : index
    %44 = vector.load %arg2[%c3, %c0_26, %c0_27] : memref<9x16x512xf32, #tpu.memory_space<vmem>>, vector<1x16x512xf32>
    %45 = vector.shape_cast %44 : vector<1x16x512xf32> to vector<16x512xf32>
    %46 = arith.mulf %43, %45 : vector<16x512xf32>
    %c511_i32 = arith.constant 511 : i32
    %47 = tpu.dynamic_rotate %30 by %c511_i32 dim 1 : vector<16x512xf32>, i32 -> vector<16x512xf32>
    %c5 = arith.constant 5 : index
    %c0_28 = arith.constant 0 : index
    %c0_29 = arith.constant 0 : index
    %48 = vector.load %arg2[%c5, %c0_28, %c0_29] : memref<9x16x512xf32, #tpu.memory_space<vmem>>, vector<1x16x512xf32>
    %49 = vector.shape_cast %48 : vector<1x16x512xf32> to vector<16x512xf32>
    %50 = arith.mulf %47, %49 : vector<16x512xf32>
    %c497_i32 = arith.constant 497 : i32
    %51 = tpu.dynamic_rotate %30 by %c497_i32 dim 1 : vector<16x512xf32>, i32 -> vector<16x512xf32>
    %c6 = arith.constant 6 : index
    %c0_30 = arith.constant 0 : index
    %c0_31 = arith.constant 0 : index
    %52 = vector.load %arg2[%c6, %c0_30, %c0_31] : memref<9x16x512xf32, #tpu.memory_space<vmem>>, vector<1x16x512xf32>
    %53 = vector.shape_cast %52 : vector<1x16x512xf32> to vector<16x512xf32>
    %54 = arith.mulf %51, %53 : vector<16x512xf32>
    %c496_i32 = arith.constant 496 : i32
    %55 = tpu.dynamic_rotate %30 by %c496_i32 dim 1 : vector<16x512xf32>, i32 -> vector<16x512xf32>
    %c7 = arith.constant 7 : index
    %c0_32 = arith.constant 0 : index
    %c0_33 = arith.constant 0 : index
    %56 = vector.load %arg2[%c7, %c0_32, %c0_33] : memref<9x16x512xf32, #tpu.memory_space<vmem>>, vector<1x16x512xf32>
    %57 = vector.shape_cast %56 : vector<1x16x512xf32> to vector<16x512xf32>
    %58 = arith.mulf %55, %57 : vector<16x512xf32>
    %c495_i32 = arith.constant 495 : i32
    %59 = tpu.dynamic_rotate %30 by %c495_i32 dim 1 : vector<16x512xf32>, i32 -> vector<16x512xf32>
    %c8 = arith.constant 8 : index
    %c0_34 = arith.constant 0 : index
    %c0_35 = arith.constant 0 : index
    %60 = vector.load %arg2[%c8, %c0_34, %c0_35] : memref<9x16x512xf32, #tpu.memory_space<vmem>>, vector<1x16x512xf32>
    %61 = vector.shape_cast %60 : vector<1x16x512xf32> to vector<16x512xf32>
    %62 = arith.mulf %59, %61 : vector<16x512xf32>
    %63 = tpu.concatenate %34, %38, %42, %46, %30, %50, %54, %58, %62 in 0 : vector<16x512xf32>, vector<16x512xf32>, vector<16x512xf32>, vector<16x512xf32>, vector<16x512xf32>, vector<16x512xf32>, vector<16x512xf32>, vector<16x512xf32>, vector<16x512xf32> -> vector<144x512xf32>
    %64 = arith.truncf %63 : vector<144x512xf32> to vector<144x512xbf16>
    %c0_36 = arith.constant 0 : index
    %c0_37 = arith.constant 0 : index
    %c0_38 = arith.constant 0 : index
    %65 = vector.load %arg8[%c0_36, %c0_37, %c0_38] : memref<4x8x144xbf16, #tpu.memory_space<vmem>>, vector<1x8x144xbf16>
    %66 = vector.shape_cast %65 : vector<1x8x144xbf16> to vector<8x144xbf16>
    %cst_39 = arith.constant dense<0.000000e+00> : vector<8x512xf32>
    %67 = tpu.matmul %66, %64, %cst_39 {dimension_numbers = #tpu.dot_dimension_numbers<[1], [0], [0], [1], [0, 0, 1, 1], [], []>} : vector<8x144xbf16>, vector<144x512xbf16>, vector<8x512xf32> -> vector<8x512xf32>
    %c0_40 = arith.constant 0 : index
    %c0_41 = arith.constant 0 : index
    %c0_42 = arith.constant 0 : index
    %68 = vector.load %arg9[%c0_40, %c0_41, %c0_42] : memref<4x8x1xf32, #tpu.memory_space<vmem>>, vector<1x8x1xf32>
    %69 = vector.shape_cast %68 : vector<1x8x1xf32> to vector<8x1xf32>
    %70 = vector.broadcast %69 : vector<8x1xf32> to vector<8x512xf32>
    %71 = arith.addf %67, %70 : vector<8x512xf32>
    %72 = arith.negf %71 : vector<8x512xf32>
    %73 = math.exp %72 : vector<8x512xf32>
    %cst_43 = arith.constant 1.000000e+00 : f32
    %74 = vector.broadcast %cst_43 : f32 to vector<8x512xf32>
    %75 = arith.addf %74, %73 : vector<8x512xf32>
    %76 = arith.divf %74, %75 : vector<8x512xf32>
    %77 = arith.mulf %71, %76 : vector<8x512xf32>
    %c17_i32_44 = arith.constant 17 : i32
    %78 = tpu.dynamic_rotate %77 by %c17_i32_44 dim 1 : vector<8x512xf32>, i32 -> vector<8x512xf32>
    %c0_45 = arith.constant 0 : index
    %c0_46 = arith.constant 0 : index
    %c0_47 = arith.constant 0 : index
    %79 = vector.load %arg3[%c0_45, %c0_46, %c0_47] : memref<9x8x512xf32, #tpu.memory_space<vmem>>, vector<1x8x512xf32>
    %80 = vector.shape_cast %79 : vector<1x8x512xf32> to vector<8x512xf32>
    %81 = arith.mulf %78, %80 : vector<8x512xf32>
    %c16_i32_48 = arith.constant 16 : i32
    %82 = tpu.dynamic_rotate %77 by %c16_i32_48 dim 1 : vector<8x512xf32>, i32 -> vector<8x512xf32>
    %c1_49 = arith.constant 1 : index
    %c0_50 = arith.constant 0 : index
    %c0_51 = arith.constant 0 : index
    %83 = vector.load %arg3[%c1_49, %c0_50, %c0_51] : memref<9x8x512xf32, #tpu.memory_space<vmem>>, vector<1x8x512xf32>
    %84 = vector.shape_cast %83 : vector<1x8x512xf32> to vector<8x512xf32>
    %85 = arith.mulf %82, %84 : vector<8x512xf32>
    %c15_i32_52 = arith.constant 15 : i32
    %86 = tpu.dynamic_rotate %77 by %c15_i32_52 dim 1 : vector<8x512xf32>, i32 -> vector<8x512xf32>
    %c2_53 = arith.constant 2 : index
    %c0_54 = arith.constant 0 : index
    %c0_55 = arith.constant 0 : index
    %87 = vector.load %arg3[%c2_53, %c0_54, %c0_55] : memref<9x8x512xf32, #tpu.memory_space<vmem>>, vector<1x8x512xf32>
    %88 = vector.shape_cast %87 : vector<1x8x512xf32> to vector<8x512xf32>
    %89 = arith.mulf %86, %88 : vector<8x512xf32>
    %c1_i32_56 = arith.constant 1 : i32
    %90 = tpu.dynamic_rotate %77 by %c1_i32_56 dim 1 : vector<8x512xf32>, i32 -> vector<8x512xf32>
    %c3_57 = arith.constant 3 : index
    %c0_58 = arith.constant 0 : index
    %c0_59 = arith.constant 0 : index
    %91 = vector.load %arg3[%c3_57, %c0_58, %c0_59] : memref<9x8x512xf32, #tpu.memory_space<vmem>>, vector<1x8x512xf32>
    %92 = vector.shape_cast %91 : vector<1x8x512xf32> to vector<8x512xf32>
    %93 = arith.mulf %90, %92 : vector<8x512xf32>
    %c511_i32_60 = arith.constant 511 : i32
    %94 = tpu.dynamic_rotate %77 by %c511_i32_60 dim 1 : vector<8x512xf32>, i32 -> vector<8x512xf32>
    %c5_61 = arith.constant 5 : index
    %c0_62 = arith.constant 0 : index
    %c0_63 = arith.constant 0 : index
    %95 = vector.load %arg3[%c5_61, %c0_62, %c0_63] : memref<9x8x512xf32, #tpu.memory_space<vmem>>, vector<1x8x512xf32>
    %96 = vector.shape_cast %95 : vector<1x8x512xf32> to vector<8x512xf32>
    %97 = arith.mulf %94, %96 : vector<8x512xf32>
    %c497_i32_64 = arith.constant 497 : i32
    %98 = tpu.dynamic_rotate %77 by %c497_i32_64 dim 1 : vector<8x512xf32>, i32 -> vector<8x512xf32>
    %c6_65 = arith.constant 6 : index
    %c0_66 = arith.constant 0 : index
    %c0_67 = arith.constant 0 : index
    %99 = vector.load %arg3[%c6_65, %c0_66, %c0_67] : memref<9x8x512xf32, #tpu.memory_space<vmem>>, vector<1x8x512xf32>
    %100 = vector.shape_cast %99 : vector<1x8x512xf32> to vector<8x512xf32>
    %101 = arith.mulf %98, %100 : vector<8x512xf32>
    %c496_i32_68 = arith.constant 496 : i32
    %102 = tpu.dynamic_rotate %77 by %c496_i32_68 dim 1 : vector<8x512xf32>, i32 -> vector<8x512xf32>
    %c7_69 = arith.constant 7 : index
    %c0_70 = arith.constant 0 : index
    %c0_71 = arith.constant 0 : index
    %103 = vector.load %arg3[%c7_69, %c0_70, %c0_71] : memref<9x8x512xf32, #tpu.memory_space<vmem>>, vector<1x8x512xf32>
    %104 = vector.shape_cast %103 : vector<1x8x512xf32> to vector<8x512xf32>
    %105 = arith.mulf %102, %104 : vector<8x512xf32>
    %c495_i32_72 = arith.constant 495 : i32
    %106 = tpu.dynamic_rotate %77 by %c495_i32_72 dim 1 : vector<8x512xf32>, i32 -> vector<8x512xf32>
    %c8_73 = arith.constant 8 : index
    %c0_74 = arith.constant 0 : index
    %c0_75 = arith.constant 0 : index
    %107 = vector.load %arg3[%c8_73, %c0_74, %c0_75] : memref<9x8x512xf32, #tpu.memory_space<vmem>>, vector<1x8x512xf32>
    %108 = vector.shape_cast %107 : vector<1x8x512xf32> to vector<8x512xf32>
    %109 = arith.mulf %106, %108 : vector<8x512xf32>
    %110 = tpu.concatenate %81, %85, %89, %93, %77, %97, %101, %105, %109 in 0 : vector<8x512xf32>, vector<8x512xf32>, vector<8x512xf32>, vector<8x512xf32>, vector<8x512xf32>, vector<8x512xf32>, vector<8x512xf32>, vector<8x512xf32>, vector<8x512xf32> -> vector<72x512xf32>
    %111 = arith.truncf %110 : vector<72x512xf32> to vector<72x512xbf16>
    %c0_76 = arith.constant 0 : index
    %c0_77 = arith.constant 0 : index
    %c0_78 = arith.constant 0 : index
    %112 = vector.load %arg10[%c0_76, %c0_77, %c0_78] : memref<4x16x72xbf16, #tpu.memory_space<vmem>>, vector<1x16x72xbf16>
    %113 = vector.shape_cast %112 : vector<1x16x72xbf16> to vector<16x72xbf16>
    %cst_79 = arith.constant dense<0.000000e+00> : vector<16x512xf32>
    %114 = tpu.matmul %113, %111, %cst_79 {dimension_numbers = #tpu.dot_dimension_numbers<[1], [0], [0], [1], [0, 0, 1, 1], [], []>} : vector<16x72xbf16>, vector<72x512xbf16>, vector<16x512xf32> -> vector<16x512xf32>
    %c0_80 = arith.constant 0 : index
    %c0_81 = arith.constant 0 : index
    %c0_82 = arith.constant 0 : index
    %115 = vector.load %arg11[%c0_80, %c0_81, %c0_82] : memref<4x16x1xf32, #tpu.memory_space<vmem>>, vector<1x16x1xf32>
    %116 = vector.shape_cast %115 : vector<1x16x1xf32> to vector<16x1xf32>
    %117 = vector.broadcast %116 : vector<16x1xf32> to vector<16x512xf32>
    %118 = arith.addf %114, %117 : vector<16x512xf32>
    %119 = arith.negf %118 : vector<16x512xf32>
    %120 = math.exp %119 : vector<16x512xf32>
    %cst_83 = arith.constant 1.000000e+00 : f32
    %121 = vector.broadcast %cst_83 : f32 to vector<16x512xf32>
    %122 = arith.addf %121, %120 : vector<16x512xf32>
    %123 = arith.divf %121, %122 : vector<16x512xf32>
    %124 = arith.mulf %118, %123 : vector<16x512xf32>
    %125 = arith.truncf %124 : vector<16x512xf32> to vector<16x512xbf16>
    %c16 = arith.constant 16 : index
    %c0_84 = arith.constant 0 : index
    %126 = vector.load %arg17[%c16, %c0_84] : memref<80x512xbf16, #tpu.memory_space<vmem>>, vector<16x512xbf16>
    tpu.vector_store %arg17[%c16, %c0_84], %125 {strides = array<i32>} : memref<80x512xbf16, #tpu.memory_space<vmem>>, vector<16x512xbf16>,
    %c17_i32_85 = arith.constant 17 : i32
    %127 = tpu.dynamic_rotate %124 by %c17_i32_85 dim 1 : vector<16x512xf32>, i32 -> vector<16x512xf32>
    %c0_86 = arith.constant 0 : index
    %c0_87 = arith.constant 0 : index
    %c0_88 = arith.constant 0 : index
    %128 = vector.load %arg2[%c0_86, %c0_87, %c0_88] : memref<9x16x512xf32, #tpu.memory_space<vmem>>, vector<1x16x512xf32>
    %129 = vector.shape_cast %128 : vector<1x16x512xf32> to vector<16x512xf32>
    %130 = arith.mulf %127, %129 : vector<16x512xf32>
    %c16_i32_89 = arith.constant 16 : i32
    %131 = tpu.dynamic_rotate %124 by %c16_i32_89 dim 1 : vector<16x512xf32>, i32 -> vector<16x512xf32>
    %c1_90 = arith.constant 1 : index
    %c0_91 = arith.constant 0 : index
    %c0_92 = arith.constant 0 : index
    %132 = vector.load %arg2[%c1_90, %c0_91, %c0_92] : memref<9x16x512xf32, #tpu.memory_space<vmem>>, vector<1x16x512xf32>
    %133 = vector.shape_cast %132 : vector<1x16x512xf32> to vector<16x512xf32>
    %134 = arith.mulf %131, %133 : vector<16x512xf32>
    %c15_i32_93 = arith.constant 15 : i32
    %135 = tpu.dynamic_rotate %124 by %c15_i32_93 dim 1 : vector<16x512xf32>, i32 -> vector<16x512xf32>
    %c2_94 = arith.constant 2 : index
    %c0_95 = arith.constant 0 : index
    %c0_96 = arith.constant 0 : index
    %136 = vector.load %arg2[%c2_94, %c0_95, %c0_96] : memref<9x16x512xf32, #tpu.memory_space<vmem>>, vector<1x16x512xf32>
    %137 = vector.shape_cast %136 : vector<1x16x512xf32> to vector<16x512xf32>
    %138 = arith.mulf %135, %137 : vector<16x512xf32>
    %c1_i32_97 = arith.constant 1 : i32
    %139 = tpu.dynamic_rotate %124 by %c1_i32_97 dim 1 : vector<16x512xf32>, i32 -> vector<16x512xf32>
    %c3_98 = arith.constant 3 : index
    %c0_99 = arith.constant 0 : index
    %c0_100 = arith.constant 0 : index
    %140 = vector.load %arg2[%c3_98, %c0_99, %c0_100] : memref<9x16x512xf32, #tpu.memory_space<vmem>>, vector<1x16x512xf32>
    %141 = vector.shape_cast %140 : vector<1x16x512xf32> to vector<16x512xf32>
    %142 = arith.mulf %139, %141 : vector<16x512xf32>
    %c511_i32_101 = arith.constant 511 : i32
    %143 = tpu.dynamic_rotate %124 by %c511_i32_101 dim 1 : vector<16x512xf32>, i32 -> vector<16x512xf32>
    %c5_102 = arith.constant 5 : index
    %c0_103 = arith.constant 0 : index
    %c0_104 = arith.constant 0 : index
    %144 = vector.load %arg2[%c5_102, %c0_103, %c0_104] : memref<9x16x512xf32, #tpu.memory_space<vmem>>, vector<1x16x512xf32>
    %145 = vector.shape_cast %144 : vector<1x16x512xf32> to vector<16x512xf32>
    %146 = arith.mulf %143, %145 : vector<16x512xf32>
    %c497_i32_105 = arith.constant 497 : i32
    %147 = tpu.dynamic_rotate %124 by %c497_i32_105 dim 1 : vector<16x512xf32>, i32 -> vector<16x512xf32>
    %c6_106 = arith.constant 6 : index
    %c0_107 = arith.constant 0 : index
    %c0_108 = arith.constant 0 : index
    %148 = vector.load %arg2[%c6_106, %c0_107, %c0_108] : memref<9x16x512xf32, #tpu.memory_space<vmem>>, vector<1x16x512xf32>
    %149 = vector.shape_cast %148 : vector<1x16x512xf32> to vector<16x512xf32>
    %150 = arith.mulf %147, %149 : vector<16x512xf32>
    %c496_i32_109 = arith.constant 496 : i32
    %151 = tpu.dynamic_rotate %124 by %c496_i32_109 dim 1 : vector<16x512xf32>, i32 -> vector<16x512xf32>
    %c7_110 = arith.constant 7 : index
    %c0_111 = arith.constant 0 : index
    %c0_112 = arith.constant 0 : index
    %152 = vector.load %arg2[%c7_110, %c0_111, %c0_112] : memref<9x16x512xf32, #tpu.memory_space<vmem>>, vector<1x16x512xf32>
    %153 = vector.shape_cast %152 : vector<1x16x512xf32> to vector<16x512xf32>
    %154 = arith.mulf %151, %153 : vector<16x512xf32>
    %c495_i32_113 = arith.constant 495 : i32
    %155 = tpu.dynamic_rotate %124 by %c495_i32_113 dim 1 : vector<16x512xf32>, i32 -> vector<16x512xf32>
    %c8_114 = arith.constant 8 : index
    %c0_115 = arith.constant 0 : index
    %c0_116 = arith.constant 0 : index
    %156 = vector.load %arg2[%c8_114, %c0_115, %c0_116] : memref<9x16x512xf32, #tpu.memory_space<vmem>>, vector<1x16x512xf32>
    %157 = vector.shape_cast %156 : vector<1x16x512xf32> to vector<16x512xf32>
    %158 = arith.mulf %155, %157 : vector<16x512xf32>
    %159 = tpu.concatenate %130, %134, %138, %142, %124, %146, %150, %154, %158 in 0 : vector<16x512xf32>, vector<16x512xf32>, vector<16x512xf32>, vector<16x512xf32>, vector<16x512xf32>, vector<16x512xf32>, vector<16x512xf32>, vector<16x512xf32>, vector<16x512xf32> -> vector<144x512xf32>
    %160 = arith.truncf %159 : vector<144x512xf32> to vector<144x512xbf16>
    %c1_117 = arith.constant 1 : index
    %c0_118 = arith.constant 0 : index
    %c0_119 = arith.constant 0 : index
    %161 = vector.load %arg8[%c1_117, %c0_118, %c0_119] : memref<4x8x144xbf16, #tpu.memory_space<vmem>>, vector<1x8x144xbf16>
    %162 = vector.shape_cast %161 : vector<1x8x144xbf16> to vector<8x144xbf16>
    %cst_120 = arith.constant dense<0.000000e+00> : vector<8x512xf32>
    %163 = tpu.matmul %162, %160, %cst_120 {dimension_numbers = #tpu.dot_dimension_numbers<[1], [0], [0], [1], [0, 0, 1, 1], [], []>} : vector<8x144xbf16>, vector<144x512xbf16>, vector<8x512xf32> -> vector<8x512xf32>
    %c1_121 = arith.constant 1 : index
    %c0_122 = arith.constant 0 : index
    %c0_123 = arith.constant 0 : index
    %164 = vector.load %arg9[%c1_121, %c0_122, %c0_123] : memref<4x8x1xf32, #tpu.memory_space<vmem>>, vector<1x8x1xf32>
    %165 = vector.shape_cast %164 : vector<1x8x1xf32> to vector<8x1xf32>
    %166 = vector.broadcast %165 : vector<8x1xf32> to vector<8x512xf32>
    %167 = arith.addf %163, %166 : vector<8x512xf32>
    %168 = arith.negf %167 : vector<8x512xf32>
    %169 = math.exp %168 : vector<8x512xf32>
    %cst_124 = arith.constant 1.000000e+00 : f32
    %170 = vector.broadcast %cst_124 : f32 to vector<8x512xf32>
    %171 = arith.addf %170, %169 : vector<8x512xf32>
    %172 = arith.divf %170, %171 : vector<8x512xf32>
    %173 = arith.mulf %167, %172 : vector<8x512xf32>
    %c17_i32_125 = arith.constant 17 : i32
    %174 = tpu.dynamic_rotate %173 by %c17_i32_125 dim 1 : vector<8x512xf32>, i32 -> vector<8x512xf32>
    %c0_126 = arith.constant 0 : index
    %c0_127 = arith.constant 0 : index
    %c0_128 = arith.constant 0 : index
    %175 = vector.load %arg3[%c0_126, %c0_127, %c0_128] : memref<9x8x512xf32, #tpu.memory_space<vmem>>, vector<1x8x512xf32>
    %176 = vector.shape_cast %175 : vector<1x8x512xf32> to vector<8x512xf32>
    %177 = arith.mulf %174, %176 : vector<8x512xf32>
    %c16_i32_129 = arith.constant 16 : i32
    %178 = tpu.dynamic_rotate %173 by %c16_i32_129 dim 1 : vector<8x512xf32>, i32 -> vector<8x512xf32>
    %c1_130 = arith.constant 1 : index
    %c0_131 = arith.constant 0 : index
    %c0_132 = arith.constant 0 : index
    %179 = vector.load %arg3[%c1_130, %c0_131, %c0_132] : memref<9x8x512xf32, #tpu.memory_space<vmem>>, vector<1x8x512xf32>
    %180 = vector.shape_cast %179 : vector<1x8x512xf32> to vector<8x512xf32>
    %181 = arith.mulf %178, %180 : vector<8x512xf32>
    %c15_i32_133 = arith.constant 15 : i32
    %182 = tpu.dynamic_rotate %173 by %c15_i32_133 dim 1 : vector<8x512xf32>, i32 -> vector<8x512xf32>
    %c2_134 = arith.constant 2 : index
    %c0_135 = arith.constant 0 : index
    %c0_136 = arith.constant 0 : index
    %183 = vector.load %arg3[%c2_134, %c0_135, %c0_136] : memref<9x8x512xf32, #tpu.memory_space<vmem>>, vector<1x8x512xf32>
    %184 = vector.shape_cast %183 : vector<1x8x512xf32> to vector<8x512xf32>
    %185 = arith.mulf %182, %184 : vector<8x512xf32>
    %c1_i32_137 = arith.constant 1 : i32
    %186 = tpu.dynamic_rotate %173 by %c1_i32_137 dim 1 : vector<8x512xf32>, i32 -> vector<8x512xf32>
    %c3_138 = arith.constant 3 : index
    %c0_139 = arith.constant 0 : index
    %c0_140 = arith.constant 0 : index
    %187 = vector.load %arg3[%c3_138, %c0_139, %c0_140] : memref<9x8x512xf32, #tpu.memory_space<vmem>>, vector<1x8x512xf32>
    %188 = vector.shape_cast %187 : vector<1x8x512xf32> to vector<8x512xf32>
    %189 = arith.mulf %186, %188 : vector<8x512xf32>
    %c511_i32_141 = arith.constant 511 : i32
    %190 = tpu.dynamic_rotate %173 by %c511_i32_141 dim 1 : vector<8x512xf32>, i32 -> vector<8x512xf32>
    %c5_142 = arith.constant 5 : index
    %c0_143 = arith.constant 0 : index
    %c0_144 = arith.constant 0 : index
    %191 = vector.load %arg3[%c5_142, %c0_143, %c0_144] : memref<9x8x512xf32, #tpu.memory_space<vmem>>, vector<1x8x512xf32>
    %192 = vector.shape_cast %191 : vector<1x8x512xf32> to vector<8x512xf32>
    %193 = arith.mulf %190, %192 : vector<8x512xf32>
    %c497_i32_145 = arith.constant 497 : i32
    %194 = tpu.dynamic_rotate %173 by %c497_i32_145 dim 1 : vector<8x512xf32>, i32 -> vector<8x512xf32>
    %c6_146 = arith.constant 6 : index
    %c0_147 = arith.constant 0 : index
    %c0_148 = arith.constant 0 : index
    %195 = vector.load %arg3[%c6_146, %c0_147, %c0_148] : memref<9x8x512xf32, #tpu.memory_space<vmem>>, vector<1x8x512xf32>
    %196 = vector.shape_cast %195 : vector<1x8x512xf32> to vector<8x512xf32>
    %197 = arith.mulf %194, %196 : vector<8x512xf32>
    %c496_i32_149 = arith.constant 496 : i32
    %198 = tpu.dynamic_rotate %173 by %c496_i32_149 dim 1 : vector<8x512xf32>, i32 -> vector<8x512xf32>
    %c7_150 = arith.constant 7 : index
    %c0_151 = arith.constant 0 : index
    %c0_152 = arith.constant 0 : index
    %199 = vector.load %arg3[%c7_150, %c0_151, %c0_152] : memref<9x8x512xf32, #tpu.memory_space<vmem>>, vector<1x8x512xf32>
    %200 = vector.shape_cast %199 : vector<1x8x512xf32> to vector<8x512xf32>
    %201 = arith.mulf %198, %200 : vector<8x512xf32>
    %c495_i32_153 = arith.constant 495 : i32
    %202 = tpu.dynamic_rotate %173 by %c495_i32_153 dim 1 : vector<8x512xf32>, i32 -> vector<8x512xf32>
    %c8_154 = arith.constant 8 : index
    %c0_155 = arith.constant 0 : index
    %c0_156 = arith.constant 0 : index
    %203 = vector.load %arg3[%c8_154, %c0_155, %c0_156] : memref<9x8x512xf32, #tpu.memory_space<vmem>>, vector<1x8x512xf32>
    %204 = vector.shape_cast %203 : vector<1x8x512xf32> to vector<8x512xf32>
    %205 = arith.mulf %202, %204 : vector<8x512xf32>
    %206 = tpu.concatenate %177, %181, %185, %189, %173, %193, %197, %201, %205 in 0 : vector<8x512xf32>, vector<8x512xf32>, vector<8x512xf32>, vector<8x512xf32>, vector<8x512xf32>, vector<8x512xf32>, vector<8x512xf32>, vector<8x512xf32>, vector<8x512xf32> -> vector<72x512xf32>
    %207 = arith.truncf %206 : vector<72x512xf32> to vector<72x512xbf16>
    %c1_157 = arith.constant 1 : index
    %c0_158 = arith.constant 0 : index
    %c0_159 = arith.constant 0 : index
    %208 = vector.load %arg10[%c1_157, %c0_158, %c0_159] : memref<4x16x72xbf16, #tpu.memory_space<vmem>>, vector<1x16x72xbf16>
    %209 = vector.shape_cast %208 : vector<1x16x72xbf16> to vector<16x72xbf16>
    %cst_160 = arith.constant dense<0.000000e+00> : vector<16x512xf32>
    %210 = tpu.matmul %209, %207, %cst_160 {dimension_numbers = #tpu.dot_dimension_numbers<[1], [0], [0], [1], [0, 0, 1, 1], [], []>} : vector<16x72xbf16>, vector<72x512xbf16>, vector<16x512xf32> -> vector<16x512xf32>
    %c1_161 = arith.constant 1 : index
    %c0_162 = arith.constant 0 : index
    %c0_163 = arith.constant 0 : index
    %211 = vector.load %arg11[%c1_161, %c0_162, %c0_163] : memref<4x16x1xf32, #tpu.memory_space<vmem>>, vector<1x16x1xf32>
    %212 = vector.shape_cast %211 : vector<1x16x1xf32> to vector<16x1xf32>
    %213 = vector.broadcast %212 : vector<16x1xf32> to vector<16x512xf32>
    %214 = arith.addf %210, %213 : vector<16x512xf32>
    %215 = arith.negf %214 : vector<16x512xf32>
    %216 = math.exp %215 : vector<16x512xf32>
    %cst_164 = arith.constant 1.000000e+00 : f32
    %217 = vector.broadcast %cst_164 : f32 to vector<16x512xf32>
    %218 = arith.addf %217, %216 : vector<16x512xf32>
    %219 = arith.divf %217, %218 : vector<16x512xf32>
    %220 = arith.mulf %214, %219 : vector<16x512xf32>
    %221 = arith.truncf %220 : vector<16x512xf32> to vector<16x512xbf16>
    %c32 = arith.constant 32 : index
    %c0_165 = arith.constant 0 : index
    %222 = vector.load %arg17[%c32, %c0_165] : memref<80x512xbf16, #tpu.memory_space<vmem>>, vector<16x512xbf16>
    tpu.vector_store %arg17[%c32, %c0_165], %221 {strides = array<i32>} : memref<80x512xbf16, #tpu.memory_space<vmem>>, vector<16x512xbf16>,
    %c17_i32_166 = arith.constant 17 : i32
    %223 = tpu.dynamic_rotate %220 by %c17_i32_166 dim 1 : vector<16x512xf32>, i32 -> vector<16x512xf32>
    %c0_167 = arith.constant 0 : index
    %c0_168 = arith.constant 0 : index
    %c0_169 = arith.constant 0 : index
    %224 = vector.load %arg2[%c0_167, %c0_168, %c0_169] : memref<9x16x512xf32, #tpu.memory_space<vmem>>, vector<1x16x512xf32>
    %225 = vector.shape_cast %224 : vector<1x16x512xf32> to vector<16x512xf32>
    %226 = arith.mulf %223, %225 : vector<16x512xf32>
    %c16_i32_170 = arith.constant 16 : i32
    %227 = tpu.dynamic_rotate %220 by %c16_i32_170 dim 1 : vector<16x512xf32>, i32 -> vector<16x512xf32>
    %c1_171 = arith.constant 1 : index
    %c0_172 = arith.constant 0 : index
    %c0_173 = arith.constant 0 : index
    %228 = vector.load %arg2[%c1_171, %c0_172, %c0_173] : memref<9x16x512xf32, #tpu.memory_space<vmem>>, vector<1x16x512xf32>
    %229 = vector.shape_cast %228 : vector<1x16x512xf32> to vector<16x512xf32>
    %230 = arith.mulf %227, %229 : vector<16x512xf32>
    %c15_i32_174 = arith.constant 15 : i32
    %231 = tpu.dynamic_rotate %220 by %c15_i32_174 dim 1 : vector<16x512xf32>, i32 -> vector<16x512xf32>
    %c2_175 = arith.constant 2 : index
    %c0_176 = arith.constant 0 : index
    %c0_177 = arith.constant 0 : index
    %232 = vector.load %arg2[%c2_175, %c0_176, %c0_177] : memref<9x16x512xf32, #tpu.memory_space<vmem>>, vector<1x16x512xf32>
    %233 = vector.shape_cast %232 : vector<1x16x512xf32> to vector<16x512xf32>
    %234 = arith.mulf %231, %233 : vector<16x512xf32>
    %c1_i32_178 = arith.constant 1 : i32
    %235 = tpu.dynamic_rotate %220 by %c1_i32_178 dim 1 : vector<16x512xf32>, i32 -> vector<16x512xf32>
    %c3_179 = arith.constant 3 : index
    %c0_180 = arith.constant 0 : index
    %c0_181 = arith.constant 0 : index
    %236 = vector.load %arg2[%c3_179, %c0_180, %c0_181] : memref<9x16x512xf32, #tpu.memory_space<vmem>>, vector<1x16x512xf32>
    %237 = vector.shape_cast %236 : vector<1x16x512xf32> to vector<16x512xf32>
    %238 = arith.mulf %235, %237 : vector<16x512xf32>
    %c511_i32_182 = arith.constant 511 : i32
    %239 = tpu.dynamic_rotate %220 by %c511_i32_182 dim 1 : vector<16x512xf32>, i32 -> vector<16x512xf32>
    %c5_183 = arith.constant 5 : index
    %c0_184 = arith.constant 0 : index
    %c0_185 = arith.constant 0 : index
    %240 = vector.load %arg2[%c5_183, %c0_184, %c0_185] : memref<9x16x512xf32, #tpu.memory_space<vmem>>, vector<1x16x512xf32>
    %241 = vector.shape_cast %240 : vector<1x16x512xf32> to vector<16x512xf32>
    %242 = arith.mulf %239, %241 : vector<16x512xf32>
    %c497_i32_186 = arith.constant 497 : i32
    %243 = tpu.dynamic_rotate %220 by %c497_i32_186 dim 1 : vector<16x512xf32>, i32 -> vector<16x512xf32>
    %c6_187 = arith.constant 6 : index
    %c0_188 = arith.constant 0 : index
    %c0_189 = arith.constant 0 : index
    %244 = vector.load %arg2[%c6_187, %c0_188, %c0_189] : memref<9x16x512xf32, #tpu.memory_space<vmem>>, vector<1x16x512xf32>
    %245 = vector.shape_cast %244 : vector<1x16x512xf32> to vector<16x512xf32>
    %246 = arith.mulf %243, %245 : vector<16x512xf32>
    %c496_i32_190 = arith.constant 496 : i32
    %247 = tpu.dynamic_rotate %220 by %c496_i32_190 dim 1 : vector<16x512xf32>, i32 -> vector<16x512xf32>
    %c7_191 = arith.constant 7 : index
    %c0_192 = arith.constant 0 : index
    %c0_193 = arith.constant 0 : index
    %248 = vector.load %arg2[%c7_191, %c0_192, %c0_193] : memref<9x16x512xf32, #tpu.memory_space<vmem>>, vector<1x16x512xf32>
    %249 = vector.shape_cast %248 : vector<1x16x512xf32> to vector<16x512xf32>
    %250 = arith.mulf %247, %249 : vector<16x512xf32>
    %c495_i32_194 = arith.constant 495 : i32
    %251 = tpu.dynamic_rotate %220 by %c495_i32_194 dim 1 : vector<16x512xf32>, i32 -> vector<16x512xf32>
    %c8_195 = arith.constant 8 : index
    %c0_196 = arith.constant 0 : index
    %c0_197 = arith.constant 0 : index
    %252 = vector.load %arg2[%c8_195, %c0_196, %c0_197] : memref<9x16x512xf32, #tpu.memory_space<vmem>>, vector<1x16x512xf32>
    %253 = vector.shape_cast %252 : vector<1x16x512xf32> to vector<16x512xf32>
    %254 = arith.mulf %251, %253 : vector<16x512xf32>
    %255 = tpu.concatenate %226, %230, %234, %238, %220, %242, %246, %250, %254 in 0 : vector<16x512xf32>, vector<16x512xf32>, vector<16x512xf32>, vector<16x512xf32>, vector<16x512xf32>, vector<16x512xf32>, vector<16x512xf32>, vector<16x512xf32>, vector<16x512xf32> -> vector<144x512xf32>
    %256 = arith.truncf %255 : vector<144x512xf32> to vector<144x512xbf16>
    %c2_198 = arith.constant 2 : index
    %c0_199 = arith.constant 0 : index
    %c0_200 = arith.constant 0 : index
    %257 = vector.load %arg8[%c2_198, %c0_199, %c0_200] : memref<4x8x144xbf16, #tpu.memory_space<vmem>>, vector<1x8x144xbf16>
    %258 = vector.shape_cast %257 : vector<1x8x144xbf16> to vector<8x144xbf16>
    %cst_201 = arith.constant dense<0.000000e+00> : vector<8x512xf32>
    %259 = tpu.matmul %258, %256, %cst_201 {dimension_numbers = #tpu.dot_dimension_numbers<[1], [0], [0], [1], [0, 0, 1, 1], [], []>} : vector<8x144xbf16>, vector<144x512xbf16>, vector<8x512xf32> -> vector<8x512xf32>
    %c2_202 = arith.constant 2 : index
    %c0_203 = arith.constant 0 : index
    %c0_204 = arith.constant 0 : index
    %260 = vector.load %arg9[%c2_202, %c0_203, %c0_204] : memref<4x8x1xf32, #tpu.memory_space<vmem>>, vector<1x8x1xf32>
    %261 = vector.shape_cast %260 : vector<1x8x1xf32> to vector<8x1xf32>
    %262 = vector.broadcast %261 : vector<8x1xf32> to vector<8x512xf32>
    %263 = arith.addf %259, %262 : vector<8x512xf32>
    %264 = arith.negf %263 : vector<8x512xf32>
    %265 = math.exp %264 : vector<8x512xf32>
    %cst_205 = arith.constant 1.000000e+00 : f32
    %266 = vector.broadcast %cst_205 : f32 to vector<8x512xf32>
    %267 = arith.addf %266, %265 : vector<8x512xf32>
    %268 = arith.divf %266, %267 : vector<8x512xf32>
    %269 = arith.mulf %263, %268 : vector<8x512xf32>
    %c17_i32_206 = arith.constant 17 : i32
    %270 = tpu.dynamic_rotate %269 by %c17_i32_206 dim 1 : vector<8x512xf32>, i32 -> vector<8x512xf32>
    %c0_207 = arith.constant 0 : index
    %c0_208 = arith.constant 0 : index
    %c0_209 = arith.constant 0 : index
    %271 = vector.load %arg3[%c0_207, %c0_208, %c0_209] : memref<9x8x512xf32, #tpu.memory_space<vmem>>, vector<1x8x512xf32>
    %272 = vector.shape_cast %271 : vector<1x8x512xf32> to vector<8x512xf32>
    %273 = arith.mulf %270, %272 : vector<8x512xf32>
    %c16_i32_210 = arith.constant 16 : i32
    %274 = tpu.dynamic_rotate %269 by %c16_i32_210 dim 1 : vector<8x512xf32>, i32 -> vector<8x512xf32>
    %c1_211 = arith.constant 1 : index
    %c0_212 = arith.constant 0 : index
    %c0_213 = arith.constant 0 : index
    %275 = vector.load %arg3[%c1_211, %c0_212, %c0_213] : memref<9x8x512xf32, #tpu.memory_space<vmem>>, vector<1x8x512xf32>
    %276 = vector.shape_cast %275 : vector<1x8x512xf32> to vector<8x512xf32>
    %277 = arith.mulf %274, %276 : vector<8x512xf32>
    %c15_i32_214 = arith.constant 15 : i32
    %278 = tpu.dynamic_rotate %269 by %c15_i32_214 dim 1 : vector<8x512xf32>, i32 -> vector<8x512xf32>
    %c2_215 = arith.constant 2 : index
    %c0_216 = arith.constant 0 : index
    %c0_217 = arith.constant 0 : index
    %279 = vector.load %arg3[%c2_215, %c0_216, %c0_217] : memref<9x8x512xf32, #tpu.memory_space<vmem>>, vector<1x8x512xf32>
    %280 = vector.shape_cast %279 : vector<1x8x512xf32> to vector<8x512xf32>
    %281 = arith.mulf %278, %280 : vector<8x512xf32>
    %c1_i32_218 = arith.constant 1 : i32
    %282 = tpu.dynamic_rotate %269 by %c1_i32_218 dim 1 : vector<8x512xf32>, i32 -> vector<8x512xf32>
    %c3_219 = arith.constant 3 : index
    %c0_220 = arith.constant 0 : index
    %c0_221 = arith.constant 0 : index
    %283 = vector.load %arg3[%c3_219, %c0_220, %c0_221] : memref<9x8x512xf32, #tpu.memory_space<vmem>>, vector<1x8x512xf32>
    %284 = vector.shape_cast %283 : vector<1x8x512xf32> to vector<8x512xf32>
    %285 = arith.mulf %282, %284 : vector<8x512xf32>
    %c511_i32_222 = arith.constant 511 : i32
    %286 = tpu.dynamic_rotate %269 by %c511_i32_222 dim 1 : vector<8x512xf32>, i32 -> vector<8x512xf32>
    %c5_223 = arith.constant 5 : index
    %c0_224 = arith.constant 0 : index
    %c0_225 = arith.constant 0 : index
    %287 = vector.load %arg3[%c5_223, %c0_224, %c0_225] : memref<9x8x512xf32, #tpu.memory_space<vmem>>, vector<1x8x512xf32>
    %288 = vector.shape_cast %287 : vector<1x8x512xf32> to vector<8x512xf32>
    %289 = arith.mulf %286, %288 : vector<8x512xf32>
    %c497_i32_226 = arith.constant 497 : i32
    %290 = tpu.dynamic_rotate %269 by %c497_i32_226 dim 1 : vector<8x512xf32>, i32 -> vector<8x512xf32>
    %c6_227 = arith.constant 6 : index
    %c0_228 = arith.constant 0 : index
    %c0_229 = arith.constant 0 : index
    %291 = vector.load %arg3[%c6_227, %c0_228, %c0_229] : memref<9x8x512xf32, #tpu.memory_space<vmem>>, vector<1x8x512xf32>
    %292 = vector.shape_cast %291 : vector<1x8x512xf32> to vector<8x512xf32>
    %293 = arith.mulf %290, %292 : vector<8x512xf32>
    %c496_i32_230 = arith.constant 496 : i32
    %294 = tpu.dynamic_rotate %269 by %c496_i32_230 dim 1 : vector<8x512xf32>, i32 -> vector<8x512xf32>
    %c7_231 = arith.constant 7 : index
    %c0_232 = arith.constant 0 : index
    %c0_233 = arith.constant 0 : index
    %295 = vector.load %arg3[%c7_231, %c0_232, %c0_233] : memref<9x8x512xf32, #tpu.memory_space<vmem>>, vector<1x8x512xf32>
    %296 = vector.shape_cast %295 : vector<1x8x512xf32> to vector<8x512xf32>
    %297 = arith.mulf %294, %296 : vector<8x512xf32>
    %c495_i32_234 = arith.constant 495 : i32
    %298 = tpu.dynamic_rotate %269 by %c495_i32_234 dim 1 : vector<8x512xf32>, i32 -> vector<8x512xf32>
    %c8_235 = arith.constant 8 : index
    %c0_236 = arith.constant 0 : index
    %c0_237 = arith.constant 0 : index
    %299 = vector.load %arg3[%c8_235, %c0_236, %c0_237] : memref<9x8x512xf32, #tpu.memory_space<vmem>>, vector<1x8x512xf32>
    %300 = vector.shape_cast %299 : vector<1x8x512xf32> to vector<8x512xf32>
    %301 = arith.mulf %298, %300 : vector<8x512xf32>
    %302 = tpu.concatenate %273, %277, %281, %285, %269, %289, %293, %297, %301 in 0 : vector<8x512xf32>, vector<8x512xf32>, vector<8x512xf32>, vector<8x512xf32>, vector<8x512xf32>, vector<8x512xf32>, vector<8x512xf32>, vector<8x512xf32>, vector<8x512xf32> -> vector<72x512xf32>
    %303 = arith.truncf %302 : vector<72x512xf32> to vector<72x512xbf16>
    %c2_238 = arith.constant 2 : index
    %c0_239 = arith.constant 0 : index
    %c0_240 = arith.constant 0 : index
    %304 = vector.load %arg10[%c2_238, %c0_239, %c0_240] : memref<4x16x72xbf16, #tpu.memory_space<vmem>>, vector<1x16x72xbf16>
    %305 = vector.shape_cast %304 : vector<1x16x72xbf16> to vector<16x72xbf16>
    %cst_241 = arith.constant dense<0.000000e+00> : vector<16x512xf32>
    %306 = tpu.matmul %305, %303, %cst_241 {dimension_numbers = #tpu.dot_dimension_numbers<[1], [0], [0], [1], [0, 0, 1, 1], [], []>} : vector<16x72xbf16>, vector<72x512xbf16>, vector<16x512xf32> -> vector<16x512xf32>
    %c2_242 = arith.constant 2 : index
    %c0_243 = arith.constant 0 : index
    %c0_244 = arith.constant 0 : index
    %307 = vector.load %arg11[%c2_242, %c0_243, %c0_244] : memref<4x16x1xf32, #tpu.memory_space<vmem>>, vector<1x16x1xf32>
    %308 = vector.shape_cast %307 : vector<1x16x1xf32> to vector<16x1xf32>
    %309 = vector.broadcast %308 : vector<16x1xf32> to vector<16x512xf32>
    %310 = arith.addf %306, %309 : vector<16x512xf32>
    %311 = arith.negf %310 : vector<16x512xf32>
    %312 = math.exp %311 : vector<16x512xf32>
    %cst_245 = arith.constant 1.000000e+00 : f32
    %313 = vector.broadcast %cst_245 : f32 to vector<16x512xf32>
    %314 = arith.addf %313, %312 : vector<16x512xf32>
    %315 = arith.divf %313, %314 : vector<16x512xf32>
    %316 = arith.mulf %310, %315 : vector<16x512xf32>
    %317 = arith.truncf %316 : vector<16x512xf32> to vector<16x512xbf16>
    %c48 = arith.constant 48 : index
    %c0_246 = arith.constant 0 : index
    %318 = vector.load %arg17[%c48, %c0_246] : memref<80x512xbf16, #tpu.memory_space<vmem>>, vector<16x512xbf16>
    tpu.vector_store %arg17[%c48, %c0_246], %317 {strides = array<i32>} : memref<80x512xbf16, #tpu.memory_space<vmem>>, vector<16x512xbf16>,
    %c17_i32_247 = arith.constant 17 : i32
    %319 = tpu.dynamic_rotate %316 by %c17_i32_247 dim 1 : vector<16x512xf32>, i32 -> vector<16x512xf32>
    %c0_248 = arith.constant 0 : index
    %c0_249 = arith.constant 0 : index
    %c0_250 = arith.constant 0 : index
    %320 = vector.load %arg2[%c0_248, %c0_249, %c0_250] : memref<9x16x512xf32, #tpu.memory_space<vmem>>, vector<1x16x512xf32>
    %321 = vector.shape_cast %320 : vector<1x16x512xf32> to vector<16x512xf32>
    %322 = arith.mulf %319, %321 : vector<16x512xf32>
    %c16_i32_251 = arith.constant 16 : i32
    %323 = tpu.dynamic_rotate %316 by %c16_i32_251 dim 1 : vector<16x512xf32>, i32 -> vector<16x512xf32>
    %c1_252 = arith.constant 1 : index
    %c0_253 = arith.constant 0 : index
    %c0_254 = arith.constant 0 : index
    %324 = vector.load %arg2[%c1_252, %c0_253, %c0_254] : memref<9x16x512xf32, #tpu.memory_space<vmem>>, vector<1x16x512xf32>
    %325 = vector.shape_cast %324 : vector<1x16x512xf32> to vector<16x512xf32>
    %326 = arith.mulf %323, %325 : vector<16x512xf32>
    %c15_i32_255 = arith.constant 15 : i32
    %327 = tpu.dynamic_rotate %316 by %c15_i32_255 dim 1 : vector<16x512xf32>, i32 -> vector<16x512xf32>
    %c2_256 = arith.constant 2 : index
    %c0_257 = arith.constant 0 : index
    %c0_258 = arith.constant 0 : index
    %328 = vector.load %arg2[%c2_256, %c0_257, %c0_258] : memref<9x16x512xf32, #tpu.memory_space<vmem>>, vector<1x16x512xf32>
    %329 = vector.shape_cast %328 : vector<1x16x512xf32> to vector<16x512xf32>
    %330 = arith.mulf %327, %329 : vector<16x512xf32>
    %c1_i32_259 = arith.constant 1 : i32
    %331 = tpu.dynamic_rotate %316 by %c1_i32_259 dim 1 : vector<16x512xf32>, i32 -> vector<16x512xf32>
    %c3_260 = arith.constant 3 : index
    %c0_261 = arith.constant 0 : index
    %c0_262 = arith.constant 0 : index
    %332 = vector.load %arg2[%c3_260, %c0_261, %c0_262] : memref<9x16x512xf32, #tpu.memory_space<vmem>>, vector<1x16x512xf32>
    %333 = vector.shape_cast %332 : vector<1x16x512xf32> to vector<16x512xf32>
    %334 = arith.mulf %331, %333 : vector<16x512xf32>
    %c511_i32_263 = arith.constant 511 : i32
    %335 = tpu.dynamic_rotate %316 by %c511_i32_263 dim 1 : vector<16x512xf32>, i32 -> vector<16x512xf32>
    %c5_264 = arith.constant 5 : index
    %c0_265 = arith.constant 0 : index
    %c0_266 = arith.constant 0 : index
    %336 = vector.load %arg2[%c5_264, %c0_265, %c0_266] : memref<9x16x512xf32, #tpu.memory_space<vmem>>, vector<1x16x512xf32>
    %337 = vector.shape_cast %336 : vector<1x16x512xf32> to vector<16x512xf32>
    %338 = arith.mulf %335, %337 : vector<16x512xf32>
    %c497_i32_267 = arith.constant 497 : i32
    %339 = tpu.dynamic_rotate %316 by %c497_i32_267 dim 1 : vector<16x512xf32>, i32 -> vector<16x512xf32>
    %c6_268 = arith.constant 6 : index
    %c0_269 = arith.constant 0 : index
    %c0_270 = arith.constant 0 : index
    %340 = vector.load %arg2[%c6_268, %c0_269, %c0_270] : memref<9x16x512xf32, #tpu.memory_space<vmem>>, vector<1x16x512xf32>
    %341 = vector.shape_cast %340 : vector<1x16x512xf32> to vector<16x512xf32>
    %342 = arith.mulf %339, %341 : vector<16x512xf32>
    %c496_i32_271 = arith.constant 496 : i32
    %343 = tpu.dynamic_rotate %316 by %c496_i32_271 dim 1 : vector<16x512xf32>, i32 -> vector<16x512xf32>
    %c7_272 = arith.constant 7 : index
    %c0_273 = arith.constant 0 : index
    %c0_274 = arith.constant 0 : index
    %344 = vector.load %arg2[%c7_272, %c0_273, %c0_274] : memref<9x16x512xf32, #tpu.memory_space<vmem>>, vector<1x16x512xf32>
    %345 = vector.shape_cast %344 : vector<1x16x512xf32> to vector<16x512xf32>
    %346 = arith.mulf %343, %345 : vector<16x512xf32>
    %c495_i32_275 = arith.constant 495 : i32
    %347 = tpu.dynamic_rotate %316 by %c495_i32_275 dim 1 : vector<16x512xf32>, i32 -> vector<16x512xf32>
    %c8_276 = arith.constant 8 : index
    %c0_277 = arith.constant 0 : index
    %c0_278 = arith.constant 0 : index
    %348 = vector.load %arg2[%c8_276, %c0_277, %c0_278] : memref<9x16x512xf32, #tpu.memory_space<vmem>>, vector<1x16x512xf32>
    %349 = vector.shape_cast %348 : vector<1x16x512xf32> to vector<16x512xf32>
    %350 = arith.mulf %347, %349 : vector<16x512xf32>
    %351 = tpu.concatenate %322, %326, %330, %334, %316, %338, %342, %346, %350 in 0 : vector<16x512xf32>, vector<16x512xf32>, vector<16x512xf32>, vector<16x512xf32>, vector<16x512xf32>, vector<16x512xf32>, vector<16x512xf32>, vector<16x512xf32>, vector<16x512xf32> -> vector<144x512xf32>
    %352 = arith.truncf %351 : vector<144x512xf32> to vector<144x512xbf16>
    %c3_279 = arith.constant 3 : index
    %c0_280 = arith.constant 0 : index
    %c0_281 = arith.constant 0 : index
    %353 = vector.load %arg8[%c3_279, %c0_280, %c0_281] : memref<4x8x144xbf16, #tpu.memory_space<vmem>>, vector<1x8x144xbf16>
    %354 = vector.shape_cast %353 : vector<1x8x144xbf16> to vector<8x144xbf16>
    %cst_282 = arith.constant dense<0.000000e+00> : vector<8x512xf32>
    %355 = tpu.matmul %354, %352, %cst_282 {dimension_numbers = #tpu.dot_dimension_numbers<[1], [0], [0], [1], [0, 0, 1, 1], [], []>} : vector<8x144xbf16>, vector<144x512xbf16>, vector<8x512xf32> -> vector<8x512xf32>
    %c3_283 = arith.constant 3 : index
    %c0_284 = arith.constant 0 : index
    %c0_285 = arith.constant 0 : index
    %356 = vector.load %arg9[%c3_283, %c0_284, %c0_285] : memref<4x8x1xf32, #tpu.memory_space<vmem>>, vector<1x8x1xf32>
    %357 = vector.shape_cast %356 : vector<1x8x1xf32> to vector<8x1xf32>
    %358 = vector.broadcast %357 : vector<8x1xf32> to vector<8x512xf32>
    %359 = arith.addf %355, %358 : vector<8x512xf32>
    %360 = arith.negf %359 : vector<8x512xf32>
    %361 = math.exp %360 : vector<8x512xf32>
    %cst_286 = arith.constant 1.000000e+00 : f32
    %362 = vector.broadcast %cst_286 : f32 to vector<8x512xf32>
    %363 = arith.addf %362, %361 : vector<8x512xf32>
    %364 = arith.divf %362, %363 : vector<8x512xf32>
    %365 = arith.mulf %359, %364 : vector<8x512xf32>
    %c17_i32_287 = arith.constant 17 : i32
    %366 = tpu.dynamic_rotate %365 by %c17_i32_287 dim 1 : vector<8x512xf32>, i32 -> vector<8x512xf32>
    %c0_288 = arith.constant 0 : index
    %c0_289 = arith.constant 0 : index
    %c0_290 = arith.constant 0 : index
    %367 = vector.load %arg3[%c0_288, %c0_289, %c0_290] : memref<9x8x512xf32, #tpu.memory_space<vmem>>, vector<1x8x512xf32>
    %368 = vector.shape_cast %367 : vector<1x8x512xf32> to vector<8x512xf32>
    %369 = arith.mulf %366, %368 : vector<8x512xf32>
    %c16_i32_291 = arith.constant 16 : i32
    %370 = tpu.dynamic_rotate %365 by %c16_i32_291 dim 1 : vector<8x512xf32>, i32 -> vector<8x512xf32>
    %c1_292 = arith.constant 1 : index
    %c0_293 = arith.constant 0 : index
    %c0_294 = arith.constant 0 : index
    %371 = vector.load %arg3[%c1_292, %c0_293, %c0_294] : memref<9x8x512xf32, #tpu.memory_space<vmem>>, vector<1x8x512xf32>
    %372 = vector.shape_cast %371 : vector<1x8x512xf32> to vector<8x512xf32>
    %373 = arith.mulf %370, %372 : vector<8x512xf32>
    %c15_i32_295 = arith.constant 15 : i32
    %374 = tpu.dynamic_rotate %365 by %c15_i32_295 dim 1 : vector<8x512xf32>, i32 -> vector<8x512xf32>
    %c2_296 = arith.constant 2 : index
    %c0_297 = arith.constant 0 : index
    %c0_298 = arith.constant 0 : index
    %375 = vector.load %arg3[%c2_296, %c0_297, %c0_298] : memref<9x8x512xf32, #tpu.memory_space<vmem>>, vector<1x8x512xf32>
    %376 = vector.shape_cast %375 : vector<1x8x512xf32> to vector<8x512xf32>
    %377 = arith.mulf %374, %376 : vector<8x512xf32>
    %c1_i32_299 = arith.constant 1 : i32
    %378 = tpu.dynamic_rotate %365 by %c1_i32_299 dim 1 : vector<8x512xf32>, i32 -> vector<8x512xf32>
    %c3_300 = arith.constant 3 : index
    %c0_301 = arith.constant 0 : index
    %c0_302 = arith.constant 0 : index
    %379 = vector.load %arg3[%c3_300, %c0_301, %c0_302] : memref<9x8x512xf32, #tpu.memory_space<vmem>>, vector<1x8x512xf32>
    %380 = vector.shape_cast %379 : vector<1x8x512xf32> to vector<8x512xf32>
    %381 = arith.mulf %378, %380 : vector<8x512xf32>
    %c511_i32_303 = arith.constant 511 : i32
    %382 = tpu.dynamic_rotate %365 by %c511_i32_303 dim 1 : vector<8x512xf32>, i32 -> vector<8x512xf32>
    %c5_304 = arith.constant 5 : index
    %c0_305 = arith.constant 0 : index
    %c0_306 = arith.constant 0 : index
    %383 = vector.load %arg3[%c5_304, %c0_305, %c0_306] : memref<9x8x512xf32, #tpu.memory_space<vmem>>, vector<1x8x512xf32>
    %384 = vector.shape_cast %383 : vector<1x8x512xf32> to vector<8x512xf32>
    %385 = arith.mulf %382, %384 : vector<8x512xf32>
    %c497_i32_307 = arith.constant 497 : i32
    %386 = tpu.dynamic_rotate %365 by %c497_i32_307 dim 1 : vector<8x512xf32>, i32 -> vector<8x512xf32>
    %c6_308 = arith.constant 6 : index
    %c0_309 = arith.constant 0 : index
    %c0_310 = arith.constant 0 : index
    %387 = vector.load %arg3[%c6_308, %c0_309, %c0_310] : memref<9x8x512xf32, #tpu.memory_space<vmem>>, vector<1x8x512xf32>
    %388 = vector.shape_cast %387 : vector<1x8x512xf32> to vector<8x512xf32>
    %389 = arith.mulf %386, %388 : vector<8x512xf32>
    %c496_i32_311 = arith.constant 496 : i32
    %390 = tpu.dynamic_rotate %365 by %c496_i32_311 dim 1 : vector<8x512xf32>, i32 -> vector<8x512xf32>
    %c7_312 = arith.constant 7 : index
    %c0_313 = arith.constant 0 : index
    %c0_314 = arith.constant 0 : index
    %391 = vector.load %arg3[%c7_312, %c0_313, %c0_314] : memref<9x8x512xf32, #tpu.memory_space<vmem>>, vector<1x8x512xf32>
    %392 = vector.shape_cast %391 : vector<1x8x512xf32> to vector<8x512xf32>
    %393 = arith.mulf %390, %392 : vector<8x512xf32>
    %c495_i32_315 = arith.constant 495 : i32
    %394 = tpu.dynamic_rotate %365 by %c495_i32_315 dim 1 : vector<8x512xf32>, i32 -> vector<8x512xf32>
    %c8_316 = arith.constant 8 : index
    %c0_317 = arith.constant 0 : index
    %c0_318 = arith.constant 0 : index
    %395 = vector.load %arg3[%c8_316, %c0_317, %c0_318] : memref<9x8x512xf32, #tpu.memory_space<vmem>>, vector<1x8x512xf32>
    %396 = vector.shape_cast %395 : vector<1x8x512xf32> to vector<8x512xf32>
    %397 = arith.mulf %394, %396 : vector<8x512xf32>
    %398 = tpu.concatenate %369, %373, %377, %381, %365, %385, %389, %393, %397 in 0 : vector<8x512xf32>, vector<8x512xf32>, vector<8x512xf32>, vector<8x512xf32>, vector<8x512xf32>, vector<8x512xf32>, vector<8x512xf32>, vector<8x512xf32>, vector<8x512xf32> -> vector<72x512xf32>
    %399 = arith.truncf %398 : vector<72x512xf32> to vector<72x512xbf16>
    %c3_319 = arith.constant 3 : index
    %c0_320 = arith.constant 0 : index
    %c0_321 = arith.constant 0 : index
    %400 = vector.load %arg10[%c3_319, %c0_320, %c0_321] : memref<4x16x72xbf16, #tpu.memory_space<vmem>>, vector<1x16x72xbf16>
    %401 = vector.shape_cast %400 : vector<1x16x72xbf16> to vector<16x72xbf16>
    %cst_322 = arith.constant dense<0.000000e+00> : vector<16x512xf32>
    %402 = tpu.matmul %401, %399, %cst_322 {dimension_numbers = #tpu.dot_dimension_numbers<[1], [0], [0], [1], [0, 0, 1, 1], [], []>} : vector<16x72xbf16>, vector<72x512xbf16>, vector<16x512xf32> -> vector<16x512xf32>
    %c3_323 = arith.constant 3 : index
    %c0_324 = arith.constant 0 : index
    %c0_325 = arith.constant 0 : index
    %403 = vector.load %arg11[%c3_323, %c0_324, %c0_325] : memref<4x16x1xf32, #tpu.memory_space<vmem>>, vector<1x16x1xf32>
    %404 = vector.shape_cast %403 : vector<1x16x1xf32> to vector<16x1xf32>
    %405 = vector.broadcast %404 : vector<16x1xf32> to vector<16x512xf32>
    %406 = arith.addf %402, %405 : vector<16x512xf32>
    %407 = arith.negf %406 : vector<16x512xf32>
    %408 = math.exp %407 : vector<16x512xf32>
    %cst_326 = arith.constant 1.000000e+00 : f32
    %409 = vector.broadcast %cst_326 : f32 to vector<16x512xf32>
    %410 = arith.addf %409, %408 : vector<16x512xf32>
    %411 = arith.divf %409, %410 : vector<16x512xf32>
    %412 = arith.mulf %406, %411 : vector<16x512xf32>
    %413 = arith.truncf %412 : vector<16x512xf32> to vector<16x512xbf16>
    %c64 = arith.constant 64 : index
    %c0_327 = arith.constant 0 : index
    %414 = vector.load %arg17[%c64, %c0_327] : memref<80x512xbf16, #tpu.memory_space<vmem>>, vector<16x512xbf16>
    tpu.vector_store %arg17[%c64, %c0_327], %413 {strides = array<i32>} : memref<80x512xbf16, #tpu.memory_space<vmem>>, vector<16x512xbf16>,
    %c0_328 = arith.constant 0 : index
    %c0_329 = arith.constant 0 : index
    %415 = vector.load %arg12[%c0_328, %c0_329] : memref<32x80xbf16, #tpu.memory_space<vmem>>, vector<32x80xbf16>
    %c0_330 = arith.constant 0 : index
    %c0_331 = arith.constant 0 : index
    %416 = vector.load %arg17[%c0_330, %c0_331] : memref<80x512xbf16, #tpu.memory_space<vmem>>, vector<80x512xbf16>
    %cst_332 = arith.constant dense<0.000000e+00> : vector<32x512xf32>
    %417 = tpu.matmul %415, %416, %cst_332 {dimension_numbers = #tpu.dot_dimension_numbers<[1], [0], [0], [1], [0, 0, 1, 1], [], []>} : vector<32x80xbf16>, vector<80x512xbf16>, vector<32x512xf32> -> vector<32x512xf32>
    %c0_333 = arith.constant 0 : index
    %c0_334 = arith.constant 0 : index
    %418 = vector.load %arg13[%c0_333, %c0_334] : memref<32x1xf32, #tpu.memory_space<vmem>>, vector<32x1xf32>
    %419 = vector.broadcast %418 : vector<32x1xf32> to vector<32x512xf32>
    %420 = arith.addf %417, %419 : vector<32x512xf32>
    %421 = arith.negf %420 : vector<32x512xf32>
    %422 = math.exp %421 : vector<32x512xf32>
    %cst_335 = arith.constant 1.000000e+00 : f32
    %423 = vector.broadcast %cst_335 : f32 to vector<32x512xf32>
    %424 = arith.addf %423, %422 : vector<32x512xf32>
    %425 = arith.divf %423, %424 : vector<32x512xf32>
    %426 = arith.mulf %420, %425 : vector<32x512xf32>
    %427 = arith.addf %426, %6 : vector<32x512xf32>
    %c0_336 = arith.constant 0 : index
    %c0_337 = arith.constant 0 : index
    %428 = vector.load %arg16[%c0_336, %c0_337] : memref<32x512xf32, #tpu.memory_space<vmem>>, vector<32x512xf32>
    tpu.vector_store %arg16[%c0_336, %c0_337], %427 {strides = array<i32>} : memref<32x512xf32, #tpu.memory_space<vmem>>, vector<32x512xf32>,
    return
  }
  func.func @transform_0(%arg0: i32) -> (i32, i32) {
    %c0_i32 = arith.constant 0 : i32
    %c0_i32_0 = arith.constant 0 : i32
    return %c0_i32, %arg0 : i32, i32
  }
  func.func @transform_1(%arg0: i32) -> (i32, i32, i32) {
    %c0_i32 = arith.constant 0 : i32
    %c0_i32_0 = arith.constant 0 : i32
    %c0_i32_1 = arith.constant 0 : i32
    %c0_i32_2 = arith.constant 0 : i32
    return %c0_i32, %c0_i32_0, %c0_i32_1 : i32, i32, i32
  }
  func.func @transform_2(%arg0: i32) -> (i32, i32, i32) {
    %c0_i32 = arith.constant 0 : i32
    %c0_i32_0 = arith.constant 0 : i32
    %c0_i32_1 = arith.constant 0 : i32
    %c0_i32_2 = arith.constant 0 : i32
    return %c0_i32, %c0_i32_0, %c0_i32_1 : i32, i32, i32
  }
  func.func @transform_3(%arg0: i32) -> (i32, i32) {
    %c0_i32 = arith.constant 0 : i32
    %c0_i32_0 = arith.constant 0 : i32
    %c0_i32_1 = arith.constant 0 : i32
    return %c0_i32, %c0_i32_0 : i32, i32
  }
  func.func @transform_4(%arg0: i32) -> (i32, i32) {
    %c0_i32 = arith.constant 0 : i32
    %c0_i32_0 = arith.constant 0 : i32
    %c0_i32_1 = arith.constant 0 : i32
    return %c0_i32, %c0_i32_0 : i32, i32
  }
  func.func @transform_5(%arg0: i32) -> (i32, i32) {
    %c0_i32 = arith.constant 0 : i32
    %c0_i32_0 = arith.constant 0 : i32
    %c0_i32_1 = arith.constant 0 : i32
    return %c0_i32, %c0_i32_0 : i32, i32
  }
  func.func @transform_6(%arg0: i32) -> (i32, i32) {
    %c0_i32 = arith.constant 0 : i32
    %c0_i32_0 = arith.constant 0 : i32
    %c0_i32_1 = arith.constant 0 : i32
    return %c0_i32, %c0_i32_0 : i32, i32
  }
  func.func @transform_7(%arg0: i32) -> (i32, i32, i32) {
    %c0_i32 = arith.constant 0 : i32
    %c0_i32_0 = arith.constant 0 : i32
    %c0_i32_1 = arith.constant 0 : i32
    %c0_i32_2 = arith.constant 0 : i32
    return %c0_i32, %c0_i32_0, %c0_i32_1 : i32, i32, i32
  }
  func.func @transform_8(%arg0: i32) -> (i32, i32, i32) {
    %c0_i32 = arith.constant 0 : i32
    %c0_i32_0 = arith.constant 0 : i32
    %c0_i32_1 = arith.constant 0 : i32
    %c0_i32_2 = arith.constant 0 : i32
    return %c0_i32, %c0_i32_0, %c0_i32_1 : i32, i32, i32
  }
  func.func @transform_9(%arg0: i32) -> (i32, i32, i32) {
    %c0_i32 = arith.constant 0 : i32
    %c0_i32_0 = arith.constant 0 : i32
    %c0_i32_1 = arith.constant 0 : i32
    %c0_i32_2 = arith.constant 0 : i32
    return %c0_i32, %c0_i32_0, %c0_i32_1 : i32, i32, i32
  }
  func.func @transform_10(%arg0: i32) -> (i32, i32, i32) {
    %c0_i32 = arith.constant 0 : i32
    %c0_i32_0 = arith.constant 0 : i32
    %c0_i32_1 = arith.constant 0 : i32
    %c0_i32_2 = arith.constant 0 : i32
    return %c0_i32, %c0_i32_0, %c0_i32_1 : i32, i32, i32
  }
  func.func @transform_11(%arg0: i32) -> (i32, i32) {
    %c0_i32 = arith.constant 0 : i32
    %c0_i32_0 = arith.constant 0 : i32
    %c0_i32_1 = arith.constant 0 : i32
    return %c0_i32, %c0_i32_0 : i32, i32
  }
  func.func @transform_12(%arg0: i32) -> (i32, i32) {
    %c0_i32 = arith.constant 0 : i32
    %c0_i32_0 = arith.constant 0 : i32
    %c0_i32_1 = arith.constant 0 : i32
    return %c0_i32, %c0_i32_0 : i32, i32
  }
  func.func @transform_13(%arg0: i32) -> (i32, i32) {
    %c0_i32 = arith.constant 0 : i32
    %c0_i32_0 = arith.constant 0 : i32
    %c0_i32_1 = arith.constant 0 : i32
    return %c0_i32, %c0_i32_0 : i32, i32
  }
  func.func @transform_14(%arg0: i32) -> (i32, i32) {
    %c0_i32 = arith.constant 0 : i32
    %c0_i32_0 = arith.constant 0 : i32
    %c0_i32_1 = arith.constant 0 : i32
    return %c0_i32, %c0_i32_0 : i32, i32
  }
  func.func @transform_15(%arg0: i32) -> (i32, i32) {
    %c0_i32 = arith.constant 0 : i32
    %c0_i32_0 = arith.constant 0 : i32
    return %c0_i32, %arg0 : i32, i32
  }
}

</mosaic_0001>

<bundles_post_ra>
// kernel: tpu_custom_call.1
= control target key start
LH: loop header
LB: loop body
LE: loop exit
PB: predicated region body
PF: predicated region fallthrough
CT: control target
= control target key end

     0   :  { %20 = vsyncpa [#allocation4], 0  ;;  %s10287_s0 = inlined_call_operand.vmem [shape: f32[16,512], index: 0, kind: input, shape index: {}]   ;;  %s10288_s1 = inlined_call_operand.hbm [shape: f32[9,16,512], index: 1, kind: input, shape index: {}]   ;;  %s10289_s2 = inlined_call_operand.hbm [shape: f32[9,8,512], index: 2, kind: input, shape index: {}]   ;;  %s10290_s3 = inlined_call_operand.vmem [shape: bf16[16,16], index: 3, kind: input, shape index: {}]   ;;  %s10291_s4 = inlined_call_operand.vmem [shape: f32[16,1], index: 4, kind: input, shape index: {}]   ;;  %s10292_s5 = inlined_call_operand.vmem [shape: bf16[16,16], index: 5, kind: input, shape index: {}]   ;;  %s10293_s6 = inlined_call_operand.vmem [shape: f32[16,1], index: 6, kind: input, shape index: {}]   ;;  %s10294_s7 = inlined_call_operand.vmem [shape: bf16[4,8,144], index: 7, kind: input, shape index: {}]   ;;  %s10295_s8 = inlined_call_operand.vmem [shape: f32[4,8,1], index: 8, kind: input, shape index: {}]   ;;  %s10296_s9 = inlined_call_operand.vmem [shape: bf16[4,16,72], index: 9, kind: input, shape index: {}]   ;;  %s10297_s10 = inlined_call_operand.vmem [shape: f32[4,16,1], index: 10, kind: input, shape index: {}]   ;;  %s10298_s11 = inlined_call_operand.vmem [shape: bf16[32,80], index: 11, kind: input, shape index: {}]   ;;  %s10299_s12 = inlined_call_operand.vmem [shape: f32[32,1], index: 12, kind: input, shape index: {}]   ;;  %s10300_s13 = inlined_call_operand.vmem [shape: bf16[32,16], index: 13, kind: input, shape index: {}]   ;;  %s10301_s14 = inlined_call_operand.vmem [shape: f32[32,1], index: 14, kind: input, shape index: {}]   ;;  %s10302_s15 = inlined_call_operand.hbm [shape: f32[32,512], index: 15, kind: output, shape index: {}]  }
   0x1   :  { %21 = vsyncpa [#allocation7], 0 }
   0x2   :  { %22 = vsyncpa [#allocation5], 0  ;;  %s29_s20 = sshll.u32 %s10288_s1, 4  ;;  %s6047_s21 = smov [#allocation3]   ;;  %s30_s20 = int_to_ptr.hbm [resolvable:$true] %s29_s20 }
   0x3   :  { %s31_s22 = sshll.u32 %s6047_s21, 4  ;;  %s42_s25 = sshll.u32 %s10289_s2, 4  ;;  %s32_s22 = int_to_ptr.vmem [resolvable:$true] %s31_s22  ;;  %s43_s25 = int_to_ptr.hbm [resolvable:$true] %s42_s25 }
   0x4   :  { %s6048_s26 = smov 512   ;;  %s6049_s27 = smov 32  }
   0x5   :  { %37 = dma.hbm_to_vmem [thread:$0]  %s30_s20, 9216, %s32_s22, [#allocation4], %s6048_s26, %s6048_s26, %s6049_s27  }
   0x6   :  { %s6050_s28 = smov [#allocation6]  }
   0x7   :  { %s44_s29 = sshll.u32 %s6050_s28, 4  ;;  %s45_s29 = int_to_ptr.vmem [resolvable:$true] %s44_s29 }
   0x8   :  { %50 = dma.hbm_to_vmem [thread:$0]  %s43_s25, 4608, %s45_s29, [#allocation7], %s6048_s26, %s6048_s26, %s6049_s27  }
   0x9   :  { %6041 = dma.done.wait [#allocation4], 9216  }
   0xa   :  { %6042 = vsyncadd [#allocation4], 4294958080 }
   0xb   :  { %6043 = dma.done.wait [#allocation7], 4608  }
   0xc   :  { %6044 = vsyncadd [#allocation7], 4294962688  ;;  %v84_v0 = vld [vmem:[%s10287_s0] sm:$0xff]  ;;  %v85_v2 = vld [vmem:[%s10287_s0 + $0x8] sm:$0xff]  ;;  %vm134_vm0 = vcmask 130048   ;;  %v6051_v15 = vmov 0  }
   0xd   :  { %v88_v1 = vld [vmem:[%s10287_s0 + $0x20] sm:$0xff]  ;;  %v89_v4 = vld [vmem:[%s10287_s0 + $0x28] sm:$0xff]  ;;  %v86_v5 = vld [vmem:[%s10287_s0 + $0x10] sm:$0xff]  ;;  %5646 = vset.pattern.permute.xlu0 %v6051_v15  ;;  %5647 = vset.pattern.permute.xlu1 %v6051_v15  ;;  %s6055_s24 = smov 15   ;;  %s6056_s25 = smov 127  }
   0xe   :  { %v92_v3 = vpack.c.bf16 %v88_v1, %v84_v0  ;;  %v90_v6 = vld [vmem:[%s10287_s0 + $0x30] sm:$0xff]  ;;  %v93_v7 = vpack.c.bf16 %v89_v4, %v85_v2  ;;  %v87_v9 = vld [vmem:[%s10287_s0 + $0x18] sm:$0xff]  ;;  %v5602_v11 = vld [vmem:[%s10300_s13] sm:$0xff]  ;;  %5648 = vset.pattern.permute.xlu2 %v6051_v15  ;;  %s6057_s28 = smov 16   ;;  %s6058_s29 = smov 17  }
   0xf   :  { %v94_v8 = vpack.c.bf16 %v90_v6, %v86_v5  ;;  %v91_v10 = vld [vmem:[%s10287_s0 + $0x38] sm:$0xff]  ;;  %v5603_v13 = vld [vmem:[%s10300_s13 + $0x8] sm:$0xff]  ;;  %v465_v14 = vld [vmem:[%s10293_s6] sm:$0xff]  ;;  %s6059_s1 = smov 111  }
  0x10   :  { %148 = vmatpush.bf16.msra.mxu0 %v92_v3  ;;  %v95_v12 = vpack.c.bf16 %v91_v10, %v87_v9  ;;  %167 = vmatpush.bf16.msra.mxu1 %v93_v7  ;;  %v466_v16 = vld [vmem:[%s10293_s6 + $0x8] sm:$0xff]  ;;  %v5604_v17 = vld [vmem:[%s10290_s3] sm:$0xff]  ;;  %s6052_s3 = smov 1   ;;  %s6054_s6 = smov 112  }
  0x11   :  { %186 = vmatpush.bf16.msra.mxu2 %v94_v8  ;;  %469 = vperm.xlu0 %5646, %v465_v14   ;;  %v5605_v18 = vld [vmem:[%s10292_s5] sm:$0xff]  ;;  %s6053_s5 = smov 113  }
  0x12   :  { %205 = vmatpush.bf16.msra.mxu3 %v95_v12 }
  0x13   :  { %5336 = vmatmul.msk.bf16.vlgmr.msra.gmra.mxu0 %vm134_vm0, %v5602_v11  ;;  %5338 = vmatmul.msk.bf16.vlgmr.msra.gmra.mxu1 %vm134_vm0, %v5602_v11 }
  0x14   :  { %260 = vmatpush.bf16.msrb.mxu1 %v93_v7  ;;  %5340 = vmatmul.msk.bf16.vlgmr.msra.gmra.mxu2 %vm134_vm0, %v5602_v11 }
  0x15   :  { %274 = vmatpush.bf16.msrb.mxu2 %v94_v8  ;;  %5342 = vmatmul.msk.bf16.vlgmr.msra.gmra.mxu3 %vm134_vm0, %v5602_v11 }
  0x16   :  { %246 = vmatpush.bf16.msrb.mxu0 %v92_v3  ;;  %288 = vmatpush.bf16.msrb.mxu3 %v95_v12 }
  0x18   :  { %506 = vmatpush.bf16.msra.mxu1 %v93_v7 }
  0x19   :  { %520 = vmatpush.bf16.msra.mxu2 %v94_v8  ;;  %474 = vperm.xlu0 %5646, %v466_v16  }
  0x1a   :  { %492 = vmatpush.bf16.msra.mxu0 %v92_v3  ;;  %534 = vmatpush.bf16.msra.mxu3 %v95_v12 }
  0x23   :  { %5337 = vmatmul.msk.bf16.gmra.mxu0 %vm134_vm0, %v5603_v13  ;;  %5339 = vmatmul.msk.bf16.gmra.mxu1 %vm134_vm0, %v5603_v13 }
  0x24   :  { %5341 = vmatmul.msk.bf16.gmra.mxu2 %vm134_vm0, %v5603_v13 }
  0x25   :  { %5343 = vmatmul.msk.bf16.gmra.mxu3 %vm134_vm0, %v5603_v13 }
  0x33   :  { %5348 = vmatmul.msk.bf16.vlgmr.msrb.gmra.mxu0 %vm134_vm0, %v5604_v17  ;;  %5349 = vmatmul.msk.bf16.vlgmr.msrb.gmra.mxu1 %vm134_vm0, %v5604_v17 }
  0x34   :  { %5350 = vmatmul.msk.bf16.vlgmr.msrb.gmra.mxu2 %vm134_vm0, %v5604_v17 }
  0x35   :  { %5351 = vmatmul.msk.bf16.vlgmr.msrb.gmra.mxu3 %vm134_vm0, %v5604_v17 }
  0x43   :  { %5364 = vmatmul.msk.bf16.vlgmr.msra.gmra.mxu0 %vm134_vm0, %v5605_v18  ;;  %5365 = vmatmul.msk.bf16.vlgmr.msra.gmra.mxu1 %vm134_vm0, %v5605_v18 }
  0x44   :  { %5366 = vmatmul.msk.bf16.vlgmr.msra.gmra.mxu2 %vm134_vm0, %v5605_v18 }
  0x45   :  { %5367 = vmatmul.msk.bf16.vlgmr.msra.gmra.mxu3 %vm134_vm0, %v5605_v18 }
  0x83   :  { %v470_v41 = vpop.permute.xlu0 %469 }
  0x90   :  { %v6211_v19 = vpop.f32.mrf.mxu0  ;;  %v6213_v20 = vpop.f32.mrf.mxu1 }
  0x91   :  { %10332 = vst [vmem:[#allocation12_spill] sm:$0xff] %v6211_v19  ;;  %v981_v19 = vld [vmem:[#allocation3 + $0x1c8] sm:$0xff] }
  0x92   :  { %10333 = vst [vmem:[#allocation13_spill] sm:$0xff] %v6213_v20 }
  0x97   :  { %v6215_v21 = vpop.f32.mrf.mxu2 }
  0x98   :  { %10334 = vst [vmem:[#allocation14_spill] sm:$0xff] %v6215_v21  ;;  %v6217_v22 = vpop.f32.mrf.mxu0  ;;  %v6219_v23 = vpop.f32.mrf.mxu1 }
  0x99   :  { %10335 = vst [vmem:[#allocation15_spill] sm:$0xff] %v6217_v22  ;;  %v6221_v24 = vpop.f32.mrf.mxu3  ;;  %v938_v22 = vld [vmem:[#allocation3 + $0x180] sm:$0xff] }
  0x9a   :  { %10336 = vst [vmem:[#allocation16_spill] sm:$0xff] %v6219_v23 }
  0x9b   :  { %10337 = vst [vmem:[#allocation17_spill] sm:$0xff] %v6221_v24  ;;  %v942_v24 = vld [vmem:[#allocation3 + $0x1a0] sm:$0xff] }
  0x9f   :  { %v6223_v25 = vpop.f32.mrf.mxu2 }
  0xa0   :  { %10338 = vst [vmem:[#allocation18_spill] sm:$0xff] %v6223_v25  ;;  %v6225_v26 = vpop.f32.mrf.mxu0  ;;  %v6227_v27 = vpop.f32.mrf.mxu1 }
  0xa1   :  { %10339 = vst [vmem:[#allocation19_spill] sm:$0xff] %v6225_v26  ;;  %v6229_v28 = vpop.f32.mrf.mxu3 }
  0xa2   :  { %10340 = vst [vmem:[#allocation20_spill] sm:$0xff] %v6227_v27 }
  0xa3   :  { %10341 = vst [vmem:[#allocation21_spill] sm:$0xff] %v6229_v28 }
  0xa7   :  { %v6231_v29 = vpop.f32.mrf.mxu2 }
  0xa8   :  { %10342 = vst [vmem:[#allocation22_spill] sm:$0xff] %v6231_v29  ;;  %v6233_v30 = vpop.f32.mrf.mxu0  ;;  %v6235_v31 = vpop.f32.mrf.mxu1 }
  0xa9   :  { %10343 = vst [vmem:[#allocation23_spill] sm:$0xff] %v6233_v30  ;;  %v6239_v33 = vpop.f32.mrf.mxu3  ;;  %v984_v30 = vld [vmem:[#allocation3 + $0x1e0] sm:$0xff] }
  0xaa   :  { %10344 = vst [vmem:[#allocation24_spill] sm:$0xff] %v6235_v31 }
  0xab   :  { %10346 = vst [vmem:[#allocation26_spill] sm:$0xff] %v6239_v33 }
  0xaf   :  { %v6237_v32 = vpop.f32.mrf.mxu2 }
  0xb0   :  { %10345 = vst [vmem:[#allocation25_spill] sm:$0xff] %v6237_v32  ;;  %v6241_v34 = vpop.f32.mrf.mxu0  ;;  %v6243_v35 = vpop.f32.mrf.mxu1 }
  0xb1   :  { %10347 = vst [vmem:[#allocation27_spill] sm:$0xff] %v6241_v34  ;;  %v6251_v39 = vpop.f32.mrf.mxu3 }
  0xb2   :  { %10348 = vst [vmem:[#allocation28_spill] sm:$0xff] %v6243_v35  ;;  %v939_v35 = vld [vmem:[#allocation3 + $0x188] sm:$0xff] }
  0xb3   :  { %10352 = vst [vmem:[#allocation32_spill] sm:$0xff] %v6251_v39  ;;  %v980_v39 = vld [vmem:[#allocation3 + $0x1c0] sm:$0xff] }
  0xb7   :  { %v6245_v36 = vpop.f32.mrf.mxu2 }
  0xb8   :  { %10349 = vst [vmem:[#allocation29_spill] sm:$0xff] %v6245_v36  ;;  %v6247_v37 = vpop.f32.mrf.mxu0  ;;  %v6249_v38 = vpop.f32.mrf.mxu1 }
  0xb9   :  { %10350 = vst [vmem:[#allocation30_spill] sm:$0xff] %v6247_v37  ;;  %v6255_v47 = vpop.f32.mrf.mxu3 }
  0xba   :  { %10351 = vst [vmem:[#allocation31_spill] sm:$0xff] %v6249_v38  ;;  %v896_v38 = vld [vmem:[#allocation3 + $0x140] sm:$0xff] }
  0xbb   :  { %10354 = vst [vmem:[#allocation34_spill] sm:$0xff] %v6255_v47 }
  0xbf   :  { %v6253_v40 = vpop.f32.mrf.mxu2 }
  0xc0   :  { %10353 = vst [vmem:[#allocation33_spill] sm:$0xff] %v6253_v40  ;;  %v494_v42 = vpop.f32.mrf.mxu0  ;;  %v508_v44 = vpop.f32.mrf.mxu1  ;;  %v985_v40 = vld [vmem:[#allocation3 + $0x1e8] sm:$0xff] }
  0xc1   :  { %v495_v43 = vadd.f32 %v494_v42, %v470_v41  ;;  %v509_v45 = vadd.f32 %v508_v44, %v470_v41  ;;  %v6260_v56 = vpop.f32.mrf.mxu3 }
  0xc2   :  { %10355 = vst [vmem:[#allocation35_spill] sm:$0xff] %v6260_v56 }
  0xc3   :  { %v5368_v46 = vmul.f32 -1.442695, %v495_v43  ;;  %v5369_v48 = vmul.f32 -1.442695, %v509_v45 }
  0xc5   :  { %5649 = vpow2.f32 %v5368_v46 }
  0xc6   :  { %5651 = vpow2.f32 %v5369_v48 }
  0xc7   :  { %v522_v49 = vpop.f32.mrf.mxu2 }
  0xc8   :  { %v6257_v50 = vadd.f32 %v522_v49, %v470_v41 }
  0xc9   :  { %v536_v2 = vpop.f32.mrf.mxu3 }
  0xca   :  { %v5370_v51 = vmul.f32 -1.442695, %v6257_v50  ;;  %v6265_v9 = vadd.f32 %v536_v2, %v470_v41 }
  0xcb   :  { %v5650_v52 = vpop.eup %5649 }
  0xcc   :  { %v5652_v53 = vpop.eup %5651  ;;  %v565_v54 = vadd.f32 1.0, %v5650_v52  ;;  %5653 = vpow2.f32 %v5370_v51  ;;  %v5371_v42 = vmul.f32 -1.442695, %v6265_v9 }
  0xcd   :  { %v566_v55 = vadd.f32 1.0, %v5652_v53  ;;  %v496_v53 = vpop.f32.mrf.mxu0 }
  0xce   :  { %5655 = vrcp.f32 %v565_v54  ;;  %v584_v0 = vand.u32 2147483648, %v565_v54  ;;  %v582_v4 = vand.u32 2147483647, %v565_v54  ;;  %vm578_vm3 = vweird.f32 %v565_v54 }
  0xcf   :  { %5657 = vrcp.f32 %v566_v55  ;;  %v599_v5 = vand.u32 2147483648, %v566_v55  ;;  %v597_v7 = vand.u32 2147483647, %v566_v55  ;;  %vm593_vm5 = vweird.f32 %v566_v55 }
  0xd0   :  { %v585_v10 = vor.u32 1.1754944e-38, %v584_v0  ;;  %vm583_vm6 = vcmp.eq.f32.partialorder %v582_v4, 8.507059e+37 }
  0xd1   :  { %v600_v13 = vor.u32 1.1754944e-38, %v599_v5  ;;  %vm598_vm8 = vcmp.eq.f32.partialorder %v597_v7, 8.507059e+37 }
  0xd2   :  { %v5654_v57 = vpop.eup %5653 }
  0xd3   :  { %v6262_v59 = vadd.f32 1.0, %v5654_v57  ;;  %v6290_v57 = vpop.permute.xlu0 %474 }
  0xd4   :  { %v5656_v58 = vpop.eup %5655 }
  0xd5   :  { %v5658_v60 = vpop.eup %5657  ;;  %v574_v61 = vmul.f32 %v5656_v58, %v565_v54  ;;  %5659 = vrcp.f32 %v6262_v59  ;;  %vm579_vm1 = vweird.f32 %v5656_v58  ;;  %v614_v51 = vand.u32 2147483648, %v6262_v59 }
  0xd6   :  { %v589_v62 = vmul.f32 %v5658_v60, %v566_v55  ;;  %vm594_vm2 = vweird.f32 %v5658_v60  ;;  %vm580_vm4 = vmor %vm578_vm3, %vm579_vm1  ;;  %5661 = vpow2.f32 %v5371_v42  ;;  %vm608_vm10 = vweird.f32 %v6262_v59  ;;  %v510_v55 = vpop.f32.mrf.mxu1 }
  0xd7   :  { %v575_v63 = vsub.f32 1.0, %v574_v61  ;;  %vm595_vm7 = vmor %vm593_vm5, %vm594_vm2  ;;  %v612_v52 = vand.u32 2147483647, %v6262_v59  ;;  %v6300_v61 = vadd.f32 %v510_v55, %v6290_v57 }
  0xd8   :  { %v590_v1 = vsub.f32 1.0, %v589_v62 }
  0xd9   :  { %v576_v3 = vmul.f32 %v5656_v58, %v575_v63  ;;  %vm613_vm12 = vcmp.eq.f32.partialorder %v612_v52, 8.507059e+37 }
  0xda   :  { %v591_v6 = vmul.f32 %v5658_v60, %v590_v1  ;;  %v5373_v1 = vmul.f32 -1.442695, %v6300_v61 }
  0xdb   :  { %v577_v8 = vadd.f32 %v5656_v58, %v576_v3  ;;  %v5660_v14 = vpop.eup %5659 }
  0xdc   :  { %v592_v11 = vadd.f32 %v5658_v60, %v591_v6  ;;  %v604_v41 = vmul.f32 %v5660_v14, %v6262_v59  ;;  %v5662_v46 = vpop.eup %5661  ;;  %vm609_vm9 = vweird.f32 %v5660_v14  ;;  %v6297_v59 = vadd.f32 %v496_v53, %v6290_v57 }
  0xdd   :  { %v581_v12 = vsel %vm580_vm4, %v5656_v58, %v577_v8  ;;  %vm610_vm11 = vmor %vm608_vm10, %vm609_vm9  ;;  %v615_v58 = vor.u32 1.1754944e-38, %v614_v51 }
  0xde   :  { %v586_v15 = vsel %vm583_vm6, %v585_v10, %v581_v12  ;;  %v596_v16 = vsel %vm595_vm7, %v5658_v60, %v592_v11  ;;  %v5372_v0 = vmul.f32 -1.442695, %v6297_v59 }
  0xdf   :  { %v6267_v17 = vmul.f32 %v586_v15, %v495_v43  ;;  %v601_v18 = vsel %vm598_vm8, %v600_v13, %v596_v16  ;;  %v605_v43 = vsub.f32 1.0, %v604_v41  ;;  %v524_v13 = vpop.f32.mrf.mxu2 }
  0xe0   :  { %v6270_v44 = vmul.f32 %v601_v18, %v509_v45  ;;  %v568_v45 = vadd.f32 1.0, %v5662_v46  ;;  %v6326_v16 = vadd.f32 %v524_v13, %v6290_v57 }
  0xe1   :  { %828 = vrot.lane.b32.xlu2 %v6267_v17, %s6052_s3  ;;  %v606_v48 = vmul.f32 %v5660_v14, %v605_v43 }
  0xe2   :  { %916 = vrot.lane.b32.xlu0 %v6270_v44, %s6053_s5  ;;  %958 = vrot.lane.b32.xlu1 %v6270_v44, %s6054_s6  ;;  %5663 = vrcp.f32 %v568_v45  ;;  %v629_v10 = vand.u32 2147483648, %v568_v45  ;;  %vm623_vm14 = vweird.f32 %v568_v45  ;;  %v627_v11 = vand.u32 2147483647, %v568_v45 }
  0xe3   :  { %v607_v49 = vadd.f32 %v5660_v14, %v606_v48  ;;  %5665 = vpow2.f32 %v5372_v0  ;;  %v5374_v43 = vmul.f32 -1.442695, %v6326_v16 }
  0xe4   :  { %5667 = vpow2.f32 %v5373_v1  ;;  %vm628_vm1 = vcmp.eq.f32.partialorder %v627_v11, 8.507059e+37 }
  0xe5   :  { %v611_v54 = vsel %vm610_vm11, %v5660_v14, %v607_v49  ;;  %v630_v14 = vor.u32 1.1754944e-38, %v629_v10 }
  0xe6   :  { %v616_v60 = vsel %vm613_vm12, %v615_v58, %v611_v54 }
  0xe7   :  { %v6303_v63 = vmul.f32 %v616_v60, %v6257_v50 }
  0xe8   :  { %v5664_v62 = vpop.eup %5663 }
  0xe9   :  { %790 = vrot.lane.b32.xlu2 %v6270_v44, %s6055_s24  ;;  %v619_v2 = vmul.f32 %v5664_v62, %v568_v45  ;;  %v5666_v4 = vpop.eup %5665  ;;  %vm624_vm13 = vweird.f32 %v5664_v62 }
  0xea   :  { %874 = vrot.lane.b32.xlu0 %v6270_v44, %s6056_s25  ;;  %954 = vrot.lane.b32.xlu1 %v6267_v17, %s6054_s6  ;;  %v5668_v5 = vpop.eup %5667  ;;  %v569_v6 = vadd.f32 1.0, %v5666_v4  ;;  %vm625_vm15 = vmor %vm623_vm14, %vm624_vm13 }
  0xeb   :  { %v620_v3 = vsub.f32 1.0, %v619_v2  ;;  %v570_v8 = vadd.f32 1.0, %v5668_v5  ;;  %v538_v2 = vpop.f32.mrf.mxu3 }
  0xec   :  { %5669 = vrcp.f32 %v569_v6  ;;  %vm638_vm4 = vweird.f32 %v569_v6  ;;  %v644_v58 = vand.u32 2147483648, %v569_v6  ;;  %v642_v0 = vand.u32 2147483647, %v569_v6 }
  0xed   :  { %v621_v50 = vmul.f32 %v5664_v62, %v620_v3  ;;  %5671 = vrcp.f32 %v570_v8  ;;  %v659_v60 = vand.u32 2147483648, %v570_v8  ;;  %vm653_vm6 = vweird.f32 %v570_v8 }
  0xee   :  { %5673 = vpow2.f32 %v5374_v43  ;;  %v657_v1 = vand.u32 2147483647, %v570_v8  ;;  %vm643_vm8 = vcmp.eq.f32.partialorder %v642_v0, 8.507059e+37 }
  0xef   :  { %v622_v7 = vadd.f32 %v5664_v62, %v621_v50  ;;  %v645_v50 = vor.u32 1.1754944e-38, %v644_v58  ;;  %v660_v5 = vor.u32 1.1754944e-38, %v659_v60 }
  0xf0   :  { %vm658_vm9 = vcmp.eq.f32.partialorder %v657_v1, 8.507059e+37 }
  0xf1   :  { %744 = vrot.lane.b32.xlu2 %v6267_v17, %s6057_s28  ;;  %v626_v12 = vsel %vm625_vm15, %v5664_v62, %v622_v7 }
  0xf2   :  { %870 = vrot.lane.b32.xlu0 %v6267_v17, %s6056_s25  ;;  %912 = vrot.lane.b32.xlu1 %v6267_v17, %s6053_s5  ;;  %v631_v15 = vsel %vm628_vm1, %v630_v14, %v626_v12  ;;  %v5670_v18 = vpop.eup %5669 }
  0xf3   :  { %v5672_v42 = vpop.eup %5671  ;;  %v6329_v41 = vmul.f32 %v631_v15, %v6265_v9  ;;  %v634_v46 = vmul.f32 %v5670_v18, %v569_v6  ;;  %vm639_vm2 = vweird.f32 %v5670_v18  ;;  %v6357_v6 = vadd.f32 %v538_v2, %v6290_v57 }
  0xf4   :  { %v649_v48 = vmul.f32 %v5672_v42, %v570_v8  ;;  %v5674_v9 = vpop.eup %5673  ;;  %vm654_vm3 = vweird.f32 %v5672_v42  ;;  %vm6344_vm5 = vmor %vm638_vm4, %vm639_vm2 }
  0xf5   :  { %10356 = vst [vmem:[#allocation36_spill] sm:$0xff] %v6329_v41  ;;  %v635_v45 = vsub.f32 1.0, %v634_v46  ;;  %v571_v53 = vadd.f32 1.0, %v5674_v9  ;;  %vm655_vm7 = vmor %vm653_vm6, %vm654_vm3  ;;  %v5375_v13 = vmul.f32 -1.442695, %v6357_v6 }
  0xf6   :  { %v650_v49 = vsub.f32 1.0, %v649_v48 }
  0xf7   :  { %v636_v51 = vmul.f32 %v5670_v18, %v635_v45  ;;  %5675 = vrcp.f32 %v571_v53  ;;  %vm668_vm11 = vweird.f32 %v571_v53  ;;  %v672_v43 = vand.u32 2147483647, %v571_v53 }
  0xf8   :  { %v651_v52 = vmul.f32 %v5672_v42, %v650_v49  ;;  %5677 = vpow2.f32 %v5375_v13 }
  0xf9   :  { %962 = vrot.lane.b32.xlu2 %v6303_v63, %s6054_s6  ;;  %v637_v54 = vadd.f32 %v5670_v18, %v636_v51  ;;  %vm673_vm13 = vcmp.eq.f32.partialorder %v672_v43, 8.507059e+37 }
  0xfa   :  { %786 = vrot.lane.b32.xlu0 %v6267_v17, %s6055_s24  ;;  %832 = vrot.lane.b32.xlu1 %v6270_v44, %s6052_s3  ;;  %v652_v55 = vadd.f32 %v5672_v42, %v651_v52 }
  0xfb   :  { %v641_v3 = vsel %vm6344_vm5, %v5670_v18, %v637_v54 }
  0xfc   :  { %v656_v4 = vsel %vm655_vm7, %v5672_v42, %v652_v55  ;;  %v646_v7 = vsel %vm643_vm8, %v645_v50, %v641_v3  ;;  %v674_v42 = vand.u32 2147483648, %v571_v53 }
  0xfd   :  { %v661_v8 = vsel %vm658_vm9, %v660_v5, %v656_v4  ;;  %v5676_v10 = vpop.eup %5675  ;;  %v6360_v11 = vmul.f32 %v646_v7, %v6297_v59 }
  0xfe   :  { %v6363_v12 = vmul.f32 %v661_v8, %v6300_v61  ;;  %v664_v14 = vmul.f32 %v5676_v10, %v571_v53  ;;  %v5678_v59 = vpop.eup %5677  ;;  %vm669_vm10 = vweird.f32 %v5676_v10  ;;  %v675_v48 = vor.u32 1.1754944e-38, %v674_v42 }
  0xff   :  { %v572_v15 = vadd.f32 1.0, %v5678_v59  ;;  %vm670_vm12 = vmor %vm668_vm11, %vm669_vm10 }
 0x100   :  { %v665_v57 = vsub.f32 1.0, %v664_v14 }
 0x101   :  { %920 = vrot.lane.b32.xlu2 %v6303_v63, %s6053_s5  ;;  %5679 = vrcp.f32 %v572_v15  ;;  %v689_v60 = vand.u32 2147483648, %v572_v15  ;;  %vm683_vm15 = vweird.f32 %v572_v15  ;;  %v687_v62 = vand.u32 2147483647, %v572_v15 }
 0x102   :  { %705 = vrot.lane.b32.xlu0 %v6270_v44, %s6058_s29  ;;  %748 = vrot.lane.b32.xlu1 %v6270_v44, %s6057_s28  ;;  %v666_v61 = vmul.f32 %v5676_v10, %v665_v57 }
 0x103   :  { %v690_v1 = vor.u32 1.1754944e-38, %v689_v60  ;;  %vm688_vm2 = vcmp.eq.f32.partialorder %v687_v62, 8.507059e+37  ;;  %v717_v62 = vlaneseq }
 0x104   :  { %v667_v18 = vadd.f32 %v5676_v10, %v666_v61 }
 0x106   :  { %v671_v46 = vsel %vm670_vm12, %v5676_v10, %v667_v18 }
 0x107   :  { %v676_v49 = vsel %vm673_vm13, %v675_v48, %v671_v46  ;;  %v5680_v9 = vpop.eup %5679 }
 0x108   :  { %v6387_v51 = vmul.f32 %v676_v49, %v6326_v16  ;;  %v679_v52 = vmul.f32 %v5680_v9, %v572_v15  ;;  %vm684_vm14 = vweird.f32 %v5680_v9  ;;  %v1075_v49 = vld [vmem:[%s10295_s8] sm:$0xff] }
 0x109   :  { %878 = vrot.lane.b32.xlu2 %v6303_v63, %s6056_s25  ;;  %vm685_vm1 = vmor %vm683_vm15, %vm684_vm14 }
 0x10a   :  { %1000 = vrot.lane.b32.xlu0 %v6270_v44, %s6059_s1  ;;  %701 = vrot.lane.b32.xlu1 %v6267_v17, %s6058_s29  ;;  %v680_v54 = vsub.f32 1.0, %v679_v52 }
 0x10c   :  { %v681_v55 = vmul.f32 %v5680_v9, %v680_v54 }
 0x10e   :  { %v682_v58 = vadd.f32 %v5680_v9, %v681_v55 }
 0x110   :  { %v686_v0 = vsel %vm685_vm1, %v5680_v9, %v682_v58 }
 0x111   :  { %924 = vrot.lane.b32.xlu2 %v6329_v41, %s6053_s5  ;;  %v691_v50 = vsel %vm688_vm2, %v690_v1, %v686_v0 }
 0x112   :  { %996 = vrot.lane.b32.xlu0 %v6267_v17, %s6059_s1  ;;  %840 = vrot.lane.b32.xlu1 %v6329_v41, %s6052_s3  ;;  %v6418_v5 = vmul.f32 %v691_v50, %v6357_v6 }
 0x114   :  { %10359 = vst [vmem:[#allocation37_spill] sm:$0xff] %v6418_v5 }
 0x119   :  { %756 = vrot.lane.b32.xlu2 %v6329_v41, %s6057_s28 }
 0x11a   :  { %966 = vrot.lane.b32.xlu0 %v6329_v41, %s6054_s6  ;;  %882 = vrot.lane.b32.xlu1 %v6329_v41, %s6056_s25 }
 0x121   :  { %1004 = vrot.lane.b32.xlu2 %v6303_v63, %s6059_s1 }
 0x122   :  { %798 = vrot.lane.b32.xlu0 %v6329_v41, %s6055_s24  ;;  %713 = vrot.lane.b32.xlu1 %v6329_v41, %s6058_s29 }
 0x129   :  { %836 = vrot.lane.b32.xlu2 %v6303_v63, %s6052_s3 }
 0x12a   :  { %830 = vrot.lane.b32.xlu0 %v6360_v11, %s6052_s3  ;;  %960 = vrot.lane.b32.xlu1 %v6363_v12, %s6054_s6 }
 0x131   :  { %956 = vrot.lane.b32.xlu2 %v6360_v11, %s6054_s6 }
 0x132   :  { %792 = vrot.lane.b32.xlu0 %v6363_v12, %s6055_s24  ;;  %918 = vrot.lane.b32.xlu1 %v6363_v12, %s6053_s5 }
 0x139   :  { %914 = vrot.lane.b32.xlu2 %v6360_v11, %s6053_s5 }
 0x13a   :  { %746 = vrot.lane.b32.xlu0 %v6360_v11, %s6057_s28  ;;  %876 = vrot.lane.b32.xlu1 %v6363_v12, %s6056_s25 }
 0x13b   :  { %v6384_v45 = vpop.permute.xlu2 %828 }
 0x141   :  { %834 = vrot.lane.b32.xlu2 %v6363_v12, %s6052_s3 }
 0x142   :  { %922 = vrot.lane.b32.xlu0 %v6387_v51, %s6053_s5  ;;  %872 = vrot.lane.b32.xlu1 %v6360_v11, %s6056_s25 }
 0x143   :  { %v6395_v53 = vpop.permute.xlu2 %790 }
 0x149   :  { %750 = vrot.lane.b32.xlu2 %v6363_v12, %s6057_s28 }
 0x14a   :  { %880 = vrot.lane.b32.xlu0 %v6387_v51, %s6056_s25  ;;  %788 = vrot.lane.b32.xlu1 %v6360_v11, %s6055_s24 }
 0x14b   :  { %v6403_v16 = vpop.permute.xlu2 %744 }
 0x151   :  { %703 = vrot.lane.b32.xlu2 %v6360_v11, %s6058_s29 }
 0x152   :  { %752 = vrot.lane.b32.xlu0 %v6303_v63, %s6057_s28  ;;  %707 = vrot.lane.b32.xlu1 %v6363_v12, %s6058_s29 }
 0x153   :  { %v6411_v2 = vpop.permute.xlu2 %962 }
 0x154   :  { %v6413_v3 = vpop.permute.xlu0 %916  ;;  %v6415_v4 = vpop.permute.xlu1 %958 }
 0x159   :  { %964 = vrot.lane.b32.xlu2 %v6387_v51, %s6054_s6 }
 0x15a   :  { %926 = vrot.lane.b32.xlu0 %v6418_v5, %s6053_s5  ;;  %1002 = vrot.lane.b32.xlu1 %v6363_v12, %s6059_s1 }
 0x15b   :  { %v6426_v7 = vpop.permute.xlu2 %920 }
 0x15c   :  { %v6428_v8 = vpop.permute.xlu0 %874  ;;  %v6430_v10 = vpop.permute.xlu1 %954 }
 0x161   :  { %842 = vrot.lane.b32.xlu2 %v6418_v5, %s6052_s3 }
 0x162   :  { %758 = vrot.lane.b32.xlu0 %v6418_v5, %s6057_s28  ;;  %998 = vrot.lane.b32.xlu1 %v6360_v11, %s6059_s1 }
 0x163   :  { %v6438_v6 = vpop.permute.xlu2 %878 }
 0x164   :  { %v6440_v13 = vpop.permute.xlu0 %870  ;;  %v6442_v14 = vpop.permute.xlu1 %912 }
 0x165   :  { %10360 = vst [vmem:[#allocation38_spill] sm:$0xff] %v6440_v13 }
 0x169   :  { %1008 = vrot.lane.b32.xlu2 %v6329_v41, %s6059_s1 }
 0x16a   :  { %1006 = vrot.lane.b32.xlu0 %v6387_v51, %s6059_s1  ;;  %968 = vrot.lane.b32.xlu1 %v6418_v5, %s6054_s6 }
 0x16b   :  { %v6450_v57 = vpop.permute.xlu2 %924 }
 0x16c   :  { %v6452_v59 = vpop.permute.xlu0 %786  ;;  %v6454_v61 = vpop.permute.xlu1 %832 }
 0x171   :  { %884 = vrot.lane.b32.xlu2 %v6418_v5, %s6056_s25 }
 0x172   :  { %838 = vrot.lane.b32.xlu0 %v6387_v51, %s6052_s3  ;;  %800 = vrot.lane.b32.xlu1 %v6418_v5, %s6055_s24 }
 0x173   :  { %v6462_v15 = vpop.permute.xlu2 %756 }
 0x174   :  { %v6464_v18 = vpop.permute.xlu0 %705  ;;  %v6466_v42 = vpop.permute.xlu1 %748 }
 0x175   :  { %10361 = vst [vmem:[#allocation39_spill] sm:$0xff] %v6464_v18 }
 0x179   :  { %715 = vrot.lane.b32.xlu2 %v6418_v5, %s6058_s29 }
 0x17a   :  { %1010 = vrot.lane.b32.xlu0 %v6418_v5, %s6059_s1  ;;  %794 = vrot.lane.b32.xlu1 %v6303_v63, %s6055_s24 }
 0x17b   :  { %v6474_v43 = vpop.permute.xlu2 %1004 }
 0x17c   :  { %v6476_v46 = vpop.permute.xlu0 %1000  ;;  %v6478_v48 = vpop.permute.xlu1 %701 }
 0x181   :  { %796 = vrot.lane.b32.xlu2 %v6387_v51, %s6055_s24 }
 0x182   :  { %1078 = vperm.xlu0 %5646, %v1075_v49   ;;  %754 = vrot.lane.b32.xlu1 %v6387_v51, %s6057_s28  ;;  %v6509_v49 = vand.u32 127, %v717_v62 }
 0x183   :  { %v6487_v9 = vpop.permute.xlu2 %836 }
 0x184   :  { %v6489_v52 = vpop.permute.xlu0 %996  ;;  %v6491_v54 = vpop.permute.xlu1 %840  ;;  %vm970_vm3 = vcmp.lt.s32.totalorder %v6509_v49, 112  ;;  %vm928_vm4 = vcmp.lt.s32.totalorder %v6509_v49, 113  ;;  %vm886_vm5 = vcmp.lt.s32.totalorder %v6509_v49, 127  ;;  %vm844_vm6 = vcmp.lt.s32.totalorder %v6509_v49, 1 }
 0x185   :  { %10362 = vst [vmem:[#allocation40_spill] sm:$0xff] %v6491_v54  ;;  %v975_v32 = vsel %vm970_vm3, %v6430_v10, %v6415_v4  ;;  %v933_v27 = vsel %vm928_vm4, %v6442_v14, %v6413_v3  ;;  %v973_v56 = vsel %vm970_vm3, %v6415_v4, %v6411_v2  ;;  %vm802_vm7 = vcmp.lt.s32.totalorder %v6509_v49, 15 }
 0x186   :  { %v988_v62 = vmul.f32 %v980_v39, %v975_v32  ;;  %v989_v4 = vmul.f32 %v981_v19, %v973_v56  ;;  %v851_v56 = vsel %vm844_vm6, %v6491_v54, %v6384_v45  ;;  %vm10313_vm8 = vcmp.lt.s32.totalorder %v6509_v49, 16  ;;  %v902_v54 = vld [vmem:[#allocation3 + $0x170] sm:$0xff] }
 0x187   :  { %vm10312_vm9 = vcmp.lt.s32.totalorder %v6509_v49, 17  ;;  %vm1012_vm10 = vcmp.lt.s32.totalorder %v6509_v49, 111 }
 0x189   :  { %711 = vrot.lane.b32.xlu2 %v6387_v51, %s6058_s29 }
 0x18a   :  { %709 = vrot.lane.b32.xlu1 %v6303_v63, %s6058_s29 }
 0x18b   :  { %v6497_v55 = vpop.permute.xlu2 %956 }
 0x18c   :  { %v6499_v58 = vpop.permute.xlu0 %966  ;;  %v6501_v60 = vpop.permute.xlu1 %882 }
 0x193   :  { %v6503_v0 = vpop.permute.xlu2 %914 }
 0x194   :  { %v6505_v1 = vpop.permute.xlu0 %798  ;;  %v6507_v50 = vpop.permute.xlu1 %713 }
 0x19b   :  { %v6516_v31 = vpop.permute.xlu2 %834 }
 0x19c   :  { %v6518_v33 = vpop.permute.xlu0 %830  ;;  %v961_v28 = vpop.permute.xlu1 %960 }
 0x19d   :  { %v976_v29 = vsel %vm970_vm3, %v6497_v55, %v961_v28 }
 0x19e   :  { %v992_v25 = vmul.f32 %v984_v30, %v976_v29 }
 0x1a0   :  { %v1066_v23 = vpack.c.bf16 %v992_v25, %v988_v62  ;;  %v946_v25 = vmul.f32 %v938_v22, %v933_v27  ;;  %v891_v22 = vsel %vm886_vm5, %v6440_v13, %v6428_v8  ;;  %v900_v27 = vld [vmem:[#allocation3 + $0x160] sm:$0xff] }
 0x1a1   :  { %v904_v34 = vmul.f32 %v896_v38, %v891_v22 }
 0x1a2   :  { %1090 = vmatpush.bf16.msrb.mxu0 %v1066_v23 }
 0x1a3   :  { %v6528_v26 = vpop.permute.xlu2 %750 }
 0x1a4   :  { %v6530_v21 = vpop.permute.xlu0 %792  ;;  %v919_v20 = vpop.permute.xlu1 %918 }
 0x1a5   :  { %v934_v29 = vsel %vm928_vm4, %v6503_v0, %v919_v20 }
 0x1a6   :  { %v950_v30 = vmul.f32 %v942_v24, %v934_v29 }
 0x1a8   :  { %v1062_v32 = vpack.c.bf16 %v950_v30, %v946_v25  ;;  %v943_v25 = vld [vmem:[#allocation3 + $0x1a8] sm:$0xff] }
 0x1aa   :  { %1091 = vmatpush.bf16.msrb.mxu0 %v1062_v32 }
 0x1ab   :  { %v6535_v23 = vpop.permute.xlu2 %703 }
 0x1ac   :  { %v6537_v39 = vpop.permute.xlu0 %746  ;;  %v877_v62 = vpop.permute.xlu1 %876 }
 0x1b3   :  { %v6548_v24 = vpop.permute.xlu2 %964 }
 0x1b4   :  { %v974_v29 = vsel %vm970_vm3, %v961_v28, %v6548_v24  ;;  %v6553_v30 = vpop.permute.xlu0 %922  ;;  %v6555_v32 = vpop.permute.xlu1 %872  ;;  %v931_v28 = vsel %vm928_vm4, %v6413_v3, %v6426_v7  ;;  %v1054_v3 = vpack.c.bf16 %v6360_v11, %v6267_v17  ;;  %v855_v17 = vld [vmem:[#allocation3 + $0xc8] sm:$0xff]  ;;  %v849_v11 = vsel %vm844_vm6, %v6384_v45, %v6454_v61 }
 0x1b5   :  { %10363 = vst [vmem:[#allocation41_spill] sm:$0xff] %v6555_v32  ;;  %v993_v37 = vmul.f32 %v985_v40, %v974_v29  ;;  %v932_v47 = vsel %vm928_vm4, %v919_v20, %v6553_v30  ;;  %v892_v36 = vsel %vm886_vm5, %v6555_v32, %v877_v62  ;;  %v947_v40 = vmul.f32 %v939_v35, %v931_v28  ;;  %v854_v20 = vld [vmem:[#allocation3 + $0xc0] sm:$0xff]  ;;  %v897_v32 = vld [vmem:[#allocation3 + $0x148] sm:$0xff] }
 0x1b6   :  { %v908_v5 = vmul.f32 %v900_v27, %v892_v36  ;;  %v951_v13 = vmul.f32 %v943_v25, %v932_v47  ;;  %v858_v29 = vld [vmem:[#allocation3 + $0xe0] sm:$0xff]  ;;  %v889_v36 = vsel %vm886_vm5, %v6428_v8, %v6438_v6  ;;  %v859_v28 = vld [vmem:[#allocation3 + $0xe8] sm:$0xff]  ;;  %v807_v45 = vsel %vm802_vm7, %v6452_v59, %v6395_v53 }
 0x1b7   :  { %v1067_v41 = vpack.c.bf16 %v993_v37, %v989_v4 }
 0x1b8   :  { %v1058_v19 = vpack.c.bf16 %v908_v5, %v904_v34  ;;  %v901_v34 = vld [vmem:[#allocation3 + $0x168] sm:$0xff]  ;;  %v1063_v35 = vpack.c.bf16 %v951_v13, %v947_v40  ;;  %v862_v5 = vmul.f32 %v854_v20, %v851_v56  ;;  %v905_v13 = vmul.f32 %v897_v32, %v889_v36 }
 0x1b9   :  { %1116 = vmatpush.bf16.msrb.mxu2 %v1067_v41  ;;  %v1055_v20 = vpack.c.bf16 %v6363_v12, %v6270_v44  ;;  %v817_v56 = vld [vmem:[#allocation3 + $0xa8] sm:$0xff]  ;;  %v766_v44 = vsel %vm10313_vm8, %v6537_v39, %v6528_v26 }
 0x1ba   :  { %1092 = vmatpush.bf16.msrb.mxu0 %v1058_v19  ;;  %v850_v19 = vsel %vm844_vm6, %v6518_v33, %v6516_v31  ;;  %v813_v36 = vld [vmem:[#allocation3 + $0x88] sm:$0xff] }
 0x1bb   :  { %v6576_v37 = vpop.permute.xlu2 %842  ;;  %v821_v12 = vmul.f32 %v813_v36, %v807_v45  ;;  %v1022_v36 = vld [vmem:[#allocation3 + $0x200] sm:$0xff]  ;;  %v1017_v45 = vsel %vm1012_vm10, %v6489_v52, %v6476_v46 }
 0x1bc   :  { %10364 = vst [vmem:[#allocation42_spill] sm:$0xff] %v6576_v37  ;;  %v852_v38 = vsel %vm844_vm6, %v6576_v37, %v6518_v33  ;;  %v6582_v47 = vpop.permute.xlu0 %880  ;;  %v6584_v41 = vpop.permute.xlu1 %788 }
 0x1bd   :  { %v866_v22 = vmul.f32 %v858_v29, %v852_v38  ;;  %v890_v8 = vsel %vm886_vm5, %v877_v62, %v6582_v47  ;;  %1117 = vmatpush.bf16.msrb.mxu2 %v1063_v35  ;;  %v867_v62 = vmul.f32 %v859_v28, %v850_v19  ;;  %v808_v33 = vsel %vm802_vm7, %v6584_v41, %v6530_v21  ;;  %v775_v38 = vld [vmem:[#allocation3 + $0x68] sm:$0xff] }
 0x1be   :  { %v909_v27 = vmul.f32 %v901_v34, %v890_v8  ;;  %1093 = vmatpush.bf16.msrb.mxu0 %v1054_v3  ;;  %v863_v29 = vmul.f32 %v855_v17, %v849_v11  ;;  %v825_v34 = vmul.f32 %v817_v56, %v808_v33  ;;  %v771_v3 = vld [vmem:[#allocation3 + $0x48] sm:$0xff]  ;;  %v1074_v17 = vld [vmem:[%s10294_s7] sm:$0xff] }
 0x1bf   :  { %v1050_v25 = vpack.c.bf16 %v866_v22, %v862_v5  ;;  %v765_v5 = vsel %vm10313_vm8, %v6403_v16, %v6466_v42  ;;  %v783_v22 = vmul.f32 %v775_v38, %v766_v44  ;;  %v729_v11 = vld [vmem:[#allocation3 + $0x8] sm:$0xff]  ;;  %v1082_v33 = vunpack.c.l.b16 %v1074_v17 }
 0x1c0   :  { %v1059_v4 = vpack.c.bf16 %v909_v27, %v905_v13  ;;  %v1051_v35 = vpack.c.bf16 %v867_v62, %v863_v29  ;;  %v1047_v27 = vpack.c.bf16 %v825_v34, %v821_v12  ;;  %v779_v19 = vmul.f32 %v771_v3, %v765_v5  ;;  %v1026_v34 = vld [vmem:[#allocation3 + $0x220] sm:$0xff] }
 0x1c1   :  { %v724_v62 = vsel %vm10312_vm9, %v6478_v48, %v6464_v18  ;;  %v6651_v3 = vpack.c.b16 %v1082_v33, %v1082_v33  ;;  %v1030_v5 = vmul.f32 %v1022_v36, %v1017_v45  ;;  %v1027_v33 = vld [vmem:[#allocation3 + $0x228] sm:$0xff]  ;;  %v944_v45 = vld [vmem:[#allocation3 + $0x1b0] sm:$0xff] }
 0x1c2   :  { %1094 = vmatpush.bf16.msrb.mxu0 %v1050_v25  ;;  %1118 = vmatpush.bf16.msrb.mxu2 %v1059_v4  ;;  %v733_v4 = vld [vmem:[#allocation3 + $0x28] sm:$0xff]  ;;  %v1043_v56 = vpack.c.bf16 %v783_v22, %v779_v19  ;;  %v737_v29 = vmul.f32 %v729_v11, %v724_v62  ;;  %v1015_v11 = vsel %vm1012_vm10, %v6476_v46, %v6474_v43  ;;  %v982_v62 = vld [vmem:[#allocation3 + $0x1d0] sm:$0xff] }
 0x1c3   :  { %v6626_v25 = vpop.permute.xlu2 %1008  ;;  %v1023_v19 = vld [vmem:[#allocation3 + $0x208] sm:$0xff] }
 0x1c4   :  { %v6600_v32 = vpop.permute.xlu0 %752  ;;  %v6602_v40 = vpop.permute.xlu1 %707 }
 0x1c5   :  { %v725_v28 = vsel %vm10312_vm9, %v6535_v23, %v6602_v40 }
 0x1c6   :  { %1119 = vmatpush.bf16.msrb.mxu2 %v1055_v20  ;;  %v741_v20 = vmul.f32 %v733_v4, %v725_v28  ;;  %v1083_v4 = vunpack.c.h.b16 %v1074_v17  ;;  %v986_v17 = vld [vmem:[#allocation3 + $0x1f0] sm:$0xff] }
 0x1c8   :  { %v1039_v44 = vpack.c.bf16 %v741_v20, %v737_v29  ;;  %v971_v20 = vsel %vm970_vm3, %v6411_v2, %v6499_v58 }
 0x1ca   :  { %1120 = vmatpush.bf16.msrb.mxu2 %v1051_v35 }
 0x1cc   :  { %v6624_v8 = vpop.permute.xlu0 %926  ;;  %v1003_v13 = vpop.permute.xlu1 %1002 }
 0x1ce   :  { %1121 = vmatpush.bf16.msrb.mxu2 %v1047_v27  ;;  %v6653_v27 = vpop.permute.xlu2 %884 }
 0x1d2   :  { %1122 = vmatpush.bf16.msrb.mxu2 %v1043_v56  ;;  %v6664_v56 = vpack.c.b16 %v1083_v4, %v1083_v4  ;;  %v940_v4 = vld [vmem:[#allocation3 + $0x190] sm:$0xff] }
 0x1d4   :  { %v6644_v35 = vpop.permute.xlu0 %758  ;;  %v6646_v38 = vpop.permute.xlu1 %998 }
 0x1d5   :  { %v1018_v12 = vsel %vm1012_vm10, %v6646_v38, %v1003_v13 }
 0x1d6   :  { %v1034_v22 = vmul.f32 %v1026_v34, %v1018_v12  ;;  %1123 = vmatpush.bf16.msrb.mxu2 %v1039_v44  ;;  %v930_v34 = vsel %vm928_vm4, %v6553_v30, %v6624_v8  ;;  %v1031_v44 = vmul.f32 %v1023_v19, %v1015_v11  ;;  %v990_v12 = vmul.f32 %v982_v62, %v971_v20  ;;  %v6688_v37 = vpop.permute.xlu2 %715  ;;  %v898_v11 = vld [vmem:[#allocation3 + $0x150] sm:$0xff]  ;;  %v812_v62 = vld [vmem:[#allocation3 + $0x80] sm:$0xff] }
 0x1d7   :  { %v929_v30 = vsel %vm928_vm4, %v6426_v7, %v6450_v57  ;;  %v887_v7 = vsel %vm886_vm5, %v6438_v6, %v6501_v60  ;;  %v809_v20 = vsel %vm802_vm7, %v6505_v1, %v6452_v59  ;;  %v768_v6 = vsel %vm10313_vm8, %v6644_v35, %v6537_v39 }
 0x1d8   :  { %v1070_v28 = vpack.c.bf16 %v1034_v22, %v1030_v5  ;;  %v948_v19 = vmul.f32 %v940_v4, %v929_v30  ;;  %v847_v39 = vsel %vm844_vm6, %v6454_v61, %v6487_v9  ;;  %v1024_v4 = vld [vmem:[#allocation3 + $0x210] sm:$0xff]  ;;  %v732_v30 = vld [vmem:[#allocation3 + $0x20] sm:$0xff] }
 0x1d9   :  { %1124 = vmatmul.bf16.vlgmr.msrb.gmra.mxu2 %v6651_v3 }
 0x1da   :  { %1110 = vmatpush.bf16.msrb.mxu1 %v1070_v28  ;;  %v952_v28 = vmul.f32 %v944_v45, %v930_v34  ;;  %v906_v34 = vmul.f32 %v898_v11, %v887_v7  ;;  %v1025_v11 = vld [vmem:[#allocation3 + $0x218] sm:$0xff] }
 0x1dc   :  { %v6666_v29 = vpop.permute.xlu0 %1006  ;;  %v969_v36 = vpop.permute.xlu1 %968 }
 0x1dd   :  { %v1016_v46 = vsel %vm1012_vm10, %v1003_v13, %v6666_v29  ;;  %v972_v2 = vsel %vm970_vm3, %v6548_v24, %v969_v36  ;;  %5376 = vmatmul.msk.bf16.vlgmr.msrb.gmra.mxu1 %vm134_vm0, %v6664_v56  ;;  %v888_v24 = vsel %vm886_vm5, %v6582_v47, %v6653_v27  ;;  %v816_v47 = vld [vmem:[#allocation3 + $0xa0] sm:$0xff] }
 0x1de   :  { %v1035_v5 = vmul.f32 %v1027_v33, %v1016_v46  ;;  %v994_v22 = vmul.f32 %v986_v17, %v972_v2  ;;  %v910_v33 = vmul.f32 %v902_v54, %v888_v24  ;;  %v774_v46 = vld [vmem:[#allocation3 + $0x60] sm:$0xff]  ;;  %v767_v2 = vsel %vm10313_vm8, %v6462_v15, %v6403_v16 }
 0x1df   :  { %v770_v54 = vld [vmem:[#allocation3 + $0x40] sm:$0xff]  ;;  %v727_v16 = vsel %vm10312_vm9, %v6688_v37, %v6535_v23  ;;  %v977_v23 = vsel %vm970_vm3, %v6499_v58, %v6430_v10  ;;  %v726_v10 = vsel %vm10312_vm9, %v6507_v50, %v6478_v48 }
 0x1e0   :  { %v1071_v18 = vpack.c.bf16 %v1035_v5, %v1031_v44  ;;  %v1068_v13 = vpack.c.bf16 %v994_v22, %v990_v12  ;;  %v820_v44 = vmul.f32 %v812_v62, %v809_v20  ;;  %v856_v5 = vld [vmem:[#allocation3 + $0xd0] sm:$0xff]  ;;  %v1060_v22 = vpack.c.bf16 %v910_v33, %v906_v34  ;;  %v6742_v20 = vpop.permute.xlu2 %796 }
 0x1e1   :  { %v864_v7 = vmul.f32 %v856_v5, %v847_v39  ;;  %v1019_v62 = vsel %vm1012_vm10, %v6626_v25, %v6489_v52  ;;  %v978_v33 = vsel %vm970_vm3, %v969_v36, %v6497_v55  ;;  %v740_v34 = vmul.f32 %v732_v30, %v727_v16 }
 0x1e2   :  { %1136 = vmatpush.bf16.msrb.mxu3 %v1071_v18  ;;  %1142 = vmatpush.bf16.msra.mxu1 %v1068_v13  ;;  %v1064_v18 = vpack.c.bf16 %v952_v28, %v948_v19  ;;  %v782_v28 = vmul.f32 %v774_v46, %v768_v6  ;;  %v860_v13 = vld [vmem:[#allocation3 + $0xf0] sm:$0xff]  ;;  %v778_v19 = vmul.f32 %v770_v54, %v767_v2 }
 0x1e3   :  { %v814_v6 = vld [vmem:[#allocation3 + $0x90] sm:$0xff]  ;;  %v1033_v54 = vmul.f32 %v1025_v11, %v1019_v62  ;;  %v903_v11 = vld [vmem:[#allocation3 + $0x178] sm:$0xff] }
 0x1e4   :  { %v6698_v17 = vpop.permute.xlu0 %838  ;;  %v6700_v45 = vpop.permute.xlu1 %800  ;;  %v899_v62 = vld [vmem:[#allocation3 + $0x158] sm:$0xff] }
 0x1e5   :  { %5377 = vmatmul.msk.bf16.vlgmr.msrb.gmra.mxu3 %vm134_vm0, %v6664_v56  ;;  %v810_v59 = vsel %vm802_vm7, %v6700_v45, %v6584_v41  ;;  %v1013_v41 = vsel %vm1012_vm10, %v6474_v43, %v6626_v25  ;;  %v848_v61 = vsel %vm844_vm6, %v6516_v31, %v6698_v17  ;;  %v1056_v43 = vpack.c.bf16 %v6387_v51, %v6303_v63  ;;  %v987_v31 = vld [vmem:[#allocation3 + $0x1f8] sm:$0xff]  ;;  %v1028_v63 = vld [vmem:[#allocation3 + $0x230] sm:$0xff] }
 0x1e6   :  { %1143 = vmatpush.bf16.msra.mxu1 %v1064_v18  ;;  %v824_v12 = vmul.f32 %v816_v47, %v810_v59  ;;  %v1029_v51 = vld [vmem:[#allocation3 + $0x238] sm:$0xff]  ;;  %v728_v18 = vld [vmem:[#allocation3] sm:$0xff]  ;;  %v1032_v58 = vmul.f32 %v1024_v4, %v1013_v41  ;;  %v868_v52 = vmul.f32 %v860_v13, %v848_v61  ;;  %v1042_v59 = vpack.c.bf16 %v782_v28, %v778_v19  ;;  %v772_v61 = vld [vmem:[#allocation3 + $0x50] sm:$0xff] }
 0x1e7   :  { %v983_v47 = vld [vmem:[#allocation3 + $0x1d8] sm:$0xff]  ;;  %v995_v2 = vmul.f32 %v987_v31, %v978_v33  ;;  %v736_v39 = vmul.f32 %v728_v18, %v726_v10  ;;  %v935_v13 = vsel %vm928_vm4, %v6450_v57, %v6442_v14  ;;  %v776_v14 = vld [vmem:[#allocation3 + $0x70] sm:$0xff] }
 0x1e8   :  { %v1046_v24 = vpack.c.bf16 %v824_v12, %v820_v44  ;;  %v991_v5 = vmul.f32 %v983_v47, %v977_v23  ;;  %v945_v41 = vld [vmem:[#allocation3 + $0x1b8] sm:$0xff]  ;;  %v1052_v16 = vpack.c.bf16 %v868_v52, %v864_v7  ;;  %v10366_v31 = vld [vmem:[#allocation38_spill] sm:$0xff] }
 0x1e9   :  { %v941_v28 = vld [vmem:[#allocation3 + $0x198] sm:$0xff]  ;;  %v893_v33 = vsel %vm886_vm5, %v6501_v60, %v10366_v31  ;;  %v734_v52 = vld [vmem:[#allocation3 + $0x30] sm:$0xff] }
 0x1ea   :  { %1144 = vmatpush.bf16.msra.mxu1 %v1060_v22  ;;  %1095 = vmatpush.bf16.msrb.mxu0 %v1046_v24  ;;  %v1069_v19 = vpack.c.bf16 %v995_v2, %v991_v5  ;;  %v949_v57 = vmul.f32 %v941_v28, %v935_v13  ;;  %v907_v10 = vmul.f32 %v899_v62, %v893_v33  ;;  %v10369_v2 = vld [vmem:[#allocation39_spill] sm:$0xff] }
 0x1eb   :  { %v777_v28 = vld [vmem:[#allocation3 + $0x78] sm:$0xff] }
 0x1ec   :  { %v1011_v25 = vpop.permute.xlu0 %1010  ;;  %v6751_v46 = vpop.permute.xlu1 %794 }
 0x1ed   :  { %v1014_v55 = vsel %vm1012_vm10, %v6666_v29, %v1011_v25  ;;  %v1020_v36 = vsel %vm1012_vm10, %v1011_v25, %v6646_v38  ;;  %v805_v48 = vsel %vm802_vm7, %v6395_v53, %v6751_v46  ;;  %v936_v38 = vsel %vm928_vm4, %v6624_v8, %v6503_v0  ;;  %v818_v29 = vld [vmem:[#allocation3 + $0xb0] sm:$0xff]  ;;  %v861_v25 = vld [vmem:[#allocation3 + $0xf8] sm:$0xff] }
 0x1ee   :  { %v1036_v44 = vmul.f32 %v1028_v63, %v1014_v55  ;;  %v1037_v12 = vmul.f32 %v1029_v51, %v1020_v36  ;;  %1145 = vmatpush.bf16.msra.mxu1 %v1056_v43  ;;  %v806_v53 = vsel %vm802_vm7, %v6530_v21, %v6742_v20  ;;  %1096 = vmatpush.bf16.msrb.mxu0 %v1042_v59  ;;  %v10365_v43 = vld [vmem:[#allocation41_spill] sm:$0xff]  ;;  %v10367_v55 = vld [vmem:[#allocation42_spill] sm:$0xff]  ;;  %v10368_v59 = vld [vmem:[#allocation40_spill] sm:$0xff] }
 0x1ef   :  { %v822_v30 = vmul.f32 %v814_v6, %v805_v48  ;;  %v763_v0 = vsel %vm10313_vm8, %v6466_v42, %v6600_v32  ;;  %v1038_v8 = vpack.c.bf16 %v740_v34, %v736_v39  ;;  %v953_v24 = vmul.f32 %v945_v41, %v936_v38  ;;  %v730_v6 = vld [vmem:[#allocation3 + $0x10] sm:$0xff]  ;;  %v857_v48 = vld [vmem:[#allocation3 + $0xd8] sm:$0xff]  ;;  %v10370_v39 = vld [vmem:[#allocation36_spill] sm:$0xff] }
 0x1f0   :  { %v1072_v22 = vpack.c.bf16 %v1036_v44, %v1032_v58  ;;  %v1073_v4 = vpack.c.bf16 %v1037_v12, %v1033_v54  ;;  %v826_v21 = vmul.f32 %v818_v29, %v806_v53  ;;  %v894_v7 = vsel %vm886_vm5, %v6653_v27, %v10365_v43  ;;  %v712_v58 = vpop.permute.xlu2 %711  ;;  %v10371_v41 = vld [vmem:[#allocation37_spill] sm:$0xff] }
 0x1f1   :  { %v780_v63 = vmul.f32 %v772_v61, %v763_v0  ;;  %v911_v27 = vmul.f32 %v903_v11, %v894_v7  ;;  %v1065_v18 = vpack.c.bf16 %v953_v24, %v949_v57  ;;  %v846_v36 = vsel %vm844_vm6, %v6698_v17, %v10367_v55  ;;  %v815_v17 = vld [vmem:[#allocation3 + $0x98] sm:$0xff] }
 0x1f2   :  { %1146 = vmatpush.bf16.msra.mxu1 %v1052_v16  ;;  %1162 = vmatpush.bf16.msra.mxu3 %v1072_v22  ;;  %v1048_v42 = vpack.c.bf16 %v826_v21, %v822_v30  ;;  %v845_v54 = vsel %vm844_vm6, %v6487_v9, %v10368_v59  ;;  %v869_v12 = vmul.f32 %v861_v25, %v846_v36  ;;  %v819_v9 = vld [vmem:[#allocation3 + $0xb8] sm:$0xff] }
 0x1f3   :  { %1097 = vmatpush.bf16.msrb.mxu0 %v1038_v8  ;;  %1188 = vmatpush.bf16.msra.mxu2 %v1073_v4  ;;  %v1061_v34 = vpack.c.bf16 %v911_v27, %v907_v10  ;;  %v1057_v38 = vpack.c.bf16 %v10371_v41, %v10370_v39  ;;  %v803_v29 = vsel %vm802_vm7, %v6751_v46, %v6505_v1  ;;  %v773_v1 = vld [vmem:[#allocation3 + $0x58] sm:$0xff] }
 0x1f4   :  { %v755_v23 = vpop.permute.xlu1 %754  ;;  %v865_v53 = vmul.f32 %v857_v48, %v845_v54  ;;  %v804_v4 = vsel %vm802_vm7, %v6742_v20, %v6700_v45  ;;  %v823_v30 = vmul.f32 %v815_v17, %v803_v29  ;;  %v761_v46 = vsel %vm10313_vm8, %v6600_v32, %v6462_v15  ;;  %v731_v20 = vld [vmem:[#allocation3 + $0x18] sm:$0xff] }
 0x1f5   :  { %v764_v51 = vsel %vm10313_vm8, %v6528_v26, %v755_v23  ;;  %5378 = vmatmul.msk.bf16.vlgmr.msra.gmra.mxu3 %vm134_vm0, %v6664_v56  ;;  %v723_v26 = vsel %vm10312_vm9, %v6602_v40, %v712_v58  ;;  %v762_v13 = vsel %vm10313_vm8, %v755_v23, %v6644_v35  ;;  %v827_v0 = vmul.f32 %v819_v9, %v804_v4  ;;  %v735_v35 = vld [vmem:[#allocation3 + $0x38] sm:$0xff] }
 0x1f6   :  { %v784_v47 = vmul.f32 %v776_v14, %v764_v51  ;;  %1098 = vmatmul.bf16.vlgmr.msrb.gmra.mxu0 %v6651_v3  ;;  %1147 = vmatpush.bf16.msra.mxu1 %v1048_v42  ;;  %v742_v40 = vmul.f32 %v734_v52, %v723_v26  ;;  %v1053_v16 = vpack.c.bf16 %v869_v12, %v865_v53  ;;  %v1079_v42 = vpop.permute.xlu0 %1078 }
 0x1f7   :  { %1168 = vmatpush.bf16.msra.mxu0 %v1069_v19  ;;  %5379 = vmatmul.msk.bf16.vlgmr.msra.gmra.mxu2 %vm134_vm0, %v6664_v56  ;;  %v785_v8 = vmul.f32 %v777_v28, %v762_v13  ;;  %v1049_v45 = vpack.c.bf16 %v827_v0, %v823_v30  ;;  %v781_v24 = vmul.f32 %v773_v1, %v761_v46 }
 0x1f8   :  { %v1044_v60 = vpack.c.bf16 %v784_v47, %v780_v63  ;;  %v721_v21 = vsel %vm10312_vm9, %v712_v58, %v6688_v37 }
 0x1f9   :  { %v1045_v11 = vpack.c.bf16 %v785_v8, %v781_v24  ;;  %v743_v43 = vmul.f32 %v735_v35, %v721_v21 }
 0x1fa   :  { %1148 = vmatpush.bf16.msra.mxu1 %v1044_v60 }
 0x1fb   :  { %1169 = vmatpush.bf16.msra.mxu0 %v1065_v18 }
 0x1fc   :  { %v710_v56 = vpop.permute.xlu1 %709 }
 0x1fd   :  { %v722_v44 = vsel %vm10312_vm9, %v10369_v2, %v710_v56  ;;  %v720_v61 = vsel %vm10312_vm9, %v710_v56, %v6507_v50 }
 0x1fe   :  { %v738_v5 = vmul.f32 %v730_v6, %v722_v44  ;;  %v739_v19 = vmul.f32 %v731_v20, %v720_v61 }
 0x1ff   :  { %1170 = vmatpush.bf16.msra.mxu0 %v1061_v34 }
 0x200   :  { %v1040_v22 = vpack.c.bf16 %v742_v40, %v738_v5  ;;  %v1041_v15 = vpack.c.bf16 %v743_v43, %v739_v19 }
 0x202   :  { %1149 = vmatpush.bf16.msra.mxu1 %v1040_v22 }
 0x203   :  { %1171 = vmatpush.bf16.msra.mxu0 %v1057_v38 }
 0x205   :  { %1150 = vmatmul.bf16.vlgmr.msra.gmra.mxu1 %v6651_v3 }
 0x207   :  { %1172 = vmatpush.bf16.msra.mxu0 %v1053_v16 }
 0x20b   :  { %1173 = vmatpush.bf16.msra.mxu0 %v1049_v45 }
 0x20f   :  { %1174 = vmatpush.bf16.msra.mxu0 %v1045_v11 }
 0x213   :  { %1175 = vmatpush.bf16.msra.mxu0 %v1041_v15 }
 0x216   :  { %1176 = vmatmul.bf16.vlgmr.msra.gmra.mxu0 %v6651_v3 }
 0x25a   :  { %v1112_v32 = vpop.f32.mrf.mxu1 }
 0x25c   :  { %v1125_v7 = vpop.f32.mrf.mxu2 }
 0x25d   :  { %v1126_v33 = vadd.f32 %v1125_v7, %v1079_v42 }
 0x262   :  { %v1114_v14 = vpop.f32.mrf.mxu1 }
 0x264   :  { %v1127_v57 = vpop.f32.mrf.mxu2 }
 0x268   :  { %v1138_v50 = vpop.f32.mrf.mxu3 }
 0x269   :  { %v6834_v63 = vadd.f32 %v1138_v50, %v1126_v33 }
 0x26b   :  { %v5381_v47 = vmul.f32 -1.442695, %v6834_v63 }
 0x270   :  { %v1140_v23 = vpop.f32.mrf.mxu3 }
 0x273   :  { %v1099_v62 = vpop.f32.mrf.mxu0 }
 0x274   :  { %v1100_v31 = vadd.f32 %v1099_v62, %v1079_v42 }
 0x276   :  { %v1113_v37 = vadd.f32 %v1112_v32, %v1100_v31 }
 0x278   :  { %v1164_v51 = vpop.f32.mrf.mxu3  ;;  %v5380_v27 = vmul.f32 -1.442695, %v1113_v37 }
 0x27a   :  { %5681 = vpow2.f32 %v5380_v27  ;;  %v1190_v3 = vpop.f32.mrf.mxu2 }
 0x27b   :  { %v1101_v18 = vpop.f32.mrf.mxu0  ;;  %5683 = vpow2.f32 %v5381_v47 }
 0x280   :  { %v1166_v10 = vpop.f32.mrf.mxu3  ;;  %v5682_v58 = vpop.eup %5681 }
 0x281   :  { %v1206_v60 = vadd.f32 1.0, %v5682_v58  ;;  %v5684_v26 = vpop.eup %5683  ;;  %v1463_v58 = vld [vmem:[%s10297_s10] sm:$0xff] }
 0x282   :  { %v1151_v34 = vpop.f32.mrf.mxu1  ;;  %v1192_v55 = vpop.f32.mrf.mxu2  ;;  %v1207_v6 = vadd.f32 1.0, %v5684_v26 }
 0x283   :  { %v1152_v52 = vadd.f32 %v1151_v34, %v1079_v42  ;;  %5685 = vrcp.f32 %v1206_v60  ;;  %v1221_v2 = vand.u32 2147483648, %v1206_v60  ;;  %v1219_v12 = vand.u32 2147483647, %v1206_v60 }
 0x284   :  { %vm1215_vm12 = vweird.f32 %v1206_v60  ;;  %v1236_v11 = vand.u32 2147483648, %v1207_v6  ;;  %v1234_v15 = vand.u32 2147483647, %v1207_v6 }
 0x285   :  { %v1165_v25 = vadd.f32 %v1164_v51, %v1152_v52  ;;  %v1222_v17 = vor.u32 1.1754944e-38, %v1221_v2  ;;  %vm1220_vm14 = vcmp.eq.f32.partialorder %v1219_v12, 8.507059e+37 }
 0x286   :  { %v1237_v57 = vor.u32 1.1754944e-38, %v1236_v11 }
 0x287   :  { %v5382_v36 = vmul.f32 -1.442695, %v1165_v25 }
 0x289   :  { %5687 = vpow2.f32 %v5382_v36  ;;  %v5686_v56 = vpop.eup %5685 }
 0x28a   :  { %v1153_v48 = vpop.f32.mrf.mxu1  ;;  %v1211_v59 = vmul.f32 %v5686_v56, %v1206_v60  ;;  %5689 = vrcp.f32 %v1207_v6  ;;  %vm1216_vm11 = vweird.f32 %v5686_v56 }
 0x28b   :  { %vm1217_vm13 = vmor %vm1215_vm12, %vm1216_vm11 }
 0x28c   :  { %v1212_v54 = vsub.f32 1.0, %v1211_v59 }
 0x28e   :  { %v1213_v40 = vmul.f32 %v5686_v56, %v1212_v54 }
 0x28f   :  { %v5688_v44 = vpop.eup %5687 }
 0x290   :  { %v1208_v5 = vadd.f32 1.0, %v5688_v44  ;;  %v1214_v41 = vadd.f32 %v5686_v56, %v1213_v40  ;;  %v5690_v38 = vpop.eup %5689  ;;  %v1435_v44 = vld [vmem:[#allocation6 + $0x110] sm:$0xff] }
 0x291   :  { %v1226_v9 = vmul.f32 %v5690_v38, %v1207_v6  ;;  %vm1231_vm11 = vweird.f32 %v5690_v38 }
 0x292   :  { %5691 = vrcp.f32 %v1208_v5  ;;  %v1218_v29 = vsel %vm1217_vm13, %v5686_v56, %v1214_v41  ;;  %v1251_v8 = vand.u32 2147483648, %v1208_v5  ;;  %v1249_v61 = vand.u32 2147483647, %v1208_v5 }
 0x293   :  { %v1177_v39 = vpop.f32.mrf.mxu0  ;;  %v1223_v22 = vsel %vm1220_vm14, %v1222_v17, %v1218_v29  ;;  %v1227_v13 = vsub.f32 1.0, %v1226_v9  ;;  %vm1245_vm1 = vweird.f32 %v1208_v5  ;;  %vm1230_vm13 = vweird.f32 %v1207_v6 }
 0x294   :  { %v1178_v53 = vadd.f32 %v1177_v39, %v1079_v42  ;;  %v6837_v4 = vmul.f32 %v1223_v22, %v1113_v37  ;;  %v1252_v35 = vor.u32 1.1754944e-38, %v1251_v8  ;;  %vm1250_vm12 = vcmp.eq.f32.partialorder %v1249_v61, 8.507059e+37  ;;  %vm1232_vm14 = vmor %vm1230_vm13, %vm1231_vm11  ;;  %v1391_v8 = vld [vmem:[#allocation6 + $0xc0] sm:$0xff] }
 0x295   :  { %v1228_v45 = vmul.f32 %v5690_v38, %v1227_v13  ;;  %vm10311_vm13 = vcmask 1043456   ;;  %v1434_v13 = vld [vmem:[#allocation6 + $0x108] sm:$0xff] }
 0x296   :  { %v6839_v30 = vadd.f32 %v1190_v3, %v1178_v53  ;;  %1399 = vrot.lane.b32.xlu1 %v6837_v4, %s6054_s6  ;;  %1378 = vrot.lane.b32.xlu2 %v6837_v4, %s6053_s5 }
 0x297   :  { %1420 = vrot.lane.b32.xlu0 %v6837_v4, %s6059_s1  ;;  %v1229_v21 = vadd.f32 %v5690_v38, %v1228_v45  ;;  %v1392_v45 = vld [vmem:[#allocation6 + $0xc8] sm:$0xff] }
 0x298   :  { %v5692_v16 = vpop.eup %5691  ;;  %v5383_v46 = vmul.f32 -1.442695, %v6839_v30 }
 0x299   :  { %v1241_v0 = vmul.f32 %v5692_v16, %v1208_v5  ;;  %vm1246_vm15 = vweird.f32 %v5692_v16  ;;  %v1233_v14 = vsel %vm1232_vm14, %v5690_v38, %v1229_v21  ;;  %vm10310_vm14 = vcmask 588800  }
 0x29a   :  { %5693 = vpow2.f32 %v5383_v46  ;;  %vm1247_vm2 = vmor %vm1245_vm1, %vm1246_vm15  ;;  %vm1235_vm15 = vcmp.eq.f32.partialorder %v1234_v15, 8.507059e+37 }
 0x29b   :  { %v1179_v28 = vpop.f32.mrf.mxu0  ;;  %v1242_v1 = vsub.f32 1.0, %v1241_v0  ;;  %v1238_v50 = vsel %vm1235_vm15, %v1237_v57, %v1233_v14  ;;  %v1370_v57 = vld [vmem:[#allocation6 + $0xa0] sm:$0xff] }
 0x29c   :  { %v6859_v42 = vmul.f32 %v1238_v50, %v6834_v63  ;;  %v1433_v28 = vld [vmem:[#allocation6 + $0x100] sm:$0xff] }
 0x29d   :  { %v1243_v20 = vmul.f32 %v5692_v16, %v1242_v1 }
 0x29e   :  { %1357 = vrot.lane.b32.xlu1 %v6837_v4, %s6056_s25 }
 0x29f   :  { %v1244_v24 = vadd.f32 %v5692_v16, %v1243_v20 }
 0x2a0   :  { %v5694_v7 = vpop.eup %5693 }
 0x2a1   :  { %v1248_v19 = vsel %vm1247_vm2, %v5692_v16, %v1244_v24  ;;  %v1209_v23 = vadd.f32 1.0, %v5694_v7 }
 0x2a2   :  { %v1253_v43 = vsel %vm1250_vm12, %v1252_v35, %v1248_v19  ;;  %v1412_v19 = vld [vmem:[#allocation6 + $0xe0] sm:$0xff] }
 0x2a3   :  { %v6850_v32 = vmul.f32 %v1253_v43, %v1165_v25  ;;  %5695 = vrcp.f32 %v1209_v23  ;;  %v1266_v51 = vand.u32 2147483648, %v1209_v23  ;;  %vm1260_vm2 = vweird.f32 %v1209_v23  ;;  %v1413_v43 = vld [vmem:[#allocation6 + $0xe8] sm:$0xff] }
 0x2a4   :  { %v1264_v27 = vand.u32 2147483647, %v1209_v23 }
 0x2a5   :  { %1382 = vrot.lane.b32.xlu2 %v6850_v32, %s6053_s5  ;;  %1361 = vrot.lane.b32.xlu0 %v6850_v32, %s6056_s25  ;;  %v1267_v18 = vor.u32 1.1754944e-38, %v1266_v51 }
 0x2a6   :  { %1315 = vrot.lane.b32.xlu1 %v6837_v4, %s6055_s24  ;;  %vm1265_vm12 = vcmp.eq.f32.partialorder %v1264_v27, 8.507059e+37 }
 0x2a9   :  { %v5696_v62 = vpop.eup %5695 }
 0x2aa   :  { %v1256_v31 = vmul.f32 %v5696_v62, %v1209_v23  ;;  %vm1261_vm1 = vweird.f32 %v5696_v62 }
 0x2ab   :  { %vm1262_vm11 = vmor %vm1260_vm2, %vm1261_vm1 }
 0x2ac   :  { %v1257_v33 = vsub.f32 1.0, %v1256_v31  ;;  %v1414_v31 = vld [vmem:[#allocation6 + $0xf0] sm:$0xff] }
 0x2ad   :  { %1401 = vrot.lane.b32.xlu2 %v6859_v42, %s6054_s6  ;;  %1340 = vrot.lane.b32.xlu0 %v6850_v32, %s6052_s3 }
 0x2ae   :  { %1424 = vrot.lane.b32.xlu1 %v6850_v32, %s6059_s1  ;;  %v1258_v63 = vmul.f32 %v5696_v62, %v1257_v33 }
 0x2b0   :  { %v1259_v37 = vadd.f32 %v5696_v62, %v1258_v63  ;;  %v1393_v63 = vld [vmem:[#allocation6 + $0xd0] sm:$0xff] }
 0x2b2   :  { %v1263_v47 = vsel %vm1262_vm11, %v5696_v62, %v1259_v37  ;;  %v1371_v37 = vld [vmem:[#allocation6 + $0xa8] sm:$0xff] }
 0x2b3   :  { %v1268_v3 = vsel %vm1265_vm12, %v1267_v18, %v1263_v47 }
 0x2b4   :  { %v6886_v10 = vmul.f32 %v1268_v3, %v6839_v30 }
 0x2b5   :  { %1338 = vrot.lane.b32.xlu2 %v6859_v42, %s6052_s3  ;;  %1298 = vrot.lane.b32.xlu0 %v6850_v32, %s6057_s28 }
 0x2b6   :  { %1403 = vrot.lane.b32.xlu1 %v6850_v32, %s6054_s6 }
 0x2bd   :  { %1359 = vrot.lane.b32.xlu2 %v6859_v42, %s6056_s25  ;;  %1380 = vrot.lane.b32.xlu0 %v6859_v42, %s6053_s5 }
 0x2be   :  { %1319 = vrot.lane.b32.xlu1 %v6850_v32, %s6055_s24 }
 0x2c5   :  { %1296 = vrot.lane.b32.xlu2 %v6859_v42, %s6057_s28  ;;  %1317 = vrot.lane.b32.xlu0 %v6859_v42, %s6055_s24 }
 0x2c6   :  { %1278 = vrot.lane.b32.xlu1 %v6850_v32, %s6058_s29 }
 0x2cd   :  { %1426 = vrot.lane.b32.xlu2 %v6886_v10, %s6059_s1  ;;  %1276 = vrot.lane.b32.xlu0 %v6859_v42, %s6058_s29 }
 0x2ce   :  { %1422 = vrot.lane.b32.xlu1 %v6859_v42, %s6059_s1 }
 0x2d5   :  { %1274 = vrot.lane.b32.xlu2 %v6837_v4, %s6058_s29  ;;  %1384 = vrot.lane.b32.xlu0 %v6886_v10, %s6053_s5 }
 0x2d6   :  { %1363 = vrot.lane.b32.xlu1 %v6886_v10, %s6056_s25 }
 0x2dd   :  { %1405 = vrot.lane.b32.xlu2 %v6886_v10, %s6054_s6  ;;  %1336 = vrot.lane.b32.xlu0 %v6837_v4, %s6052_s3 }
 0x2de   :  { %1342 = vrot.lane.b32.xlu1 %v6886_v10, %s6052_s3 }
 0x2e5   :  { %1321 = vrot.lane.b32.xlu2 %v6886_v10, %s6055_s24  ;;  %1280 = vrot.lane.b32.xlu0 %v6886_v10, %s6058_s29 }
 0x2e6   :  { %1294 = vrot.lane.b32.xlu1 %v6837_v4, %s6057_s28 }
 0x2ed   :  { %1300 = vrot.lane.b32.xlu2 %v6886_v10, %s6057_s28  ;;  %1467 = vperm.xlu0 %5646, %v1463_v58  }
 0x2f0   :  { %v6917_v60 = vpop.permute.xlu2 %1378 }
 0x2ff   :  { %v6919_v34 = vpop.permute.xlu2 %1382 }
 0x307   :  { %v1402_v52 = vpop.permute.xlu2 %1401 }
 0x308   :  { %v6921_v26 = vpop.permute.xlu1 %1399 }
 0x309   :  { %v6923_v25 = vpop.permute.xlu0 %1420  ;;  %v1409_v11 = vsel %vm970_vm3, %v6921_v26, %v1402_v52 }
 0x30a   :  { %v1416_v3 = vmul.f32 %v1412_v19, %v1409_v11 }
 0x30f   :  { %v6925_v55 = vpop.permute.xlu2 %1338 }
 0x310   :  { %v6927_v36 = vpop.permute.xlu1 %1357 }
 0x317   :  { %v1360_v6 = vpop.permute.xlu2 %1359  ;;  %v6929_v56 = vpop.permute.xlu0 %1361 }
 0x318   :  { %v6931_v48 = vpop.permute.xlu1 %1315  ;;  %v1367_v50 = vsel %vm886_vm5, %v6927_v36, %v1360_v6  ;;  %v1366_v51 = vsel %vm886_vm5, %v1360_v6, %v6929_v56 }
 0x31f   :  { %v6933_v59 = vpop.permute.xlu2 %1296  ;;  %v6935_v54 = vpop.permute.xlu0 %1340 }
 0x320   :  { %v1425_v2 = vpop.permute.xlu1 %1424 }
 0x327   :  { %v6937_v40 = vpop.permute.xlu2 %1426  ;;  %v6939_v12 = vpop.permute.xlu0 %1298 }
 0x328   :  { %v1428_v5 = vsel %vm1012_vm10, %v1425_v2, %v6937_v40  ;;  %v1404_v39 = vpop.permute.xlu1 %1403 }
 0x329   :  { %v1439_v41 = vmul.f32 %v1435_v44, %v1428_v5  ;;  %v1408_v15 = vsel %vm970_vm3, %v1402_v52, %v1404_v39  ;;  %v1372_v52 = vld [vmem:[#allocation6 + $0xb0] sm:$0xff]  ;;  %v1374_v44 = vmul.f32 %v1370_v57, %v1367_v50 }
 0x32a   :  { %v1417_v58 = vmul.f32 %v1413_v43, %v1408_v15  ;;  %v1328_v15 = vld [vmem:[#allocation6 + $0x40] sm:$0xff] }
 0x32b   :  { %v1459_v38 = vpack.c.bf16 %v1439_v41, %v1439_v41  ;;  %v1375_v41 = vmul.f32 %v1371_v37, %v1366_v51 }
 0x32d   :  { %v1492_v17 = vsel %vm10311_vm13, %v1459_v38, 0 }
 0x32e   :  { %1528 = vmatpush.bf16.msrb.mxu2 %v1492_v17 }
 0x32f   :  { %v1381_v29 = vpop.permute.xlu0 %1380  ;;  %v6947_v9 = vpop.permute.xlu2 %1274 }
 0x330   :  { %v6945_v53 = vpop.permute.xlu1 %1319  ;;  %v1387_v20 = vsel %vm928_vm4, %v1381_v29, %v6919_v34  ;;  %v1388_v61 = vsel %vm928_vm4, %v6917_v60, %v1381_v29 }
 0x331   :  { %v1395_v23 = vmul.f32 %v1391_v8, %v1388_v61  ;;  %v1396_v62 = vmul.f32 %v1392_v45, %v1387_v20  ;;  %v1449_v61 = vpack.c.bf16 %v1374_v44, %v6837_v4  ;;  %v1349_v4 = vld [vmem:[#allocation6 + $0x60] sm:$0xff] }
 0x333   :  { %v1453_v17 = vpack.c.bf16 %v1416_v3, %v1395_v23  ;;  %v1454_v29 = vpack.c.bf16 %v1417_v58, %v1396_v62  ;;  %v1309_v23 = vld [vmem:[#allocation6 + $0x30] sm:$0xff]  ;;  %v1303_v62 = vsel %vm10313_vm8, %v6933_v59, %v6939_v12  ;;  %v1286_v58 = vld [vmem:[#allocation6] sm:$0xff] }
 0x337   :  { %v1318_v22 = vpop.permute.xlu0 %1317  ;;  %v6964_v24 = vpop.permute.xlu2 %1405 }
 0x338   :  { %v6949_v30 = vpop.permute.xlu1 %1278  ;;  %v1407_v33 = vsel %vm970_vm3, %v1404_v39, %v6964_v24  ;;  %v1325_v45 = vsel %vm802_vm7, %v6931_v48, %v1318_v22 }
 0x339   :  { %v1418_v5 = vmul.f32 %v1414_v31, %v1407_v33 }
 0x33f   :  { %v6951_v16 = vpop.permute.xlu0 %1276  ;;  %v7001_v8 = vpop.permute.xlu2 %1321 }
 0x340   :  { %v1423_v0 = vpop.permute.xlu1 %1422 }
 0x341   :  { %v1429_v1 = vsel %vm1012_vm10, %v1423_v0, %v1425_v2  ;;  %v1430_v46 = vsel %vm1012_vm10, %v6923_v25, %v1423_v0 }
 0x342   :  { %v1437_v35 = vmul.f32 %v1433_v28, %v1430_v46  ;;  %v1438_v21 = vmul.f32 %v1434_v13, %v1429_v1  ;;  %v1330_v28 = vld [vmem:[#allocation6 + $0x50] sm:$0xff]  ;;  %v1324_v13 = vsel %vm802_vm7, %v1318_v22, %v6945_v53  ;;  %v1345_v46 = vsel %vm844_vm6, %v6925_v55, %v6935_v54 }
 0x343   :  { %v1351_v1 = vld [vmem:[#allocation6 + $0x70] sm:$0xff]  ;;  %v1334_v20 = vmul.f32 %v1330_v28, %v1324_v13  ;;  %v1283_v22 = vsel %vm10312_vm9, %v6951_v16, %v6949_v30 }
 0x344   :  { %v1457_v7 = vpack.c.bf16 %v1437_v35, %v1437_v35  ;;  %v1458_v14 = vpack.c.bf16 %v1438_v21, %v1438_v21  ;;  %v1450_v35 = vpack.c.bf16 %v1375_v41, %v6859_v42  ;;  %v1350_v21 = vld [vmem:[#allocation6 + $0x68] sm:$0xff]  ;;  %v1355_v19 = vmul.f32 %v1351_v1, %v1345_v46  ;;  %v1394_v46 = vld [vmem:[#allocation6 + $0xd8] sm:$0xff] }
 0x345   :  { %v1308_v41 = vld [vmem:[#allocation6 + $0x28] sm:$0xff] }
 0x346   :  { %v1486_v27 = vsel %vm10311_vm13, %v1457_v7, 0  ;;  %v1489_v47 = vsel %vm10311_vm13, %v1458_v14, 0  ;;  %v1326_v7 = vsel %vm802_vm7, %v7001_v8, %v6931_v48  ;;  %v1288_v14 = vld [vmem:[#allocation6 + $0x10] sm:$0xff]  ;;  %v1431_v48 = vsel %vm1012_vm10, %v6937_v40, %v6923_v25 }
 0x347   :  { %v6982_v18 = vpop.permute.xlu0 %1384  ;;  %1500 = vmatpush.bf16.msrb.mxu3 %v1486_v27  ;;  %1514 = vmatpush.bf16.msrb.mxu1 %v1489_v47  ;;  %v1447_v33 = vpack.c.bf16 %v1355_v19, %v1334_v20  ;;  %v1292_v37 = vmul.f32 %v1288_v14, %v1283_v22  ;;  %v1464_v47 = vld [vmem:[%s10297_s10 + $0x8] sm:$0xff]  ;;  %v1313_v25 = vmul.f32 %v1309_v23, %v1303_v62  ;;  %v1415_v20 = vld [vmem:[#allocation6 + $0xf8] sm:$0xff] }
 0x348   :  { %v1386_v2 = vsel %vm928_vm4, %v6919_v34, %v6982_v18  ;;  %v6988_v39 = vpop.permute.xlu1 %1363  ;;  %1472 = vperm.xlu1 %5647, %v1464_v47   ;;  %v1373_v19 = vld [vmem:[#allocation6 + $0xb8] sm:$0xff] }
 0x349   :  { %v1397_v6 = vmul.f32 %v1393_v63, %v1386_v2  ;;  %v1365_v38 = vsel %vm886_vm5, %v6929_v56, %v6988_v39  ;;  %v1329_v56 = vld [vmem:[#allocation6 + $0x48] sm:$0xff]  ;;  %v1332_v63 = vmul.f32 %v1328_v15, %v1326_v7  ;;  %v1443_v44 = vpack.c.bf16 %v1313_v25, %v1292_v37  ;;  %v1331_v7 = vld [vmem:[#allocation6 + $0x58] sm:$0xff] }
 0x34a   :  { %v1376_v0 = vmul.f32 %v1372_v52, %v1365_v38  ;;  %v1287_v52 = vld [vmem:[#allocation6 + $0x8] sm:$0xff]  ;;  %v1289_v22 = vld [vmem:[#allocation6 + $0x18] sm:$0xff] }
 0x34b   :  { %v1455_v34 = vpack.c.bf16 %v1418_v5, %v1397_v6  ;;  %1501 = vmatpush.bf16.msrb.mxu3 %v1453_v17  ;;  %1515 = vmatpush.bf16.msrb.mxu1 %v1454_v29  ;;  %v1284_v5 = vsel %vm10312_vm9, %v6947_v9, %v6951_v16  ;;  %v1307_v6 = vld [vmem:[#allocation6 + $0x20] sm:$0xff]  ;;  %v1301_v29 = vpop.permute.xlu2 %1300 }
 0x34c   :  { %v1451_v43 = vpack.c.bf16 %v1376_v0, %v6850_v32  ;;  %v1333_v32 = vmul.f32 %v1329_v56, %v1325_v45  ;;  %v5606_v17 = vld [vmem:[%s10296_s9] sm:$0xff]  ;;  %v1291_v1 = vmul.f32 %v1287_v52, %v1284_v5 }
 0x34d   :  { %1529 = vmatpush.bf16.msrb.mxu2 %v1455_v34 }
 0x34f   :  { %v1337_v11 = vpop.permute.xlu0 %1336  ;;  %1502 = vmatpush.bf16.msrb.mxu3 %v1449_v61  ;;  %1516 = vmatpush.bf16.msrb.mxu1 %v1450_v35 }
 0x350   :  { %v1346_v42 = vsel %vm844_vm6, %v1337_v11, %v6925_v55  ;;  %v1343_v57 = vpop.permute.xlu1 %1342  ;;  %v1436_v55 = vld [vmem:[#allocation6 + $0x118] sm:$0xff] }
 0x351   :  { %v1354_v50 = vmul.f32 %v1350_v21, %v1346_v42  ;;  %1530 = vmatpush.bf16.msrb.mxu2 %v1451_v43  ;;  %v1347_v31 = vsel %vm844_vm6, %v1343_v57, %v1337_v11  ;;  %v1440_v3 = vmul.f32 %v1436_v55, %v1431_v48  ;;  %v1368_v11 = vsel %vm886_vm5, %v6988_v39, %v6927_v36 }
 0x352   :  { %v1353_v51 = vmul.f32 %v1349_v4, %v1347_v31  ;;  %v1377_v43 = vmul.f32 %v1373_v19, %v1368_v11  ;;  %v1344_v15 = vsel %vm844_vm6, %v6935_v54, %v1343_v57  ;;  %v1323_v36 = vsel %vm802_vm7, %v6945_v53, %v7001_v8 }
 0x353   :  { %v1446_v27 = vpack.c.bf16 %v1354_v50, %v1333_v32  ;;  %v1460_v0 = vpack.c.bf16 %v1440_v3, %v1440_v3  ;;  %v1335_v42 = vmul.f32 %v1331_v7, %v1323_v36  ;;  %v1310_v32 = vld [vmem:[#allocation6 + $0x38] sm:$0xff]  ;;  %v1302_v54 = vsel %vm10313_vm8, %v6939_v12, %v1301_v29 }
 0x354   :  { %v1445_v40 = vpack.c.bf16 %v1353_v51, %v1332_v63  ;;  %v1452_v14 = vpack.c.bf16 %v1377_v43, %v6886_v10  ;;  %v1314_v48 = vmul.f32 %v1310_v32, %v1302_v54 }
 0x355   :  { %1517 = vmatpush.bf16.msrb.mxu1 %v1446_v27  ;;  %1531 = vmatpush.bf16.msrb.mxu2 %v1447_v33 }
 0x356   :  { %1503 = vmatpush.bf16.msrb.mxu3 %v1445_v40 }
 0x357   :  { %v1281_v2 = vpop.permute.xlu0 %1280 }
 0x358   :  { %v1285_v38 = vsel %vm10312_vm9, %v1281_v2, %v6947_v9  ;;  %v1295_v28 = vpop.permute.xlu1 %1294  ;;  %v1389_v9 = vsel %vm928_vm4, %v6982_v18, %v6917_v60  ;;  %v1495_v60 = vsel %vm10311_vm13, %v1460_v0, 0  ;;  %v1282_v4 = vsel %vm10312_vm9, %v6949_v30, %v1281_v2 }
 0x359   :  { %v1290_v13 = vmul.f32 %v1286_v58, %v1285_v38  ;;  %1532 = vmatpush.bf16.msrb.mxu2 %v1443_v44  ;;  %v1304_v16 = vsel %vm10313_vm8, %v1295_v28, %v6933_v59  ;;  %v1305_v34 = vsel %vm10313_vm8, %v1301_v29, %v1295_v28  ;;  %v1410_v59 = vsel %vm970_vm3, %v6964_v24, %v6921_v26  ;;  %v1352_v24 = vld [vmem:[#allocation6 + $0x78] sm:$0xff] }
 0x35a   :  { %v1311_v56 = vmul.f32 %v1307_v6, %v1305_v34  ;;  %v1312_v45 = vmul.f32 %v1308_v41, %v1304_v16  ;;  %v1398_v21 = vmul.f32 %v1394_v46, %v1389_v9  ;;  %v1419_v18 = vmul.f32 %v1415_v20, %v1410_v59 }
 0x35b   :  { %v1356_v39 = vmul.f32 %v1352_v24, %v1344_v15  ;;  %v1293_v57 = vmul.f32 %v1289_v22, %v1282_v4 }
 0x35c   :  { %5390 = vmatmul.msk.bf16.vlgmr.msrb.gmra.mxu2 %vm10310_vm14, %v5606_v17  ;;  %v1441_v61 = vpack.c.bf16 %v1311_v56, %v1290_v13  ;;  %v1442_v35 = vpack.c.bf16 %v1312_v45, %v1291_v1  ;;  %v1456_v26 = vpack.c.bf16 %v1419_v18, %v1398_v21 }
 0x35d   :  { %v1448_v50 = vpack.c.bf16 %v1356_v39, %v1335_v42  ;;  %v1444_v53 = vpack.c.bf16 %v1314_v48, %v1293_v57 }
 0x35e   :  { %1504 = vmatpush.bf16.msrb.mxu3 %v1441_v61  ;;  %1518 = vmatpush.bf16.msrb.mxu1 %v1442_v35 }
 0x35f   :  { %v1468_v10 = vpop.permute.xlu0 %1467 }
 0x361   :  { %5388 = vmatmul.msk.bf16.vlgmr.msrb.gmra.mxu3 %vm10310_vm14, %v5606_v17  ;;  %5389 = vmatmul.msk.bf16.vlgmr.msrb.gmra.mxu1 %vm10310_vm14, %v5606_v17 }
 0x362   :  { %1542 = vmatpush.bf16.msra.mxu3 %v1495_v60 }
 0x366   :  { %1543 = vmatpush.bf16.msra.mxu3 %v1456_v26 }
 0x36a   :  { %1544 = vmatpush.bf16.msra.mxu3 %v1452_v14 }
 0x36e   :  { %1545 = vmatpush.bf16.msra.mxu3 %v1448_v50 }
 0x372   :  { %1546 = vmatpush.bf16.msra.mxu3 %v1444_v53 }
 0x375   :  { %5391 = vmatmul.msk.bf16.vlgmr.msra.gmra.mxu3 %vm10310_vm14, %v5606_v17 }
 0x3ba   :  { %v7082_v33 = vpop.permute.xlu1 %1472 }
 0x3de   :  { %v1520_v8 = vpop.f32.mrf.mxu1 }
 0x3df   :  { %v1534_v23 = vpop.f32.mrf.mxu2  ;;  %v7079_v62 = vadd.f32 %v1520_v8, %v1468_v10 }
 0x3e0   :  { %v7084_v12 = vadd.f32 %v1534_v23, %v1468_v10 }
 0x3e1   :  { %v5393_v30 = vmul.f32 -1.442695, %v7079_v62 }
 0x3e2   :  { %v5394_v40 = vmul.f32 -1.442695, %v7084_v12 }
 0x3e3   :  { %5697 = vpow2.f32 %v5393_v30 }
 0x3e4   :  { %v1506_v31 = vpop.f32.mrf.mxu3 }
 0x3e5   :  { %v7086_v55 = vadd.f32 %v1506_v31, %v1468_v10 }
 0x3e6   :  { %v1522_v63 = vpop.f32.mrf.mxu1 }
 0x3e7   :  { %v1536_v37 = vpop.f32.mrf.mxu2  ;;  %v5392_v51 = vmul.f32 -1.442695, %v7086_v55  ;;  %v7090_v27 = vadd.f32 %v1522_v63, %v7082_v33 }
 0x3e8   :  { %v7093_v47 = vadd.f32 %v1536_v37, %v7082_v33 }
 0x3e9   :  { %v5698_v25 = vpop.eup %5697  ;;  %5699 = vpow2.f32 %v5392_v51  ;;  %v5397_v3 = vmul.f32 -1.442695, %v7090_v27 }
 0x3ea   :  { %v1578_v58 = vadd.f32 1.0, %v5698_v25  ;;  %v5398_v52 = vmul.f32 -1.442695, %v7093_v47 }
 0x3eb   :  { %5701 = vpow2.f32 %v5397_v3 }
 0x3ec   :  { %5703 = vrcp.f32 %v1578_v58  ;;  %v1508_v2 = vpop.f32.mrf.mxu3  ;;  %v1611_v1 = vand.u32 2147483648, %v1578_v58  ;;  %v1609_v56 = vand.u32 2147483647, %v1578_v58  ;;  %vm1605_vm1 = vweird.f32 %v1578_v58 }
 0x3ed   :  { %5705 = vpow2.f32 %v5394_v40  ;;  %v7099_v44 = vadd.f32 %v1508_v2, %v7082_v33 }
 0x3ee   :  { %5707 = vpow2.f32 %v5398_v52  ;;  %v1612_v19 = vor.u32 1.1754944e-38, %v1611_v1  ;;  %vm1610_vm11 = vcmp.eq.f32.partialorder %v1609_v56, 8.507059e+37 }
 0x3ef   :  { %v5700_v5 = vpop.eup %5699  ;;  %v5396_v41 = vmul.f32 -1.442695, %v7099_v44 }
 0x3f0   :  { %v1577_v6 = vadd.f32 1.0, %v5700_v5 }
 0x3f1   :  { %v5702_v38 = vpop.eup %5701 }
 0x3f2   :  { %v5704_v17 = vpop.eup %5703  ;;  %5709 = vrcp.f32 %v1577_v6  ;;  %v7102_v13 = vadd.f32 1.0, %v5702_v38  ;;  %v1596_v26 = vand.u32 2147483648, %v1577_v6  ;;  %v1594_v15 = vand.u32 2147483647, %v1577_v6 }
 0x3f3   :  { %v5706_v29 = vpop.eup %5705  ;;  %v1601_v28 = vmul.f32 %v5704_v17, %v1578_v58  ;;  %5711 = vpow2.f32 %v5396_v41  ;;  %vm1606_vm15 = vweird.f32 %v5704_v17 }
 0x3f4   :  { %5713 = vrcp.f32 %v7102_v13  ;;  %v5708_v34 = vpop.eup %5707  ;;  %v7105_v46 = vadd.f32 1.0, %v5706_v29  ;;  %vm1607_vm2 = vmor %vm1605_vm1, %vm1606_vm15  ;;  %vm1590_vm15 = vweird.f32 %v1577_v6  ;;  %v1597_v32 = vor.u32 1.1754944e-38, %v1596_v26 }
 0x3f5   :  { %v1602_v0 = vsub.f32 1.0, %v1601_v28  ;;  %v7109_v21 = vadd.f32 1.0, %v5708_v34  ;;  %v1669_v54 = vand.u32 2147483647, %v7102_v13  ;;  %v1671_v57 = vand.u32 2147483648, %v7102_v13 }
 0x3f6   :  { %5715 = vrcp.f32 %v7105_v46  ;;  %vm1665_vm14 = vweird.f32 %v7102_v13  ;;  %v1624_v1 = vand.u32 2147483647, %v7105_v46 }
 0x3f7   :  { %v1603_v9 = vmul.f32 %v5704_v17, %v1602_v0  ;;  %5717 = vrcp.f32 %v7109_v21 }
 0x3f8   :  { %v1548_v16 = vpop.f32.mrf.mxu3  ;;  %v5710_v45 = vpop.eup %5709 }
 0x3f9   :  { %v7107_v20 = vadd.f32 %v1548_v16, %v1468_v10  ;;  %v5712_v59 = vpop.eup %5711  ;;  %v1604_v61 = vadd.f32 %v5704_v17, %v1603_v9  ;;  %v1586_v35 = vmul.f32 %v5710_v45, %v1577_v6  ;;  %vm1591_vm12 = vweird.f32 %v5710_v45 }
 0x3fa   :  { %v7112_v11 = vadd.f32 1.0, %v5712_v59  ;;  %v5714_v60 = vpop.eup %5713  ;;  %vm1592_vm1 = vmor %vm1590_vm15, %vm1591_vm12  ;;  %vm1670_vm15 = vcmp.eq.f32.partialorder %v1669_v54, 8.507059e+37 }
 0x3fb   :  { %v1608_v18 = vsel %vm1607_vm2, %v5704_v17, %v1604_v61  ;;  %v1587_v43 = vsub.f32 1.0, %v1586_v35  ;;  %v1661_v7 = vmul.f32 %v5714_v60, %v7102_v13  ;;  %v5395_v36 = vmul.f32 -1.442695, %v7107_v20 }
 0x3fc   :  { %v1613_v24 = vsel %vm1610_vm11, %v1612_v19, %v1608_v18  ;;  %5719 = vrcp.f32 %v7112_v11  ;;  %v7127_v50 = vpop.eup %5715  ;;  %vm1666_vm2 = vweird.f32 %v5714_v60  ;;  %vm1595_vm11 = vcmp.eq.f32.partialorder %v1594_v15, 8.507059e+37 }
 0x3fd   :  { %v7117_v39 = vmul.f32 %v1613_v24, %v7079_v62  ;;  %v1588_v14 = vmul.f32 %v5710_v45, %v1587_v43  ;;  %v1662_v4 = vsub.f32 1.0, %v1661_v7  ;;  %5721 = vpow2.f32 %v5395_v36  ;;  %v7136_v30 = vpop.eup %5717  ;;  %vm1667_vm12 = vmor %vm1665_vm14, %vm1666_vm2 }
 0x3fe   :  { %v1616_v31 = vmul.f32 %v7127_v50, %v7105_v46  ;;  %vm1650_vm14 = vweird.f32 %v7112_v11  ;;  %v1654_v17 = vand.u32 2147483647, %v7112_v11  ;;  %v1684_v43 = vand.u32 2147483647, %v7109_v21 }
 0x3ff   :  { %v1589_v42 = vadd.f32 %v5710_v45, %v1588_v14  ;;  %1845 = vrot.lane.b32.xlu1 %v7117_v39, %s6052_s3  ;;  %1925 = vrot.lane.b32.xlu0 %v7117_v39, %s6053_s5  ;;  %v1663_v48 = vmul.f32 %v5714_v60, %v1662_v4  ;;  %v1686_v7 = vand.u32 2147483648, %v7109_v21 }
 0x400   :  { %v1550_v22 = vpop.f32.mrf.mxu3  ;;  %1965 = vrot.lane.b32.xlu2 %v7117_v39, %s6054_s6  ;;  %v1617_v2 = vsub.f32 1.0, %v1616_v31  ;;  %vm7218_vm8 = vcmp.eq.f32.partialorder %v1684_v43, 8.507059e+37 }
 0x401   :  { %v7130_v53 = vadd.f32 %v1550_v22, %v7082_v33  ;;  %v1593_v10 = vsel %vm1592_vm1, %v5710_v45, %v1589_v42  ;;  %v1664_v23 = vadd.f32 %v5714_v60, %v1663_v48  ;;  %v1672_v33 = vor.u32 1.1754944e-38, %v1671_v57 }
 0x402   :  { %v1598_v8 = vsel %vm1595_vm11, %v1597_v32, %v1593_v10  ;;  %v5720_v37 = vpop.eup %5719  ;;  %v1618_v28 = vmul.f32 %v7127_v50, %v1617_v2  ;;  %vm1655_vm11 = vcmp.eq.f32.partialorder %v1654_v17, 8.507059e+37 }
 0x403   :  { %v5399_v62 = vmul.f32 -1.442695, %v7130_v53  ;;  %v7141_v63 = vmul.f32 %v1598_v8, %v7086_v55  ;;  %v1668_v51 = vsel %vm1667_vm12, %v5714_v60, %v1664_v23  ;;  %v1646_v40 = vmul.f32 %v5720_v37, %v7112_v11  ;;  %v5722_v3 = vpop.eup %5721 }
 0x404   :  { %v1673_v25 = vsel %vm1670_vm15, %v1672_v33, %v1668_v51  ;;  %v1676_v55 = vmul.f32 %v7136_v30, %v7109_v21  ;;  %v7151_v6 = vadd.f32 1.0, %v5722_v3  ;;  %vm1651_vm1 = vweird.f32 %v5720_v37 }
 0x405   :  { %5723 = vpow2.f32 %v5399_v62  ;;  %v7145_v58 = vmul.f32 %v1673_v25, %v7090_v27  ;;  %v1713_v52 = vpack.c.bf16 %v7117_v39, %v7141_v63  ;;  %v1647_v5 = vsub.f32 1.0, %v1646_v40  ;;  %vm1652_vm2 = vmor %vm1650_vm14, %vm1651_vm1 }
 0x406   :  { %v1656_v27 = vand.u32 2147483648, %v7112_v11  ;;  %5725 = vrcp.f32 %v7151_v6  ;;  %v1677_v13 = vsub.f32 1.0, %v1676_v55  ;;  %v1619_v59 = vadd.f32 %v7127_v50, %v1618_v28 }
 0x407   :  { %1765 = vrot.lane.b32.xlu1 %v7117_v39, %s6057_s28  ;;  %1885 = vrot.lane.b32.xlu0 %v7117_v39, %s6056_s25  ;;  %1717 = vst [vmem:[#allocation2 + $0x20] sm:$0xff] %v1713_v52  ;;  %v1648_v38 = vmul.f32 %v5720_v37, %v1647_v5  ;;  %vm1621_vm12 = vweird.f32 %v7127_v50  ;;  %vm1620_vm15 = vweird.f32 %v7105_v46  ;;  %vm7184_vm14 = vcmp.eq.f32.partialorder %v1624_v1, 8.507059e+37 }
 0x408   :  { %1805 = vrot.lane.b32.xlu2 %v7117_v39, %s6055_s24  ;;  %v1657_v34 = vor.u32 1.1754944e-38, %v1656_v27  ;;  %v1678_v61 = vmul.f32 %v7136_v30, %v1677_v13  ;;  %vm7191_vm1 = vmor %vm1620_vm15, %vm1621_vm12  ;;  %v1641_v36 = vand.u32 2147483648, %v7151_v6  ;;  %v1639_v22 = vand.u32 2147483647, %v7151_v6 }
 0x409   :  { %v1649_v0 = vadd.f32 %v5720_v37, %v1648_v38  ;;  %v1623_v15 = vsel %vm7191_vm1, %v7127_v50, %v1619_v59  ;;  %vm1635_vm1 = vweird.f32 %v7151_v6  ;;  %v1687_v8 = vor.u32 1.1754944e-38, %v1686_v7 }
 0x40a   :  { %v1642_v23 = vor.u32 1.1754944e-38, %v1641_v36 }
 0x40b   :  { %v5724_v29 = vpop.eup %5723  ;;  %v1653_v9 = vsel %vm1652_vm2, %v5720_v37, %v1649_v0  ;;  %vm1680_vm2 = vweird.f32 %v7109_v21 }
 0x40c   :  { %v7166_v16 = vadd.f32 1.0, %v5724_v29  ;;  %v1658_v56 = vsel %vm1655_vm11, %v1657_v34, %v1653_v9  ;;  %v5726_v45 = vpop.eup %5725  ;;  %vm1681_vm11 = vweird.f32 %v7136_v30 }
 0x40d   :  { %v7174_v35 = vmul.f32 %v1658_v56, %v7099_v44  ;;  %v1631_v19 = vmul.f32 %v5726_v45, %v7151_v6  ;;  %v1626_v44 = vand.u32 2147483648, %v7105_v46  ;;  %v1679_v46 = vadd.f32 %v7136_v30, %v1678_v61  ;;  %vm7208_vm15 = vmor %vm1680_vm2, %vm1681_vm11 }
 0x40e   :  { %5727 = vrcp.f32 %v7166_v16  ;;  %vm1636_vm12 = vweird.f32 %v5726_v45  ;;  %vm1695_vm13 = vweird.f32 %v7166_v16  ;;  %v1701_v54 = vand.u32 2147483648, %v7166_v16 }
 0x40f   :  { %1725 = vrot.lane.b32.xlu0 %v7117_v39, %s6058_s29  ;;  %1961 = vrot.lane.b32.xlu1 %v7141_v63, %s6054_s6  ;;  %v1715_v60 = vpack.c.bf16 %v7145_v58, %v7174_v35  ;;  %v1632_v26 = vsub.f32 1.0, %v1631_v19  ;;  %v1627_v42 = vor.u32 1.1754944e-38, %v1626_v44  ;;  %v1699_v48 = vand.u32 2147483647, %v7166_v16  ;;  %vm1637_vm2 = vmor %vm1635_vm1, %vm1636_vm12 }
 0x410   :  { %1841 = vrot.lane.b32.xlu2 %v7141_v63, %s6052_s3  ;;  %v1683_v62 = vsel %vm7208_vm15, %v7136_v30, %v1679_v46  ;;  %v1702_v51 = vor.u32 1.1754944e-38, %v1701_v54  ;;  %v1989_v46 = vld [vmem:[#allocation3 + $0x1e0] sm:$0xff] }
 0x411   :  { %1719 = vst [vmem:[#allocation2 + $0x30] sm:$0xff] %v1715_v60  ;;  %v1633_v14 = vmul.f32 %v5726_v45, %v1632_v26  ;;  %v1628_v10 = vsel %vm7184_vm14, %v1627_v42, %v1623_v15  ;;  %vm1640_vm14 = vcmp.eq.f32.partialorder %v1639_v22, 8.507059e+37  ;;  %vm1700_vm12 = vcmp.eq.f32.partialorder %v1699_v48, 8.507059e+37  ;;  %v5401_v26 = vld [vmem:[%s10295_s8 + $0x8] sm:$0xff] }
 0x412   :  { %v7236_v25 = vmul.f32 %v1628_v10, %v7084_v12  ;;  %v1688_v30 = vsel %vm7218_vm8, %v1687_v8, %v1683_v62  ;;  %vm10386_vm8 = vcmp.lt.s32.totalorder %v6509_v49, 16 }
 0x413   :  { %v1634_v57 = vadd.f32 %v5726_v45, %v1633_v14  ;;  %v7246_v5 = vmul.f32 %v1688_v30, %v7093_v47  ;;  %v1949_v14 = vld [vmem:[#allocation3 + $0x1a0] sm:$0xff]  ;;  %vm10390_vm1 = vmmov %vm10386_vm8 }
 0x414   :  { %v5728_v24 = vpop.eup %5727 }
 0x415   :  { %v1691_v4 = vmul.f32 %v5728_v24, %v7166_v16  ;;  %vm1696_vm9 = vweird.f32 %v5728_v24  ;;  %v1638_v31 = vsel %vm1637_vm2, %v5726_v45, %v1634_v57  ;;  %v1945_v57 = vld [vmem:[#allocation3 + $0x180] sm:$0xff] }
 0x416   :  { %v1643_v37 = vsel %vm1640_vm14, %v1642_v23, %v1638_v31  ;;  %vm1697_vm11 = vmor %vm1695_vm13, %vm1696_vm9  ;;  %vm10388_vm13 = vcmp.lt.s32.totalorder %v6509_v49, 17 }
 0x417   :  { %v1692_v50 = vsub.f32 1.0, %v1691_v4  ;;  %2005 = vrot.lane.b32.xlu0 %v7117_v39, %s6059_s1  ;;  %1921 = vrot.lane.b32.xlu1 %v7141_v63, %s6053_s5  ;;  %v7239_v40 = vmul.f32 %v1643_v37, %v7107_v20  ;;  %vm10387_vm9 = vmmov %vm10386_vm8 }
 0x418   :  { %1761 = vrot.lane.b32.xlu2 %v7141_v63, %s6057_s28  ;;  %vm10389_vm15 = vmmov %vm10388_vm13 }
 0x419   :  { %v1693_v33 = vmul.f32 %v5728_v24, %v1692_v50  ;;  %10380 = vst [vmem:[#allocation41_spill] sm:$0xff] %v7239_v40  ;;  %v1714_v2 = vpack.c.bf16 %v7239_v40, %v7236_v25  ;;  %vm10391_vm2 = vmmov %vm10388_vm13 }
 0x41a   :  { %vm10392_vm14 = vmmov %vm10390_vm1 }
 0x41b   :  { %v1694_v3 = vadd.f32 %v5728_v24, %v1693_v33  ;;  %1718 = vst [vmem:[#allocation2 + $0x28] sm:$0xff] %v1714_v2  ;;  %v1905_v33 = vld [vmem:[#allocation3 + $0x140] sm:$0xff] }
 0x41d   :  { %v1698_v52 = vsel %vm1697_vm11, %v5728_v24, %v1694_v3  ;;  %v1985_v24 = vld [vmem:[#allocation3 + $0x1c0] sm:$0xff]  ;;  %vm10393_vm11 = vmmov %vm10391_vm2 }
 0x41e   :  { %v1703_v55 = vsel %vm1700_vm12, %v1702_v51, %v1698_v52  ;;  %v1909_v51 = vld [vmem:[#allocation3 + $0x160] sm:$0xff]  ;;  %vm10394_vm12 = vmmov %vm10390_vm1 }
 0x41f   :  { %v7249_v6 = vmul.f32 %v1703_v55, %v7130_v53  ;;  %1881 = vrot.lane.b32.xlu0 %v7141_v63, %s6056_s25  ;;  %1721 = vrot.lane.b32.xlu1 %v7141_v63, %s6058_s29 }
 0x420   :  { %1847 = vrot.lane.b32.xlu2 %v7145_v58, %s6052_s3 }
 0x421   :  { %10381 = vst [vmem:[#allocation38_spill] sm:$0xff] %v7249_v6  ;;  %v1716_v12 = vpack.c.bf16 %v7249_v6, %v7246_v5 }
 0x423   :  { %1720 = vst [vmem:[#allocation2 + $0x38] sm:$0xff] %v1716_v12 }
 0x427   :  { %1801 = vrot.lane.b32.xlu0 %v7141_v63, %s6055_s24  ;;  %1927 = vrot.lane.b32.xlu1 %v7145_v58, %s6053_s5 }
 0x428   :  { %1767 = vrot.lane.b32.xlu2 %v7145_v58, %s6057_s28 }
 0x42f   :  { %2001 = vrot.lane.b32.xlu0 %v7141_v63, %s6059_s1  ;;  %1887 = vrot.lane.b32.xlu1 %v7145_v58, %s6056_s25 }
 0x430   :  { %1963 = vrot.lane.b32.xlu2 %v7174_v35, %s6054_s6 }
 0x437   :  { %1967 = vrot.lane.b32.xlu0 %v7145_v58, %s6054_s6  ;;  %1727 = vrot.lane.b32.xlu1 %v7145_v58, %s6058_s29 }
 0x438   :  { %1923 = vrot.lane.b32.xlu2 %v7174_v35, %s6053_s5 }
 0x43f   :  { %1807 = vrot.lane.b32.xlu0 %v7145_v58, %s6055_s24  ;;  %2007 = vrot.lane.b32.xlu1 %v7145_v58, %s6059_s1 }
 0x440   :  { %1723 = vrot.lane.b32.xlu2 %v7174_v35, %s6058_s29 }
 0x447   :  { %1843 = vrot.lane.b32.xlu0 %v7174_v35, %s6052_s3  ;;  %1883 = vrot.lane.b32.xlu1 %v7174_v35, %s6056_s25 }
 0x448   :  { %1929 = vrot.lane.b32.xlu2 %v7236_v25, %s6053_s5 }
 0x44f   :  { %1763 = vrot.lane.b32.xlu0 %v7174_v35, %s6057_s28  ;;  %1803 = vrot.lane.b32.xlu1 %v7174_v35, %s6055_s24 }
 0x450   :  { %1889 = vrot.lane.b32.xlu2 %v7236_v25, %s6056_s25 }
 0x457   :  { %1973 = vrot.lane.b32.xlu0 %v7239_v40, %s6054_s6  ;;  %2003 = vrot.lane.b32.xlu1 %v7174_v35, %s6059_s1 }
 0x458   :  { %2009 = vrot.lane.b32.xlu2 %v7236_v25, %s6059_s1 }
 0x45a   :  { %v7301_v47 = vpop.permute.xlu2 %1965 }
 0x45f   :  { %1813 = vrot.lane.b32.xlu0 %v7239_v40, %s6055_s24  ;;  %1969 = vrot.lane.b32.xlu1 %v7236_v25, %s6054_s6 }
 0x460   :  { %1849 = vrot.lane.b32.xlu2 %v7236_v25, %s6052_s3 }
 0x462   :  { %v7309_v20 = vpop.permute.xlu2 %1805 }
 0x467   :  { %1931 = vrot.lane.b32.xlu0 %v7246_v5, %s6053_s5  ;;  %1853 = vrot.lane.b32.xlu1 %v7239_v40, %s6052_s3 }
 0x468   :  { %1933 = vrot.lane.b32.xlu2 %v7239_v40, %s6053_s5 }
 0x46a   :  { %v7317_v53 = vpop.permute.xlu2 %1841 }
 0x46f   :  { %1891 = vrot.lane.b32.xlu0 %v7246_v5, %s6056_s25  ;;  %1893 = vrot.lane.b32.xlu1 %v7239_v40, %s6056_s25 }
 0x470   :  { %1773 = vrot.lane.b32.xlu2 %v7239_v40, %s6057_s28 }
 0x471   :  { %v7325_v27 = vpop.permute.xlu1 %1845  ;;  %v7327_v38 = vpop.permute.xlu0 %1925 }
 0x472   :  { %v7329_v17 = vpop.permute.xlu2 %1761 }
 0x477   :  { %2011 = vrot.lane.b32.xlu0 %v7246_v5, %s6059_s1  ;;  %1733 = vrot.lane.b32.xlu1 %v7239_v40, %s6058_s29 }
 0x478   :  { %1971 = vrot.lane.b32.xlu2 %v7246_v5, %s6054_s6 }
 0x479   :  { %v7337_v29 = vpop.permute.xlu1 %1765  ;;  %v7339_v28 = vpop.permute.xlu0 %1885 }
 0x47a   :  { %v7341_v13 = vpop.permute.xlu2 %1847 }
 0x47f   :  { %1851 = vrot.lane.b32.xlu0 %v7246_v5, %s6052_s3  ;;  %1975 = vrot.lane.b32.xlu1 %v7249_v6, %s6054_s6 }
 0x480   :  { %1855 = vrot.lane.b32.xlu2 %v7249_v6, %s6052_s3 }
 0x481   :  { %v7349_v0 = vpop.permute.xlu0 %1725  ;;  %v7351_v16 = vpop.permute.xlu1 %1961 }
 0x482   :  { %v7353_v34 = vpop.permute.xlu2 %1767  ;;  %v1981_v15 = vsel %vm970_vm3, %v7351_v16, %v7301_v47 }
 0x483   :  { %v1993_v32 = vmul.f32 %v1985_v24, %v1981_v15 }
 0x487   :  { %1935 = vrot.lane.b32.xlu0 %v7249_v6, %s6053_s5  ;;  %1815 = vrot.lane.b32.xlu1 %v7249_v6, %s6055_s24 }
 0x488   :  { %1811 = vrot.lane.b32.xlu2 %v7246_v5, %s6055_s24 }
 0x489   :  { %v7361_v1 = vpop.permute.xlu0 %2005  ;;  %v7363_v9 = vpop.permute.xlu1 %1921 }
 0x48a   :  { %v7365_v56 = vpop.permute.xlu2 %1963  ;;  %v1941_v50 = vsel %vm928_vm4, %v7363_v9, %v7327_v38 }
 0x48b   :  { %v1953_v21 = vmul.f32 %v1945_v57, %v1941_v50 }
 0x48f   :  { %1775 = vrot.lane.b32.xlu0 %v7249_v6, %s6057_s28  ;;  %1809 = vrot.lane.b32.xlu1 %v7236_v25, %s6055_s24 }
 0x490   :  { %1895 = vrot.lane.b32.xlu2 %v7249_v6, %s6056_s25 }
 0x491   :  { %v7373_v45 = vpop.permute.xlu0 %1881  ;;  %v7375_v59 = vpop.permute.xlu1 %1721 }
 0x492   :  { %v7377_v61 = vpop.permute.xlu2 %1923  ;;  %v1901_v37 = vsel %vm886_vm5, %v7373_v45, %v7339_v28 }
 0x493   :  { %v1913_v55 = vmul.f32 %v1905_v33, %v1901_v37 }
 0x497   :  { %1769 = vrot.lane.b32.xlu0 %v7236_v25, %s6057_s28  ;;  %1771 = vrot.lane.b32.xlu1 %v7246_v5, %s6057_s28 }
 0x498   :  { %1735 = vrot.lane.b32.xlu2 %v7249_v6, %s6058_s29 }
 0x499   :  { %v7385_v19 = vpop.permute.xlu0 %1801  ;;  %v7387_v11 = vpop.permute.xlu1 %1927 }
 0x49a   :  { %v7389_v44 = vpop.permute.xlu2 %1723  ;;  %v1942_v22 = vsel %vm928_vm4, %v7377_v61, %v7387_v11 }
 0x49b   :  { %v1957_v48 = vmul.f32 %v1949_v14, %v1942_v22  ;;  %v2025_v22 = vld [vmem:[#allocation3 + $0x200] sm:$0xff] }
 0x49d   :  { %v2065_v62 = vpack.c.bf16 %v1957_v48, %v1953_v21  ;;  %v1986_v21 = vld [vmem:[#allocation3 + $0x1c8] sm:$0xff] }
 0x49f   :  { %2015 = vrot.lane.b32.xlu0 %v7249_v6, %s6059_s1  ;;  %1729 = vrot.lane.b32.xlu1 %v7236_v25, %s6058_s29  ;;  %v1906_v6 = vld [vmem:[#allocation3 + $0x148] sm:$0xff] }
 0x4a0   :  { %2013 = vrot.lane.b32.xlu2 %v7239_v40, %s6059_s1 }
 0x4a1   :  { %v7397_v60 = vpop.permute.xlu0 %2001  ;;  %v7399_v18 = vpop.permute.xlu1 %1887 }
 0x4a2   :  { %v7401_v43 = vpop.permute.xlu2 %1929 }
 0x4a7   :  { %2083 = vperm.xlu0 %5646, %v5401_v26  }
 0x4a8   :  { %1731 = vrot.lane.b32.xlu2 %v7246_v5, %s6058_s29 }
 0x4a9   :  { %v1968_v7 = vpop.permute.xlu0 %1967  ;;  %v7412_v36 = vpop.permute.xlu1 %1727 }
 0x4aa   :  { %v7418_v4 = vpop.permute.xlu2 %1889  ;;  %v1982_v42 = vsel %vm970_vm3, %v7365_v56, %v1968_v7 }
 0x4ab   :  { %v1997_v54 = vmul.f32 %v1989_v46, %v1982_v42  ;;  %v2057_v46 = vpack.c.bf16 %v7174_v35, %v7141_v63  ;;  %v2021_v42 = vsel %vm1012_vm10, %v7397_v60, %v7361_v1 }
 0x4ac   :  { %v2033_v35 = vmul.f32 %v2025_v22, %v2021_v42  ;;  %v1946_v22 = vld [vmem:[#allocation3 + $0x188] sm:$0xff]  ;;  %v1939_v42 = vsel %vm928_vm4, %v7327_v38, %v7401_v43 }
 0x4ad   :  { %v2069_v10 = vpack.c.bf16 %v1997_v54, %v1993_v32  ;;  %v2029_v32 = vld [vmem:[#allocation3 + $0x220] sm:$0xff] }
 0x4af   :  { %2095 = vmatpush.bf16.msrb.mxu0 %v2069_v10 }
 0x4b1   :  { %v7427_v8 = vpop.permute.xlu0 %1807  ;;  %v7429_v23 = vpop.permute.xlu1 %2007 }
 0x4b2   :  { %v7431_v31 = vpop.permute.xlu2 %2009 }
 0x4b3   :  { %2096 = vmatpush.bf16.msrb.mxu0 %v2065_v62  ;;  %v1990_v62 = vld [vmem:[#allocation3 + $0x1e8] sm:$0xff] }
 0x4b9   :  { %v7437_v3 = vpop.permute.xlu0 %1843  ;;  %v7439_v30 = vpop.permute.xlu1 %1883 }
 0x4ba   :  { %v7441_v52 = vpop.permute.xlu2 %1849  ;;  %v1902_v2 = vsel %vm886_vm5, %v7439_v30, %v7399_v18 }
 0x4bb   :  { %v1917_v12 = vmul.f32 %v1909_v51, %v1902_v2 }
 0x4bd   :  { %v2061_v26 = vpack.c.bf16 %v1917_v12, %v1913_v55 }
 0x4bf   :  { %2097 = vmatpush.bf16.msrb.mxu0 %v2061_v26 }
 0x4c1   :  { %v7447_v24 = vpop.permute.xlu0 %1763  ;;  %v7449_v15 = vpop.permute.xlu1 %1803 }
 0x4c2   :  { %v7453_v14 = vpop.permute.xlu2 %1933 }
 0x4c3   :  { %2098 = vmatpush.bf16.msrb.mxu0 %v2057_v46 }
 0x4c9   :  { %v7459_v54 = vpop.permute.xlu0 %1973  ;;  %v7461_v57 = vpop.permute.xlu1 %2003 }
 0x4ca   :  { %10382 = vst [vmem:[#allocation42_spill] sm:$0xff] %v7461_v57  ;;  %v7463_v50 = vpop.permute.xlu2 %1773  ;;  %v2022_v63 = vsel %vm1012_vm10, %v7461_v57, %v7429_v23 }
 0x4cb   :  { %v2037_v48 = vmul.f32 %v2029_v32, %v2022_v63  ;;  %v1950_v32 = vld [vmem:[#allocation3 + $0x1a8] sm:$0xff]  ;;  %v1865_v63 = vld [vmem:[#allocation3 + $0xc0] sm:$0xff] }
 0x4cd   :  { %v2073_v10 = vpack.c.bf16 %v2037_v48, %v2033_v35  ;;  %v1869_v35 = vld [vmem:[#allocation3 + $0xe0] sm:$0xff] }
 0x4cf   :  { %2115 = vmatpush.bf16.msra.mxu1 %v2073_v10 }
 0x4d1   :  { %v7469_v33 = vpop.permute.xlu0 %1813  ;;  %v7471_v37 = vpop.permute.xlu1 %1969 }
 0x4d2   :  { %v7473_v51 = vpop.permute.xlu2 %1971  ;;  %v1979_v2 = vsel %vm970_vm3, %v7301_v47, %v7471_v37 }
 0x4d3   :  { %v1980_v55 = vsel %vm970_vm3, %v1968_v7, %v7473_v51  ;;  %v1994_v12 = vmul.f32 %v1986_v21, %v1979_v2  ;;  %v1954_v21 = vmul.f32 %v1946_v22, %v1939_v42  ;;  %v1899_v22 = vsel %vm886_vm5, %v7339_v28, %v7418_v4  ;;  %v1910_v42 = vld [vmem:[#allocation3 + $0x168] sm:$0xff] }
 0x4d4   :  { %v1998_v26 = vmul.f32 %v1990_v62, %v1980_v55 }
 0x4d6   :  { %v2070_v46 = vpack.c.bf16 %v1998_v26, %v1994_v12 }
 0x4d8   :  { %2121 = vmatpush.bf16.msra.mxu2 %v2070_v46  ;;  %v7507_v46 = vld [vmem:[%s10294_s7 + $0x8] sm:$0xff] }
 0x4d9   :  { %v7486_v48 = vpop.permute.xlu0 %1931  ;;  %v7488_v47 = vpop.permute.xlu1 %1853  ;;  %v2088_v41 = vunpack.c.h.b16 %v7507_v46 }
 0x4da   :  { %10383 = vst [vmem:[#allocation40_spill] sm:$0xff] %v7488_v47  ;;  %v7490_v10 = vpop.permute.xlu2 %1855  ;;  %v1940_v7 = vsel %vm928_vm4, %v7387_v11, %v7486_v48  ;;  %v1863_v38 = vsel %vm844_vm6, %v7488_v47, %v7317_v53 }
 0x4db   :  { %10384 = vst [vmem:[#allocation39_spill] sm:$0xff] %v7490_v10  ;;  %v1864_v62 = vsel %vm844_vm6, %v7490_v10, %v7437_v3  ;;  %v1958_v2 = vmul.f32 %v1950_v32, %v1940_v7  ;;  %v1873_v55 = vmul.f32 %v1865_v63, %v1863_v38  ;;  %v7514_v32 = vpack.c.b16 %v2088_v41, %v2088_v41  ;;  %v1790_v10 = vld [vmem:[#allocation3 + $0x68] sm:$0xff] }
 0x4dc   :  { %v1877_v12 = vmul.f32 %v1869_v35, %v1864_v62  ;;  %v1914_v38 = vmul.f32 %v1906_v6, %v1899_v22  ;;  %v1862_v41 = vsel %vm844_vm6, %v7437_v3, %v7341_v13  ;;  %v2019_v6 = vsel %vm1012_vm10, %v7361_v1, %v7431_v31  ;;  %v1830_v3 = vld [vmem:[#allocation3 + $0xa8] sm:$0xff] }
 0x4dd   :  { %v2066_v26 = vpack.c.bf16 %v1958_v2, %v1954_v21  ;;  %5402 = vmatmul.msk.bf16.vlgmr.msra.gmra.mxu1 %vm134_vm0, %v7514_v32  ;;  %v1870_v2 = vld [vmem:[#allocation3 + $0xe8] sm:$0xff] }
 0x4de   :  { %v2053_v11 = vpack.c.bf16 %v1877_v12, %v1873_v55  ;;  %v1866_v55 = vld [vmem:[#allocation3 + $0xc8] sm:$0xff] }
 0x4df   :  { %2122 = vmatpush.bf16.msra.mxu2 %v2066_v26  ;;  %v2026_v12 = vld [vmem:[#allocation3 + $0x208] sm:$0xff] }
 0x4e0   :  { %2099 = vmatpush.bf16.msrb.mxu0 %v2053_v11  ;;  %v2030_v26 = vld [vmem:[#allocation3 + $0x228] sm:$0xff]  ;;  %v1878_v11 = vmul.f32 %v1870_v2, %v1862_v41  ;;  %v1821_v41 = vsel %vm802_vm7, %v7385_v19, %v7309_v20 }
 0x4e1   :  { %v7516_v63 = vpop.permute.xlu0 %1891  ;;  %v7518_v35 = vpop.permute.xlu1 %1893  ;;  %v1826_v2 = vld [vmem:[#allocation3 + $0x88] sm:$0xff] }
 0x4e2   :  { %v1900_v7 = vsel %vm886_vm5, %v7399_v18, %v7516_v63  ;;  %v7526_v62 = vpop.permute.xlu2 %1811  ;;  %v1861_v18 = vsel %vm844_vm6, %v7317_v53, %v7325_v27 }
 0x4e3   :  { %v1918_v21 = vmul.f32 %v1910_v42, %v1900_v7  ;;  %v1822_v7 = vsel %vm802_vm7, %v7449_v15, %v7427_v8 }
 0x4e4   :  { %v1838_v40 = vmul.f32 %v1830_v3, %v1822_v7 }
 0x4e5   :  { %v2062_v28 = vpack.c.bf16 %v1918_v21, %v1914_v38  ;;  %v1874_v38 = vmul.f32 %v1866_v55, %v1861_v18  ;;  %v2034_v21 = vmul.f32 %v2026_v12, %v2019_v6  ;;  %v1834_v18 = vmul.f32 %v1826_v2, %v1821_v41  ;;  %v1987_v12 = vld [vmem:[#allocation3 + $0x1d0] sm:$0xff] }
 0x4e6   :  { %v1977_v6 = vsel %vm970_vm3, %v7471_v37, %v7459_v54 }
 0x4e7   :  { %2123 = vmatpush.bf16.msra.mxu2 %v2062_v28  ;;  %v10385_v28 = vpack.c.bf16 %v7145_v58, %v7117_v39  ;;  %v2054_v57 = vpack.c.bf16 %v1878_v11, %v1874_v38  ;;  %v1786_v39 = vld [vmem:[#allocation3 + $0x48] sm:$0xff]  ;;  %v1781_v58 = vsel %vm10387_vm9, %v7329_v17, %v7337_v29  ;;  %vm10396_vm9 = vmmov %vm10391_vm2 }
 0x4e8   :  { %v1794_v37 = vmul.f32 %v1786_v39, %v1781_v58  ;;  %v1937_v39 = vsel %vm928_vm4, %v7401_v43, %v7453_v14 }
 0x4e9   :  { %v7540_v22 = vpop.permute.xlu0 %2011  ;;  %v7542_v42 = vpop.permute.xlu1 %1733 }
 0x4ea   :  { %v2020_v53 = vsel %vm1012_vm10, %v7429_v23, %v7540_v22  ;;  %v1782_v23 = vsel %vm10386_vm8, %v7447_v24, %v7353_v34  ;;  %v7563_v55 = vpop.permute.xlu2 %1895  ;;  %vm10395_vm8 = vmmov %vm10390_vm1 }
 0x4eb   :  { %v2038_v1 = vmul.f32 %v2030_v26, %v2020_v53  ;;  %2124 = vmatpush.bf16.msra.mxu2 %v10385_v28  ;;  %v1991_v26 = vld [vmem:[#allocation3 + $0x1f0] sm:$0xff]  ;;  %v1798_v11 = vmul.f32 %v1790_v10, %v1782_v23  ;;  %v2050_v53 = vpack.c.bf16 %v1838_v40, %v1834_v18  ;;  %v1741_v40 = vsel %vm10389_vm15, %v7375_v59, %v7349_v0  ;;  %vm10403_vm15 = vmmov %vm10390_vm1 }
 0x4ec   :  { %v2087_v23 = vunpack.c.l.b16 %v7507_v46  ;;  %v1829_v46 = vld [vmem:[#allocation3 + $0xa0] sm:$0xff]  ;;  %v1898_v43 = vsel %vm886_vm5, %v7516_v63, %v7563_v55  ;;  %v1897_v63 = vsel %vm886_vm5, %v7418_v4, %v7518_v35 }
 0x4ed   :  { %v2074_v47 = vpack.c.bf16 %v2038_v1, %v2034_v21  ;;  %v1995_v21 = vmul.f32 %v1987_v12, %v1977_v6  ;;  %v1746_v1 = vld [vmem:[#allocation3 + $0x8] sm:$0xff]  ;;  %v2046_v41 = vpack.c.bf16 %v1798_v11, %v1794_v37  ;;  %v1951_v12 = vld [vmem:[#allocation3 + $0x1b0] sm:$0xff]  ;;  %v1825_v6 = vld [vmem:[#allocation3 + $0x80] sm:$0xff] }
 0x4ee   :  { %v1754_v18 = vmul.f32 %v1746_v1, %v1741_v40  ;;  %v7612_v37 = vpack.c.b16 %v2087_v23, %v2087_v23  ;;  %v1907_v40 = vld [vmem:[#allocation3 + $0x150] sm:$0xff]  ;;  %v1783_v23 = vsel %vm10390_vm1, %v7463_v50, %v7329_v17 }
 0x4ef   :  { %2125 = vmatpush.bf16.msra.mxu2 %v2054_v57  ;;  %2141 = vmatpush.bf16.msrb.mxu3 %v2074_v47  ;;  %v1750_v57 = vld [vmem:[#allocation3 + $0x28] sm:$0xff]  ;;  %v1742_v47 = vsel %vm10388_vm13, %v7389_v44, %v7412_v36  ;;  %v1871_v17 = vld [vmem:[#allocation3 + $0xf0] sm:$0xff]  ;;  %vm10399_vm13 = vmmov %vm10391_vm2 }
 0x4f0   :  { %v1758_v28 = vmul.f32 %v1750_v57, %v1742_v47  ;;  %v1911_v47 = vld [vmem:[#allocation3 + $0x170] sm:$0xff] }
 0x4f1   :  { %v7573_v3 = vpop.permute.xlu0 %1851  ;;  %v1976_v7 = vpop.permute.xlu1 %1975 }
 0x4f2   :  { %v1978_v38 = vsel %vm970_vm3, %v7473_v51, %v1976_v7  ;;  %5403 = vmatmul.msk.bf16.vlgmr.msrb.gmra.mxu3 %vm134_vm0, %v7514_v32  ;;  %v1947_v51 = vld [vmem:[#allocation3 + $0x190] sm:$0xff]  ;;  %v7593_v58 = vpop.permute.xlu2 %1735  ;;  %v2042_v57 = vpack.c.bf16 %v1758_v28, %v1754_v18  ;;  %v1915_v18 = vmul.f32 %v1907_v40, %v1897_v63  ;;  %v1988_v40 = vld [vmem:[#allocation3 + $0x1d8] sm:$0xff] }
 0x4f3   :  { %v1999_v10 = vmul.f32 %v1991_v26, %v1978_v38  ;;  %2126 = vmatpush.bf16.msra.mxu2 %v2050_v53  ;;  %v1823_v26 = vsel %vm802_vm7, %v7469_v33, %v7385_v19 }
 0x4f4   :  { %v1833_v1 = vmul.f32 %v1825_v6, %v1823_v26  ;;  %v1749_v6 = vld [vmem:[#allocation3 + $0x20] sm:$0xff]  ;;  %v1744_v26 = vsel %vm10391_vm2, %v7593_v58, %v7389_v44 }
 0x4f5   :  { %v2071_v2 = vpack.c.bf16 %v1999_v10, %v1995_v21  ;;  %v1955_v21 = vmul.f32 %v1947_v51, %v1937_v39  ;;  %v1789_v51 = vld [vmem:[#allocation3 + $0x60] sm:$0xff] }
 0x4f6   :  { %v1745_v44 = vld [vmem:[#allocation3] sm:$0xff] }
 0x4f7   :  { %2127 = vmatpush.bf16.msra.mxu2 %v2046_v41  ;;  %2147 = vmatpush.bf16.msrb.mxu1 %v2071_v2  ;;  %v1919_v2 = vmul.f32 %v1911_v47, %v1898_v43  ;;  %v1860_v47 = vsel %vm844_vm6, %v7341_v13, %v7573_v3  ;;  %v1992_v43 = vld [vmem:[#allocation3 + $0x1f8] sm:$0xff]  ;;  %v1859_v13 = vsel %vm844_vm6, %v7325_v27, %v7441_v52 }
 0x4f9   :  { %v1936_v11 = vpop.permute.xlu0 %1935  ;;  %v7599_v53 = vpop.permute.xlu1 %1815  ;;  %v2063_v4 = vpack.c.bf16 %v1919_v2, %v1915_v18  ;;  %v1943_v18 = vsel %vm928_vm4, %v7453_v14, %v7363_v9 }
 0x4fa   :  { %v1938_v38 = vsel %vm928_vm4, %v7486_v48, %v1936_v11  ;;  %v1824_v19 = vsel %vm802_vm7, %v7599_v53, %v7449_v15  ;;  %v1785_v15 = vld [vmem:[#allocation3 + $0x40] sm:$0xff] }
 0x4fb   :  { %v1959_v10 = vmul.f32 %v1951_v12, %v1938_v38  ;;  %2128 = vmatpush.bf16.msra.mxu2 %v2042_v57  ;;  %v1837_v28 = vmul.f32 %v1829_v46, %v1824_v19  ;;  %v1793_v57 = vmul.f32 %v1785_v15, %v1783_v23  ;;  %v1984_v38 = vsel %vm970_vm3, %v1976_v7, %v7365_v56  ;;  %v2014_v19 = vpop.permute.xlu2 %2013  ;;  %v1831_v15 = vld [vmem:[#allocation3 + $0xb0] sm:$0xff] }
 0x4fc   :  { %v1983_v56 = vsel %vm970_vm3, %v7459_v54, %v7351_v16  ;;  %v1757_v7 = vmul.f32 %v1749_v6, %v1744_v26  ;;  %v2000_v2 = vmul.f32 %v1992_v43, %v1984_v38  ;;  %v1948_v54 = vld [vmem:[#allocation3 + $0x198] sm:$0xff]  ;;  %v1903_v43 = vsel %vm886_vm5, %v7518_v35, %v7373_v45 }
 0x4fd   :  { %v2067_v48 = vpack.c.bf16 %v1959_v10, %v1955_v21  ;;  %v2049_v41 = vpack.c.bf16 %v1837_v28, %v1833_v1  ;;  %v2059_v10 = vpack.c.bf16 %v7246_v5, %v7236_v25  ;;  %v1867_v1 = vld [vmem:[#allocation3 + $0xd0] sm:$0xff]  ;;  %v1879_v28 = vmul.f32 %v1871_v17, %v1860_v47  ;;  %v1908_v47 = vld [vmem:[#allocation3 + $0x158] sm:$0xff] }
 0x4fe   :  { %2129 = vmatmul.bf16.vlgmr.msra.gmra.mxu2 %v7612_v37  ;;  %v1944_v25 = vsel %vm928_vm4, %v1936_v11, %v7377_v61  ;;  %v1827_v5 = vld [vmem:[#allocation3 + $0x90] sm:$0xff]  ;;  %v1996_v16 = vmul.f32 %v1988_v40, %v1983_v56  ;;  %v1820_v61 = vsel %vm802_vm7, %v7427_v8, %v7526_v62 }
 0x4ff   :  { %2148 = vmatpush.bf16.msrb.mxu1 %v2067_v48  ;;  %2100 = vmatpush.bf16.msrb.mxu0 %v2049_v41  ;;  %v1952_v48 = vld [vmem:[#allocation3 + $0x1b8] sm:$0xff]  ;;  %v1875_v41 = vmul.f32 %v1867_v1, %v1859_v13  ;;  %v1839_v17 = vmul.f32 %v1831_v15, %v1820_v61  ;;  %v1916_v13 = vmul.f32 %v1908_v47, %v1903_v43  ;;  %v1751_v40 = vld [vmem:[#allocation3 + $0x30] sm:$0xff] }
 0x500   :  { %v2072_v6 = vpack.c.bf16 %v2000_v2, %v1996_v16  ;;  %v1960_v26 = vmul.f32 %v1952_v48, %v1944_v25  ;;  %v1747_v56 = vld [vmem:[#allocation3 + $0x10] sm:$0xff]  ;;  %v1792_v43 = vld [vmem:[#allocation3 + $0x78] sm:$0xff] }
 0x501   :  { %v7623_v39 = vpop.permute.xlu0 %1775  ;;  %v7625_v12 = vpop.permute.xlu1 %1809  ;;  %v2055_v14 = vpack.c.bf16 %v1879_v28, %v1875_v41 }
 0x502   :  { %v1784_v46 = vsel %vm10392_vm14, %v7623_v39, %v7447_v24  ;;  %v1743_v24 = vsel %vm10393_vm11, %v7542_v42, %v7375_v59  ;;  %v1819_v27 = vsel %vm802_vm7, %v7309_v20, %v7625_v12  ;;  %v1904_v20 = vsel %vm886_vm5, %v7563_v55, %v7439_v30  ;;  %vm10404_vm14 = vmmov %vm10391_vm2 }
 0x503   :  { %v1797_v21 = vmul.f32 %v1789_v51, %v1784_v46  ;;  %2149 = vmatpush.bf16.msrb.mxu1 %v2063_v4  ;;  %v1753_v59 = vmul.f32 %v1745_v44, %v1743_v24  ;;  %v1912_v4 = vld [vmem:[#allocation3 + $0x178] sm:$0xff]  ;;  %v1835_v9 = vmul.f32 %v1827_v5, %v1819_v27  ;;  %v1787_v46 = vld [vmem:[#allocation3 + $0x50] sm:$0xff]  ;;  %v1956_v55 = vmul.f32 %v1948_v54, %v1943_v18 }
 0x504   :  { %v1920_v38 = vmul.f32 %v1912_v4, %v1904_v20  ;;  %v2027_v44 = vld [vmem:[#allocation3 + $0x210] sm:$0xff]  ;;  %v2028_v24 = vld [vmem:[#allocation3 + $0x218] sm:$0xff] }
 0x505   :  { %v2045_v63 = vpack.c.bf16 %v1797_v21, %v1793_v57  ;;  %v2041_v51 = vpack.c.bf16 %v1757_v7, %v1753_v59  ;;  %v1791_v57 = vld [vmem:[#allocation3 + $0x70] sm:$0xff]  ;;  %v7697_v21 = vpop.permute.xlu2 %1731  ;;  %v2051_v45 = vpack.c.bf16 %v1839_v17, %v1835_v9  ;;  %v2068_v35 = vpack.c.bf16 %v1960_v26, %v1956_v55  ;;  %v10397_v7 = vld [vmem:[#allocation39_spill] sm:$0xff] }
 0x506   :  { %v2064_v25 = vpack.c.bf16 %v1920_v38, %v1916_v13  ;;  %v1872_v54 = vld [vmem:[#allocation3 + $0xf8] sm:$0xff] }
 0x507   :  { %2101 = vmatpush.bf16.msrb.mxu0 %v2045_v63  ;;  %2150 = vmatpush.bf16.msrb.mxu1 %v2059_v10  ;;  %v1858_v63 = vsel %vm844_vm6, %v7573_v3, %v10397_v7  ;;  %v1868_v20 = vld [vmem:[#allocation3 + $0xd8] sm:$0xff] }
 0x508   :  { %v1880_v9 = vmul.f32 %v1872_v54, %v1858_v63  ;;  %v1832_v55 = vld [vmem:[#allocation3 + $0xb8] sm:$0xff] }
 0x509   :  { %v7675_v11 = vpop.permute.xlu0 %1769  ;;  %v7677_v23 = vpop.permute.xlu1 %1771 }
 0x50a   :  { %v1779_v8 = vsel %vm10394_vm12, %v7337_v29, %v7675_v11  ;;  %v1780_v30 = vsel %vm10395_vm8, %v7353_v34, %v7677_v23  ;;  %v2017_v29 = vsel %vm1012_vm10, %v7431_v31, %v2014_v19  ;;  %v2023_v34 = vsel %vm1012_vm10, %v2014_v19, %v7397_v60  ;;  %v2031_v60 = vld [vmem:[#allocation3 + $0x230] sm:$0xff]  ;;  %v2032_v19 = vld [vmem:[#allocation3 + $0x238] sm:$0xff] }
 0x50b   :  { %2102 = vmatpush.bf16.msrb.mxu0 %v2041_v51  ;;  %2151 = vmatpush.bf16.msrb.mxu1 %v2055_v14  ;;  %v1795_v10 = vmul.f32 %v1787_v46, %v1779_v8  ;;  %v1799_v1 = vmul.f32 %v1791_v57, %v1780_v30  ;;  %v1740_v31 = vsel %vm10396_vm9, %v7412_v36, %v7697_v21  ;;  %v10398_v36 = vld [vmem:[#allocation42_spill] sm:$0xff]  ;;  %v10400_v51 = vld [vmem:[#allocation40_spill] sm:$0xff]  ;;  %v10401_v14 = vld [vmem:[#allocation41_spill] sm:$0xff] }
 0x50c   :  { %v2035_v28 = vmul.f32 %v2027_v44, %v2017_v29  ;;  %v2036_v2 = vmul.f32 %v2028_v24, %v2023_v34  ;;  %v1759_v3 = vmul.f32 %v1751_v40, %v1740_v31  ;;  %v1828_v8 = vld [vmem:[#allocation3 + $0x98] sm:$0xff]  ;;  %v1817_v57 = vsel %vm802_vm7, %v7625_v12, %v7469_v33 }
 0x50d   :  { %v2047_v16 = vpack.c.bf16 %v1799_v1, %v1795_v10  ;;  %v1836_v17 = vmul.f32 %v1828_v8, %v1817_v57  ;;  %v1788_v33 = vld [vmem:[#allocation3 + $0x58] sm:$0xff]  ;;  %v1777_v12 = vsel %vm10403_vm15, %v7675_v11, %v7463_v50  ;;  %v1738_v11 = vsel %vm10404_vm14, %v7697_v21, %v7593_v58 }
 0x50e   :  { %2103 = vmatmul.bf16.vlgmr.msrb.gmra.mxu0 %v7612_v37  ;;  %v1796_v38 = vmul.f32 %v1788_v33, %v1777_v12  ;;  %v1752_v50 = vld [vmem:[#allocation3 + $0x38] sm:$0xff] }
 0x50f   :  { %2173 = vmatpush.bf16.msra.mxu0 %v2072_v6  ;;  %2152 = vmatpush.bf16.msrb.mxu1 %v2051_v45  ;;  %v1760_v24 = vmul.f32 %v1752_v50, %v1738_v11 }
 0x511   :  { %v2016_v59 = vpop.permute.xlu0 %2015  ;;  %v1730_v48 = vpop.permute.xlu1 %1729 }
 0x512   :  { %v2018_v5 = vsel %vm1012_vm10, %v7540_v22, %v2016_v59  ;;  %v2024_v27 = vsel %vm1012_vm10, %v2016_v59, %v10398_v36  ;;  %v1739_v41 = vsel %vm10399_vm13, %v7349_v0, %v1730_v48  ;;  %v1857_v22 = vsel %vm844_vm6, %v7441_v52, %v10400_v51  ;;  %v10402_v0 = vld [vmem:[#allocation38_spill] sm:$0xff] }
 0x513   :  { %2174 = vmatpush.bf16.msra.mxu0 %v2068_v35  ;;  %v2039_v18 = vmul.f32 %v2031_v60, %v2018_v5  ;;  %v2040_v15 = vmul.f32 %v2032_v19, %v2024_v27  ;;  %v1755_v61 = vmul.f32 %v1747_v56, %v1739_v41  ;;  %2153 = vmatpush.bf16.msrb.mxu1 %v2047_v16 }
 0x514   :  { %v2060_v46 = vpack.c.bf16 %v10402_v0, %v10401_v14  ;;  %v1876_v30 = vmul.f32 %v1868_v20, %v1857_v22  ;;  %v1818_v52 = vsel %vm802_vm7, %v7526_v62, %v7599_v53  ;;  %v1778_v62 = vsel %vm10390_vm1, %v7677_v23, %v7623_v39 }
 0x515   :  { %v2075_v4 = vpack.c.bf16 %v2039_v18, %v2035_v28  ;;  %v2076_v6 = vpack.c.bf16 %v2040_v15, %v2036_v2  ;;  %v2043_v26 = vpack.c.bf16 %v1759_v3, %v1755_v61  ;;  %v1840_v53 = vmul.f32 %v1832_v55, %v1818_v52 }
 0x516   :  { %v2056_v47 = vpack.c.bf16 %v1880_v9, %v1876_v30  ;;  %v1800_v29 = vmul.f32 %v1792_v43, %v1778_v62  ;;  %v1737_v44 = vsel %vm10391_vm2, %v1730_v48, %v7542_v42 }
 0x517   :  { %2175 = vmatpush.bf16.msra.mxu0 %v2064_v25  ;;  %2167 = vmatpush.bf16.msra.mxu3 %v2075_v4  ;;  %v2052_v34 = vpack.c.bf16 %v1840_v53, %v1836_v17 }
 0x518   :  { %2193 = vmatpush.bf16.msrb.mxu2 %v2076_v6  ;;  %2154 = vmatpush.bf16.msrb.mxu1 %v2043_v26  ;;  %v2048_v23 = vpack.c.bf16 %v1800_v29, %v1796_v38 }
 0x519   :  { %v2084_v31 = vpop.permute.xlu0 %2083 }
 0x51a   :  { %5404 = vmatmul.msk.bf16.vlgmr.msra.gmra.mxu3 %vm134_vm0, %v7514_v32 }
 0x51b   :  { %2176 = vmatpush.bf16.msra.mxu0 %v2060_v46  ;;  %5405 = vmatmul.msk.bf16.vlgmr.msrb.gmra.mxu2 %vm134_vm0, %v7514_v32  ;;  %v1748_v32 = vld [vmem:[#allocation3 + $0x18] sm:$0xff] }
 0x51c   :  { %2155 = vmatmul.bf16.vlgmr.msrb.gmra.mxu1 %v7612_v37  ;;  %v1756_v39 = vmul.f32 %v1748_v32, %v1737_v44 }
 0x51e   :  { %v2044_v10 = vpack.c.bf16 %v1760_v24, %v1756_v39 }
 0x51f   :  { %2177 = vmatpush.bf16.msra.mxu0 %v2056_v47 }
 0x523   :  { %2178 = vmatpush.bf16.msra.mxu0 %v2052_v34 }
 0x527   :  { %2179 = vmatpush.bf16.msra.mxu0 %v2048_v23 }
 0x52b   :  { %2180 = vmatpush.bf16.msra.mxu0 %v2044_v10 }
 0x52e   :  { %2181 = vmatmul.bf16.vlgmr.msra.gmra.mxu0 %v7612_v37 }
 0x55a   :  { %v2117_v1 = vpop.f32.mrf.mxu1 }
 0x562   :  { %v2119_v35 = vpop.f32.mrf.mxu1 }
 0x575   :  { %v2143_v45 = vpop.f32.mrf.mxu3 }
 0x57d   :  { %v2145_v13 = vpop.f32.mrf.mxu3 }
 0x581   :  { %v2130_v42 = vpop.f32.mrf.mxu2 }
 0x582   :  { %v2131_v19 = vadd.f32 %v2130_v42, %v2084_v31 }
 0x584   :  { %v7752_v58 = vadd.f32 %v2143_v45, %v2131_v19 }
 0x586   :  { %v5407_v28 = vmul.f32 -1.442695, %v7752_v58 }
 0x589   :  { %v2132_v40 = vpop.f32.mrf.mxu2 }
 0x58b   :  { %v2104_v60 = vpop.f32.mrf.mxu0 }
 0x58c   :  { %v2105_v56 = vadd.f32 %v2104_v60, %v2084_v31 }
 0x58e   :  { %v2118_v7 = vadd.f32 %v2117_v1, %v2105_v56 }
 0x590   :  { %v5406_v21 = vmul.f32 -1.442695, %v2118_v7 }
 0x592   :  { %5729 = vpow2.f32 %v5406_v21 }
 0x593   :  { %v2106_v63 = vpop.f32.mrf.mxu0  ;;  %5731 = vpow2.f32 %v5407_v28 }
 0x598   :  { %v5730_v2 = vpop.eup %5729 }
 0x599   :  { %v2156_v37 = vpop.f32.mrf.mxu1  ;;  %v2211_v59 = vadd.f32 1.0, %v5730_v2  ;;  %v5732_v36 = vpop.eup %5731 }
 0x59a   :  { %v2157_v48 = vadd.f32 %v2156_v37, %v2084_v31  ;;  %v7755_v3 = vadd.f32 1.0, %v5732_v36 }
 0x59b   :  { %5733 = vrcp.f32 %v2211_v59  ;;  %v2226_v61 = vand.u32 2147483648, %v2211_v59  ;;  %v2224_v4 = vand.u32 2147483647, %v2211_v59  ;;  %vm2220_vm12 = vweird.f32 %v2211_v59 }
 0x59c   :  { %v2241_v10 = vand.u32 2147483648, %v7755_v3  ;;  %v2239_v45 = vand.u32 2147483647, %v7755_v3 }
 0x59d   :  { %v2169_v25 = vpop.f32.mrf.mxu3  ;;  %v2227_v14 = vor.u32 1.1754944e-38, %v2226_v61  ;;  %vm2225_vm9 = vcmp.eq.f32.partialorder %v2224_v4, 8.507059e+37 }
 0x59e   :  { %v2195_v5 = vpop.f32.mrf.mxu2  ;;  %v2170_v27 = vadd.f32 %v2169_v25, %v2157_v48  ;;  %v2242_v42 = vor.u32 1.1754944e-38, %v2241_v10  ;;  %v5412_v48 = vld [vmem:[%s10297_s10 + $0x10] sm:$0xff]  ;;  %v5413_v25 = vld [vmem:[%s10297_s10 + $0x18] sm:$0xff] }
 0x5a0   :  { %v5408_v41 = vmul.f32 -1.442695, %v2170_v27 }
 0x5a1   :  { %v2158_v16 = vpop.f32.mrf.mxu1  ;;  %v5734_v54 = vpop.eup %5733 }
 0x5a2   :  { %v2216_v18 = vmul.f32 %v5734_v54, %v2211_v59  ;;  %5735 = vpow2.f32 %v5408_v41  ;;  %vm2221_vm11 = vweird.f32 %v5734_v54  ;;  %v2431_v16 = vld [vmem:[#allocation6 + $0x100] sm:$0xff] }
 0x5a3   :  { %5737 = vrcp.f32 %v7755_v3  ;;  %vm2222_vm8 = vmor %vm2220_vm12, %vm2221_vm11  ;;  %vm2235_vm11 = vweird.f32 %v7755_v3 }
 0x5a4   :  { %v2217_v15 = vsub.f32 1.0, %v2216_v18 }
 0x5a5   :  { %v2171_v20 = vpop.f32.mrf.mxu3 }
 0x5a6   :  { %v2197_v51 = vpop.f32.mrf.mxu2  ;;  %v2218_v22 = vmul.f32 %v5734_v54, %v2217_v15 }
 0x5a8   :  { %v5736_v6 = vpop.eup %5735  ;;  %v2219_v26 = vadd.f32 %v5734_v54, %v2218_v22  ;;  %v2432_v22 = vld [vmem:[#allocation6 + $0x108] sm:$0xff] }
 0x5a9   :  { %v2213_v0 = vadd.f32 1.0, %v5736_v6  ;;  %v5738_v57 = vpop.eup %5737 }
 0x5aa   :  { %v2223_v8 = vsel %vm2222_vm8, %v5734_v54, %v2219_v26  ;;  %v2231_v17 = vmul.f32 %v5738_v57, %v7755_v3  ;;  %vm2236_vm1 = vweird.f32 %v5738_v57  ;;  %vm2240_vm8 = vcmp.eq.f32.partialorder %v2239_v45, 8.507059e+37  ;;  %v2372_v45 = vld [vmem:[#allocation6 + $0xa8] sm:$0xff] }
 0x5ab   :  { %v2182_v9 = vpop.f32.mrf.mxu0  ;;  %v2228_v30 = vsel %vm2225_vm9, %v2227_v14, %v2223_v8  ;;  %5739 = vrcp.f32 %v2213_v0  ;;  %v2256_v38 = vand.u32 2147483648, %v2213_v0  ;;  %v2254_v32 = vand.u32 2147483647, %v2213_v0  ;;  %vm2237_vm12 = vmor %vm2235_vm11, %vm2236_vm1 }
 0x5ac   :  { %v2183_v46 = vadd.f32 %v2182_v9, %v2084_v31  ;;  %v7758_v55 = vmul.f32 %v2228_v30, %v2118_v7  ;;  %v2232_v43 = vsub.f32 1.0, %v2231_v17  ;;  %vm2250_vm15 = vweird.f32 %v2213_v0 }
 0x5ad   :  { %v2257_v11 = vor.u32 1.1754944e-38, %v2256_v38  ;;  %vm2255_vm14 = vcmp.eq.f32.partialorder %v2254_v32, 8.507059e+37 }
 0x5ae   :  { %v7760_v52 = vadd.f32 %v2195_v5, %v2183_v46  ;;  %2299 = vrot.lane.b32.xlu0 %v7758_v55, %s6057_s28  ;;  %2379 = vrot.lane.b32.xlu2 %v7758_v55, %s6053_s5  ;;  %v2233_v29 = vmul.f32 %v5738_v57, %v2232_v43  ;;  %v2412_v43 = vld [vmem:[#allocation6 + $0xe8] sm:$0xff] }
 0x5af   :  { %2419 = vrot.lane.b32.xlu1 %v7758_v55, %s6059_s1 }
 0x5b0   :  { %v5409_v47 = vmul.f32 -1.442695, %v7760_v52  ;;  %v2234_v39 = vadd.f32 %v5738_v57, %v2233_v29  ;;  %v2391_v29 = vld [vmem:[#allocation6 + $0xc0] sm:$0xff] }
 0x5b1   :  { %v5740_v12 = vpop.eup %5739 }
 0x5b2   :  { %5741 = vpow2.f32 %v5409_v47  ;;  %v2246_v62 = vmul.f32 %v5740_v12, %v2213_v0  ;;  %vm2251_vm13 = vweird.f32 %v5740_v12  ;;  %v2238_v13 = vsel %vm2237_vm12, %v5738_v57, %v2234_v39  ;;  %v2371_v39 = vld [vmem:[#allocation6 + $0xa0] sm:$0xff] }
 0x5b3   :  { %v2184_v33 = vpop.f32.mrf.mxu0  ;;  %vm2252_vm2 = vmor %vm2250_vm15, %vm2251_vm13  ;;  %v2243_v40 = vsel %vm2240_vm8, %v2242_v42, %v2238_v13  ;;  %vm10408_vm12 = vcmp.lt.s32.totalorder %v6509_v49, 16  ;;  %vm10409_vm8 = vcmp.lt.s32.totalorder %v6509_v49, 17 }
 0x5b4   :  { %v2247_v53 = vsub.f32 1.0, %v2246_v62  ;;  %v7786_v60 = vmul.f32 %v2243_v40, %v7752_v58 }
 0x5b6   :  { %v2248_v34 = vmul.f32 %v5740_v12, %v2247_v53  ;;  %2319 = vrot.lane.b32.xlu2 %v7758_v55, %s6055_s24  ;;  %v2411_v53 = vld [vmem:[#allocation6 + $0xe0] sm:$0xff] }
 0x5b7   :  { %2399 = vrot.lane.b32.xlu1 %v7758_v55, %s6054_s6 }
 0x5b8   :  { %v5742_v44 = vpop.eup %5741  ;;  %v2249_v50 = vadd.f32 %v5740_v12, %v2248_v34  ;;  %v2392_v34 = vld [vmem:[#allocation6 + $0xc8] sm:$0xff] }
 0x5b9   :  { %v2214_v24 = vadd.f32 1.0, %v5742_v44 }
 0x5ba   :  { %v2253_v23 = vsel %vm2252_vm2, %v5740_v12, %v2249_v50  ;;  %vm10405_vm2 = vcmask 1043456   ;;  %v2433_v50 = vld [vmem:[#allocation6 + $0x110] sm:$0xff] }
 0x5bb   :  { %v2258_v1 = vsel %vm2255_vm14, %v2257_v11, %v2253_v23  ;;  %5743 = vrcp.f32 %v2214_v24  ;;  %v2271_v21 = vand.u32 2147483648, %v2214_v24  ;;  %vm2265_vm13 = vweird.f32 %v2214_v24  ;;  %vm10406_vm14 = vmmov %vm10405_vm2 }
 0x5bc   :  { %v7777_v35 = vmul.f32 %v2258_v1, %v2170_v27  ;;  %v2269_v63 = vand.u32 2147483647, %v2214_v24  ;;  %vm10407_vm11 = vmmov %vm10405_vm2 }
 0x5bd   :  { %v2272_v2 = vor.u32 1.1754944e-38, %v2271_v21 }
 0x5be   :  { %2423 = vrot.lane.b32.xlu0 %v7777_v35, %s6059_s1  ;;  %2403 = vrot.lane.b32.xlu2 %v7777_v35, %s6054_s6  ;;  %vm2270_vm1 = vcmp.eq.f32.partialorder %v2269_v63, 8.507059e+37 }
 0x5bf   :  { %2359 = vrot.lane.b32.xlu1 %v7758_v55, %s6056_s25 }
 0x5c1   :  { %v5744_v31 = vpop.eup %5743 }
 0x5c2   :  { %v2261_v19 = vmul.f32 %v5744_v31, %v2214_v24  ;;  %vm2266_vm9 = vweird.f32 %v5744_v31 }
 0x5c3   :  { %vm2267_vm15 = vmor %vm2265_vm13, %vm2266_vm9 }
 0x5c4   :  { %v2262_v56 = vsub.f32 1.0, %v2261_v19  ;;  %vm10410_vm9 = vmmov %vm10409_vm8 }
 0x5c5   :  { %vm10411_vm13 = vmmov %vm10409_vm8 }
 0x5c6   :  { %2383 = vrot.lane.b32.xlu0 %v7777_v35, %s6053_s5  ;;  %2421 = vrot.lane.b32.xlu2 %v7786_v60, %s6059_s1  ;;  %v2263_v7 = vmul.f32 %v5744_v31, %v2262_v56 }
 0x5c7   :  { %2339 = vrot.lane.b32.xlu1 %v7758_v55, %s6052_s3 }
 0x5c8   :  { %v2264_v58 = vadd.f32 %v5744_v31, %v2263_v7 }
 0x5ca   :  { %v2268_v28 = vsel %vm2267_vm15, %v5744_v31, %v2264_v58  ;;  %vm10412_vm15 = vmmov %vm10405_vm2 }
 0x5cb   :  { %v2273_v37 = vsel %vm2270_vm1, %v2272_v2, %v2268_v28  ;;  %v2352_v2 = vld [vmem:[#allocation6 + $0x68] sm:$0xff]  ;;  %vm10413_vm1 = vmmov %vm10408_vm12 }
 0x5cc   :  { %v7807_v59 = vmul.f32 %v2273_v37, %v7760_v52 }
 0x5ce   :  { %2363 = vrot.lane.b32.xlu0 %v7777_v35, %s6056_s25  ;;  %2401 = vrot.lane.b32.xlu2 %v7786_v60, %s6054_s6 }
 0x5cf   :  { %2279 = vrot.lane.b32.xlu1 %v7758_v55, %s6058_s29 }
 0x5d6   :  { %2343 = vrot.lane.b32.xlu0 %v7777_v35, %s6052_s3  ;;  %2361 = vrot.lane.b32.xlu2 %v7786_v60, %s6056_s25 }
 0x5d7   :  { %2323 = vrot.lane.b32.xlu1 %v7777_v35, %s6055_s24 }
 0x5de   :  { %2381 = vrot.lane.b32.xlu0 %v7786_v60, %s6053_s5  ;;  %2341 = vrot.lane.b32.xlu2 %v7786_v60, %s6052_s3 }
 0x5df   :  { %2425 = vrot.lane.b32.xlu1 %v7807_v59, %s6059_s1 }
 0x5e6   :  { %2321 = vrot.lane.b32.xlu0 %v7786_v60, %s6055_s24  ;;  %2281 = vrot.lane.b32.xlu2 %v7786_v60, %s6058_s29 }
 0x5e7   :  { %2385 = vrot.lane.b32.xlu1 %v7807_v59, %s6053_s5 }
 0x5ee   :  { %2405 = vrot.lane.b32.xlu0 %v7807_v59, %s6054_s6  ;;  %2345 = vrot.lane.b32.xlu2 %v7807_v59, %s6052_s3 }
 0x5ef   :  { %2365 = vrot.lane.b32.xlu1 %v7807_v59, %s6056_s25 }
 0x5f6   :  { %2325 = vrot.lane.b32.xlu0 %v7807_v59, %s6055_s24  ;;  %2285 = vrot.lane.b32.xlu2 %v7807_v59, %s6058_s29 }
 0x5f7   :  { %2305 = vrot.lane.b32.xlu1 %v7807_v59, %s6057_s28 }
 0x5fe   :  { %2283 = vrot.lane.b32.xlu0 %v7777_v35, %s6058_s29  ;;  %2303 = vrot.lane.b32.xlu2 %v7777_v35, %s6057_s28 }
 0x5ff   :  { %2301 = vrot.lane.b32.xlu1 %v7786_v60, %s6057_s28 }
 0x606   :  { %2467 = vperm.xlu0 %5646, %v5412_v48  }
 0x607   :  { %2472 = vperm.xlu1 %5647, %v5413_v25   ;;  %v2332_v25 = vld [vmem:[#allocation6 + $0x48] sm:$0xff] }
 0x608   :  { %v7845_v5 = vpop.permute.xlu2 %2379 }
 0x610   :  { %v7847_v36 = vpop.permute.xlu2 %2319 }
 0x618   :  { %v7849_v27 = vpop.permute.xlu2 %2403 }
 0x620   :  { %v2422_v41 = vpop.permute.xlu2 %2421  ;;  %v7857_v20 = vpop.permute.xlu0 %2299 }
 0x621   :  { %v7851_v54 = vpop.permute.xlu1 %2419 }
 0x622   :  { %v2429_v3 = vsel %vm1012_vm10, %v7851_v54, %v2422_v41 }
 0x623   :  { %v2435_v18 = vmul.f32 %v2431_v16, %v2429_v3 }
 0x625   :  { %v2455_v15 = vpack.c.bf16 %v2435_v18, %v2435_v18 }
 0x627   :  { %v2484_v61 = vsel %vm10405_vm2, %v2455_v15, 0  ;;  %vm10414_vm2 = vmmov %vm10413_vm1 }
 0x628   :  { %2498 = vmatpush.bf16.msrb.mxu3 %v2484_v61  ;;  %v2402_v0 = vpop.permute.xlu2 %2401 }
 0x629   :  { %v7859_v51 = vpop.permute.xlu1 %2399  ;;  %v2408_v62 = vsel %vm970_vm3, %v2402_v0, %v7849_v27 }
 0x62a   :  { %v2409_v38 = vsel %vm970_vm3, %v7859_v51, %v2402_v0  ;;  %v2416_v32 = vmul.f32 %v2412_v43, %v2408_v62 }
 0x62b   :  { %v2415_v11 = vmul.f32 %v2411_v53, %v2409_v38 }
 0x630   :  { %v2424_v4 = vpop.permute.xlu0 %2423  ;;  %v2362_v30 = vpop.permute.xlu2 %2361 }
 0x631   :  { %v2428_v6 = vsel %vm1012_vm10, %v2422_v41, %v2424_v4  ;;  %v7863_v26 = vpop.permute.xlu1 %2359 }
 0x632   :  { %v2436_v9 = vmul.f32 %v2432_v22, %v2428_v6  ;;  %v2369_v23 = vsel %vm886_vm5, %v7863_v26, %v2362_v30 }
 0x633   :  { %v2375_v7 = vmul.f32 %v2371_v39, %v2369_v23  ;;  %v2331_v23 = vld [vmem:[#allocation6 + $0x40] sm:$0xff] }
 0x634   :  { %v2456_v14 = vpack.c.bf16 %v2436_v9, %v2436_v9  ;;  %v2393_v9 = vld [vmem:[#allocation6 + $0xd0] sm:$0xff] }
 0x635   :  { %v2447_v16 = vpack.c.bf16 %v2375_v7, %v7758_v55 }
 0x636   :  { %v2487_v46 = vsel %vm10406_vm14, %v2456_v14, 0  ;;  %v2413_v14 = vld [vmem:[#allocation6 + $0xf0] sm:$0xff]  ;;  %vm10415_vm14 = vcmask 588800  }
 0x637   :  { %2512 = vmatpush.bf16.msra.mxu1 %v2487_v46 }
 0x638   :  { %v2384_v8 = vpop.permute.xlu0 %2383  ;;  %v7872_v33 = vpop.permute.xlu2 %2341 }
 0x639   :  { %v7866_v57 = vpop.permute.xlu1 %2339 }
 0x63a   :  { %v2349_v37 = vsel %vm844_vm6, %v7866_v57, %v7872_v33 }
 0x63b   :  { %v2356_v61 = vmul.f32 %v2352_v2, %v2349_v37  ;;  %v2293_v37 = vld [vmem:[#allocation6 + $0x10] sm:$0xff] }
 0x640   :  { %v2364_v52 = vpop.permute.xlu0 %2363  ;;  %v7894_v19 = vpop.permute.xlu2 %2281 }
 0x641   :  { %v7868_v17 = vpop.permute.xlu1 %2279  ;;  %v2368_v13 = vsel %vm886_vm5, %v2362_v30, %v2364_v52 }
 0x642   :  { %v2376_v63 = vmul.f32 %v2372_v45, %v2368_v13  ;;  %v2311_v13 = vld [vmem:[#allocation6 + $0x20] sm:$0xff] }
 0x644   :  { %v2448_v15 = vpack.c.bf16 %v2376_v63, %v7786_v60  ;;  %v2373_v60 = vld [vmem:[#allocation6 + $0xb0] sm:$0xff] }
 0x648   :  { %v7870_v47 = vpop.permute.xlu0 %2343  ;;  %v7908_v6 = vpop.permute.xlu2 %2345 }
 0x649   :  { %v7874_v12 = vpop.permute.xlu1 %2323 }
 0x650   :  { %v2382_v44 = vpop.permute.xlu0 %2381  ;;  %v7932_v39 = vpop.permute.xlu2 %2285 }
 0x651   :  { %v2388_v24 = vsel %vm928_vm4, %v2382_v44, %v2384_v8  ;;  %v2389_v10 = vsel %vm928_vm4, %v7845_v5, %v2382_v44  ;;  %v2426_v1 = vpop.permute.xlu1 %2425 }
 0x652   :  { %v2395_v42 = vmul.f32 %v2391_v29, %v2389_v10  ;;  %v2396_v40 = vmul.f32 %v2392_v34, %v2388_v24  ;;  %v2427_v31 = vsel %vm1012_vm10, %v2424_v4, %v2426_v1  ;;  %v2333_v34 = vld [vmem:[#allocation6 + $0x50] sm:$0xff]  ;;  %v2430_v44 = vsel %vm1012_vm10, %v2426_v1, %v7851_v54 }
 0x653   :  { %v2437_v56 = vmul.f32 %v2433_v50, %v2427_v31  ;;  %v2348_v50 = vsel %vm844_vm6, %v7872_v33, %v7870_v47 }
 0x654   :  { %v2451_v58 = vpack.c.bf16 %v2415_v11, %v2395_v42  ;;  %v2452_v21 = vpack.c.bf16 %v2416_v32, %v2396_v40  ;;  %v2434_v32 = vld [vmem:[#allocation6 + $0x118] sm:$0xff]  ;;  %v2350_v11 = vsel %vm844_vm6, %v7908_v6, %v7866_v57 }
 0x655   :  { %v2457_v28 = vpack.c.bf16 %v2437_v56, %v2437_v56  ;;  %v2438_v1 = vmul.f32 %v2434_v32, %v2430_v44  ;;  %v2291_v56 = vld [vmem:[#allocation6] sm:$0xff]  ;;  %v2334_v32 = vld [vmem:[#allocation6 + $0x58] sm:$0xff] }
 0x656   :  { %2499 = vmatpush.bf16.msrb.mxu3 %v2451_v58  ;;  %2513 = vmatpush.bf16.msra.mxu1 %v2452_v21  ;;  %v2354_v44 = vld [vmem:[#allocation6 + $0x78] sm:$0xff] }
 0x657   :  { %v2490_v48 = vsel %vm10407_vm11, %v2457_v28, 0  ;;  %v2458_v21 = vpack.c.bf16 %v2438_v1, %v2438_v1  ;;  %v2414_v28 = vld [vmem:[#allocation6 + $0xf8] sm:$0xff]  ;;  %vm10416_vm11 = vmmov %vm10415_vm14 }
 0x658   :  { %2526 = vmatpush.bf16.msra.mxu2 %v2490_v48  ;;  %v2322_v41 = vpop.permute.xlu0 %2321  ;;  %v2292_v48 = vld [vmem:[#allocation6 + $0x8] sm:$0xff] }
 0x659   :  { %v2329_v3 = vsel %vm802_vm7, %v7847_v36, %v2322_v41  ;;  %v7905_v18 = vpop.permute.xlu1 %2385 }
 0x65a   :  { %v2336_v22 = vmul.f32 %v2332_v25, %v2329_v3  ;;  %2500 = vmatpush.bf16.msrb.mxu3 %v2447_v16  ;;  %2514 = vmatpush.bf16.msra.mxu1 %v2448_v15  ;;  %v2387_v55 = vsel %vm928_vm4, %v2384_v8, %v7905_v18  ;;  %v2328_v8 = vsel %vm802_vm7, %v2322_v41, %v7874_v12  ;;  %v2312_v16 = vld [vmem:[#allocation6 + $0x28] sm:$0xff]  ;;  %v2313_v3 = vld [vmem:[#allocation6 + $0x30] sm:$0xff] }
 0x65b   :  { %v2397_v43 = vmul.f32 %v2393_v9, %v2387_v55  ;;  %v2337_v24 = vmul.f32 %v2333_v34, %v2328_v8  ;;  %v2289_v25 = vsel %vm10410_vm9, %v7868_v17, %v7894_v19  ;;  %v2493_v55 = vsel %vm10412_vm15, %v2458_v21, 0  ;;  %vm10418_vm9 = vmmov %vm10413_vm1 }
 0x65c   :  { %v2444_v4 = vpack.c.bf16 %v2356_v61, %v2336_v22  ;;  %v2304_v61 = vpop.permute.xlu2 %2303  ;;  %v2394_v22 = vld [vmem:[#allocation6 + $0xd8] sm:$0xff] }
 0x65e   :  { %2515 = vmatpush.bf16.msra.mxu1 %v2444_v4  ;;  %v2390_v4 = vsel %vm928_vm4, %v7905_v18, %v7845_v5  ;;  %v2296_v18 = vmul.f32 %v2292_v48, %v2289_v25 }
 0x660   :  { %v2406_v0 = vpop.permute.xlu0 %2405 }
 0x661   :  { %v2407_v46 = vsel %vm970_vm3, %v7849_v27, %v2406_v0  ;;  %v2366_v30 = vpop.permute.xlu1 %2365  ;;  %v2353_v27 = vld [vmem:[#allocation6 + $0x70] sm:$0xff]  ;;  %v2410_v2 = vsel %vm970_vm3, %v2406_v0, %v7859_v51 }
 0x662   :  { %v2417_v62 = vmul.f32 %v2413_v14, %v2407_v46  ;;  %v2367_v53 = vsel %vm886_vm5, %v2364_v52, %v2366_v30  ;;  %v2351_v52 = vld [vmem:[#allocation6 + $0x60] sm:$0xff]  ;;  %v2357_v42 = vmul.f32 %v2353_v27, %v2348_v50  ;;  %v2418_v14 = vmul.f32 %v2414_v28, %v2410_v2  ;;  %v2294_v50 = vld [vmem:[#allocation6 + $0x18] sm:$0xff] }
 0x663   :  { %v2377_v38 = vmul.f32 %v2373_v60, %v2367_v53  ;;  %v2355_v40 = vmul.f32 %v2351_v52, %v2350_v11  ;;  %v2374_v60 = vld [vmem:[#allocation6 + $0xb8] sm:$0xff]  ;;  %v2398_v53 = vmul.f32 %v2394_v22, %v2390_v4 }
 0x664   :  { %v2453_v29 = vpack.c.bf16 %v2417_v62, %v2397_v43  ;;  %v2445_v58 = vpack.c.bf16 %v2357_v42, %v2337_v24  ;;  %v2314_v11 = vld [vmem:[#allocation6 + $0x38] sm:$0xff] }
 0x665   :  { %v2449_v54 = vpack.c.bf16 %v2377_v38, %v7777_v35  ;;  %v2290_v35 = vsel %vm10409_vm8, %v7932_v39, %v7868_v17  ;;  %v5607_v17 = vld [vmem:[%s10296_s9 + $0x8] sm:$0xff]  ;;  %v2454_v8 = vpack.c.bf16 %v2418_v14, %v2398_v53 }
 0x666   :  { %2527 = vmatpush.bf16.msra.mxu2 %v2453_v29  ;;  %v2295_v63 = vmul.f32 %v2291_v56, %v2290_v35 }
 0x668   :  { %v2326_v10 = vpop.permute.xlu0 %2325 }
 0x669   :  { %v2330_v45 = vsel %vm802_vm7, %v2326_v10, %v7847_v36  ;;  %v7938_v33 = vpop.permute.xlu1 %2305 }
 0x66a   :  { %v2335_v31 = vmul.f32 %v2331_v23, %v2330_v45  ;;  %v2310_v57 = vsel %vm10408_vm12, %v7938_v33, %v7857_v20  ;;  %2528 = vmatpush.bf16.msra.mxu2 %v2449_v54  ;;  %vm10417_vm12 = vmmov %vm10416_vm11  ;;  %v2307_v23 = vsel %vm10418_vm9, %v2304_v61, %v7938_v33 }
 0x66b   :  { %v2315_v7 = vmul.f32 %v2311_v13, %v2310_v57  ;;  %v2318_v24 = vmul.f32 %v2314_v11, %v2307_v23 }
 0x66c   :  { %v2443_v36 = vpack.c.bf16 %v2355_v40, %v2335_v31 }
 0x66d   :  { %v2439_v15 = vpack.c.bf16 %v2315_v7, %v2295_v63 }
 0x66e   :  { %2501 = vmatpush.bf16.msrb.mxu3 %v2443_v36  ;;  %2529 = vmatpush.bf16.msra.mxu2 %v2445_v58 }
 0x670   :  { %v2284_v41 = vpop.permute.xlu0 %2283 }
 0x671   :  { %v2288_v51 = vsel %vm10411_vm13, %v7894_v19, %v2284_v41  ;;  %v2302_v9 = vpop.permute.xlu1 %2301  ;;  %v2370_v19 = vsel %vm886_vm5, %v2366_v30, %v7863_v26  ;;  %v2347_v26 = vsel %vm844_vm6, %v7870_v47, %v7908_v6  ;;  %vm10419_vm13 = vmmov %vm10416_vm11 }
 0x672   :  { %v2297_v0 = vmul.f32 %v2293_v37, %v2288_v51  ;;  %v2308_v46 = vsel %vm10413_vm1, %v2302_v9, %v2304_v61  ;;  %v2309_v5 = vsel %vm10414_vm2, %v7857_v20, %v2302_v9  ;;  %2502 = vmatpush.bf16.msrb.mxu3 %v2439_v15  ;;  %v2378_v34 = vmul.f32 %v2374_v60, %v2370_v19 }
 0x673   :  { %v2316_v43 = vmul.f32 %v2312_v16, %v2309_v5  ;;  %v2317_v62 = vmul.f32 %v2313_v3, %v2308_v46  ;;  %v2327_v20 = vsel %vm802_vm7, %v7874_v12, %v2326_v10  ;;  %v2287_v12 = vsel %vm10409_vm8, %v2284_v41, %v7932_v39 }
 0x674   :  { %v2338_v30 = vmul.f32 %v2334_v32, %v2327_v20  ;;  %v2450_v27 = vpack.c.bf16 %v2378_v34, %v7807_v59  ;;  %v2358_v52 = vmul.f32 %v2354_v44, %v2347_v26  ;;  %v2298_v47 = vmul.f32 %v2294_v50, %v2287_v12 }
 0x675   :  { %5418 = vmatmul.msk.bf16.vlgmr.msrb.gmra.mxu3 %vm10415_vm14, %v5607_v17  ;;  %v2440_v38 = vpack.c.bf16 %v2316_v43, %v2296_v18  ;;  %v2441_v29 = vpack.c.bf16 %v2317_v62, %v2297_v0 }
 0x676   :  { %2540 = vmatpush.bf16.msra.mxu3 %v2493_v55  ;;  %v2446_v6 = vpack.c.bf16 %v2358_v52, %v2338_v30  ;;  %v2442_v10 = vpack.c.bf16 %v2318_v24, %v2298_v47 }
 0x677   :  { %2516 = vmatpush.bf16.msra.mxu1 %v2440_v38  ;;  %2530 = vmatpush.bf16.msra.mxu2 %v2441_v29 }
 0x678   :  { %v2468_v59 = vpop.permute.xlu0 %2467 }
 0x679   :  { %v8000_v31 = vpop.permute.xlu1 %2472 }
 0x67a   :  { %2541 = vmatpush.bf16.msra.mxu3 %v2454_v8  ;;  %5419 = vmatmul.msk.bf16.vlgmr.msra.gmra.mxu1 %vm10416_vm11, %v5607_v17 }
 0x67b   :  { %5420 = vmatmul.msk.bf16.vlgmr.msra.gmra.mxu2 %vm10417_vm12, %v5607_v17 }
 0x67e   :  { %2542 = vmatpush.bf16.msra.mxu3 %v2450_v27 }
 0x682   :  { %2543 = vmatpush.bf16.msra.mxu3 %v2446_v6 }
 0x686   :  { %2544 = vmatpush.bf16.msra.mxu3 %v2442_v10 }
 0x689   :  { %5421 = vmatmul.msk.bf16.vlgmr.msra.gmra.mxu3 %vm10419_vm13, %v5607_v17 }
 0x6f7   :  { %v2518_v54 = vpop.f32.mrf.mxu1 }
 0x6f8   :  { %v7992_v1 = vadd.f32 %v2518_v54, %v2468_v59  ;;  %v2504_v39 = vpop.f32.mrf.mxu3 }
 0x6f9   :  { %v7994_v45 = vadd.f32 %v2504_v39, %v2468_v59 }
 0x6fa   :  { %v5423_v13 = vmul.f32 -1.442695, %v7992_v1 }
 0x6fb   :  { %v5422_v42 = vmul.f32 -1.442695, %v7994_v45 }
 0x6fc   :  { %5745 = vpow2.f32 %v5423_v13 }
 0x6fd   :  { %5747 = vpow2.f32 %v5422_v42 }
 0x6fe   :  { %v2532_v33 = vpop.f32.mrf.mxu2 }
 0x6ff   :  { %v7998_v40 = vadd.f32 %v2532_v33, %v2468_v59  ;;  %v2520_v57 = vpop.f32.mrf.mxu1 }
 0x700   :  { %v8004_v35 = vadd.f32 %v2520_v57, %v8000_v31  ;;  %v2506_v7 = vpop.f32.mrf.mxu3 }
 0x701   :  { %v5424_v56 = vmul.f32 -1.442695, %v7998_v40  ;;  %v8007_v36 = vadd.f32 %v2506_v7, %v8000_v31 }
 0x702   :  { %v5746_v58 = vpop.eup %5745  ;;  %v5427_v21 = vmul.f32 -1.442695, %v8004_v35 }
 0x703   :  { %v5748_v63 = vpop.eup %5747  ;;  %v2576_v28 = vadd.f32 1.0, %v5746_v58  ;;  %5749 = vpow2.f32 %v5424_v56  ;;  %v5426_v2 = vmul.f32 -1.442695, %v8007_v36 }
 0x704   :  { %v2575_v37 = vadd.f32 1.0, %v5748_v63  ;;  %5751 = vpow2.f32 %v5427_v21 }
 0x705   :  { %5753 = vrcp.f32 %v2576_v28  ;;  %v2607_v14 = vand.u32 2147483647, %v2576_v28  ;;  %v2609_v46 = vand.u32 2147483648, %v2576_v28  ;;  %vm2603_vm2 = vweird.f32 %v2576_v28 }
 0x706   :  { %v2534_v48 = vpop.f32.mrf.mxu2  ;;  %5755 = vrcp.f32 %v2575_v37  ;;  %v2592_v18 = vand.u32 2147483647, %v2575_v37  ;;  %v2594_v43 = vand.u32 2147483648, %v2575_v37  ;;  %vm2588_vm14 = vweird.f32 %v2575_v37 }
 0x707   :  { %5757 = vpow2.f32 %v5426_v2  ;;  %v8012_v25 = vadd.f32 %v2534_v48, %v8000_v31  ;;  %vm2608_vm12 = vcmp.eq.f32.partialorder %v2607_v14, 8.507059e+37  ;;  %v2610_v8 = vor.u32 1.1754944e-38, %v2609_v46 }
 0x708   :  { %vm2593_vm9 = vcmp.eq.f32.partialorder %v2592_v18, 8.507059e+37  ;;  %v2595_v30 = vor.u32 1.1754944e-38, %v2594_v43 }
 0x709   :  { %v5750_v41 = vpop.eup %5749  ;;  %v5428_v16 = vmul.f32 -1.442695, %v8012_v25 }
 0x70a   :  { %v5752_v3 = vpop.eup %5751  ;;  %v8017_v0 = vadd.f32 1.0, %v5750_v41 }
 0x70b   :  { %v5754_v61 = vpop.eup %5753  ;;  %v8015_v51 = vadd.f32 1.0, %v5752_v3  ;;  %5759 = vpow2.f32 %v5428_v16 }
 0x70c   :  { %v2546_v15 = vpop.f32.mrf.mxu3  ;;  %v5756_v22 = vpop.eup %5755  ;;  %v2599_v4 = vmul.f32 %v5754_v61, %v2576_v28  ;;  %vm2604_vm15 = vweird.f32 %v5754_v61 }
 0x70d   :  { %v5758_v9 = vpop.eup %5757  ;;  %v2584_v55 = vmul.f32 %v5756_v22, %v2575_v37  ;;  %5761 = vrcp.f32 %v8015_v51  ;;  %v8022_v62 = vadd.f32 %v2546_v15, %v2468_v59  ;;  %vm2589_vm1 = vweird.f32 %v5756_v22  ;;  %vm2605_vm11 = vmor %vm2603_vm2, %vm2604_vm15 }
 0x70e   :  { %v2600_v17 = vsub.f32 1.0, %v2599_v4  ;;  %v8020_v60 = vadd.f32 1.0, %v5758_v9  ;;  %vm2590_vm8 = vmor %vm2588_vm14, %vm2589_vm1  ;;  %v2669_v54 = vand.u32 2147483648, %v8015_v51  ;;  %vm2663_vm15 = vweird.f32 %v8015_v51 }
 0x70f   :  { %v2585_v5 = vsub.f32 1.0, %v2584_v55  ;;  %v5425_v27 = vmul.f32 -1.442695, %v8022_v62  ;;  %v2667_v13 = vand.u32 2147483647, %v8015_v51 }
 0x710   :  { %v2601_v19 = vmul.f32 %v5754_v61, %v2600_v17  ;;  %5763 = vrcp.f32 %v8020_v60  ;;  %v2654_v56 = vand.u32 2147483648, %v8020_v60  ;;  %v2652_v58 = vand.u32 2147483647, %v8020_v60 }
 0x711   :  { %v2586_v53 = vmul.f32 %v5756_v22, %v2585_v5  ;;  %v5760_v38 = vpop.eup %5759  ;;  %5765 = vrcp.f32 %v8017_v0  ;;  %v2670_v28 = vor.u32 1.1754944e-38, %v2669_v54  ;;  %vm2668_vm14 = vcmp.eq.f32.partialorder %v2667_v13, 8.507059e+37 }
 0x712   :  { %v2602_v29 = vadd.f32 %v5754_v61, %v2601_v19  ;;  %v8026_v20 = vadd.f32 1.0, %v5760_v38  ;;  %v2655_v16 = vor.u32 1.1754944e-38, %v2654_v56 }
 0x713   :  { %v2587_v32 = vadd.f32 %v5756_v22, %v2586_v53  ;;  %v5762_v44 = vpop.eup %5761 }
 0x714   :  { %v2548_v34 = vpop.f32.mrf.mxu3  ;;  %v2606_v26 = vsel %vm2605_vm11, %v5754_v61, %v2602_v29  ;;  %v2659_v52 = vmul.f32 %v5762_v44, %v8015_v51  ;;  %5767 = vrcp.f32 %v8026_v20  ;;  %vm2664_vm13 = vweird.f32 %v5762_v44 }
 0x715   :  { %v2611_v50 = vsel %vm2608_vm12, %v2610_v8, %v2606_v26  ;;  %v2591_v12 = vsel %vm2590_vm8, %v5756_v22, %v2587_v32  ;;  %v8032_v11 = vadd.f32 %v2548_v34, %v8000_v31  ;;  %5769 = vpow2.f32 %v5425_v27  ;;  %vm2665_vm1 = vmor %vm2663_vm15, %vm2664_vm13 }
 0x716   :  { %v8035_v23 = vmul.f32 %v2611_v50, %v7992_v1  ;;  %v2596_v47 = vsel %vm2593_vm9, %v2595_v30, %v2591_v12  ;;  %v5764_v6 = vpop.eup %5763  ;;  %v2660_v10 = vsub.f32 1.0, %v2659_v52  ;;  %vm2648_vm11 = vweird.f32 %v8020_v60 }
 0x717   :  { %v8038_v24 = vmul.f32 %v2596_v47, %v7994_v45  ;;  %v8041_v59 = vpop.eup %5765  ;;  %v2644_v39 = vmul.f32 %v5764_v6, %v8020_v60  ;;  %v5429_v45 = vmul.f32 -1.442695, %v8032_v11  ;;  %vm2649_vm2 = vweird.f32 %v5764_v6 }
 0x718   :  { %2923 = vrot.lane.b32.xlu0 %v8035_v23, %s6053_s5  ;;  %2963 = vrot.lane.b32.xlu2 %v8035_v23, %s6054_s6  ;;  %v2661_v1 = vmul.f32 %v5762_v44, %v2660_v10  ;;  %v2614_v31 = vmul.f32 %v8041_v59, %v8017_v0  ;;  %vm2650_vm12 = vmor %vm2648_vm11, %vm2649_vm2  ;;  %vm2653_vm8 = vcmp.eq.f32.partialorder %v2652_v58, 8.507059e+37  ;;  %vm2619_vm9 = vweird.f32 %v8041_v59 }
 0x719   :  { %2959 = vrot.lane.b32.xlu1 %v8038_v24, %s6054_s6  ;;  %v2645_v42 = vsub.f32 1.0, %v2644_v39  ;;  %v2711_v33 = vpack.c.bf16 %v8035_v23, %v8038_v24  ;;  %5771 = vpow2.f32 %v5429_v45  ;;  %vm2618_vm13 = vweird.f32 %v8017_v0 }
 0x71a   :  { %v2662_v57 = vadd.f32 %v5762_v44, %v2661_v1  ;;  %v8060_v21 = vpop.eup %5767  ;;  %v2615_v48 = vsub.f32 1.0, %v2614_v31  ;;  %vm2620_vm15 = vmor %vm2618_vm13, %vm2619_vm9  ;;  %vm2678_vm11 = vweird.f32 %v8026_v20  ;;  %v2682_v27 = vand.u32 2147483647, %v8026_v20 }
 0x71b   :  { %v2646_v7 = vmul.f32 %v5764_v6, %v2645_v42  ;;  %2715 = vst [vmem:[#allocation2 + $0x40] sm:$0xff] %v2711_v33  ;;  %v5770_v37 = vpop.eup %5769  ;;  %v2674_v15 = vmul.f32 %v8060_v21, %v8026_v20  ;;  %vm2679_vm2 = vweird.f32 %v8060_v21 }
 0x71c   :  { %v2666_v63 = vsel %vm2665_vm1, %v5762_v44, %v2662_v57  ;;  %v2578_v61 = vadd.f32 1.0, %v5770_v37  ;;  %v2616_v55 = vmul.f32 %v8041_v59, %v2615_v48  ;;  %v2684_v44 = vand.u32 2147483648, %v8026_v20 }
 0x71d   :  { %v2647_v2 = vadd.f32 %v5764_v6, %v2646_v7  ;;  %v2671_v41 = vsel %vm2668_vm14, %v2670_v28, %v2666_v63  ;;  %v2675_v14 = vsub.f32 1.0, %v2674_v15 }
 0x71e   :  { %v8072_v51 = vmul.f32 %v2671_v41, %v8004_v35  ;;  %5773 = vrcp.f32 %v2578_v61  ;;  %v2617_v5 = vadd.f32 %v8041_v59, %v2616_v55  ;;  %v2622_v35 = vand.u32 2147483647, %v8017_v0 }
 0x71f   :  { %v2651_v3 = vsel %vm2650_vm12, %v5764_v6, %v2647_v2  ;;  %v5772_v22 = vpop.eup %5771  ;;  %v2676_v60 = vmul.f32 %v8060_v21, %v2675_v14  ;;  %v2639_v29 = vand.u32 2147483648, %v2578_v61  ;;  %v2637_v26 = vand.u32 2147483647, %v2578_v61  ;;  %vm8098_vm12 = vmor %vm2678_vm11, %vm2679_vm2 }
 0x720   :  { %2883 = vrot.lane.b32.xlu0 %v8035_v23, %s6056_s25  ;;  %2763 = vrot.lane.b32.xlu2 %v8035_v23, %s6057_s28  ;;  %v2656_v4 = vsel %vm2653_vm8, %v2655_v16, %v2651_v3  ;;  %v2582_v17 = vadd.f32 1.0, %v5772_v22  ;;  %v2621_v53 = vsel %vm2620_vm15, %v8041_v59, %v2617_v5  ;;  %vm2623_vm1 = vcmp.eq.f32.partialorder %v2622_v35, 8.507059e+37 }
 0x721   :  { %2919 = vrot.lane.b32.xlu1 %v8038_v24, %s6053_s5  ;;  %v8075_v9 = vmul.f32 %v2656_v4, %v8007_v36  ;;  %v2624_v36 = vand.u32 2147483648, %v8017_v0  ;;  %v2677_v8 = vadd.f32 %v8060_v21, %v2676_v60  ;;  %vm2633_vm8 = vweird.f32 %v2578_v61 }
 0x722   :  { %5775 = vrcp.f32 %v2582_v17  ;;  %v2640_v47 = vor.u32 1.1754944e-38, %v2639_v29  ;;  %v2699_v6 = vand.u32 2147483648, %v2582_v17  ;;  %v2697_v54 = vand.u32 2147483647, %v2582_v17 }
 0x723   :  { %v2713_v46 = vpack.c.bf16 %v8072_v51, %v8075_v9  ;;  %v2625_v34 = vor.u32 1.1754944e-38, %v2624_v36  ;;  %v2681_v10 = vsel %vm8098_vm12, %v8060_v21, %v2677_v8  ;;  %v2685_v20 = vor.u32 1.1754944e-38, %v2684_v44 }
 0x724   :  { %v5774_v18 = vpop.eup %5773  ;;  %vm2638_vm15 = vcmp.eq.f32.partialorder %v2637_v26, 8.507059e+37  ;;  %vm2693_vm2 = vweird.f32 %v2582_v17  ;;  %v2700_v31 = vor.u32 1.1754944e-38, %v2699_v6  ;;  %vm2698_vm11 = vcmp.eq.f32.partialorder %v2697_v54, 8.507059e+37 }
 0x725   :  { %2717 = vst [vmem:[#allocation2 + $0x50] sm:$0xff] %v2713_v46  ;;  %v2629_v19 = vmul.f32 %v5774_v18, %v2578_v61  ;;  %vm2634_vm14 = vweird.f32 %v5774_v18  ;;  %v2626_v30 = vsel %vm2623_vm1, %v2625_v34, %v2621_v53  ;;  %vm2683_vm1 = vcmp.eq.f32.partialorder %v2682_v27, 8.507059e+37  ;;  %v2947_v27 = vld [vmem:[#allocation3 + $0x1a0] sm:$0xff] }
 0x726   :  { %vm2635_vm9 = vmor %vm2633_vm8, %vm2634_vm14  ;;  %v8112_v13 = vmul.f32 %v2626_v30, %v7998_v40  ;;  %v2686_v42 = vsel %vm2683_vm1, %v2685_v20, %v2681_v10  ;;  %v2943_v10 = vld [vmem:[#allocation3 + $0x180] sm:$0xff]  ;;  %vm10426_vm12 = vcmp.lt.s32.totalorder %v6509_v49, 16 }
 0x727   :  { %v2630_v38 = vsub.f32 1.0, %v2629_v19  ;;  %v8121_v58 = vmul.f32 %v2686_v42, %v8012_v25  ;;  %v5431_v19 = vld [vmem:[%s10295_s8 + $0x10] sm:$0xff]  ;;  %vm10427_vm8 = vmmov %vm10426_vm12 }
 0x728   :  { %2843 = vrot.lane.b32.xlu0 %v8035_v23, %s6052_s3  ;;  %2961 = vrot.lane.b32.xlu2 %v8075_v9, %s6054_s6  ;;  %v5776_v43 = vpop.eup %5775  ;;  %vm10431_vm1 = vmmov %vm10427_vm8 }
 0x729   :  { %2839 = vrot.lane.b32.xlu1 %v8038_v24, %s6052_s3  ;;  %v2689_v32 = vmul.f32 %v5776_v43, %v2582_v17  ;;  %v2631_v0 = vmul.f32 %v5774_v18, %v2630_v38  ;;  %vm2694_vm13 = vweird.f32 %v5776_v43 }
 0x72a   :  { %vm2695_vm14 = vmor %vm2693_vm2, %vm2694_vm13 }
 0x72b   :  { %v2690_v50 = vsub.f32 1.0, %v2689_v32  ;;  %v2632_v52 = vadd.f32 %v5774_v18, %v2631_v0  ;;  %v2983_v32 = vld [vmem:[#allocation3 + $0x1c0] sm:$0xff] }
 0x72c   :  { %v2987_v0 = vld [vmem:[#allocation3 + $0x1e0] sm:$0xff] }
 0x72d   :  { %v2691_v59 = vmul.f32 %v5776_v43, %v2690_v50  ;;  %v2636_v39 = vsel %vm2635_vm9, %v5774_v18, %v2632_v52  ;;  %vm10428_vm9 = vcmp.lt.s32.totalorder %v6509_v49, 17 }
 0x72e   :  { %v2641_v1 = vsel %vm2638_vm15, %v2640_v47, %v2636_v39  ;;  %vm10429_vm13 = vmmov %vm10428_vm9 }
 0x72f   :  { %v2692_v45 = vadd.f32 %v5776_v43, %v2691_v59  ;;  %v8115_v33 = vmul.f32 %v2641_v1, %v8022_v62  ;;  %vm10430_vm15 = vmmov %vm10427_vm8 }
 0x730   :  { %2803 = vrot.lane.b32.xlu0 %v8035_v23, %s6055_s24  ;;  %2921 = vrot.lane.b32.xlu2 %v8075_v9, %s6053_s5  ;;  %vm10433_vm2 = vmmov %vm10428_vm9 }
 0x731   :  { %2799 = vrot.lane.b32.xlu1 %v8038_v24, %s6055_s24  ;;  %v2696_v57 = vsel %vm2695_vm14, %v5776_v43, %v2692_v45  ;;  %v2712_v7 = vpack.c.bf16 %v8115_v33, %v8112_v13  ;;  %vm10434_vm14 = vmmov %vm10431_vm1 }
 0x732   :  { %v2701_v56 = vsel %vm2698_vm11, %v2700_v31, %v2696_v57  ;;  %v2903_v57 = vld [vmem:[#allocation3 + $0x140] sm:$0xff]  ;;  %vm10435_vm11 = vmmov %vm10431_vm1 }
 0x733   :  { %v8124_v21 = vmul.f32 %v2701_v56, %v8032_v11  ;;  %2716 = vst [vmem:[#allocation2 + $0x48] sm:$0xff] %v2712_v7 }
 0x735   :  { %v2714_v40 = vpack.c.bf16 %v8124_v21, %v8121_v58 }
 0x737   :  { %2718 = vst [vmem:[#allocation2 + $0x58] sm:$0xff] %v2714_v40 }
 0x738   :  { %3003 = vrot.lane.b32.xlu0 %v8035_v23, %s6059_s1  ;;  %2841 = vrot.lane.b32.xlu2 %v8075_v9, %s6052_s3 }
 0x739   :  { %2719 = vrot.lane.b32.xlu1 %v8038_v24, %s6058_s29 }
 0x740   :  { %2723 = vrot.lane.b32.xlu0 %v8035_v23, %s6058_s29  ;;  %2801 = vrot.lane.b32.xlu2 %v8075_v9, %s6055_s24 }
 0x741   :  { %2925 = vrot.lane.b32.xlu1 %v8072_v51, %s6053_s5 }
 0x748   :  { %2879 = vrot.lane.b32.xlu0 %v8038_v24, %s6056_s25  ;;  %2721 = vrot.lane.b32.xlu2 %v8075_v9, %s6058_s29 }
 0x749   :  { %2885 = vrot.lane.b32.xlu1 %v8072_v51, %s6056_s25 }
 0x750   :  { %2759 = vrot.lane.b32.xlu0 %v8038_v24, %s6057_s28  ;;  %2927 = vrot.lane.b32.xlu2 %v8112_v13, %s6053_s5 }
 0x751   :  { %2845 = vrot.lane.b32.xlu1 %v8072_v51, %s6052_s3 }
 0x758   :  { %2999 = vrot.lane.b32.xlu0 %v8038_v24, %s6059_s1  ;;  %2887 = vrot.lane.b32.xlu2 %v8112_v13, %s6056_s25 }
 0x759   :  { %2805 = vrot.lane.b32.xlu1 %v8072_v51, %s6055_s24 }
 0x760   :  { %2965 = vrot.lane.b32.xlu0 %v8072_v51, %s6054_s6  ;;  %3007 = vrot.lane.b32.xlu2 %v8112_v13, %s6059_s1 }
 0x761   :  { %3005 = vrot.lane.b32.xlu1 %v8072_v51, %s6059_s1 }
 0x768   :  { %2765 = vrot.lane.b32.xlu0 %v8072_v51, %s6057_s28  ;;  %2971 = vrot.lane.b32.xlu2 %v8115_v33, %s6054_s6 }
 0x769   :  { %2725 = vrot.lane.b32.xlu1 %v8072_v51, %s6058_s29 }
 0x770   :  { %2929 = vrot.lane.b32.xlu0 %v8121_v58, %s6053_s5  ;;  %2931 = vrot.lane.b32.xlu2 %v8115_v33, %s6053_s5 }
 0x771   :  { %2881 = vrot.lane.b32.xlu1 %v8075_v9, %s6056_s25 }
 0x772   :  { %v8176_v25 = vpop.permute.xlu2 %2963 }
 0x778   :  { %2889 = vrot.lane.b32.xlu0 %v8121_v58, %s6056_s25  ;;  %2851 = vrot.lane.b32.xlu2 %v8115_v33, %s6052_s3 }
 0x779   :  { %2761 = vrot.lane.b32.xlu1 %v8075_v9, %s6057_s28 }
 0x77a   :  { %v8184_v62 = vpop.permute.xlu2 %2763 }
 0x780   :  { %3009 = vrot.lane.b32.xlu0 %v8121_v58, %s6059_s1  ;;  %2771 = vrot.lane.b32.xlu2 %v8115_v33, %s6057_s28 }
 0x781   :  { %3001 = vrot.lane.b32.xlu1 %v8075_v9, %s6059_s1 }
 0x782   :  { %v8192_v11 = vpop.permute.xlu2 %2961 }
 0x788   :  { %2973 = vrot.lane.b32.xlu0 %v8124_v21, %s6054_s6  ;;  %2731 = vrot.lane.b32.xlu2 %v8115_v33, %s6058_s29 }
 0x789   :  { %2967 = vrot.lane.b32.xlu1 %v8112_v13, %s6054_s6 }
 0x78a   :  { %v8200_v63 = vpop.permute.xlu0 %2923  ;;  %v8202_v28 = vpop.permute.xlu2 %2921 }
 0x78b   :  { %v8204_v2 = vpop.permute.xlu1 %2959 }
 0x78c   :  { %v2979_v44 = vsel %vm970_vm3, %v8204_v2, %v8176_v25 }
 0x78d   :  { %v2991_v47 = vmul.f32 %v2983_v32, %v2979_v44 }
 0x790   :  { %2933 = vrot.lane.b32.xlu0 %v8124_v21, %s6053_s5  ;;  %2969 = vrot.lane.b32.xlu2 %v8121_v58, %s6054_s6 }
 0x791   :  { %2847 = vrot.lane.b32.xlu1 %v8112_v13, %s6052_s3 }
 0x792   :  { %v8212_v37 = vpop.permute.xlu0 %2883  ;;  %v8214_v48 = vpop.permute.xlu2 %2841 }
 0x793   :  { %v8216_v41 = vpop.permute.xlu1 %2919 }
 0x794   :  { %v2939_v59 = vsel %vm928_vm4, %v8216_v41, %v8200_v63 }
 0x795   :  { %v2951_v39 = vmul.f32 %v2943_v10, %v2939_v59  ;;  %v3055_v10 = vpack.c.bf16 %v8075_v9, %v8038_v24  ;;  %v3024_v59 = vld [vmem:[#allocation3 + $0x208] sm:$0xff] }
 0x798   :  { %2853 = vrot.lane.b32.xlu0 %v8124_v21, %s6052_s3  ;;  %2849 = vrot.lane.b32.xlu2 %v8121_v58, %s6052_s3 }
 0x799   :  { %2891 = vrot.lane.b32.xlu1 %v8115_v33, %s6056_s25 }
 0x79a   :  { %v8224_v16 = vpop.permute.xlu0 %2843  ;;  %v8226_v3 = vpop.permute.xlu2 %2801 }
 0x79b   :  { %v8228_v15 = vpop.permute.xlu1 %2839 }
 0x7a0   :  { %2767 = vrot.lane.b32.xlu0 %v8112_v13, %s6057_s28  ;;  %2893 = vrot.lane.b32.xlu2 %v8124_v21, %s6056_s25 }
 0x7a1   :  { %2811 = vrot.lane.b32.xlu1 %v8115_v33, %s6055_s24 }
 0x7a2   :  { %v8236_v61 = vpop.permute.xlu0 %2803  ;;  %v8238_v22 = vpop.permute.xlu2 %2721 }
 0x7a3   :  { %v8240_v4 = vpop.permute.xlu1 %2799 }
 0x7a8   :  { %2773 = vrot.lane.b32.xlu0 %v8124_v21, %s6057_s28  ;;  %2813 = vrot.lane.b32.xlu2 %v8124_v21, %s6055_s24 }
 0x7a9   :  { %2807 = vrot.lane.b32.xlu1 %v8112_v13, %s6055_s24 }
 0x7aa   :  { %v8248_v55 = vpop.permute.xlu0 %3003  ;;  %v8250_v17 = vpop.permute.xlu2 %2927 }
 0x7ab   :  { %v8252_v14 = vpop.permute.xlu1 %2719 }
 0x7b0   :  { %2733 = vrot.lane.b32.xlu0 %v8124_v21, %s6058_s29  ;;  %2809 = vrot.lane.b32.xlu2 %v8121_v58, %s6055_s24 }
 0x7b1   :  { %2769 = vrot.lane.b32.xlu1 %v8121_v58, %s6057_s28 }
 0x7b2   :  { %v8260_v46 = vpop.permute.xlu0 %2723  ;;  %v8262_v5 = vpop.permute.xlu2 %2887 }
 0x7b3   :  { %v8264_v35 = vpop.permute.xlu1 %2925 }
 0x7b4   :  { %v2940_v50 = vsel %vm928_vm4, %v8202_v28, %v8264_v35 }
 0x7b5   :  { %v2955_v54 = vmul.f32 %v2947_v27, %v2940_v50 }
 0x7b7   :  { %v3063_v42 = vpack.c.bf16 %v2955_v54, %v2951_v39  ;;  %v3023_v39 = vld [vmem:[#allocation3 + $0x200] sm:$0xff] }
 0x7b8   :  { %2729 = vrot.lane.b32.xlu0 %v8121_v58, %s6058_s29  ;;  %2727 = vrot.lane.b32.xlu2 %v8112_v13, %s6058_s29 }
 0x7b9   :  { %3011 = vrot.lane.b32.xlu1 %v8115_v33, %s6059_s1 }
 0x7ba   :  { %v8272_v18 = vpop.permute.xlu0 %2879  ;;  %v8274_v36 = vpop.permute.xlu2 %3007 }
 0x7bb   :  { %10422 = vst [vmem:[#allocation36_spill] sm:$0xff] %v8274_v36  ;;  %v8276_v60 = vpop.permute.xlu1 %2885  ;;  %v2899_v56 = vsel %vm886_vm5, %v8272_v18, %v8212_v37  ;;  %v3017_v54 = vsel %vm1012_vm10, %v8248_v55, %v8274_v36  ;;  %v2986_v36 = vld [vmem:[#allocation3 + $0x1d8] sm:$0xff] }
 0x7c0   :  { %3081 = vperm.xlu0 %5646, %v5431_v19   ;;  %3013 = vrot.lane.b32.xlu2 %v8124_v21, %s6059_s1  ;;  %v2907_v19 = vld [vmem:[#allocation3 + $0x160] sm:$0xff] }
 0x7c2   :  { %v8283_v43 = vpop.permute.xlu0 %2759  ;;  %v8285_v53 = vpop.permute.xlu2 %2971 }
 0x7c3   :  { %v8287_v38 = vpop.permute.xlu1 %2845 }
 0x7ca   :  { %v8289_v29 = vpop.permute.xlu0 %2999  ;;  %v8291_v34 = vpop.permute.xlu2 %2931 }
 0x7cb   :  { %10423 = vst [vmem:[#allocation37_spill] sm:$0xff] %v8289_v29  ;;  %v8293_v8 = vpop.permute.xlu1 %2805 }
 0x7d2   :  { %v2966_v26 = vpop.permute.xlu0 %2965  ;;  %v8299_v30 = vpop.permute.xlu2 %2851 }
 0x7d3   :  { %v2980_v12 = vsel %vm970_vm3, %v8192_v11, %v2966_v26  ;;  %v3006_v52 = vpop.permute.xlu1 %3005 }
 0x7d4   :  { %v2995_v6 = vmul.f32 %v2987_v0, %v2980_v12  ;;  %v2911_v0 = vmul.f32 %v2903_v57, %v2899_v56  ;;  %v3027_v56 = vld [vmem:[#allocation3 + $0x220] sm:$0xff] }
 0x7d6   :  { %v3067_v20 = vpack.c.bf16 %v2995_v6, %v2991_v47 }
 0x7d8   :  { %3093 = vmatpush.bf16.msrb.mxu0 %v3067_v20  ;;  %v3028_v20 = vld [vmem:[#allocation3 + $0x228] sm:$0xff] }
 0x7da   :  { %v8312_v1 = vpop.permute.xlu0 %2765  ;;  %v8314_v45 = vpop.permute.xlu2 %2771 }
 0x7db   :  { %v8316_v31 = vpop.permute.xlu1 %2725 }
 0x7dc   :  { %3094 = vmatpush.bf16.msrb.mxu0 %v3063_v42  ;;  %v3019_v42 = vsel %vm1012_vm10, %v8289_v29, %v8248_v55 }
 0x7e2   :  { %v8322_v7 = vpop.permute.xlu0 %2929  ;;  %v8324_v40 = vpop.permute.xlu2 %2731 }
 0x7e3   :  { %10424 = vst [vmem:[#allocation39_spill] sm:$0xff] %v8324_v40  ;;  %v8326_v32 = vpop.permute.xlu1 %2881  ;;  %v2990_v40 = vld [vmem:[#allocation3 + $0x1f8] sm:$0xff] }
 0x7e4   :  { %v2900_v44 = vsel %vm886_vm5, %v8326_v32, %v8276_v60 }
 0x7e5   :  { %v2915_v27 = vmul.f32 %v2907_v19, %v2900_v44  ;;  %v3032_v19 = vmul.f32 %v3024_v59, %v3017_v54  ;;  %v2988_v59 = vld [vmem:[#allocation3 + $0x1e8] sm:$0xff] }
 0x7e7   :  { %v3059_v50 = vpack.c.bf16 %v2915_v27, %v2911_v0  ;;  %v3031_v27 = vmul.f32 %v3023_v39, %v3019_v42 }
 0x7e9   :  { %3095 = vmatpush.bf16.msrb.mxu0 %v3059_v50 }
 0x7ea   :  { %v8332_v12 = vpop.permute.xlu0 %2889  ;;  %v2970_v47 = vpop.permute.xlu2 %2969 }
 0x7eb   :  { %v8334_v6 = vpop.permute.xlu1 %2761  ;;  %v2978_v54 = vsel %vm970_vm3, %v2966_v26, %v2970_v47 }
 0x7ec   :  { %v2996_v26 = vmul.f32 %v2988_v59, %v2978_v54  ;;  %v2946_v54 = vld [vmem:[#allocation3 + $0x198] sm:$0xff] }
 0x7ed   :  { %3096 = vmatpush.bf16.msrb.mxu0 %v3055_v10 }
 0x7f2   :  { %v8346_v57 = vpop.permute.xlu0 %3009  ;;  %v8356_v50 = vpop.permute.xlu2 %2849 }
 0x7f3   :  { %10425 = vst [vmem:[#allocation42_spill] sm:$0xff] %v8346_v57  ;;  %v3018_v24 = vsel %vm1012_vm10, %v3006_v52, %v8346_v57  ;;  %v8351_v9 = vpop.permute.xlu1 %3001  ;;  %v2981_v57 = vsel %vm970_vm3, %v8285_v53, %v8204_v2 }
 0x7f4   :  { %v3036_v44 = vmul.f32 %v3028_v20, %v3018_v24  ;;  %v3020_v0 = vsel %vm1012_vm10, %v8351_v9, %v3006_v52  ;;  %v2989_v20 = vld [vmem:[#allocation3 + $0x1f0] sm:$0xff] }
 0x7f5   :  { %v3035_v10 = vmul.f32 %v3027_v56, %v3020_v0  ;;  %v2984_v56 = vld [vmem:[#allocation3 + $0x1c8] sm:$0xff]  ;;  %v2985_v24 = vld [vmem:[#allocation3 + $0x1d0] sm:$0xff] }
 0x7f6   :  { %v3072_v55 = vpack.c.bf16 %v3036_v44, %v3032_v19  ;;  %v2994_v44 = vmul.f32 %v2986_v36, %v2981_v57  ;;  %v2948_v0 = vld [vmem:[#allocation3 + $0x1a8] sm:$0xff]  ;;  %v2937_v57 = vsel %vm928_vm4, %v8200_v63, %v8250_v17  ;;  %v8394_v63 = vld [vmem:[%s10294_s7 + $0x10] sm:$0xff] }
 0x7f7   :  { %v3071_v29 = vpack.c.bf16 %v3035_v10, %v3031_v27 }
 0x7f8   :  { %3139 = vmatpush.bf16.msrb.mxu3 %v3072_v55 }
 0x7f9   :  { %3113 = vmatpush.bf16.msrb.mxu1 %v3071_v29  ;;  %v2938_v29 = vsel %vm928_vm4, %v8264_v35, %v8322_v7  ;;  %v2945_v35 = vld [vmem:[#allocation3 + $0x190] sm:$0xff] }
 0x7fa   :  { %v2974_v52 = vpop.permute.xlu0 %2973  ;;  %v2894_v59 = vpop.permute.xlu2 %2893 }
 0x7fb   :  { %v2976_v39 = vsel %vm970_vm3, %v2970_v47, %v2974_v52  ;;  %v2982_v42 = vsel %vm970_vm3, %v2974_v52, %v8192_v11  ;;  %v2968_v19 = vpop.permute.xlu1 %2967  ;;  %v2956_v52 = vmul.f32 %v2948_v0, %v2938_v29  ;;  %v2904_v0 = vld [vmem:[#allocation3 + $0x148] sm:$0xff] }
 0x7fc   :  { %v2998_v2 = vmul.f32 %v2990_v40, %v2982_v42  ;;  %v2975_v47 = vsel %vm970_vm3, %v2968_v19, %v8285_v53  ;;  %v2977_v11 = vsel %vm970_vm3, %v8176_v25, %v2968_v19  ;;  %v2997_v27 = vmul.f32 %v2989_v20, %v2976_v39  ;;  %v2944_v40 = vld [vmem:[#allocation3 + $0x188] sm:$0xff] }
 0x7fd   :  { %v2992_v55 = vmul.f32 %v2984_v56, %v2977_v11  ;;  %v2993_v36 = vmul.f32 %v2985_v24, %v2975_v47  ;;  %v2935_v53 = vsel %vm928_vm4, %v8250_v17, %v8291_v34  ;;  %v2941_v25 = vsel %vm928_vm4, %v8291_v34, %v8216_v41  ;;  %v2908_v42 = vld [vmem:[#allocation3 + $0x168] sm:$0xff]  ;;  %v2949_v56 = vld [vmem:[#allocation3 + $0x1b0] sm:$0xff]  ;;  %v2950_v24 = vld [vmem:[#allocation3 + $0x1b8] sm:$0xff] }
 0x7fe   :  { %v3070_v10 = vpack.c.bf16 %v2998_v2, %v2994_v44  ;;  %v2898_v17 = vsel %vm886_vm5, %v8276_v60, %v8332_v12  ;;  %v3086_v19 = vunpack.c.h.b16 %v8394_v63  ;;  %v2952_v41 = vmul.f32 %v2944_v40, %v2937_v57  ;;  %v2864_v57 = vld [vmem:[#allocation3 + $0xc8] sm:$0xff] }
 0x7ff   :  { %v3068_v20 = vpack.c.bf16 %v2996_v26, %v2992_v55  ;;  %v3069_v39 = vpack.c.bf16 %v2997_v27, %v2993_v36  ;;  %v2897_v34 = vsel %vm886_vm5, %v8212_v37, %v8262_v5  ;;  %v2953_v44 = vmul.f32 %v2945_v35, %v2935_v53  ;;  %v2868_v53 = vld [vmem:[#allocation3 + $0xe8] sm:$0xff] }
 0x800   :  { %3171 = vmatpush.bf16.msra.mxu3 %v3070_v10  ;;  %v2954_v29 = vmul.f32 %v2946_v54, %v2941_v25  ;;  %v8413_v11 = vpack.c.b16 %v3086_v19, %v3086_v19  ;;  %v2916_v27 = vmul.f32 %v2908_v42, %v2898_v17  ;;  %v3064_v55 = vpack.c.bf16 %v2956_v52, %v2952_v41  ;;  %v2863_v25 = vld [vmem:[#allocation3 + $0xc0] sm:$0xff]  ;;  %v2909_v42 = vld [vmem:[#allocation3 + $0x170] sm:$0xff] }
 0x801   :  { %3119 = vmatpush.bf16.msrb.mxu2 %v3068_v20  ;;  %3145 = vmatpush.bf16.msra.mxu1 %v3069_v39  ;;  %v2912_v36 = vmul.f32 %v2904_v0, %v2897_v34  ;;  %v2859_v35 = vsel %vm844_vm6, %v8228_v15, %v8224_v16  ;;  %v2860_v54 = vsel %vm844_vm6, %v8214_v48, %v8287_v38  ;;  %v2867_v39 = vld [vmem:[#allocation3 + $0xe0] sm:$0xff]  ;;  %v2906_v34 = vld [vmem:[#allocation3 + $0x158] sm:$0xff] }
 0x802   :  { %v2934_v2 = vpop.permute.xlu0 %2933  ;;  %5432 = vmatmul.msk.bf16.vlgmr.msrb.gmra.mxu1 %vm134_vm0, %v8413_v11  ;;  %5433 = vmatmul.msk.bf16.vlgmr.msrb.gmra.mxu3 %vm134_vm0, %v8413_v11  ;;  %v2861_v52 = vsel %vm844_vm6, %v8299_v30, %v8228_v15  ;;  %v8431_v20 = vpop.permute.xlu2 %2813  ;;  %v2896_v17 = vsel %vm886_vm5, %v8332_v12, %v2894_v59  ;;  %v2902_v19 = vsel %vm886_vm5, %v2894_v59, %v8326_v32  ;;  %v2905_v15 = vld [vmem:[#allocation3 + $0x150] sm:$0xff] }
 0x803   :  { %v2936_v60 = vsel %vm928_vm4, %v8322_v7, %v2934_v2  ;;  %v2942_v26 = vsel %vm928_vm4, %v2934_v2, %v8202_v28  ;;  %v8411_v47 = vpop.permute.xlu1 %2847  ;;  %v3060_v28 = vpack.c.bf16 %v2916_v27, %v2912_v36  ;;  %v3056_v2 = vpack.c.bf16 %v8072_v51, %v8035_v23 }
 0x804   :  { %v2957_v37 = vmul.f32 %v2949_v56, %v2936_v60  ;;  %v2958_v10 = vmul.f32 %v2950_v24, %v2942_v26  ;;  %v2910_v24 = vld [vmem:[#allocation3 + $0x178] sm:$0xff]  ;;  %v2872_v0 = vmul.f32 %v2864_v57, %v2859_v35  ;;  %v2871_v12 = vmul.f32 %v2863_v25, %v2861_v52  ;;  %v2828_v26 = vld [vmem:[#allocation3 + $0xa8] sm:$0xff] }
 0x805   :  { %3120 = vmatpush.bf16.msrb.mxu2 %v3064_v55  ;;  %v2820_v32 = vsel %vm802_vm7, %v8226_v3, %v8293_v8  ;;  %v2917_v59 = vmul.f32 %v2909_v42, %v2896_v17  ;;  %v2918_v23 = vmul.f32 %v2910_v24, %v2902_v19  ;;  %v2824_v55 = vld [vmem:[#allocation3 + $0x88] sm:$0xff]  ;;  %v2819_v36 = vsel %vm802_vm7, %v8240_v4, %v8236_v61  ;;  %v2870_v25 = vld [vmem:[#allocation3 + $0xf8] sm:$0xff]  ;;  %v2827_v24 = vld [vmem:[#allocation3 + $0xa0] sm:$0xff] }
 0x806   :  { %v3065_v7 = vpack.c.bf16 %v2957_v37, %v2953_v44  ;;  %v3066_v40 = vpack.c.bf16 %v2958_v10, %v2954_v29  ;;  %v2876_v29 = vmul.f32 %v2868_v53, %v2860_v54  ;;  %v2832_v35 = vmul.f32 %v2824_v55, %v2819_v36  ;;  %v2865_v53 = vld [vmem:[#allocation3 + $0xd0] sm:$0xff]  ;;  %v2784_v42 = vld [vmem:[#allocation3 + $0x48] sm:$0xff] }
 0x807   :  { %v2857_v54 = vsel %vm844_vm6, %v8224_v16, %v8411_v47  ;;  %v2779_v17 = vsel %vm10427_vm8, %v8283_v43, %v8184_v62  ;;  %v2822_v16 = vsel %vm802_vm7, %v8431_v20, %v8226_v3  ;;  %v2855_v3 = vsel %vm844_vm6, %v8411_v47, %v8299_v30  ;;  %vm10437_vm8 = vmmov %vm10431_vm1 }
 0x808   :  { %3146 = vmatpush.bf16.msra.mxu1 %v3065_v7  ;;  %3172 = vmatpush.bf16.msra.mxu3 %v3066_v40  ;;  %v2836_v7 = vmul.f32 %v2828_v26, %v2820_v32  ;;  %v3052_v40 = vpack.c.bf16 %v2876_v29, %v2872_v0  ;;  %v2858_v0 = vsel %vm844_vm6, %v8287_v38, %v8356_v50  ;;  %v2866_v29 = vld [vmem:[#allocation3 + $0xd8] sm:$0xff]  ;;  %v2744_v32 = vld [vmem:[#allocation3 + $0x8] sm:$0xff]  ;;  %v3085_v36 = vunpack.c.l.b16 %v8394_v63  ;;  %v2825_v63 = vld [vmem:[#allocation3 + $0x90] sm:$0xff] }
 0x809   :  { %3121 = vmatpush.bf16.msrb.mxu2 %v3060_v28  ;;  %v2788_v28 = vld [vmem:[#allocation3 + $0x68] sm:$0xff]  ;;  %v2792_v38 = vmul.f32 %v2784_v42, %v2779_v17  ;;  %v2739_v30 = vsel %vm10429_vm13, %v8252_v14, %v8260_v46  ;;  %vm10439_vm13 = vmmov %vm10433_vm2 }
 0x80a   :  { %v2854_v56 = vpop.permute.xlu0 %2853  ;;  %v2810_v19 = vpop.permute.xlu2 %2809 }
 0x80b   :  { %v2862_v41 = vsel %vm844_vm6, %v2854_v56, %v8214_v48  ;;  %v2892_v44 = vpop.permute.xlu1 %2891  ;;  %v2856_v52 = vsel %vm844_vm6, %v8356_v50, %v2854_v56  ;;  %v2835_v50 = vmul.f32 %v2827_v24, %v2822_v16  ;;  %v8521_v16 = vpack.c.b16 %v3085_v36, %v3085_v36 }
 0x80c   :  { %v2875_v60 = vmul.f32 %v2867_v39, %v2862_v41  ;;  %v2895_v48 = vsel %vm886_vm5, %v8262_v5, %v2892_v44  ;;  %v2901_v27 = vsel %vm886_vm5, %v2892_v44, %v8272_v18  ;;  %v2780_v18 = vsel %vm10426_vm12, %v8334_v6, %v8312_v1  ;;  %v2823_v41 = vld [vmem:[#allocation3 + $0x80] sm:$0xff]  ;;  %vm10436_vm12 = vmmov %vm10433_vm2 }
 0x80d   :  { %v2913_v51 = vmul.f32 %v2905_v15, %v2895_v48  ;;  %v2914_v37 = vmul.f32 %v2906_v34, %v2901_v27  ;;  %3122 = vmatpush.bf16.msrb.mxu2 %v3056_v2  ;;  %v3057_v15 = vpack.c.bf16 %v8121_v58, %v8112_v13  ;;  %v3058_v34 = vpack.c.bf16 %v8124_v21, %v8115_v33  ;;  %v2869_v2 = vld [vmem:[#allocation3 + $0xf0] sm:$0xff] }
 0x80e   :  { %v3051_v10 = vpack.c.bf16 %v2875_v60, %v2871_v12  ;;  %v2796_v44 = vmul.f32 %v2788_v28, %v2780_v18  ;;  %v3048_v12 = vpack.c.bf16 %v2836_v7, %v2832_v35  ;;  %v2748_v60 = vld [vmem:[#allocation3 + $0x28] sm:$0xff]  ;;  %v2740_v13 = vsel %vm10428_vm9, %v8238_v22, %v8316_v31  ;;  %v2826_v28 = vld [vmem:[#allocation3 + $0x98] sm:$0xff]  ;;  %v2829_v18 = vld [vmem:[#allocation3 + $0xb0] sm:$0xff] }
 0x80f   :  { %v3061_v57 = vpack.c.bf16 %v2917_v59, %v2913_v51  ;;  %v3062_v5 = vpack.c.bf16 %v2918_v23, %v2914_v37  ;;  %v2873_v33 = vmul.f32 %v2865_v53, %v2857_v54  ;;  %v2878_v58 = vmul.f32 %v2870_v25, %v2856_v52  ;;  %v2783_v51 = vld [vmem:[#allocation3 + $0x40] sm:$0xff]  ;;  %vm10438_vm9 = vmmov %vm10431_vm1 }
 0x810   :  { %3097 = vmatpush.bf16.msrb.mxu0 %v3051_v10  ;;  %v2877_v47 = vmul.f32 %v2869_v2, %v2858_v0  ;;  %v2874_v59 = vmul.f32 %v2866_v29, %v2855_v3  ;;  %v2756_v48 = vmul.f32 %v2748_v60, %v2740_v13  ;;  %v3044_v23 = vpack.c.bf16 %v2796_v44, %v2792_v38  ;;  %v2787_v37 = vld [vmem:[#allocation3 + $0x60] sm:$0xff]  ;;  %v2785_v0 = vld [vmem:[#allocation3 + $0x50] sm:$0xff]  ;;  %v2786_v29 = vld [vmem:[#allocation3 + $0x58] sm:$0xff] }
 0x811   :  { %3123 = vmatpush.bf16.msrb.mxu2 %v3052_v40  ;;  %3147 = vmatpush.bf16.msra.mxu1 %v3061_v57  ;;  %v2752_v7 = vmul.f32 %v2744_v32, %v2739_v30  ;;  %v2830_v40 = vld [vmem:[#allocation3 + $0xb8] sm:$0xff]  ;;  %v2816_v57 = vsel %vm802_vm7, %v2810_v19, %v8431_v20  ;;  %v2743_v44 = vld [vmem:[#allocation3] sm:$0xff]  ;;  %v2789_v13 = vld [vmem:[#allocation3 + $0x70] sm:$0xff] }
 0x812   :  { %v8469_v39 = vpop.permute.xlu0 %2767  ;;  %3173 = vmatpush.bf16.msra.mxu3 %v3062_v5  ;;  %v3053_v10 = vpack.c.bf16 %v2877_v47, %v2873_v33  ;;  %v3054_v55 = vpack.c.bf16 %v2878_v58, %v2874_v59  ;;  %v2838_v42 = vmul.f32 %v2830_v40, %v2816_v57  ;;  %v2728_v17 = vpop.permute.xlu2 %2727  ;;  %v3025_v57 = vld [vmem:[#allocation3 + $0x210] sm:$0xff] }
 0x813   :  { %v2812_v56 = vpop.permute.xlu1 %2811  ;;  %v3040_v52 = vpack.c.bf16 %v2756_v48, %v2752_v7  ;;  %v2775_v3 = vsel %vm10434_vm14, %v8469_v39, %v8314_v45 }
 0x814   :  { %v2821_v21 = vsel %vm802_vm7, %v2812_v56, %v8240_v4  ;;  %v2781_v4 = vsel %vm10430_vm15, %v8314_v45, %v8283_v43  ;;  %v2818_v43 = vsel %vm802_vm7, %v8293_v8, %v2810_v19  ;;  %vm10440_vm15 = vmmov %vm10433_vm2 }
 0x815   :  { %v2831_v26 = vmul.f32 %v2823_v41, %v2821_v21  ;;  %3124 = vmatpush.bf16.msrb.mxu2 %v3048_v12  ;;  %3148 = vmatpush.bf16.msra.mxu1 %v3057_v15  ;;  %v2791_v54 = vmul.f32 %v2783_v51, %v2781_v4  ;;  %v2777_v12 = vsel %vm10435_vm11, %v8184_v62, %v8469_v39  ;;  %v2749_v4 = vld [vmem:[#allocation3 + $0x30] sm:$0xff] }
 0x816   :  { %3174 = vmatpush.bf16.msra.mxu3 %v3058_v34  ;;  %v2794_v62 = vmul.f32 %v2786_v29, %v2775_v3  ;;  %v2737_v51 = vsel %vm10440_vm15, %v8260_v46, %v2728_v17 }
 0x817   :  { %v3047_v27 = vpack.c.bf16 %v2835_v50, %v2831_v26  ;;  %v2793_v26 = vmul.f32 %v2785_v0, %v2777_v12 }
 0x819   :  { %3098 = vmatpush.bf16.msrb.mxu0 %v3047_v27  ;;  %3125 = vmatpush.bf16.msrb.mxu2 %v3044_v23  ;;  %v2745_v27 = vld [vmem:[#allocation3 + $0x10] sm:$0xff] }
 0x81a   :  { %v2774_v5 = vpop.permute.xlu0 %2773  ;;  %3149 = vmatpush.bf16.msra.mxu1 %v3053_v10  ;;  %3175 = vmatpush.bf16.msra.mxu3 %v3054_v55  ;;  %v3014_v47 = vpop.permute.xlu2 %3013  ;;  %v3030_v10 = vld [vmem:[#allocation3 + $0x238] sm:$0xff]  ;;  %v10441_v55 = vld [vmem:[#allocation42_spill] sm:$0xff] }
 0x81b   :  { %v2782_v35 = vsel %vm10431_vm1, %v2774_v5, %v8334_v6  ;;  %v2808_v53 = vpop.permute.xlu1 %2807  ;;  %v2837_v6 = vmul.f32 %v2829_v18, %v2818_v43  ;;  %v3016_v36 = vsel %vm1012_vm10, %v10441_v55, %v3014_v47  ;;  %v3022_v7 = vsel %vm1012_vm10, %v3014_v47, %v8351_v9  ;;  %vm10442_vm1 = vmmov %vm10433_vm2 }
 0x81c   :  { %v2795_v25 = vmul.f32 %v2787_v37, %v2782_v35  ;;  %v2815_v20 = vsel %vm802_vm7, %v2808_v53, %v2812_v56  ;;  %v2817_v8 = vsel %vm802_vm7, %v8236_v61, %v2808_v53  ;;  %v10432_v56 = vld [vmem:[#allocation39_spill] sm:$0xff]  ;;  %v2747_v61 = vld [vmem:[#allocation3 + $0x20] sm:$0xff] }
 0x81d   :  { %v2834_v24 = vmul.f32 %v2826_v28, %v2815_v20  ;;  %v2833_v19 = vmul.f32 %v2825_v63, %v2817_v8  ;;  %3126 = vmatpush.bf16.msrb.mxu2 %v3040_v52  ;;  %v2741_v2 = vsel %vm10433_vm2, %v10432_v56, %v8252_v14  ;;  %v2790_v14 = vld [vmem:[#allocation3 + $0x78] sm:$0xff]  ;;  %v2735_v23 = vsel %vm10439_vm13, %v2728_v17, %v10432_v56  ;;  %vm10443_vm2 = vmmov %vm10442_vm1 }
 0x81e   :  { %v3043_v41 = vpack.c.bf16 %v2795_v25, %v2791_v54  ;;  %v2751_v21 = vmul.f32 %v2743_v44, %v2741_v2  ;;  %v2750_v37 = vld [vmem:[#allocation3 + $0x38] sm:$0xff]  ;;  %v2753_v28 = vmul.f32 %v2745_v27, %v2737_v51  ;;  %v10444_v54 = vld [vmem:[#allocation36_spill] sm:$0xff]  ;;  %v10445_v25 = vld [vmem:[#allocation37_spill] sm:$0xff] }
 0x81f   :  { %v3050_v15 = vpack.c.bf16 %v2838_v42, %v2834_v24  ;;  %v3049_v34 = vpack.c.bf16 %v2837_v6, %v2833_v19  ;;  %v3038_v42 = vmul.f32 %v3030_v10, %v3022_v7 }
 0x820   :  { %3099 = vmatpush.bf16.msrb.mxu0 %v3043_v41  ;;  %3127 = vmatmul.bf16.vlgmr.msrb.gmra.mxu2 %v8521_v16 }
 0x821   :  { %3176 = vmatpush.bf16.msra.mxu3 %v3050_v15  ;;  %3150 = vmatpush.bf16.msra.mxu1 %v3049_v34 }
 0x822   :  { %v2734_v60 = vpop.permute.xlu0 %2733 }
 0x823   :  { %v2742_v33 = vsel %vm10436_vm12, %v2734_v60, %v8238_v22  ;;  %v2770_v58 = vpop.permute.xlu1 %2769  ;;  %v2746_v22 = vld [vmem:[#allocation3 + $0x18] sm:$0xff] }
 0x824   :  { %v2755_v38 = vmul.f32 %v2747_v61, %v2742_v33  ;;  %v2776_v50 = vsel %vm10437_vm8, %v2770_v58, %v2774_v5  ;;  %v2778_v45 = vsel %vm10438_vm9, %v8312_v1, %v2770_v58  ;;  %v3029_v1 = vld [vmem:[#allocation3 + $0x230] sm:$0xff]  ;;  %v3026_v5 = vld [vmem:[#allocation3 + $0x218] sm:$0xff]  ;;  %v2754_v46 = vmul.f32 %v2746_v22, %v2735_v23 }
 0x825   :  { %v2797_v39 = vmul.f32 %v2789_v13, %v2778_v45  ;;  %v2798_v32 = vmul.f32 %v2790_v14, %v2776_v50  ;;  %v3037_v52 = vmul.f32 %v3029_v1, %v3016_v36 }
 0x826   :  { %v3039_v30 = vpack.c.bf16 %v2755_v38, %v2751_v21 }
 0x827   :  { %v3045_v59 = vpack.c.bf16 %v2797_v39, %v2793_v26  ;;  %v3046_v48 = vpack.c.bf16 %v2798_v32, %v2794_v62 }
 0x828   :  { %3100 = vmatpush.bf16.msrb.mxu0 %v3039_v30 }
 0x829   :  { %3151 = vmatpush.bf16.msra.mxu1 %v3045_v59  ;;  %3177 = vmatpush.bf16.msra.mxu3 %v3046_v48 }
 0x82a   :  { %v2730_v40 = vpop.permute.xlu0 %2729 }
 0x82b   :  { %v2736_v18 = vsel %vm10442_vm1, %v2730_v40, %v2734_v60  ;;  %v2738_v43 = vsel %vm10443_vm2, %v8316_v31, %v2730_v40  ;;  %3101 = vmatmul.bf16.vlgmr.msrb.gmra.mxu0 %v8521_v16  ;;  %v3012_v35 = vpop.permute.xlu1 %3011 }
 0x82c   :  { %v2757_v63 = vmul.f32 %v2749_v4, %v2738_v43  ;;  %v2758_v53 = vmul.f32 %v2750_v37, %v2736_v18  ;;  %v3015_v9 = vsel %vm1012_vm10, %v10444_v54, %v3012_v35  ;;  %v3021_v20 = vsel %vm1012_vm10, %v3012_v35, %v10445_v25 }
 0x82d   :  { %v3033_v17 = vmul.f32 %v3025_v57, %v3015_v9  ;;  %v3034_v8 = vmul.f32 %v3026_v5, %v3021_v20 }
 0x82e   :  { %v3041_v24 = vpack.c.bf16 %v2757_v63, %v2753_v28  ;;  %v3042_v6 = vpack.c.bf16 %v2758_v53, %v2754_v46 }
 0x82f   :  { %v3073_v31 = vpack.c.bf16 %v3037_v52, %v3033_v17  ;;  %v3074_v19 = vpack.c.bf16 %v3038_v42, %v3034_v8 }
 0x830   :  { %3152 = vmatpush.bf16.msra.mxu1 %v3041_v24  ;;  %3178 = vmatpush.bf16.msra.mxu3 %v3042_v6 }
 0x831   :  { %3165 = vmatpush.bf16.msra.mxu0 %v3073_v31  ;;  %3191 = vmatpush.bf16.msra.mxu2 %v3074_v19 }
 0x832   :  { %v3082_v2 = vpop.permute.xlu0 %3081 }
 0x833   :  { %3153 = vmatmul.bf16.vlgmr.msra.gmra.mxu1 %v8521_v16  ;;  %3179 = vmatmul.bf16.vlgmr.msra.gmra.mxu3 %v8521_v16 }
 0x834   :  { %5435 = vmatmul.msk.bf16.vlgmr.msra.gmra.mxu2 %vm134_vm0, %v8413_v11 }
 0x83b   :  { %5434 = vmatmul.msk.bf16.vlgmr.msra.gmra.mxu0 %vm134_vm0, %v8413_v11 }
 0x87f   :  { %v3115_v41 = vpop.f32.mrf.mxu1 }
 0x885   :  { %v3141_v15 = vpop.f32.mrf.mxu3 }
 0x887   :  { %v3117_v34 = vpop.f32.mrf.mxu1 }
 0x88d   :  { %v3143_v44 = vpop.f32.mrf.mxu3 }
 0x8a3   :  { %v3128_v56 = vpop.f32.mrf.mxu2 }
 0x8a4   :  { %v3129_v60 = vadd.f32 %v3128_v56, %v3082_v2 }
 0x8a6   :  { %v8574_v14 = vadd.f32 %v3141_v15, %v3129_v60 }
 0x8a8   :  { %v3102_v0 = vpop.f32.mrf.mxu0  ;;  %v5437_v21 = vmul.f32 -1.442695, %v8574_v14 }
 0x8a9   :  { %v3103_v61 = vadd.f32 %v3102_v0, %v3082_v2 }
 0x8ab   :  { %v3116_v29 = vadd.f32 %v3115_v41, %v3103_v61  ;;  %v3130_v3 = vpop.f32.mrf.mxu2 }
 0x8ad   :  { %v5436_v12 = vmul.f32 -1.442695, %v3116_v29 }
 0x8af   :  { %5777 = vpow2.f32 %v5436_v12 }
 0x8b0   :  { %v3104_v16 = vpop.f32.mrf.mxu0  ;;  %v3154_v13 = vpop.f32.mrf.mxu1 }
 0x8b1   :  { %v3155_v38 = vadd.f32 %v3154_v13, %v3082_v2 }
 0x8b5   :  { %v5778_v33 = vpop.eup %5777 }
 0x8b6   :  { %v3209_v58 = vadd.f32 1.0, %v5778_v33  ;;  %v3180_v11 = vpop.f32.mrf.mxu3 }
 0x8b7   :  { %v3193_v50 = vpop.f32.mrf.mxu2  ;;  %v3181_v40 = vadd.f32 %v3180_v11, %v3082_v2 }
 0x8b8   :  { %5779 = vrcp.f32 %v3209_v58  ;;  %v3156_v45 = vpop.f32.mrf.mxu1  ;;  %v3167_v26 = vpop.f32.mrf.mxu0  ;;  %v3224_v23 = vand.u32 2147483648, %v3209_v58  ;;  %v3222_v4 = vand.u32 2147483647, %v3209_v58  ;;  %vm3218_vm11 = vweird.f32 %v3209_v58 }
 0x8b9   :  { %v3168_v62 = vadd.f32 %v3167_v26, %v3155_v38  ;;  %5781 = vpow2.f32 %v5437_v21  ;;  %v8579_v28 = vadd.f32 %v3193_v50, %v3181_v40  ;;  %v5442_v21 = vld [vmem:[%s10297_s10 + $0x20] sm:$0xff]  ;;  %v5443_v38 = vld [vmem:[%s10297_s10 + $0x28] sm:$0xff] }
 0x8ba   :  { %v3225_v36 = vor.u32 1.1754944e-38, %v3224_v23  ;;  %vm3223_vm8 = vcmp.eq.f32.partialorder %v3222_v4, 8.507059e+37  ;;  %v3432_v4 = vld [vmem:[#allocation6 + $0x118] sm:$0xff]  ;;  %v3429_v40 = vld [vmem:[#allocation6 + $0x100] sm:$0xff] }
 0x8bb   :  { %v5438_v39 = vmul.f32 -1.442695, %v3168_v62  ;;  %v5439_v63 = vmul.f32 -1.442695, %v8579_v28 }
 0x8bd   :  { %5783 = vpow2.f32 %v5438_v39 }
 0x8be   :  { %v5780_v32 = vpop.eup %5779  ;;  %v3182_v30 = vpop.f32.mrf.mxu3 }
 0x8bf   :  { %v3214_v47 = vmul.f32 %v5780_v32, %v3209_v58  ;;  %v3195_v59 = vpop.f32.mrf.mxu2  ;;  %v5782_v27 = vpop.eup %5781  ;;  %vm3219_vm14 = vweird.f32 %v5780_v32 }
 0x8c0   :  { %v3169_v48 = vpop.f32.mrf.mxu0  ;;  %v3210_v37 = vadd.f32 1.0, %v5782_v27  ;;  %vm3220_vm12 = vmor %vm3218_vm11, %vm3219_vm14 }
 0x8c1   :  { %v3215_v22 = vsub.f32 1.0, %v3214_v47 }
 0x8c2   :  { %v3239_v15 = vand.u32 2147483648, %v3210_v37  ;;  %vm3233_vm14 = vweird.f32 %v3210_v37  ;;  %v3237_v34 = vand.u32 2147483647, %v3210_v37 }
 0x8c3   :  { %v5784_v51 = vpop.eup %5783  ;;  %v3216_v1 = vmul.f32 %v5780_v32, %v3215_v22 }
 0x8c4   :  { %v3211_v10 = vadd.f32 1.0, %v5784_v51  ;;  %v3240_v56 = vor.u32 1.1754944e-38, %v3239_v15  ;;  %v3389_v15 = vld [vmem:[#allocation6 + $0xc0] sm:$0xff] }
 0x8c5   :  { %v3217_v55 = vadd.f32 %v5780_v32, %v3216_v1  ;;  %v3431_v1 = vld [vmem:[#allocation6 + $0x110] sm:$0xff] }
 0x8c6   :  { %5785 = vrcp.f32 %v3211_v10  ;;  %v3254_v53 = vand.u32 2147483648, %v3211_v10  ;;  %v3252_v25 = vand.u32 2147483647, %v3211_v10  ;;  %vm3248_vm13 = vweird.f32 %v3211_v10 }
 0x8c7   :  { %v3221_v7 = vsel %vm3220_vm12, %v5780_v32, %v3217_v55  ;;  %5787 = vrcp.f32 %v3210_v37  ;;  %vm3238_vm12 = vcmp.eq.f32.partialorder %v3237_v34, 8.507059e+37  ;;  %v3430_v55 = vld [vmem:[#allocation6 + $0x108] sm:$0xff] }
 0x8c8   :  { %v3226_v57 = vsel %vm3223_vm8, %v3225_v36, %v3221_v7  ;;  %5789 = vpow2.f32 %v5439_v63  ;;  %v3255_v52 = vor.u32 1.1754944e-38, %v3254_v53  ;;  %vm3253_vm1 = vcmp.eq.f32.partialorder %v3252_v25, 8.507059e+37  ;;  %v3390_v34 = vld [vmem:[#allocation6 + $0xc8] sm:$0xff] }
 0x8c9   :  { %v8577_v5 = vmul.f32 %v3226_v57, %v3116_v29 }
 0x8cb   :  { %3377 = vrot.lane.b32.xlu1 %v8577_v5, %s6053_s5  ;;  %3417 = vrot.lane.b32.xlu0 %v8577_v5, %s6059_s1 }
 0x8cc   :  { %v5786_v46 = vpop.eup %5785 }
 0x8cd   :  { %v3244_v18 = vmul.f32 %v5786_v46, %v3211_v10  ;;  %v5788_v43 = vpop.eup %5787  ;;  %vm3249_vm9 = vweird.f32 %v5786_v46 }
 0x8ce   :  { %v3229_v54 = vmul.f32 %v5788_v43, %v3210_v37  ;;  %vm3250_vm15 = vmor %vm3248_vm13, %vm3249_vm9  ;;  %v5790_v6 = vpop.eup %5789  ;;  %vm3234_vm2 = vweird.f32 %v5788_v43 }
 0x8cf   :  { %v3245_v35 = vsub.f32 1.0, %v3244_v18  ;;  %v3212_v19 = vadd.f32 1.0, %v5790_v6  ;;  %vm3235_vm11 = vmor %vm3233_vm14, %vm3234_vm2 }
 0x8d0   :  { %v3230_v42 = vsub.f32 1.0, %v3229_v54 }
 0x8d1   :  { %v3246_v9 = vmul.f32 %v5786_v46, %v3245_v35  ;;  %5791 = vrcp.f32 %v3212_v19  ;;  %v3269_v16 = vand.u32 2147483648, %v3212_v19  ;;  %vm3263_vm9 = vweird.f32 %v3212_v19 }
 0x8d2   :  { %v3231_v31 = vmul.f32 %v5788_v43, %v3230_v42  ;;  %v3267_v13 = vand.u32 2147483647, %v3212_v19 }
 0x8d3   :  { %v3247_v20 = vadd.f32 %v5786_v46, %v3246_v9  ;;  %v3270_v33 = vor.u32 1.1754944e-38, %v3269_v16 }
 0x8d4   :  { %v3232_v41 = vadd.f32 %v5788_v43, %v3231_v31 }
 0x8d5   :  { %v3251_v17 = vsel %vm3250_vm15, %v5786_v46, %v3247_v20  ;;  %vm3268_vm15 = vcmp.eq.f32.partialorder %v3267_v13, 8.507059e+37 }
 0x8d6   :  { %v3256_v8 = vsel %vm3253_vm1, %v3255_v52, %v3251_v17  ;;  %v3236_v44 = vsel %vm3235_vm11, %v5788_v43, %v3232_v41  ;;  %vm10446_vm1 = vcmask 1043456   ;;  %v3409_v17 = vld [vmem:[#allocation6 + $0xe0] sm:$0xff] }
 0x8d7   :  { %v8586_v24 = vmul.f32 %v3256_v8, %v3168_v62  ;;  %v3241_v2 = vsel %vm3238_vm12, %v3240_v56, %v3236_v44  ;;  %v5792_v0 = vpop.eup %5791  ;;  %vm10447_vm2 = vmmov %vm10446_vm1  ;;  %v3410_v8 = vld [vmem:[#allocation6 + $0xe8] sm:$0xff]  ;;  %vm10450_vm12 = vcmp.lt.s32.totalorder %v6509_v49, 17 }
 0x8d8   :  { %v8601_v61 = vmul.f32 %v3241_v2, %v8574_v14  ;;  %v3259_v29 = vmul.f32 %v5792_v0, %v3212_v19  ;;  %vm3264_vm8 = vweird.f32 %v5792_v0  ;;  %vm10448_vm14 = vmmov %vm10446_vm1  ;;  %v3370_v2 = vld [vmem:[#allocation6 + $0xa8] sm:$0xff] }
 0x8d9   :  { %3401 = vrot.lane.b32.xlu2 %v8586_v24, %s6054_s6  ;;  %3381 = vrot.lane.b32.xlu0 %v8586_v24, %s6053_s5  ;;  %vm3265_vm13 = vmor %vm3263_vm9, %vm3264_vm8  ;;  %vm10451_vm8 = vcmp.lt.s32.totalorder %v6509_v49, 16 }
 0x8da   :  { %3421 = vrot.lane.b32.xlu1 %v8586_v24, %s6059_s1  ;;  %v3260_v3 = vsub.f32 1.0, %v3259_v29  ;;  %vm10449_vm11 = vmmov %vm10446_vm1 }
 0x8db   :  { %vm10452_vm9 = vmmov %vm10450_vm12 }
 0x8dc   :  { %v3261_v12 = vmul.f32 %v5792_v0, %v3260_v3 }
 0x8de   :  { %v3262_v60 = vadd.f32 %v5792_v0, %v3261_v12 }
 0x8e0   :  { %v3266_v14 = vsel %vm3265_vm13, %v5792_v0, %v3262_v60  ;;  %vm10453_vm13 = vmmov %vm10451_vm8 }
 0x8e1   :  { %3361 = vrot.lane.b32.xlu2 %v8586_v24, %s6056_s25  ;;  %3301 = vrot.lane.b32.xlu0 %v8586_v24, %s6057_s28  ;;  %v3271_v58 = vsel %vm3268_vm15, %v3270_v33, %v3266_v14  ;;  %vm10454_vm15 = vcmask 588800  }
 0x8e2   :  { %3341 = vrot.lane.b32.xlu1 %v8586_v24, %s6052_s3  ;;  %v8622_v11 = vmul.f32 %v3271_v58, %v8579_v28 }
 0x8e9   :  { %3321 = vrot.lane.b32.xlu2 %v8586_v24, %s6055_s24  ;;  %3339 = vrot.lane.b32.xlu0 %v8601_v61, %s6052_s3 }
 0x8ea   :  { %3281 = vrot.lane.b32.xlu1 %v8586_v24, %s6058_s29 }
 0x8f1   :  { %3399 = vrot.lane.b32.xlu2 %v8601_v61, %s6054_s6  ;;  %3279 = vrot.lane.b32.xlu0 %v8601_v61, %s6058_s29 }
 0x8f2   :  { %3419 = vrot.lane.b32.xlu1 %v8601_v61, %s6059_s1 }
 0x8f9   :  { %3359 = vrot.lane.b32.xlu2 %v8601_v61, %s6056_s25  ;;  %3317 = vrot.lane.b32.xlu0 %v8577_v5, %s6055_s24 }
 0x8fa   :  { %3379 = vrot.lane.b32.xlu1 %v8601_v61, %s6053_s5 }
 0x901   :  { %3299 = vrot.lane.b32.xlu2 %v8601_v61, %s6057_s28  ;;  %3403 = vrot.lane.b32.xlu0 %v8622_v11, %s6054_s6 }
 0x902   :  { %3319 = vrot.lane.b32.xlu1 %v8601_v61, %s6055_s24 }
 0x909   :  { %3423 = vrot.lane.b32.xlu2 %v8622_v11, %s6059_s1  ;;  %3363 = vrot.lane.b32.xlu0 %v8622_v11, %s6056_s25 }
 0x90a   :  { %3383 = vrot.lane.b32.xlu1 %v8622_v11, %s6053_s5 }
 0x911   :  { %3397 = vrot.lane.b32.xlu2 %v8577_v5, %s6054_s6  ;;  %3277 = vrot.lane.b32.xlu0 %v8577_v5, %s6058_s29 }
 0x912   :  { %3337 = vrot.lane.b32.xlu1 %v8577_v5, %s6052_s3 }
 0x919   :  { %3357 = vrot.lane.b32.xlu2 %v8577_v5, %s6056_s25  ;;  %3343 = vrot.lane.b32.xlu0 %v8622_v11, %s6052_s3 }
 0x91a   :  { %3297 = vrot.lane.b32.xlu1 %v8577_v5, %s6057_s28 }
 0x921   :  { %3323 = vrot.lane.b32.xlu2 %v8622_v11, %s6055_s24  ;;  %3465 = vperm.xlu0 %5646, %v5442_v21   ;;  %v3369_v21 = vld [vmem:[#allocation6 + $0xa0] sm:$0xff] }
 0x922   :  { %3283 = vrot.lane.b32.xlu1 %v8622_v11, %s6058_s29 }
 0x929   :  { %3303 = vrot.lane.b32.xlu2 %v8622_v11, %s6057_s28 }
 0x92a   :  { %3470 = vperm.xlu1 %5647, %v5443_v38  }
 0x933   :  { %v8660_v50 = vpop.permute.xlu2 %3401 }
 0x93b   :  { %v8662_v45 = vpop.permute.xlu2 %3361 }
 0x93d   :  { %v3418_v26 = vpop.permute.xlu0 %3417  ;;  %v8666_v39 = vpop.permute.xlu1 %3377 }
 0x943   :  { %v8664_v62 = vpop.permute.xlu2 %3321 }
 0x94b   :  { %v3400_v32 = vpop.permute.xlu2 %3399  ;;  %v8668_v30 = vpop.permute.xlu0 %3381 }
 0x94c   :  { %v3422_v47 = vpop.permute.xlu1 %3421  ;;  %v3406_v6 = vsel %vm970_vm3, %v3400_v32, %v8660_v50 }
 0x94d   :  { %v3414_v60 = vmul.f32 %v3410_v8, %v3406_v6  ;;  %v3330_v8 = vld [vmem:[#allocation6 + $0x48] sm:$0xff] }
 0x94e   :  { %v3350_v6 = vld [vmem:[#allocation6 + $0x68] sm:$0xff] }
 0x953   :  { %v3360_v59 = vpop.permute.xlu2 %3359  ;;  %v8670_v48 = vpop.permute.xlu0 %3301 }
 0x954   :  { %v8672_v27 = vpop.permute.xlu1 %3341  ;;  %v3366_v0 = vsel %vm886_vm5, %v3360_v59, %v8662_v45 }
 0x955   :  { %v3374_v14 = vmul.f32 %v3370_v2, %v3366_v0 }
 0x95b   :  { %v8674_v22 = vpop.permute.xlu2 %3299  ;;  %v8676_v23 = vpop.permute.xlu0 %3339 }
 0x95c   :  { %v8678_v51 = vpop.permute.xlu1 %3281 }
 0x963   :  { %v3424_v37 = vpop.permute.xlu2 %3423  ;;  %v8680_v10 = vpop.permute.xlu0 %3279 }
 0x964   :  { %v3425_v36 = vsel %vm1012_vm10, %v3422_v47, %v3424_v37  ;;  %v3428_v7 = vsel %vm1012_vm10, %v3424_v37, %v3418_v26  ;;  %v3420_v57 = vpop.permute.xlu1 %3419 }
 0x965   :  { %v3435_v28 = vmul.f32 %v3431_v1, %v3425_v36  ;;  %v3436_v46 = vmul.f32 %v3432_v4, %v3428_v7  ;;  %v3426_v18 = vsel %vm1012_vm10, %v3420_v57, %v3422_v47  ;;  %v3427_v43 = vsel %vm1012_vm10, %v3418_v26, %v3420_v57  ;;  %v3412_v7 = vld [vmem:[#allocation6 + $0xf8] sm:$0xff] }
 0x966   :  { %v3434_v35 = vmul.f32 %v3430_v55, %v3426_v18  ;;  %v3433_v54 = vmul.f32 %v3429_v40, %v3427_v43  ;;  %v3446_v1 = vpack.c.bf16 %v3374_v14, %v8601_v61  ;;  %v3411_v55 = vld [vmem:[#allocation6 + $0xf0] sm:$0xff]  ;;  %v3372_v61 = vld [vmem:[#allocation6 + $0xb8] sm:$0xff] }
 0x967   :  { %v3455_v63 = vpack.c.bf16 %v3435_v28, %v3435_v28  ;;  %v3456_v53 = vpack.c.bf16 %v3436_v46, %v3436_v46  ;;  %v3391_v28 = vld [vmem:[#allocation6 + $0xd0] sm:$0xff] }
 0x968   :  { %v3454_v9 = vpack.c.bf16 %v3434_v35, %v3434_v35  ;;  %v3453_v25 = vpack.c.bf16 %v3433_v54, %v3433_v54  ;;  %v3371_v18 = vld [vmem:[#allocation6 + $0xb0] sm:$0xff] }
 0x969   :  { %v3488_v20 = vsel %vm10446_vm1, %v3455_v63, 0  ;;  %v3491_v52 = vsel %vm10447_vm2, %v3456_v53, 0  ;;  %vm10455_vm1 = vmmov %vm10451_vm8 }
 0x96a   :  { %v3485_v42 = vsel %vm10448_vm14, %v3454_v9, 0  ;;  %3524 = vmatpush.bf16.msrb.mxu2 %v3488_v20  ;;  %3538 = vmatpush.bf16.msrb.mxu3 %v3491_v52  ;;  %v3482_v31 = vsel %vm10449_vm11, %v3453_v25, 0  ;;  %vm10456_vm2 = vmmov %vm10455_vm1 }
 0x96b   :  { %3510 = vmatpush.bf16.msrb.mxu1 %v3485_v42  ;;  %v3398_v19 = vpop.permute.xlu2 %3397  ;;  %v8697_v41 = vpop.permute.xlu0 %3317  ;;  %3496 = vmatpush.bf16.msrb.mxu0 %v3482_v31  ;;  %v3351_v31 = vld [vmem:[#allocation6 + $0x70] sm:$0xff]  ;;  %vm10457_vm14 = vmmov %vm10452_vm9 }
 0x96c   :  { %v3407_v44 = vsel %vm970_vm3, %v3398_v19, %v3400_v32  ;;  %v3380_v56 = vpop.permute.xlu1 %3379  ;;  %vm10458_vm11 = vmmov %vm10452_vm9 }
 0x96d   :  { %v3413_v29 = vmul.f32 %v3409_v17, %v3407_v44  ;;  %v3386_v3 = vsel %vm928_vm4, %v3380_v56, %v8668_v30  ;;  %v3387_v12 = vsel %vm928_vm4, %v8666_v39, %v3380_v56  ;;  %v3291_v44 = vld [vmem:[#allocation6 + $0x10] sm:$0xff] }
 0x96e   :  { %v3393_v16 = vmul.f32 %v3389_v15, %v3387_v12  ;;  %v3394_v13 = vmul.f32 %v3390_v34, %v3386_v3  ;;  %v3286_v15 = vsel %vm10450_vm12, %v8680_v10, %v8678_v51  ;;  %vm10459_vm12 = vmmov %vm10454_vm15 }
 0x970   :  { %v3449_v33 = vpack.c.bf16 %v3413_v29, %v3393_v16  ;;  %v3450_v58 = vpack.c.bf16 %v3414_v60, %v3394_v13  ;;  %v3311_v16 = vld [vmem:[#allocation6 + $0x30] sm:$0xff]  ;;  %v3306_v13 = vsel %vm10451_vm8, %v8674_v22, %v8670_v48  ;;  %vm10460_vm8 = vmmov %vm10459_vm12 }
 0x972   :  { %3497 = vmatpush.bf16.msrb.mxu0 %v3449_v33  ;;  %3511 = vmatpush.bf16.msrb.mxu1 %v3450_v58  ;;  %v3295_v33 = vmul.f32 %v3291_v44, %v3286_v15 }
 0x973   :  { %v3358_v38 = vpop.permute.xlu2 %3357  ;;  %v3404_v26 = vpop.permute.xlu0 %3403 }
 0x974   :  { %v3367_v32 = vsel %vm886_vm5, %v3358_v38, %v3360_v59  ;;  %v3320_v47 = vpop.permute.xlu1 %3319  ;;  %v3405_v40 = vsel %vm970_vm3, %v8660_v50, %v3404_v26  ;;  %v3408_v57 = vsel %vm970_vm3, %v3404_v26, %v3398_v19  ;;  %v3392_v59 = vld [vmem:[#allocation6 + $0xd8] sm:$0xff]  ;;  %v3346_v19 = vsel %vm844_vm6, %v8676_v23, %v8672_v27 }
 0x975   :  { %v3373_v4 = vmul.f32 %v3369_v21, %v3367_v32  ;;  %v3415_v63 = vmul.f32 %v3411_v55, %v3405_v40  ;;  %v3416_v53 = vmul.f32 %v3412_v7, %v3408_v57  ;;  %v3326_v17 = vsel %vm802_vm7, %v3320_v47, %v8664_v62  ;;  %v3329_v21 = vld [vmem:[#allocation6 + $0x40] sm:$0xff]  ;;  %v3310_v55 = vld [vmem:[#allocation6 + $0x28] sm:$0xff] }
 0x976   :  { %3512 = vmatpush.bf16.msrb.mxu1 %v3446_v1  ;;  %v3355_v14 = vmul.f32 %v3351_v31, %v3346_v19  ;;  %v3349_v32 = vld [vmem:[#allocation6 + $0x60] sm:$0xff]  ;;  %v3290_v1 = vld [vmem:[#allocation6 + $0x8] sm:$0xff] }
 0x977   :  { %v3445_v37 = vpack.c.bf16 %v3373_v4, %v8577_v5 }
 0x979   :  { %3498 = vmatpush.bf16.msrb.mxu0 %v3445_v37 }
 0x97b   :  { %v3364_v36 = vpop.permute.xlu0 %3363  ;;  %v3324_v12 = vpop.permute.xlu2 %3323 }
 0x97c   :  { %v3384_v46 = vpop.permute.xlu1 %3383  ;;  %v3365_v5 = vsel %vm886_vm5, %v8662_v45, %v3364_v36  ;;  %v3368_v43 = vsel %vm886_vm5, %v3364_v36, %v3358_v38  ;;  %v3331_v45 = vld [vmem:[#allocation6 + $0x50] sm:$0xff]  ;;  %v3332_v38 = vld [vmem:[#allocation6 + $0x58] sm:$0xff]  ;;  %v3325_v26 = vsel %vm802_vm7, %v8664_v62, %v3324_v12 }
 0x97d   :  { %v3385_v35 = vsel %vm928_vm4, %v8668_v30, %v3384_v46  ;;  %v3388_v50 = vsel %vm928_vm4, %v3384_v46, %v8666_v39  ;;  %v3375_v25 = vmul.f32 %v3371_v18, %v3365_v5  ;;  %v3376_v20 = vmul.f32 %v3372_v61, %v3368_v43  ;;  %v5608_v61 = vld [vmem:[%s10296_s9 + $0x10] sm:$0xff] }
 0x97e   :  { %v3395_v54 = vmul.f32 %v3391_v28, %v3385_v35  ;;  %v3396_v9 = vmul.f32 %v3392_v59, %v3388_v50  ;;  %v3327_v30 = vsel %vm802_vm7, %v8697_v41, %v3320_v47  ;;  %v3335_v56 = vmul.f32 %v3331_v45, %v3326_v17  ;;  %v3352_v47 = vld [vmem:[#allocation6 + $0x78] sm:$0xff] }
 0x97f   :  { %v3447_v0 = vpack.c.bf16 %v3375_v25, %v8586_v24  ;;  %v3448_v29 = vpack.c.bf16 %v3376_v20, %v8622_v11  ;;  %v3334_v3 = vmul.f32 %v3330_v8, %v3327_v30  ;;  %v3328_v24 = vsel %vm802_vm7, %v3324_v12, %v8697_v41  ;;  %v3312_v50 = vld [vmem:[#allocation6 + $0x38] sm:$0xff] }
 0x980   :  { %v3451_v52 = vpack.c.bf16 %v3415_v63, %v3395_v54  ;;  %v3452_v42 = vpack.c.bf16 %v3416_v53, %v3396_v9  ;;  %v3443_v11 = vpack.c.bf16 %v3355_v14, %v3335_v56  ;;  %v3333_v41 = vmul.f32 %v3329_v21, %v3328_v24  ;;  %v3309_v63 = vld [vmem:[#allocation6 + $0x20] sm:$0xff]  ;;  %v3292_v9 = vld [vmem:[#allocation6 + $0x18] sm:$0xff] }
 0x981   :  { %v3336_v57 = vmul.f32 %v3332_v38, %v3325_v26  ;;  %v3289_v54 = vld [vmem:[#allocation6] sm:$0xff] }
 0x982   :  { %3525 = vmatpush.bf16.msrb.mxu2 %v3451_v52  ;;  %3539 = vmatpush.bf16.msrb.mxu3 %v3452_v42 }
 0x983   :  { %v8736_v39 = vpop.permute.xlu0 %3277  ;;  %v3304_v43 = vpop.permute.xlu2 %3303 }
 0x984   :  { %v3338_v34 = vpop.permute.xlu1 %3337  ;;  %v3287_v4 = vsel %vm10452_vm9, %v8736_v39, %v8680_v10  ;;  %vm10461_vm9 = vmmov %vm10460_vm8 }
 0x985   :  { %v3347_v2 = vsel %vm844_vm6, %v3338_v34, %v8676_v23  ;;  %v3315_v23 = vmul.f32 %v3311_v16, %v3306_v13  ;;  %v3294_v46 = vmul.f32 %v3290_v1, %v3287_v4 }
 0x986   :  { %v3354_v60 = vmul.f32 %v3350_v6, %v3347_v2  ;;  %3526 = vmatpush.bf16.msrb.mxu2 %v3447_v0  ;;  %3540 = vmatpush.bf16.msrb.mxu3 %v3448_v29 }
 0x987   :  { %v3439_v40 = vpack.c.bf16 %v3315_v23, %v3295_v33 }
 0x988   :  { %v3442_v58 = vpack.c.bf16 %v3354_v60, %v3334_v3 }
 0x98a   :  { %3513 = vmatpush.bf16.msrb.mxu1 %v3442_v58  ;;  %3527 = vmatpush.bf16.msrb.mxu2 %v3443_v11 }
 0x98b   :  { %v3344_v37 = vpop.permute.xlu0 %3343 }
 0x98c   :  { %v3345_v36 = vsel %vm844_vm6, %v8672_v27, %v3344_v37  ;;  %v3348_v62 = vsel %vm844_vm6, %v3344_v37, %v3338_v34  ;;  %v3298_v7 = vpop.permute.xlu1 %3297 }
 0x98d   :  { %v3353_v28 = vmul.f32 %v3349_v32, %v3348_v62  ;;  %v3356_v59 = vmul.f32 %v3352_v47, %v3345_v36  ;;  %v3307_v10 = vsel %vm10453_vm13, %v3298_v7, %v8674_v22  ;;  %v3305_v22 = vsel %vm10455_vm1, %v8670_v48, %v3304_v43 }
 0x98e   :  { %v3314_v18 = vmul.f32 %v3310_v55, %v3307_v10  ;;  %3528 = vmatpush.bf16.msrb.mxu2 %v3439_v40  ;;  %v3308_v53 = vsel %vm10456_vm2, %v3304_v43, %v3298_v7  ;;  %v3316_v42 = vmul.f32 %v3312_v50, %v3305_v22 }
 0x98f   :  { %v3441_v27 = vpack.c.bf16 %v3353_v28, %v3333_v41  ;;  %v3444_v5 = vpack.c.bf16 %v3356_v59, %v3336_v57  ;;  %v3313_v45 = vmul.f32 %v3309_v63, %v3308_v53 }
 0x990   :  { %v3438_v35 = vpack.c.bf16 %v3314_v18, %v3294_v46 }
 0x991   :  { %3499 = vmatpush.bf16.msrb.mxu0 %v3441_v27  ;;  %3541 = vmatpush.bf16.msrb.mxu3 %v3444_v5 }
 0x992   :  { %5450 = vmatmul.msk.bf16.vlgmr.msrb.gmra.mxu2 %vm10454_vm15, %v5608_v61  ;;  %3514 = vmatpush.bf16.msrb.mxu1 %v3438_v35 }
 0x993   :  { %v3466_v6 = vpop.permute.xlu0 %3465 }
 0x994   :  { %v3284_v25 = vpop.permute.xlu1 %3283 }
 0x995   :  { %v3285_v20 = vsel %vm10457_vm14, %v8678_v51, %v3284_v25  ;;  %v3288_v52 = vsel %vm10458_vm11, %v3284_v25, %v8736_v39  ;;  %5449 = vmatmul.msk.bf16.vlgmr.msrb.gmra.mxu1 %vm10459_vm12, %v5608_v61 }
 0x996   :  { %v3293_v48 = vmul.f32 %v3289_v54, %v3288_v52  ;;  %v3296_v17 = vmul.f32 %v3292_v9, %v3285_v20 }
 0x998   :  { %v3437_v8 = vpack.c.bf16 %v3313_v45, %v3293_v48  ;;  %v3440_v30 = vpack.c.bf16 %v3316_v42, %v3296_v17 }
 0x99a   :  { %3500 = vmatpush.bf16.msrb.mxu0 %v3437_v8  ;;  %3542 = vmatpush.bf16.msrb.mxu3 %v3440_v30 }
 0x99c   :  { %v3471_v44 = vpop.permute.xlu1 %3470 }
 0x99d   :  { %5448 = vmatmul.msk.bf16.vlgmr.msrb.gmra.mxu0 %vm10460_vm8, %v5608_v61  ;;  %5451 = vmatmul.msk.bf16.vlgmr.msrb.gmra.mxu3 %vm10461_vm9, %v5608_v61 }
 0xa12   :  { %v3516_v51 = vpop.f32.mrf.mxu1 }
 0xa13   :  { %v8791_v31 = vadd.f32 %v3516_v51, %v3466_v6 }
 0xa15   :  { %v5453_v39 = vmul.f32 -1.442695, %v8791_v31  ;;  %v3530_v19 = vpop.f32.mrf.mxu2 }
 0xa16   :  { %v8794_v15 = vadd.f32 %v3530_v19, %v3466_v6 }
 0xa17   :  { %5793 = vpow2.f32 %v5453_v39 }
 0xa18   :  { %v5454_v34 = vmul.f32 -1.442695, %v8794_v15 }
 0xa1a   :  { %5795 = vpow2.f32 %v5454_v34  ;;  %v3502_v56 = vpop.f32.mrf.mxu0  ;;  %v3518_v2 = vpop.f32.mrf.mxu1 }
 0xa1b   :  { %v8797_v0 = vadd.f32 %v3502_v56, %v3466_v6  ;;  %v8799_v29 = vadd.f32 %v3518_v2, %v3471_v44 }
 0xa1d   :  { %v5794_v3 = vpop.eup %5793  ;;  %v5452_v12 = vmul.f32 -1.442695, %v8797_v0  ;;  %v5457_v60 = vmul.f32 -1.442695, %v8799_v29  ;;  %v3532_v16 = vpop.f32.mrf.mxu2 }
 0xa1e   :  { %v3574_v13 = vadd.f32 1.0, %v5794_v3  ;;  %v8803_v14 = vadd.f32 %v3532_v16, %v3471_v44 }
 0xa1f   :  { %5797 = vpow2.f32 %v5452_v12 }
 0xa20   :  { %v5796_v33 = vpop.eup %5795  ;;  %5799 = vrcp.f32 %v3574_v13  ;;  %v3544_v58 = vpop.f32.mrf.mxu3  ;;  %v5458_v24 = vmul.f32 -1.442695, %v8803_v14  ;;  %v3607_v57 = vand.u32 2147483648, %v3574_v13  ;;  %v3605_v10 = vand.u32 2147483647, %v3574_v13 }
 0xa21   :  { %v8805_v21 = vadd.f32 1.0, %v5796_v33  ;;  %5801 = vpow2.f32 %v5457_v60  ;;  %v8808_v11 = vadd.f32 %v3544_v58, %v3466_v6  ;;  %vm3601_vm15 = vweird.f32 %v3574_v13 }
 0xa22   :  { %v3504_v23 = vpop.f32.mrf.mxu0  ;;  %v3608_v50 = vor.u32 1.1754944e-38, %v3607_v57  ;;  %vm3606_vm2 = vcmp.eq.f32.partialorder %v3605_v10, 8.507059e+37 }
 0xa23   :  { %5803 = vrcp.f32 %v8805_v21  ;;  %v5455_v38 = vmul.f32 -1.442695, %v8808_v11  ;;  %v8812_v26 = vadd.f32 %v3504_v23, %v3471_v44  ;;  %v3620_v34 = vand.u32 2147483647, %v8805_v21 }
 0xa24   :  { %5805 = vpow2.f32 %v5458_v24  ;;  %vm3616_vm9 = vweird.f32 %v8805_v21 }
 0xa25   :  { %v5798_v32 = vpop.eup %5797  ;;  %5807 = vpow2.f32 %v5455_v38  ;;  %v5456_v4 = vmul.f32 -1.442695, %v8812_v26 }
 0xa26   :  { %v5800_v47 = vpop.eup %5799  ;;  %v8814_v1 = vadd.f32 1.0, %v5798_v32 }
 0xa27   :  { %v5802_v37 = vpop.eup %5801  ;;  %v3597_v55 = vmul.f32 %v5800_v47, %v3574_v13  ;;  %vm3602_vm13 = vweird.f32 %v5800_v47 }
 0xa28   :  { %5809 = vrcp.f32 %v8814_v1  ;;  %v8820_v62 = vadd.f32 1.0, %v5802_v37  ;;  %v3546_v7 = vpop.f32.mrf.mxu3  ;;  %vm3603_vm1 = vmor %vm3601_vm15, %vm3602_vm13  ;;  %v3592_v45 = vand.u32 2147483648, %v8814_v1  ;;  %v3590_v8 = vand.u32 2147483647, %v8814_v1 }
 0xa29   :  { %v8818_v41 = vpop.eup %5803  ;;  %v3598_v36 = vsub.f32 1.0, %v3597_v55  ;;  %5811 = vpow2.f32 %v5456_v4  ;;  %v8827_v61 = vadd.f32 %v3546_v7, %v3471_v44  ;;  %vm3586_vm11 = vweird.f32 %v8814_v1 }
 0xa2a   :  { %v5806_v40 = vpop.eup %5805  ;;  %v3612_v28 = vmul.f32 %v8818_v41, %v8805_v21  ;;  %5813 = vrcp.f32 %v8820_v62  ;;  %vm3617_vm12 = vweird.f32 %v8818_v41  ;;  %v3622_v44 = vand.u32 2147483648, %v8805_v21 }
 0xa2b   :  { %v3599_v59 = vmul.f32 %v5800_v47, %v3598_v36  ;;  %v5808_v46 = vpop.eup %5807  ;;  %v8825_v18 = vadd.f32 1.0, %v5806_v40  ;;  %v5459_v9 = vmul.f32 -1.442695, %v8827_v61  ;;  %v3593_v56 = vor.u32 1.1754944e-38, %v3592_v45  ;;  %vm8862_vm15 = vmor %vm3616_vm9, %vm3617_vm12 }
 0xa2c   :  { %v3613_v5 = vsub.f32 1.0, %v3612_v28  ;;  %v8829_v43 = vadd.f32 1.0, %v5808_v46  ;;  %vm3591_vm13 = vcmp.eq.f32.partialorder %v3590_v8, 8.507059e+37  ;;  %v3623_v23 = vor.u32 1.1754944e-38, %v3622_v44 }
 0xa2d   :  { %v3600_v27 = vadd.f32 %v5800_v47, %v3599_v59  ;;  %5815 = vrcp.f32 %v8825_v18  ;;  %v3665_v40 = vand.u32 2147483647, %v8820_v62  ;;  %v3667_v57 = vand.u32 2147483648, %v8820_v62 }
 0xa2e   :  { %v5810_v35 = vpop.eup %5809  ;;  %5817 = vrcp.f32 %v8829_v43  ;;  %v3614_v52 = vmul.f32 %v8818_v41, %v3613_v5  ;;  %v3637_v38 = vand.u32 2147483648, %v8829_v43 }
 0xa2f   :  { %v3604_v22 = vsel %vm3603_vm1, %v5800_v47, %v3600_v27  ;;  %v3582_v63 = vmul.f32 %v5810_v35, %v8814_v1  ;;  %v5812_v53 = vpop.eup %5811  ;;  %vm3587_vm14 = vweird.f32 %v5810_v35  ;;  %5819 = vpow2.f32 %v5459_v9 }
 0xa30   :  { %v3609_v54 = vsel %vm3606_vm2, %v3608_v50, %v3604_v22  ;;  %v8835_v25 = vpop.eup %5813  ;;  %v8850_v30 = vadd.f32 1.0, %v5812_v53  ;;  %v3615_v51 = vadd.f32 %v8818_v41, %v3614_v52  ;;  %vm3588_vm8 = vmor %vm3586_vm11, %vm3587_vm14  ;;  %vm3621_vm1 = vcmp.eq.f32.partialorder %v3620_v34, 8.507059e+37 }
 0xa31   :  { %v8838_v20 = vmul.f32 %v3609_v54, %v8791_v31  ;;  %v3583_v42 = vsub.f32 1.0, %v3582_v63  ;;  %v3657_v48 = vmul.f32 %v8835_v25, %v8820_v62  ;;  %vm3661_vm2 = vweird.f32 %v8820_v62 }
 0xa32   :  { %5821 = vrcp.f32 %v8850_v30  ;;  %v3619_v13 = vsel %vm8862_vm15, %v8818_v41, %v3615_v51  ;;  %v3635_v47 = vand.u32 2147483647, %v8829_v43  ;;  %vm3631_vm11 = vweird.f32 %v8829_v43 }
 0xa33   :  { %v3584_v17 = vmul.f32 %v5810_v35, %v3583_v42  ;;  %3921 = vrot.lane.b32.xlu0 %v8838_v20, %s6053_s5  ;;  %3961 = vrot.lane.b32.xlu2 %v8838_v20, %s6054_s6  ;;  %v8852_v6 = vpop.eup %5815  ;;  %v3658_v39 = vsub.f32 1.0, %v3657_v48  ;;  %v3624_v4 = vsel %vm3621_vm1, %v3623_v23, %v3619_v13  ;;  %vm3662_vm12 = vweird.f32 %v8835_v25 }
 0xa34   :  { %v5818_v19 = vpop.eup %5817  ;;  %v3672_v16 = vmul.f32 %v8852_v6, %v8825_v18  ;;  %v3638_v28 = vor.u32 1.1754944e-38, %v3637_v38  ;;  %v8897_v59 = vmul.f32 %v3624_v4, %v8794_v15  ;;  %vm3636_vm9 = vcmp.eq.f32.partialorder %v3635_v47, 8.507059e+37 }
 0xa35   :  { %v3585_v31 = vadd.f32 %v5810_v35, %v3584_v17  ;;  %v3627_v3 = vmul.f32 %v5818_v19, %v8829_v43  ;;  %v3659_v58 = vmul.f32 %v8835_v25, %v3658_v39  ;;  %v5820_v24 = vpop.eup %5819  ;;  %vm3632_vm14 = vweird.f32 %v5818_v19 }
 0xa36   :  { %v8878_v1 = vadd.f32 1.0, %v5820_v24  ;;  %v3673_v37 = vsub.f32 1.0, %v3672_v16  ;;  %v3652_v50 = vand.u32 2147483648, %v8850_v30  ;;  %v3668_v62 = vor.u32 1.1754944e-38, %v3667_v57 }
 0xa37   :  { %v3589_v2 = vsel %vm3588_vm8, %v5810_v35, %v3585_v31  ;;  %v3628_v21 = vsub.f32 1.0, %v3627_v3  ;;  %v3660_v41 = vadd.f32 %v8835_v25, %v3659_v58  ;;  %vm3633_vm8 = vmor %vm3631_vm11, %vm3632_vm14  ;;  %v3650_v35 = vand.u32 2147483647, %v8850_v30 }
 0xa38   :  { %v3594_v60 = vsel %vm3591_vm13, %v3593_v56, %v3589_v2  ;;  %5823 = vrcp.f32 %v8878_v1  ;;  %vm8901_vm13 = vmor %vm3661_vm2, %vm3662_vm12  ;;  %v3674_v5 = vmul.f32 %v8852_v6, %v3673_v37  ;;  %vm3666_vm1 = vcmp.eq.f32.partialorder %v3665_v40, 8.507059e+37 }
 0xa39   :  { %v8872_v33 = vmul.f32 %v3594_v60, %v8797_v0  ;;  %v3629_v32 = vmul.f32 %v5818_v19, %v3628_v21  ;;  %v5822_v0 = vpop.eup %5821  ;;  %v3664_v15 = vsel %vm8901_vm13, %v8835_v25, %v3660_v41  ;;  %vm3646_vm2 = vweird.f32 %v8850_v30 }
 0xa3a   :  { %v3642_v7 = vmul.f32 %v5822_v0, %v8850_v30  ;;  %vm3647_vm15 = vweird.f32 %v5822_v0  ;;  %v3669_v52 = vsel %vm3666_vm1, %v3668_v62, %v3664_v15  ;;  %v3675_v25 = vadd.f32 %v8852_v6, %v3674_v5  ;;  %v3981_v30 = vld [vmem:[#allocation3 + $0x1c0] sm:$0xff] }
 0xa3b   :  { %3881 = vrot.lane.b32.xlu0 %v8838_v20, %s6056_s25  ;;  %3761 = vrot.lane.b32.xlu2 %v8838_v20, %s6057_s28  ;;  %v3709_v55 = vpack.c.bf16 %v8838_v20, %v8872_v33  ;;  %v3630_v36 = vadd.f32 %v5818_v19, %v3629_v32  ;;  %vm3677_vm14 = vweird.f32 %v8852_v6  ;;  %vm3648_vm11 = vmor %vm3646_vm2, %vm3647_vm15  ;;  %vm3651_vm12 = vcmp.eq.f32.partialorder %v3650_v35, 8.507059e+37 }
 0xa3c   :  { %3957 = vrot.lane.b32.xlu1 %v8872_v33, %s6054_s6  ;;  %v3643_v46 = vsub.f32 1.0, %v3642_v7  ;;  %v3682_v48 = vand.u32 2147483648, %v8825_v18  ;;  %v8927_v8 = vmul.f32 %v3669_v52, %v8799_v29  ;;  %v3680_v51 = vand.u32 2147483647, %v8825_v18  ;;  %v3866_v52 = vld [vmem:[#allocation3 + $0xe8] sm:$0xff] }
 0xa3d   :  { %3713 = vst [vmem:[#allocation2 + $0x60] sm:$0xff] %v3709_v55  ;;  %v3634_v10 = vsel %vm3633_vm8, %v5818_v19, %v3630_v36  ;;  %vm3676_vm8 = vweird.f32 %v8825_v18  ;;  %v3697_v34 = vand.u32 2147483648, %v8878_v1  ;;  %v3695_v29 = vand.u32 2147483647, %v8878_v1 }
 0xa3e   :  { %v3639_v43 = vsel %vm3636_vm9, %v3638_v28, %v3634_v10  ;;  %v3644_v63 = vmul.f32 %v5822_v0, %v3643_v46  ;;  %v5824_v9 = vpop.eup %5823  ;;  %vm8929_vm9 = vmor %vm3676_vm8, %vm3677_vm14  ;;  %v3683_v56 = vor.u32 1.1754944e-38, %v3682_v48  ;;  %vm3681_vm15 = vcmp.eq.f32.partialorder %v3680_v51, 8.507059e+37 }
 0xa3f   :  { %v8912_v22 = vmul.f32 %v3639_v43, %v8808_v11  ;;  %v3653_v11 = vor.u32 1.1754944e-38, %v3652_v50  ;;  %v3687_v45 = vmul.f32 %v5824_v9, %v8878_v1  ;;  %v3679_v19 = vsel %vm8929_vm9, %v8852_v6, %v3675_v25  ;;  %v5461_v43 = vld [vmem:[%s10295_s8 + $0x18] sm:$0xff] }
 0xa40   :  { %v3645_v53 = vadd.f32 %v5822_v0, %v3644_v63  ;;  %vm3692_vm13 = vweird.f32 %v5824_v9  ;;  %vm3691_vm1 = vweird.f32 %v8878_v1  ;;  %v3684_v6 = vsel %vm3681_vm15, %v3683_v56, %v3679_v19 }
 0xa41   :  { %10466 = vst [vmem:[#allocation40_spill] sm:$0xff] %v8912_v22  ;;  %v3710_v54 = vpack.c.bf16 %v8912_v22, %v8897_v59  ;;  %v3688_v39 = vsub.f32 1.0, %v3687_v45  ;;  %vm3693_vm2 = vmor %vm3691_vm1, %vm3692_vm13  ;;  %v3698_v2 = vor.u32 1.1754944e-38, %v3697_v34  ;;  %vm3696_vm14 = vcmp.eq.f32.partialorder %v3695_v29, 8.507059e+37  ;;  %v3945_v34 = vld [vmem:[#allocation3 + $0x1a0] sm:$0xff] }
 0xa42   :  { %v3649_v42 = vsel %vm3648_vm11, %v5822_v0, %v3645_v53  ;;  %v8952_v60 = vmul.f32 %v3684_v6, %v8803_v14  ;;  %v3862_v53 = vld [vmem:[#allocation3 + $0xc8] sm:$0xff]  ;;  %v3941_v6 = vld [vmem:[#allocation3 + $0x180] sm:$0xff]  ;;  %vm10479_vm11 = vcmp.lt.s32.totalorder %v6509_v49, 16  ;;  %vm10483_vm9 = vcmp.lt.s32.totalorder %v6509_v49, 17 }
 0xa43   :  { %3841 = vrot.lane.b32.xlu0 %v8838_v20, %s6052_s3  ;;  %3714 = vst [vmem:[#allocation2 + $0x68] sm:$0xff] %v3710_v54  ;;  %v3654_v17 = vsel %vm3651_vm12, %v3653_v11, %v3649_v42  ;;  %v3689_v44 = vmul.f32 %v5824_v9, %v3688_v39  ;;  %v3985_v39 = vld [vmem:[#allocation3 + $0x1e0] sm:$0xff]  ;;  %vm10480_vm12 = vmmov %vm10479_vm11 }
 0xa44   :  { %3917 = vrot.lane.b32.xlu1 %v8872_v33, %s6053_s5  ;;  %v8935_v31 = vmul.f32 %v3654_v17, %v8812_v26  ;;  %vm10481_vm8 = vmmov %vm10479_vm11 }
 0xa45   :  { %v3690_v26 = vadd.f32 %v5824_v9, %v3689_v44  ;;  %vm10484_vm13 = vmmov %vm10481_vm8 }
 0xa46   :  { %3959 = vrot.lane.b32.xlu2 %v8935_v31, %s6054_s6  ;;  %v3711_v18 = vpack.c.bf16 %v8927_v8, %v8935_v31  ;;  %vm10488_vm15 = vmmov %vm10483_vm9 }
 0xa47   :  { %v3694_v3 = vsel %vm3693_vm2, %v5824_v9, %v3690_v26  ;;  %vm10490_vm1 = vmmov %vm10483_vm9 }
 0xa48   :  { %3715 = vst [vmem:[#allocation2 + $0x70] sm:$0xff] %v3711_v18  ;;  %v3699_v12 = vsel %vm3696_vm14, %v3698_v2, %v3694_v3  ;;  %vm10493_vm2 = vmmov %vm10490_vm1 }
 0xa49   :  { %v8955_v16 = vmul.f32 %v3699_v12, %v8827_v61  ;;  %vm10495_vm14 = vmmov %vm10481_vm8 }
 0xa4b   :  { %3801 = vrot.lane.b32.xlu0 %v8838_v20, %s6055_s24  ;;  %10469 = vst [vmem:[#allocation41_spill] sm:$0xff] %v8955_v16  ;;  %v3712_v13 = vpack.c.bf16 %v8955_v16, %v8952_v60 }
 0xa4c   :  { %3837 = vrot.lane.b32.xlu1 %v8872_v33, %s6052_s3 }
 0xa4d   :  { %3716 = vst [vmem:[#allocation2 + $0x78] sm:$0xff] %v3712_v13 }
 0xa4e   :  { %3919 = vrot.lane.b32.xlu2 %v8935_v31, %s6053_s5 }
 0xa53   :  { %4001 = vrot.lane.b32.xlu0 %v8838_v20, %s6059_s1 }
 0xa54   :  { %3797 = vrot.lane.b32.xlu1 %v8872_v33, %s6055_s24 }
 0xa56   :  { %3839 = vrot.lane.b32.xlu2 %v8935_v31, %s6052_s3 }
 0xa5b   :  { %3721 = vrot.lane.b32.xlu0 %v8838_v20, %s6058_s29 }
 0xa5c   :  { %3717 = vrot.lane.b32.xlu1 %v8872_v33, %s6058_s29 }
 0xa5e   :  { %3799 = vrot.lane.b32.xlu2 %v8935_v31, %s6055_s24 }
 0xa63   :  { %3877 = vrot.lane.b32.xlu0 %v8872_v33, %s6056_s25 }
 0xa64   :  { %3923 = vrot.lane.b32.xlu1 %v8927_v8, %s6053_s5 }
 0xa66   :  { %3719 = vrot.lane.b32.xlu2 %v8935_v31, %s6058_s29 }
 0xa6b   :  { %3757 = vrot.lane.b32.xlu0 %v8872_v33, %s6057_s28 }
 0xa6c   :  { %3883 = vrot.lane.b32.xlu1 %v8927_v8, %s6056_s25 }
 0xa6e   :  { %3925 = vrot.lane.b32.xlu2 %v8897_v59, %s6053_s5 }
 0xa73   :  { %3997 = vrot.lane.b32.xlu0 %v8872_v33, %s6059_s1 }
 0xa74   :  { %3843 = vrot.lane.b32.xlu1 %v8927_v8, %s6052_s3 }
 0xa76   :  { %3885 = vrot.lane.b32.xlu2 %v8897_v59, %s6056_s25 }
 0xa7b   :  { %3963 = vrot.lane.b32.xlu0 %v8927_v8, %s6054_s6 }
 0xa7c   :  { %3803 = vrot.lane.b32.xlu1 %v8927_v8, %s6055_s24 }
 0xa7e   :  { %3969 = vrot.lane.b32.xlu2 %v8912_v22, %s6054_s6 }
 0xa83   :  { %3763 = vrot.lane.b32.xlu0 %v8927_v8, %s6057_s28 }
 0xa84   :  { %4003 = vrot.lane.b32.xlu1 %v8927_v8, %s6059_s1 }
 0xa86   :  { %3929 = vrot.lane.b32.xlu2 %v8912_v22, %s6053_s5 }
 0xa8b   :  { %3765 = vrot.lane.b32.xlu0 %v8897_v59, %s6057_s28 }
 0xa8c   :  { %3723 = vrot.lane.b32.xlu1 %v8927_v8, %s6058_s29 }
 0xa8d   :  { %v9007_v14 = vpop.permute.xlu2 %3961 }
 0xa8e   :  { %3849 = vrot.lane.b32.xlu2 %v8912_v22, %s6052_s3 }
 0xa93   :  { %3927 = vrot.lane.b32.xlu0 %v8952_v60, %s6053_s5 }
 0xa94   :  { %3879 = vrot.lane.b32.xlu1 %v8935_v31, %s6056_s25 }
 0xa95   :  { %v9017_v61 = vpop.permute.xlu2 %3761 }
 0xa96   :  { %4005 = vrot.lane.b32.xlu2 %v8897_v59, %s6059_s1 }
 0xa9b   :  { %3887 = vrot.lane.b32.xlu0 %v8952_v60, %s6056_s25 }
 0xa9c   :  { %3759 = vrot.lane.b32.xlu1 %v8935_v31, %s6057_s28 }
 0xa9e   :  { %3769 = vrot.lane.b32.xlu2 %v8912_v22, %s6057_s28 }
 0xaa0   :  { %v9025_v58 = vpop.permute.xlu2 %3959 }
 0xaa3   :  { %3971 = vrot.lane.b32.xlu0 %v8955_v16, %s6054_s6 }
 0xaa4   :  { %3999 = vrot.lane.b32.xlu1 %v8935_v31, %s6059_s1 }
 0xaa5   :  { %v9031_v21 = vpop.permute.xlu0 %3921 }
 0xaa6   :  { %3729 = vrot.lane.b32.xlu2 %v8912_v22, %s6058_s29 }
 0xaa8   :  { %v9035_v24 = vpop.permute.xlu2 %3919 }
 0xaab   :  { %3931 = vrot.lane.b32.xlu0 %v8955_v16, %s6053_s5 }
 0xaac   :  { %3965 = vrot.lane.b32.xlu1 %v8897_v59, %s6054_s6 }
 0xaad   :  { %v9041_v23 = vpop.permute.xlu0 %3881 }
 0xaae   :  { %v3958_v38 = vpop.permute.xlu1 %3957  ;;  %3967 = vrot.lane.b32.xlu2 %v8952_v60, %s6054_s6 }
 0xaaf   :  { %v3977_v51 = vsel %vm970_vm3, %v3958_v38, %v9007_v14 }
 0xab0   :  { %v9045_v32 = vpop.permute.xlu2 %3839  ;;  %v3989_v56 = vmul.f32 %v3981_v30, %v3977_v51  ;;  %v3942_v51 = vld [vmem:[#allocation3 + $0x188] sm:$0xff] }
 0xab3   :  { %3851 = vrot.lane.b32.xlu0 %v8955_v16, %s6052_s3 }
 0xab4   :  { %3889 = vrot.lane.b32.xlu1 %v8912_v22, %s6056_s25 }
 0xab5   :  { %v9051_v47 = vpop.permute.xlu0 %3841 }
 0xab6   :  { %10470 = vst [vmem:[#allocation38_spill] sm:$0xff] %v9051_v47  ;;  %v9053_v1 = vpop.permute.xlu1 %3917  ;;  %3891 = vrot.lane.b32.xlu2 %v8955_v16, %s6056_s25 }
 0xab7   :  { %v3937_v2 = vsel %vm928_vm4, %v9053_v1, %v9031_v21 }
 0xab8   :  { %v9057_v0 = vpop.permute.xlu2 %3799  ;;  %v3949_v13 = vmul.f32 %v3941_v6, %v3937_v2 }
 0xabb   :  { %4007 = vrot.lane.b32.xlu0 %v8952_v60, %s6059_s1 }
 0xabc   :  { %3809 = vrot.lane.b32.xlu1 %v8912_v22, %s6055_s24 }
 0xabd   :  { %v9063_v4 = vpop.permute.xlu0 %3801 }
 0xabe   :  { %v9065_v37 = vpop.permute.xlu1 %3837  ;;  %3811 = vrot.lane.b32.xlu2 %v8955_v16, %s6055_s24 }
 0xabf   :  { %v3857_v54 = vsel %vm844_vm6, %v9065_v37, %v9051_v47 }
 0xac0   :  { %v9069_v55 = vpop.permute.xlu2 %3719  ;;  %v9145_v42 = vmul.f32 %v3862_v53, %v3857_v54 }
 0xac3   :  { %3771 = vrot.lane.b32.xlu0 %v8955_v16, %s6057_s28 }
 0xac4   :  { %3845 = vrot.lane.b32.xlu1 %v8897_v59, %s6052_s3 }
 0xac5   :  { %v9075_v41 = vpop.permute.xlu0 %4001 }
 0xac6   :  { %v9077_v36 = vpop.permute.xlu1 %3797  ;;  %3847 = vrot.lane.b32.xlu2 %v8952_v60, %s6052_s3 }
 0xac8   :  { %v9081_v7 = vpop.permute.xlu2 %3925 }
 0xac9   :  { %v9089_v40 = vsel %vm928_vm4, %v9031_v21, %v9081_v7 }
 0xaca   :  { %v9191_v2 = vmul.f32 %v3942_v51, %v9089_v40 }
 0xacb   :  { %3731 = vrot.lane.b32.xlu0 %v8955_v16, %s6058_s29 }
 0xacc   :  { %3805 = vrot.lane.b32.xlu1 %v8897_v59, %s6055_s24 }
 0xacd   :  { %v9093_v57 = vpop.permute.xlu0 %3721 }
 0xace   :  { %10471 = vst [vmem:[#allocation39_spill] sm:$0xff] %v9093_v57  ;;  %v9095_v28 = vpop.permute.xlu1 %3717  ;;  %3807 = vrot.lane.b32.xlu2 %v8952_v60, %s6055_s24 }
 0xacf   :  { %10472 = vst [vmem:[#allocation42_spill] sm:$0xff] %v9095_v28 }
 0xad0   :  { %v9099_v10 = vpop.permute.xlu2 %3885 }
 0xad1   :  { %v9107_v46 = vsel %vm886_vm5, %v9041_v23, %v9099_v10 }
 0xad3   :  { %3727 = vrot.lane.b32.xlu0 %v8952_v60, %s6058_s29 }
 0xad4   :  { %3767 = vrot.lane.b32.xlu1 %v8952_v60, %s6057_s28 }
 0xad5   :  { %v9111_v27 = vpop.permute.xlu0 %3877 }
 0xad6   :  { %v3924_v5 = vpop.permute.xlu1 %3923  ;;  %3725 = vrot.lane.b32.xlu2 %v8897_v59, %s6058_s29 }
 0xad7   :  { %v3938_v44 = vsel %vm928_vm4, %v9035_v24, %v3924_v5 }
 0xad8   :  { %v9118_v35 = vpop.permute.xlu2 %3969  ;;  %v3953_v3 = vmul.f32 %v3945_v34, %v3938_v44  ;;  %v3901_v34 = vld [vmem:[#allocation3 + $0x140] sm:$0xff]  ;;  %v3897_v44 = vsel %vm886_vm5, %v9111_v27, %v9041_v23 }
 0xad9   :  { %v9123_v50 = vsel %vm970_vm3, %v9118_v35, %v3958_v38 }
 0xada   :  { %v4061_v53 = vpack.c.bf16 %v3953_v3, %v3949_v13  ;;  %v3909_v13 = vmul.f32 %v3901_v34, %v3897_v44 }
 0xadb   :  { %4079 = vperm.xlu0 %5646, %v5461_v43  }
 0xadc   :  { %4009 = vrot.lane.b32.xlu1 %v8912_v22, %s6059_s1 }
 0xadd   :  { %v9127_v15 = vpop.permute.xlu0 %3757 }
 0xade   :  { %v3884_v63 = vpop.permute.xlu1 %3883  ;;  %4011 = vrot.lane.b32.xlu2 %v8955_v16, %s6059_s1 }
 0xae0   :  { %v9131_v62 = vpop.permute.xlu2 %3929 }
 0xae5   :  { %v9137_v9 = vpop.permute.xlu0 %3997 }
 0xae6   :  { %10473 = vst [vmem:[#allocation36_spill] sm:$0xff] %v9137_v9  ;;  %v9139_v25 = vpop.permute.xlu1 %3843 }
 0xae7   :  { %v3858_v11 = vsel %vm844_vm6, %v9045_v32, %v9139_v25 }
 0xae8   :  { %v9147_v45 = vmul.f32 %v3866_v52, %v3858_v11  ;;  %v9151_v17 = vpop.permute.xlu2 %3849 }
 0xaed   :  { %v3964_v19 = vpop.permute.xlu0 %3963 }
 0xaee   :  { %v3978_v29 = vsel %vm970_vm3, %v9025_v58, %v3964_v19  ;;  %v9162_v18 = vpop.permute.xlu1 %3803 }
 0xaef   :  { %v3993_v26 = vmul.f32 %v3985_v39, %v3978_v29  ;;  %v3946_v39 = vld [vmem:[#allocation3 + $0x1a8] sm:$0xff] }
 0xaf0   :  { %v9168_v38 = vpop.permute.xlu2 %4005 }
 0xaf1   :  { %v4065_v12 = vpack.c.bf16 %v3993_v26, %v3989_v56  ;;  %v3905_v56 = vld [vmem:[#allocation3 + $0x160] sm:$0xff] }
 0xaf3   :  { %4091 = vmatpush.bf16.msra.mxu0 %v4065_v12 }
 0xaf5   :  { %v9170_v43 = vpop.permute.xlu0 %3763 }
 0xaf6   :  { %v9172_v54 = vpop.permute.xlu1 %4003 }
 0xaf7   :  { %4092 = vmatpush.bf16.msra.mxu0 %v4061_v53 }
 0xaf8   :  { %v9174_v52 = vpop.permute.xlu2 %3769 }
 0xafd   :  { %v9176_v11 = vpop.permute.xlu0 %3765 }
 0xafe   :  { %10474 = vst [vmem:[#allocation37_spill] sm:$0xff] %v9176_v11  ;;  %v9178_v30 = vpop.permute.xlu1 %3723  ;;  %v3902_v11 = vld [vmem:[#allocation3 + $0x148] sm:$0xff] }
 0xaff   :  { %v9207_v34 = vmul.f32 %v3902_v11, %v9107_v46 }
 0xb00   :  { %v9180_v21 = vpop.permute.xlu2 %3729 }
 0xb01   :  { %10475 = vst [vmem:[#allocation43_spill] sm:$0xff] %v9180_v21  ;;  %v3983_v21 = vld [vmem:[#allocation3 + $0x1d0] sm:$0xff] }
 0xb05   :  { %v3928_v29 = vpop.permute.xlu0 %3927 }
 0xb06   :  { %v3936_v26 = vsel %vm928_vm4, %v3924_v5, %v3928_v29  ;;  %v9188_v6 = vpop.permute.xlu1 %3879  ;;  %v3906_v5 = vld [vmem:[#allocation3 + $0x168] sm:$0xff] }
 0xb07   :  { %v9193_v3 = vmul.f32 %v3946_v39, %v3936_v26  ;;  %v3898_v12 = vsel %vm886_vm5, %v9188_v6, %v3884_v63  ;;  %v4053_v39 = vpack.c.bf16 %v8935_v31, %v8872_v33 }
 0xb08   :  { %v3913_v53 = vmul.f32 %v3905_v56, %v3898_v12  ;;  %v3968_v22 = vpop.permute.xlu2 %3967  ;;  %v4021_v56 = vld [vmem:[#allocation3 + $0x200] sm:$0xff] }
 0xb09   :  { %v4025_v12 = vld [vmem:[#allocation3 + $0x220] sm:$0xff] }
 0xb0a   :  { %v4057_v48 = vpack.c.bf16 %v3913_v53, %v3909_v13 }
 0xb0c   :  { %4093 = vmatpush.bf16.msra.mxu0 %v4057_v48 }
 0xb0d   :  { %v3888_v16 = vpop.permute.xlu0 %3887 }
 0xb0e   :  { %v3896_v40 = vsel %vm886_vm5, %v3884_v63, %v3888_v16  ;;  %v9202_v51 = vpop.permute.xlu1 %3759  ;;  %v4017_v63 = vsel %vm1012_vm10, %v9137_v9, %v9075_v41  ;;  %v3982_v9 = vld [vmem:[#allocation3 + $0x1c8] sm:$0xff] }
 0xb0f   :  { %v9209_v44 = vmul.f32 %v3906_v5, %v3896_v40  ;;  %v4029_v31 = vmul.f32 %v4021_v56, %v4017_v63  ;;  %v3986_v5 = vld [vmem:[#allocation3 + $0x1e8] sm:$0xff]  ;;  %v3976_v40 = vsel %vm970_vm3, %v3964_v19, %v3968_v22 }
 0xb10   :  { %4094 = vmatpush.bf16.msra.mxu0 %v4053_v39  ;;  %v9223_v46 = vpop.permute.xlu2 %3891  ;;  %v3987_v39 = vld [vmem:[#allocation3 + $0x1f0] sm:$0xff] }
 0xb15   :  { %v3972_v26 = vpop.permute.xlu0 %3971 }
 0xb16   :  { %v9217_v13 = vpop.permute.xlu1 %3999  ;;  %v3974_v48 = vsel %vm970_vm3, %v3968_v22, %v3972_v26 }
 0xb17   :  { %10476 = vst [vmem:[#allocation44_spill] sm:$0xff] %v9217_v13  ;;  %v4018_v33 = vsel %vm1012_vm10, %v9217_v13, %v9172_v54  ;;  %v3947_v13 = vld [vmem:[#allocation3 + $0x1b0] sm:$0xff]  ;;  %v3995_v22 = vmul.f32 %v3987_v39, %v3974_v48  ;;  %v3859_v48 = vsel %vm844_vm6, %v9151_v17, %v9065_v37 }
 0xb18   :  { %v4033_v11 = vmul.f32 %v4025_v12, %v4018_v33  ;;  %v3994_v12 = vmul.f32 %v3986_v5, %v3976_v40  ;;  %v3907_v40 = vld [vmem:[#allocation3 + $0x170] sm:$0xff] }
 0xb1a   :  { %v4069_v53 = vpack.c.bf16 %v4033_v11, %v4029_v31  ;;  %v3943_v11 = vld [vmem:[#allocation3 + $0x190] sm:$0xff] }
 0xb1c   :  { %4111 = vmatpush.bf16.msra.mxu1 %v4069_v53  ;;  %v3933_v53 = vsel %vm928_vm4, %v9081_v7, %v9131_v62  ;;  %v3865_v7 = vld [vmem:[#allocation3 + $0xe0] sm:$0xff] }
 0xb1d   :  { %v9229_v23 = vpop.permute.xlu0 %3931 }
 0xb1e   :  { %v3966_v28 = vpop.permute.xlu1 %3965  ;;  %v3934_v56 = vsel %vm928_vm4, %v3928_v29, %v9229_v23  ;;  %v9247_v29 = vld [vmem:[%s10294_s7 + $0x18] sm:$0xff] }
 0xb1f   :  { %v3973_v63 = vsel %vm970_vm3, %v3966_v28, %v9118_v35  ;;  %v3975_v19 = vsel %vm970_vm3, %v9007_v14, %v3966_v28  ;;  %v9249_v35 = vpop.permute.xlu2 %3811  ;;  %v3955_v57 = vmul.f32 %v3947_v13, %v3934_v56  ;;  %v4084_v28 = vunpack.c.h.b16 %v9247_v29  ;;  %v3903_v56 = vld [vmem:[#allocation3 + $0x150] sm:$0xff] }
 0xb20   :  { %v3990_v33 = vmul.f32 %v3982_v9, %v3975_v19  ;;  %v3991_v31 = vmul.f32 %v3983_v21, %v3973_v63  ;;  %v3951_v9 = vmul.f32 %v3943_v11, %v3933_v53  ;;  %v3861_v21 = vld [vmem:[#allocation3 + $0xc0] sm:$0xff]  ;;  %v3894_v13 = vsel %vm886_vm5, %v3888_v16, %v9223_v46 }
 0xb21   :  { %v9256_v5 = vpack.c.b16 %v4084_v28, %v4084_v28  ;;  %v3915_v16 = vmul.f32 %v3907_v40, %v3894_v13  ;;  %v4015_v53 = vsel %vm1012_vm10, %v9075_v41, %v9168_v38 }
 0xb22   :  { %v4066_v47 = vpack.c.bf16 %v3994_v12, %v3990_v33  ;;  %v4067_v14 = vpack.c.bf16 %v3995_v22, %v3991_v31  ;;  %v4063_v37 = vpack.c.bf16 %v3955_v57, %v3951_v9  ;;  %v10477_v31 = vpack.c.bf16 %v9193_v3, %v9191_v2  ;;  %v4022_v57 = vld [vmem:[#allocation3 + $0x208] sm:$0xff]  ;;  %v3825_v9 = vld [vmem:[#allocation3 + $0xa0] sm:$0xff] }
 0xb23   :  { %5462 = vmatmul.msk.bf16.vlgmr.msra.gmra.mxu1 %vm134_vm0, %v9256_v5  ;;  %v10478_v2 = vpack.c.bf16 %v9209_v44, %v9207_v34  ;;  %v4026_v3 = vld [vmem:[#allocation3 + $0x228] sm:$0xff]  ;;  %v3817_v34 = vsel %vm802_vm7, %v9077_v36, %v9063_v4  ;;  %v3984_v44 = vld [vmem:[#allocation3 + $0x1d8] sm:$0xff] }
 0xb24   :  { %4117 = vmatpush.bf16.msra.mxu2 %v4066_v47  ;;  %4143 = vmatpush.bf16.msrb.mxu1 %v4067_v14  ;;  %v3869_v47 = vmul.f32 %v3861_v21, %v3859_v48  ;;  %v3988_v14 = vld [vmem:[#allocation3 + $0x1f8] sm:$0xff]  ;;  %v3820_v21 = vsel %vm802_vm7, %v9249_v35, %v9057_v0  ;;  %v3821_v48 = vld [vmem:[#allocation3 + $0x80] sm:$0xff] }
 0xb25   :  { %v9261_v39 = vpop.permute.xlu0 %3851 }
 0xb26   :  { %v3860_v63 = vsel %vm844_vm6, %v9261_v39, %v9045_v32  ;;  %v3890_v19 = vpop.permute.xlu1 %3889 }
 0xb27   :  { %v3873_v12 = vmul.f32 %v3865_v7, %v3860_v63  ;;  %v3893_v22 = vsel %vm886_vm5, %v9099_v10, %v3890_v19  ;;  %v3980_v10 = vsel %vm970_vm3, %v3972_v26, %v9025_v58  ;;  %v9282_v28 = vpop.permute.xlu2 %3847  ;;  %v4054_v58 = vpack.c.bf16 %v8927_v8, %v8838_v20  ;;  %v3826_v26 = vld [vmem:[#allocation3 + $0xa8] sm:$0xff] }
 0xb28   :  { %v3911_v33 = vmul.f32 %v3903_v56, %v3893_v22  ;;  %4118 = vmatpush.bf16.msra.mxu2 %v10477_v31  ;;  %4144 = vmatpush.bf16.msrb.mxu1 %v4063_v37  ;;  %v3818_v7 = vsel %vm802_vm7, %v9057_v0, %v9162_v18  ;;  %v4055_v20 = vpack.c.bf16 %v8952_v60, %v8897_v59  ;;  %v3781_v31 = vld [vmem:[#allocation3 + $0x40] sm:$0xff] }
 0xb29   :  { %v4049_v11 = vpack.c.bf16 %v3873_v12, %v3869_v47  ;;  %v4030_v8 = vmul.f32 %v4022_v57, %v4015_v53  ;;  %v3996_v56 = vmul.f32 %v3988_v14, %v3980_v10  ;;  %v3822_v47 = vld [vmem:[#allocation3 + $0x88] sm:$0xff]  ;;  %v3833_v0 = vmul.f32 %v3825_v9, %v3820_v21  ;;  %v3948_v12 = vld [vmem:[#allocation3 + $0x1b8] sm:$0xff] }
 0xb2a   :  { %v4059_v32 = vpack.c.bf16 %v3915_v16, %v3911_v33  ;;  %v3992_v59 = vmul.f32 %v3984_v44, %v9123_v50  ;;  %v3834_v60 = vmul.f32 %v3826_v26, %v3818_v7  ;;  %v3944_v33 = vld [vmem:[#allocation3 + $0x198] sm:$0xff]  ;;  %v3778_v50 = vsel %vm10480_vm12, %v9202_v51, %v9170_v43  ;;  %vm10497_vm12 = vmmov %vm10490_vm1 }
 0xb2b   :  { %4095 = vmatpush.bf16.msra.mxu0 %v4049_v11  ;;  %v3779_v11 = vsel %vm10479_vm11, %v9174_v52, %v9127_v15  ;;  %v3899_v14 = vsel %vm886_vm5, %v3890_v19, %v9111_v27  ;;  %v10482_v10 = vpack.c.bf16 %v9147_v45, %v9145_v42  ;;  %v3738_v42 = vsel %vm10483_vm9, %v9069_v55, %v9178_v30  ;;  %v3908_v45 = vld [vmem:[#allocation3 + $0x178] sm:$0xff]  ;;  %vm10496_vm11 = vmmov %vm10481_vm8 }
 0xb2c   :  { %4119 = vmatpush.bf16.msra.mxu2 %v10478_v2  ;;  %4145 = vmatpush.bf16.msrb.mxu1 %v4059_v32  ;;  %v3786_v32 = vld [vmem:[#allocation3 + $0x68] sm:$0xff]  ;;  %v4068_v57 = vpack.c.bf16 %v3996_v56, %v3992_v59  ;;  %v3785_v2 = vld [vmem:[#allocation3 + $0x60] sm:$0xff]  ;;  %v3789_v21 = vmul.f32 %v3781_v31, %v3779_v11  ;;  %v3900_v19 = vsel %vm886_vm5, %v9223_v46, %v9188_v6  ;;  %v10485_v56 = vld [vmem:[#allocation38_spill] sm:$0xff] }
 0xb2d   :  { %v9291_v41 = vpop.permute.xlu0 %4007  ;;  %v3794_v44 = vmul.f32 %v3786_v32, %v3778_v50  ;;  %v10489_v31 = vld [vmem:[#allocation43_spill] sm:$0xff]  ;;  %vm10498_vm9 = vmmov %vm10481_vm8 }
 0xb2e   :  { %v4016_v40 = vsel %vm1012_vm10, %v9172_v54, %v9291_v41  ;;  %v9307_v13 = vpop.permute.xlu1 %3809  ;;  %v3940_v54 = vsel %vm928_vm4, %v9229_v23, %v9035_v24  ;;  %v3830_v23 = vmul.f32 %v3822_v47, %v3817_v34  ;;  %v3863_v34 = vld [vmem:[#allocation3 + $0xd0] sm:$0xff]  ;;  %v3864_v50 = vld [vmem:[#allocation3 + $0xd8] sm:$0xff] }
 0xb2f   :  { %v4034_v63 = vmul.f32 %v4026_v3, %v4016_v40  ;;  %v3819_v37 = vsel %vm802_vm7, %v9307_v13, %v9077_v36  ;;  %v3939_v36 = vsel %vm928_vm4, %v9131_v62, %v9053_v1  ;;  %v3956_v53 = vmul.f32 %v3948_v12, %v3940_v54  ;;  %v3904_v62 = vld [vmem:[#allocation3 + $0x158] sm:$0xff]  ;;  %v3782_v3 = vld [vmem:[#allocation3 + $0x48] sm:$0xff]  ;;  %v3808_v26 = vpop.permute.xlu2 %3807  ;;  %v10487_v54 = vld [vmem:[#allocation42_spill] sm:$0xff] }
 0xb30   :  { %v3829_v22 = vmul.f32 %v3821_v48, %v3819_v37  ;;  %4120 = vmatpush.bf16.msra.mxu2 %v4054_v58  ;;  %4146 = vmatpush.bf16.msrb.mxu1 %v4055_v20  ;;  %v3777_v1 = vsel %vm10481_vm8, %v9127_v15, %v9017_v61  ;;  %v3952_v9 = vmul.f32 %v3944_v33, %v3939_v36  ;;  %v3867_v48 = vld [vmem:[#allocation3 + $0xf0] sm:$0xff]  ;;  %v3746_v40 = vld [vmem:[#allocation3 + $0x28] sm:$0xff]  ;;  %v10486_v12 = vld [vmem:[#allocation39_spill] sm:$0xff] }
 0xb31   :  { %v4070_v16 = vpack.c.bf16 %v4034_v63, %v4030_v8  ;;  %v3856_v15 = vsel %vm844_vm6, %v9139_v25, %v9282_v28  ;;  %v4046_v27 = vpack.c.bf16 %v3834_v60, %v3830_v23  ;;  %v3912_v20 = vmul.f32 %v3904_v62, %v3899_v14  ;;  %v3741_v36 = vld [vmem:[#allocation3] sm:$0xff] }
 0xb32   :  { %v4045_v24 = vpack.c.bf16 %v3833_v0, %v3829_v22  ;;  %v4064_v37 = vpack.c.bf16 %v3956_v53, %v3952_v9  ;;  %v3790_v6 = vmul.f32 %v3782_v3, %v3777_v1  ;;  %v3875_v46 = vmul.f32 %v3867_v48, %v3856_v15  ;;  %v3742_v0 = vld [vmem:[#allocation3 + $0x8] sm:$0xff]  ;;  %v3745_v53 = vld [vmem:[#allocation3 + $0x20] sm:$0xff]  ;;  %v3827_v1 = vld [vmem:[#allocation3 + $0xb0] sm:$0xff] }
 0xb33   :  { %4137 = vmatpush.bf16.msra.mxu3 %v4070_v16  ;;  %v3916_v22 = vmul.f32 %v3908_v45, %v3900_v19  ;;  %v3754_v60 = vmul.f32 %v3746_v40, %v3738_v42  ;;  %v3739_v11 = vsel %vm10490_vm1, %v10489_v31, %v10487_v54  ;;  %v4083_v23 = vunpack.c.l.b16 %v9247_v29  ;;  %v10492_v3 = vld [vmem:[#allocation41_spill] sm:$0xff]  ;;  %v3828_v40 = vld [vmem:[#allocation3 + $0xb8] sm:$0xff] }
 0xb34   :  { %4096 = vmatpush.bf16.msra.mxu0 %v4045_v24  ;;  %4121 = vmatpush.bf16.msra.mxu2 %v10482_v10  ;;  %v4042_v16 = vpack.c.bf16 %v3794_v44, %v3790_v6  ;;  %v3816_v62 = vsel %vm802_vm7, %v9162_v18, %v3808_v26  ;;  %v3823_v10 = vld [vmem:[#allocation3 + $0x90] sm:$0xff]  ;;  %v3749_v9 = vmul.f32 %v3741_v36, %v3739_v11  ;;  %v3784_v6 = vld [vmem:[#allocation3 + $0x58] sm:$0xff] }
 0xb35   :  { %v9346_v58 = vpop.permute.xlu0 %3771  ;;  %v4060_v24 = vpack.c.bf16 %v3916_v22, %v3912_v20  ;;  %v9392_v45 = vpack.c.b16 %v4083_v23, %v4083_v23  ;;  %v3835_v19 = vmul.f32 %v3827_v1, %v3816_v62  ;;  %v3814_v20 = vsel %vm802_vm7, %v3808_v26, %v9249_v35  ;;  %v3743_v23 = vld [vmem:[#allocation3 + $0x10] sm:$0xff] }
 0xb36   :  { %v3780_v25 = vsel %vm10484_vm13, %v9346_v58, %v9202_v51  ;;  %v3846_v7 = vpop.permute.xlu1 %3845  ;;  %5463 = vmatmul.msk.bf16.vlgmr.msra.gmra.mxu3 %vm134_vm0, %v9256_v5  ;;  %v3737_v51 = vsel %vm10488_vm15, %v10487_v54, %v10486_v12  ;;  %v3836_v35 = vmul.f32 %v3828_v40, %v3814_v20  ;;  %vm10499_vm13 = vmmov %vm10490_vm1 }
 0xb37   :  { %4169 = vmatpush.bf16.msrb.mxu3 %v4068_v57  ;;  %v3793_v8 = vmul.f32 %v3785_v2, %v3780_v25  ;;  %v3855_v63 = vsel %vm844_vm6, %v10485_v56, %v3846_v7  ;;  %v3750_v32 = vmul.f32 %v3742_v0, %v3737_v51  ;;  %v3853_v57 = vsel %vm844_vm6, %v3846_v7, %v9151_v17  ;;  %v10491_v2 = vld [vmem:[#allocation40_spill] sm:$0xff]  ;;  %v3726_v44 = vpop.permute.xlu2 %3725  ;;  %v3824_v25 = vld [vmem:[#allocation3 + $0x98] sm:$0xff]  ;;  %v10494_v56 = vld [vmem:[#allocation37_spill] sm:$0xff] }
 0xb38   :  { %v3871_v47 = vmul.f32 %v3863_v34, %v3855_v63  ;;  %4122 = vmatpush.bf16.msra.mxu2 %v4046_v27  ;;  %v4056_v29 = vpack.c.bf16 %v10492_v3, %v10491_v2  ;;  %v3854_v17 = vsel %vm844_vm6, %v9282_v28, %v9261_v39  ;;  %v3872_v18 = vmul.f32 %v3864_v50, %v3853_v57  ;;  %v3788_v0 = vld [vmem:[#allocation3 + $0x78] sm:$0xff]  ;;  %vm10500_vm15 = vmmov %vm10490_vm1  ;;  %v10501_v3 = vld [vmem:[#allocation44_spill] sm:$0xff] }
 0xb39   :  { %v4041_v59 = vpack.c.bf16 %v3793_v8, %v3789_v21  ;;  %v3868_v21 = vld [vmem:[#allocation3 + $0xf8] sm:$0xff]  ;;  %v4038_v34 = vpack.c.bf16 %v3754_v60, %v3750_v32  ;;  %v3783_v8 = vld [vmem:[#allocation3 + $0x50] sm:$0xff]  ;;  %v3775_v63 = vsel %vm10495_vm14, %v9017_v61, %v10494_v56 }
 0xb3a   :  { %v4051_v33 = vpack.c.bf16 %v3875_v46, %v3871_v47  ;;  %v3773_v46 = vsel %vm10496_vm11, %v10494_v56, %v9174_v52  ;;  %v3787_v47 = vld [vmem:[#allocation3 + $0x70] sm:$0xff]  ;;  %v3791_v54 = vmul.f32 %v3783_v8, %v3775_v63  ;;  %v3744_v32 = vld [vmem:[#allocation3 + $0x18] sm:$0xff] }
 0xb3b   :  { %4170 = vmatpush.bf16.msrb.mxu3 %v4064_v37  ;;  %4097 = vmatpush.bf16.msra.mxu0 %v4041_v59  ;;  %v3747_v61 = vld [vmem:[#allocation3 + $0x30] sm:$0xff]  ;;  %v4028_v2 = vld [vmem:[#allocation3 + $0x238] sm:$0xff] }
 0xb3c   :  { %4123 = vmatpush.bf16.msra.mxu2 %v4042_v16  ;;  %4147 = vmatpush.bf16.msrb.mxu1 %v4051_v33  ;;  %v3792_v16 = vmul.f32 %v3784_v6, %v3773_v46  ;;  %v3748_v33 = vld [vmem:[#allocation3 + $0x38] sm:$0xff] }
 0xb3d   :  { %v3732_v14 = vpop.permute.xlu0 %3731 }
 0xb3e   :  { %v3740_v48 = vsel %vm10493_vm2, %v3732_v14, %v9069_v55  ;;  %v3806_v15 = vpop.permute.xlu1 %3805  ;;  %v3876_v55 = vmul.f32 %v3868_v21, %v3854_v17 }
 0xb3f   :  { %4171 = vmatpush.bf16.msrb.mxu3 %v4060_v24  ;;  %v3753_v27 = vmul.f32 %v3745_v53, %v3740_v48  ;;  %v3815_v42 = vsel %vm802_vm7, %v9063_v4, %v3806_v15  ;;  %v3813_v39 = vsel %vm802_vm7, %v3806_v15, %v9307_v13  ;;  %v10502_v15 = vld [vmem:[#allocation36_spill] sm:$0xff] }
 0xb40   :  { %v3831_v28 = vmul.f32 %v3823_v10, %v3815_v42  ;;  %4124 = vmatpush.bf16.msra.mxu2 %v4038_v34  ;;  %v3832_v37 = vmul.f32 %v3824_v25, %v3813_v39  ;;  %v4052_v13 = vpack.c.bf16 %v3876_v55, %v3872_v18 }
 0xb41   :  { %v4037_v7 = vpack.c.bf16 %v3753_v27, %v3749_v9  ;;  %v4024_v9 = vld [vmem:[#allocation3 + $0x218] sm:$0xff] }
 0xb42   :  { %v4047_v4 = vpack.c.bf16 %v3835_v19, %v3831_v28  ;;  %v4048_v60 = vpack.c.bf16 %v3836_v35, %v3832_v37 }
 0xb43   :  { %4172 = vmatpush.bf16.msrb.mxu3 %v4056_v29  ;;  %4125 = vmatmul.bf16.vlgmr.msra.gmra.mxu2 %v9392_v45 }
 0xb44   :  { %4098 = vmatpush.bf16.msra.mxu0 %v4037_v7  ;;  %4148 = vmatpush.bf16.msrb.mxu1 %v4047_v4 }
 0xb45   :  { %v3728_v26 = vpop.permute.xlu0 %3727 }
 0xb46   :  { %v3768_v51 = vpop.permute.xlu1 %3767  ;;  %v3736_v22 = vsel %vm10497_vm12, %v9178_v30, %v3728_v26  ;;  %v3734_v36 = vsel %vm10499_vm13, %v3728_v26, %v3732_v14  ;;  %v3735_v30 = vsel %vm10500_vm15, %v10486_v12, %v3726_v44  ;;  %v4027_v14 = vld [vmem:[#allocation3 + $0x230] sm:$0xff] }
 0xb47   :  { %4173 = vmatpush.bf16.msrb.mxu3 %v4052_v13  ;;  %4099 = vmatmul.bf16.vlgmr.msra.gmra.mxu0 %v9392_v45  ;;  %v3774_v59 = vsel %vm10481_vm8, %v3768_v51, %v9346_v58  ;;  %v3776_v52 = vsel %vm10498_vm9, %v9170_v43, %v3768_v51  ;;  %v3733_v58 = vsel %vm10490_vm1, %v3726_v44, %v10489_v31  ;;  %v4012_v43 = vpop.permute.xlu2 %4011  ;;  %v4023_v31 = vld [vmem:[#allocation3 + $0x210] sm:$0xff] }
 0xb48   :  { %v3795_v11 = vmul.f32 %v3787_v47, %v3776_v52  ;;  %v3796_v24 = vmul.f32 %v3788_v0, %v3774_v59  ;;  %v3755_v50 = vmul.f32 %v3747_v61, %v3736_v22  ;;  %v3756_v1 = vmul.f32 %v3748_v33, %v3734_v36 }
 0xb49   :  { %v3751_v62 = vmul.f32 %v3743_v23, %v3735_v30  ;;  %v3752_v10 = vmul.f32 %v3744_v32, %v3733_v58  ;;  %v4014_v12 = vsel %vm1012_vm10, %v9291_v41, %v4012_v43  ;;  %v4020_v29 = vsel %vm1012_vm10, %v4012_v43, %v10501_v3 }
 0xb4a   :  { %v4043_v57 = vpack.c.bf16 %v3795_v11, %v3791_v54  ;;  %v4044_v53 = vpack.c.bf16 %v3796_v24, %v3792_v16  ;;  %v4035_v27 = vmul.f32 %v4027_v14, %v4014_v12  ;;  %v4036_v41 = vmul.f32 %v4028_v2, %v4020_v29 }
 0xb4b   :  { %4174 = vmatpush.bf16.msrb.mxu3 %v4048_v60  ;;  %v4039_v17 = vpack.c.bf16 %v3755_v50, %v3751_v62  ;;  %v4040_v18 = vpack.c.bf16 %v3756_v1, %v3752_v10 }
 0xb4c   :  { %4149 = vmatpush.bf16.msrb.mxu1 %v4043_v57 }
 0xb4d   :  { %v4080_v7 = vpop.permute.xlu0 %4079 }
 0xb4e   :  { %v4010_v21 = vpop.permute.xlu1 %4009 }
 0xb4f   :  { %4175 = vmatpush.bf16.msrb.mxu3 %v4044_v53  ;;  %v4013_v48 = vsel %vm1012_vm10, %v9168_v38, %v4010_v21  ;;  %v4019_v34 = vsel %vm1012_vm10, %v4010_v21, %v10502_v15 }
 0xb50   :  { %v4031_v42 = vmul.f32 %v4023_v31, %v4013_v48  ;;  %v4032_v19 = vmul.f32 %v4024_v9, %v4019_v34  ;;  %4150 = vmatpush.bf16.msrb.mxu1 %v4039_v17 }
 0xb52   :  { %v4071_v44 = vpack.c.bf16 %v4035_v27, %v4031_v42  ;;  %v4072_v25 = vpack.c.bf16 %v4036_v41, %v4032_v19 }
 0xb53   :  { %4176 = vmatpush.bf16.msrb.mxu3 %v4040_v18  ;;  %4151 = vmatmul.bf16.vlgmr.msrb.gmra.mxu1 %v9392_v45 }
 0xb54   :  { %4163 = vmatpush.bf16.msrb.mxu0 %v4071_v44  ;;  %4189 = vmatpush.bf16.msrb.mxu2 %v4072_v25 }
 0xb56   :  { %4177 = vmatmul.bf16.vlgmr.msrb.gmra.mxu3 %v9392_v45 }
 0xb57   :  { %5464 = vmatmul.msk.bf16.vlgmr.msrb.gmra.mxu0 %vm134_vm0, %v9256_v5  ;;  %5465 = vmatmul.msk.bf16.vlgmr.msrb.gmra.mxu2 %vm134_vm0, %v9256_v5 }
 0xba0   :  { %v4113_v38 = vpop.f32.mrf.mxu1 }
 0xba8   :  { %v4115_v39 = vpop.f32.mrf.mxu1 }
 0xbb9   :  { %v4139_v28 = vpop.f32.mrf.mxu3 }
 0xbc1   :  { %v4141_v55 = vpop.f32.mrf.mxu3 }
 0xbc4   :  { %v4100_v40 = vpop.f32.mrf.mxu0 }
 0xbc5   :  { %v4101_v20 = vadd.f32 %v4100_v40, %v4080_v7 }
 0xbc6   :  { %v4126_v8 = vpop.f32.mrf.mxu2 }
 0xbc7   :  { %v4114_v4 = vadd.f32 %v4113_v38, %v4101_v20  ;;  %v4127_v45 = vadd.f32 %v4126_v8, %v4080_v7 }
 0xbc9   :  { %v5466_v56 = vmul.f32 -1.442695, %v4114_v4  ;;  %v9445_v6 = vadd.f32 %v4139_v28, %v4127_v45 }
 0xbcb   :  { %5825 = vpow2.f32 %v5466_v56  ;;  %v5467_v26 = vmul.f32 -1.442695, %v9445_v6 }
 0xbcc   :  { %v4102_v63 = vpop.f32.mrf.mxu0 }
 0xbce   :  { %v4128_v37 = vpop.f32.mrf.mxu2 }
 0xbd0   :  { %v4152_v46 = vpop.f32.mrf.mxu1 }
 0xbd1   :  { %v5826_v13 = vpop.eup %5825  ;;  %v4153_v5 = vadd.f32 %v4152_v46, %v4080_v7 }
 0xbd2   :  { %v4207_v35 = vadd.f32 1.0, %v5826_v13 }
 0xbd4   :  { %5827 = vrcp.f32 %v4207_v35  ;;  %v4165_v47 = vpop.f32.mrf.mxu0  ;;  %v4222_v11 = vand.u32 2147483648, %v4207_v35  ;;  %v4220_v30 = vand.u32 2147483647, %v4207_v35  ;;  %vm4216_vm2 = vweird.f32 %v4207_v35 }
 0xbd5   :  { %v4166_v0 = vadd.f32 %v4165_v47, %v4153_v5  ;;  %5829 = vpow2.f32 %v5467_v26  ;;  %v5472_v47 = vld [vmem:[%s10297_s10 + $0x30] sm:$0xff] }
 0xbd6   :  { %v4223_v53 = vor.u32 1.1754944e-38, %v4222_v11  ;;  %vm4221_vm11 = vcmp.eq.f32.partialorder %v4220_v30, 8.507059e+37  ;;  %v100_v11 = vld [vmem:[%s10301_s14] sm:$0xff]  ;;  %v103_v30 = vld [vmem:[%s10301_s14 + $0x18] sm:$0xff] }
 0xbd7   :  { %v5468_v54 = vmul.f32 -1.442695, %v4166_v0 }
 0xbd8   :  { %v4154_v22 = vpop.f32.mrf.mxu1 }
 0xbd9   :  { %v4178_v51 = vpop.f32.mrf.mxu3  ;;  %5831 = vpow2.f32 %v5468_v54  ;;  %v220_v54 = vld [vmem:[%s10291_s4 + $0x8] sm:$0xff] }
 0xbda   :  { %v4179_v61 = vadd.f32 %v4178_v51, %v4080_v7  ;;  %v5828_v59 = vpop.eup %5827  ;;  %v4191_v60 = vpop.f32.mrf.mxu2  ;;  %v219_v51 = vld [vmem:[%s10291_s4] sm:$0xff] }
 0xbdb   :  { %v4212_v52 = vmul.f32 %v5828_v59, %v4207_v35  ;;  %v5830_v24 = vpop.eup %5829  ;;  %vm4217_vm0 = vweird.f32 %v5828_v59 }
 0xbdc   :  { %v9448_v33 = vadd.f32 %v4191_v60, %v4179_v61  ;;  %v4167_v36 = vpop.f32.mrf.mxu0  ;;  %vm4218_vm14 = vmor %vm4216_vm2, %vm4217_vm0  ;;  %v4208_v1 = vadd.f32 1.0, %v5830_v24  ;;  %v4742_v61 = vld [vmem:[%s10299_s12 + $0x18] sm:$0xff]  ;;  %v102_v60 = vld [vmem:[%s10301_s14 + $0x10] sm:$0xff] }
 0xbdd   :  { %v4213_v16 = vsub.f32 1.0, %v4212_v52  ;;  %v4740_v52 = vld [vmem:[%s10299_s12 + $0x8] sm:$0xff] }
 0xbde   :  { %v5469_v32 = vmul.f32 -1.442695, %v9448_v33  ;;  %v4237_v7 = vand.u32 2147483648, %v4208_v1  ;;  %vm4231_vm1 = vweird.f32 %v4208_v1  ;;  %v4235_v40 = vand.u32 2147483647, %v4208_v1  ;;  %v101_v36 = vld [vmem:[%s10301_s14 + $0x8] sm:$0xff] }
 0xbdf   :  { %v4214_v23 = vmul.f32 %v5828_v59, %v4213_v16  ;;  %v5832_v58 = vpop.eup %5831 }
 0xbe0   :  { %v4209_v57 = vadd.f32 1.0, %v5832_v58  ;;  %5833 = vpow2.f32 %v5469_v32  ;;  %v4238_v8 = vor.u32 1.1754944e-38, %v4237_v7  ;;  %vm4236_vm2 = vcmp.eq.f32.partialorder %v4235_v40, 8.507059e+37 }
 0xbe1   :  { %v4180_v43 = vpop.f32.mrf.mxu3  ;;  %v4215_v50 = vadd.f32 %v5828_v59, %v4214_v23 }
 0xbe2   :  { %5835 = vrcp.f32 %v4209_v57  ;;  %v4193_v10 = vpop.f32.mrf.mxu2  ;;  %v4252_v17 = vand.u32 2147483648, %v4209_v57  ;;  %v4250_v15 = vand.u32 2147483647, %v4209_v57  ;;  %vm4246_vm8 = vweird.f32 %v4209_v57 }
 0xbe3   :  { %v4219_v62 = vsel %vm4218_vm14, %v5828_v59, %v4215_v50  ;;  %5837 = vrcp.f32 %v4208_v1  ;;  %v4741_v59 = vld [vmem:[%s10299_s12 + $0x10] sm:$0xff]  ;;  %v4428_v10 = vld [vmem:[#allocation6 + $0x108] sm:$0xff] }
 0xbe4   :  { %v4224_v14 = vsel %vm4221_vm11, %v4223_v53, %v4219_v62  ;;  %v4253_v27 = vor.u32 1.1754944e-38, %v4252_v17  ;;  %vm4251_vm13 = vcmp.eq.f32.partialorder %v4250_v15, 8.507059e+37 }
 0xbe5   :  { %v9451_v2 = vmul.f32 %v4224_v14, %v4114_v4  ;;  %v4427_v14 = vld [vmem:[#allocation6 + $0x100] sm:$0xff] }
 0xbe6   :  { %v5834_v12 = vpop.eup %5833 }
 0xbe7   :  { %4415 = vrot.lane.b32.xlu1 %v9451_v2, %s6059_s1  ;;  %v4210_v31 = vadd.f32 1.0, %v5834_v12 }
 0xbe8   :  { %v5836_v3 = vpop.eup %5835 }
 0xbe9   :  { %v4242_v29 = vmul.f32 %v5836_v3, %v4209_v57  ;;  %v5838_v9 = vpop.eup %5837  ;;  %vm4247_vm12 = vweird.f32 %v5836_v3  ;;  %5839 = vrcp.f32 %v4210_v31  ;;  %v4267_v45 = vand.u32 2147483648, %v4210_v31 }
 0xbea   :  { %v4227_v34 = vmul.f32 %v5838_v9, %v4208_v1  ;;  %vm4248_vm9 = vmor %vm4246_vm8, %vm4247_vm12  ;;  %vm4232_vm15 = vweird.f32 %v5838_v9  ;;  %vm4261_vm11 = vweird.f32 %v4210_v31  ;;  %v4265_v13 = vand.u32 2147483647, %v4210_v31 }
 0xbeb   :  { %v4243_v21 = vsub.f32 1.0, %v4242_v29  ;;  %vm4233_vm0 = vmor %vm4231_vm1, %vm4232_vm15  ;;  %v4268_v35 = vor.u32 1.1754944e-38, %v4267_v45 }
 0xbec   :  { %v4228_v42 = vsub.f32 1.0, %v4227_v34  ;;  %vm4266_vm8 = vcmp.eq.f32.partialorder %v4265_v13, 8.507059e+37  ;;  %v4389_v13 = vld [vmem:[#allocation6 + $0xd0] sm:$0xff] }
 0xbed   :  { %v4244_v48 = vmul.f32 %v5836_v3, %v4243_v21 }
 0xbee   :  { %v4229_v38 = vmul.f32 %v5838_v9, %v4228_v42  ;;  %v4430_v42 = vld [vmem:[#allocation6 + $0x118] sm:$0xff] }
 0xbef   :  { %4375 = vrot.lane.b32.xlu1 %v9451_v2, %s6053_s5  ;;  %v4245_v18 = vadd.f32 %v5836_v3, %v4244_v48  ;;  %v5840_v44 = vpop.eup %5839 }
 0xbf0   :  { %v4257_v39 = vmul.f32 %v5840_v44, %v4210_v31  ;;  %v4230_v28 = vadd.f32 %v5838_v9, %v4229_v38  ;;  %vm4262_vm14 = vweird.f32 %v5840_v44 }
 0xbf1   :  { %v4249_v41 = vsel %vm4248_vm9, %v5836_v3, %v4245_v18  ;;  %vm4263_vm12 = vmor %vm4261_vm11, %vm4262_vm14  ;;  %vm10503_vm9 = vcmask 1043456  }
 0xbf2   :  { %v4254_v19 = vsel %vm4251_vm13, %v4253_v27, %v4249_v41  ;;  %v4258_v55 = vsub.f32 1.0, %v4257_v39  ;;  %v4234_v20 = vsel %vm4233_vm0, %v5838_v9, %v4230_v28  ;;  %vm10504_vm13 = vmmov %vm10503_vm9  ;;  %v4429_v41 = vld [vmem:[#allocation6 + $0x110] sm:$0xff]  ;;  %vm10508_vm0 = vcmp.lt.s32.totalorder %v6509_v49, 17 }
 0xbf3   :  { %v9457_v25 = vmul.f32 %v4254_v19, %v4166_v0  ;;  %v4239_v56 = vsel %vm4236_vm2, %v4238_v8, %v4234_v20  ;;  %v4739_v0 = vld [vmem:[%s10299_s12] sm:$0xff]  ;;  %vm10505_vm15 = vmmov %vm10503_vm9 }
 0xbf4   :  { %v4259_v4 = vmul.f32 %v5840_v44, %v4258_v55  ;;  %v9472_v37 = vmul.f32 %v4239_v56, %v9445_v6  ;;  %v5473_v6 = vld [vmem:[%s10297_s10 + $0x38] sm:$0xff]  ;;  %vm10506_vm1 = vmmov %vm10503_vm9 }
 0xbf5   :  { %4319 = vrot.lane.b32.xlu0 %v9457_v25, %s6055_s24  ;;  %4419 = vrot.lane.b32.xlu2 %v9457_v25, %s6059_s1  ;;  %vm10510_vm14 = vmmov %vm10508_vm0 }
 0xbf6   :  { %v4260_v63 = vadd.f32 %v5840_v44, %v4259_v4 }
 0xbf7   :  { %4395 = vrot.lane.b32.xlu1 %v9451_v2, %s6054_s6 }
 0xbf8   :  { %v4264_v46 = vsel %vm4263_vm12, %v5840_v44, %v4260_v63 }
 0xbf9   :  { %v4269_v5 = vsel %vm4266_vm8, %v4268_v35, %v4264_v46  ;;  %v4390_v46 = vld [vmem:[#allocation6 + $0xd8] sm:$0xff] }
 0xbfa   :  { %v9481_v26 = vmul.f32 %v4269_v5, %v9448_v33 }
 0xbfd   :  { %4339 = vrot.lane.b32.xlu0 %v9457_v25, %s6052_s3  ;;  %4379 = vrot.lane.b32.xlu2 %v9457_v25, %s6053_s5 }
 0xbff   :  { %4355 = vrot.lane.b32.xlu1 %v9451_v2, %s6056_s25 }
 0xc05   :  { %4279 = vrot.lane.b32.xlu0 %v9457_v25, %s6058_s29  ;;  %4399 = vrot.lane.b32.xlu2 %v9457_v25, %s6054_s6 }
 0xc07   :  { %4417 = vrot.lane.b32.xlu1 %v9472_v37, %s6059_s1 }
 0xc0d   :  { %4299 = vrot.lane.b32.xlu0 %v9457_v25, %s6057_s28  ;;  %4359 = vrot.lane.b32.xlu2 %v9457_v25, %s6056_s25 }
 0xc0f   :  { %4321 = vrot.lane.b32.xlu1 %v9481_v26, %s6055_s24 }
 0xc15   :  { %4421 = vrot.lane.b32.xlu0 %v9481_v26, %s6059_s1  ;;  %4317 = vrot.lane.b32.xlu2 %v9472_v37, %s6055_s24 }
 0xc17   :  { %4341 = vrot.lane.b32.xlu1 %v9481_v26, %s6052_s3 }
 0xc1d   :  { %4381 = vrot.lane.b32.xlu0 %v9481_v26, %s6053_s5  ;;  %4337 = vrot.lane.b32.xlu2 %v9472_v37, %s6052_s3 }
 0xc1f   :  { %4281 = vrot.lane.b32.xlu1 %v9481_v26, %s6058_s29 }
 0xc25   :  { %4401 = vrot.lane.b32.xlu0 %v9481_v26, %s6054_s6  ;;  %4277 = vrot.lane.b32.xlu2 %v9472_v37, %s6058_s29 }
 0xc27   :  { %4301 = vrot.lane.b32.xlu1 %v9481_v26, %s6057_s28 }
 0xc2d   :  { %4361 = vrot.lane.b32.xlu0 %v9481_v26, %s6056_s25  ;;  %4297 = vrot.lane.b32.xlu2 %v9472_v37, %s6057_s28 }
 0xc2f   :  { %4357 = vrot.lane.b32.xlu1 %v9472_v37, %s6056_s25 }
 0xc35   :  { %4397 = vrot.lane.b32.xlu0 %v9472_v37, %s6054_s6  ;;  %4377 = vrot.lane.b32.xlu2 %v9472_v37, %s6053_s5 }
 0xc37   :  { %4275 = vrot.lane.b32.xlu1 %v9451_v2, %s6058_s29  ;;  %s5314_s29 = sshll.u32 %s10302_s15, 4  ;;  %s5315_s29 = int_to_ptr.hbm [resolvable:$true] %s5314_s29 }
 0xc3d   :  { %4335 = vrot.lane.b32.xlu0 %v9451_v2, %s6052_s3  ;;  %4315 = vrot.lane.b32.xlu2 %v9451_v2, %s6055_s24 }
 0xc3f   :  { %4468 = vperm.xlu1 %5647, %v5473_v6   ;;  %v4409_v6 = vld [vmem:[#allocation6 + $0xf0] sm:$0xff] }
 0xc45   :  { %4463 = vperm.xlu0 %5646, %v5472_v47   ;;  %4295 = vrot.lane.b32.xlu2 %v9451_v2, %s6057_s28  ;;  %v4410_v47 = vld [vmem:[#allocation6 + $0xf8] sm:$0xff] }
 0xc47   :  { %4745 = vperm.xlu1 %5647, %v4739_v0  }
 0xc4d   :  { %228 = vperm.xlu0 %5646, %v220_v54   ;;  %223 = vperm.xlu2 %5648, %v219_v51  }
 0xc4f   :  { %4760 = vperm.xlu1 %5647, %v4742_v61   ;;  %v4420_v22 = vpop.permute.xlu2 %4419 }
 0xc55   :  { %4755 = vperm.xlu0 %5646, %v4741_v59   ;;  %4750 = vperm.xlu2 %5648, %v4740_v52  }
 0xc57   :  { %116 = vperm.xlu1 %5647, %v102_v60   ;;  %v9552_v16 = vpop.permute.xlu2 %4379 }
 0xc59   :  { %v4416_v33 = vpop.permute.xlu1 %4415 }
 0xc5d   :  { %111 = vperm.xlu0 %5646, %v101_v36   ;;  %106 = vperm.xlu2 %5648, %v100_v11  }
 0xc5f   :  { %v9560_v24 = vpop.permute.xlu2 %4399 }
 0xc61   :  { %v9562_v23 = vpop.permute.xlu1 %4375 }
 0xc65   :  { %121 = vperm.xlu2 %5648, %v103_v30   ;;  %v4369_v30 = vld [vmem:[#allocation6 + $0xb0] sm:$0xff] }
 0xc67   :  { %v9567_v32 = vpop.permute.xlu0 %4319  ;;  %v9569_v58 = vpop.permute.xlu2 %4359 }
 0xc69   :  { %v9571_v43 = vpop.permute.xlu1 %4395 }
 0xc6f   :  { %v9573_v50 = vpop.permute.xlu0 %4339  ;;  %v9575_v57 = vpop.permute.xlu2 %4317 }
 0xc71   :  { %v9577_v53 = vpop.permute.xlu1 %4355 }
 0xc77   :  { %v9579_v1 = vpop.permute.xlu0 %4279  ;;  %v9581_v62 = vpop.permute.xlu2 %4337 }
 0xc79   :  { %v4418_v12 = vpop.permute.xlu1 %4417 }
 0xc7a   :  { %v4424_v3 = vsel %vm1012_vm10, %v4418_v12, %v4420_v22  ;;  %v4425_v29 = vsel %vm1012_vm10, %v4416_v33, %v4418_v12  ;;  %v4344_v12 = vsel %vm844_vm6, %v9581_v62, %v9573_v50 }
 0xc7b   :  { %v4431_v31 = vmul.f32 %v4427_v14, %v4425_v29  ;;  %v4432_v9 = vmul.f32 %v4428_v10, %v4424_v3  ;;  %v4370_v14 = vld [vmem:[#allocation6 + $0xb8] sm:$0xff]  ;;  %v4349_v10 = vld [vmem:[#allocation6 + $0x70] sm:$0xff] }
 0xc7c   :  { %v4309_v3 = vld [vmem:[#allocation6 + $0x30] sm:$0xff] }
 0xc7d   :  { %v4451_v21 = vpack.c.bf16 %v4431_v31, %v4431_v31  ;;  %v4452_v17 = vpack.c.bf16 %v4432_v9, %v4432_v9  ;;  %v4350_v31 = vld [vmem:[#allocation6 + $0x78] sm:$0xff] }
 0xc7f   :  { %v4480_v48 = vsel %vm10503_vm9, %v4451_v21, 0  ;;  %v4483_v15 = vsel %vm10504_vm13, %v4452_v17, 0  ;;  %v9589_v34 = vpop.permute.xlu0 %4299  ;;  %v9591_v18 = vpop.permute.xlu2 %4277 }
 0xc80   :  { %4494 = vmatpush.bf16.msra.mxu0 %v4480_v48  ;;  %4508 = vmatpush.bf16.msra.mxu1 %v4483_v15  ;;  %v4329_v48 = vld [vmem:[#allocation6 + $0x50] sm:$0xff]  ;;  %v4324_v15 = vsel %vm802_vm7, %v9575_v57, %v9567_v32 }
 0xc81   :  { %v9593_v27 = vpop.permute.xlu1 %4321 }
 0xc87   :  { %v4422_v19 = vpop.permute.xlu0 %4421  ;;  %v9595_v44 = vpop.permute.xlu2 %4297 }
 0xc88   :  { %v4423_v38 = vsel %vm1012_vm10, %v4420_v22, %v4422_v19  ;;  %v4426_v39 = vsel %vm1012_vm10, %v4422_v19, %v4416_v33  ;;  %vm10507_vm10 = vcmp.lt.s32.totalorder %v6509_v49, 16  ;;  %v4289_v19 = vld [vmem:[#allocation6 + $0x10] sm:$0xff] }
 0xc89   :  { %v9601_v28 = vpop.permute.xlu1 %4341  ;;  %v4433_v55 = vmul.f32 %v4429_v41, %v4423_v38  ;;  %v4434_v7 = vmul.f32 %v4430_v42, %v4426_v39  ;;  %v4304_v29 = vsel %vm10507_vm10, %v9595_v44, %v9589_v34  ;;  %v4330_v38 = vld [vmem:[#allocation6 + $0x58] sm:$0xff]  ;;  %v4323_v39 = vsel %vm802_vm7, %v9567_v32, %v9593_v27  ;;  %vm10509_vm2 = vmmov %vm10507_vm10 }
 0xc8a   :  { %v4343_v9 = vsel %vm844_vm6, %v9573_v50, %v9601_v28  ;;  %v4284_v50 = vsel %vm10508_vm0, %v9591_v18, %v9579_v1  ;;  %vm10520_vm11 = vmmov %vm10509_vm2 }
 0xc8b   :  { %v4453_v40 = vpack.c.bf16 %v4433_v55, %v4433_v55  ;;  %v4454_v20 = vpack.c.bf16 %v4434_v7, %v4434_v7 }
 0xc8d   :  { %v4486_v4 = vsel %vm10505_vm15, %v4453_v40, 0  ;;  %v4489_v8 = vsel %vm10506_vm1, %v4454_v20, 0  ;;  %v4353_v40 = vmul.f32 %v4349_v10, %v4344_v12  ;;  %v4313_v20 = vmul.f32 %v4309_v3, %v4304_v29  ;;  %v10511_v10 = vld [vmem:[#allocation27_spill] sm:$0xff]  ;;  %v4367_v29 = vld [vmem:[#allocation6 + $0xa0] sm:$0xff] }
 0xc8e   :  { %4522 = vmatpush.bf16.msra.mxu2 %v4486_v4  ;;  %4536 = vmatpush.bf16.msra.mxu3 %v4489_v8  ;;  %v4354_v4 = vmul.f32 %v4350_v31, %v4343_v9  ;;  %v4333_v8 = vmul.f32 %v4329_v48, %v4324_v15  ;;  %v10513_v9 = vld [vmem:[#allocation29_spill] sm:$0xff]  ;;  %v10514_v48 = vld [vmem:[#allocation34_spill] sm:$0xff] }
 0xc8f   :  { %v4382_v56 = vpop.permute.xlu0 %4381  ;;  %v4378_v63 = vpop.permute.xlu2 %4377 }
 0xc90   :  { %v4383_v35 = vsel %vm928_vm4, %v9552_v16, %v4382_v56  ;;  %v4386_v5 = vsel %vm928_vm4, %v4382_v56, %v9562_v23 }
 0xc91   :  { %v9605_v45 = vpop.permute.xlu1 %4281  ;;  %v4393_v22 = vmul.f32 %v4389_v13, %v4383_v35  ;;  %v4394_v59 = vmul.f32 %v4390_v46, %v4386_v5  ;;  %v4293_v46 = vmul.f32 %v4289_v19, %v4284_v50  ;;  %v4334_v35 = vmul.f32 %v4330_v38, %v4323_v39  ;;  %v4387_v5 = vld [vmem:[#allocation6 + $0xc0] sm:$0xff] }
 0xc97   :  { %v4402_v0 = vpop.permute.xlu0 %4401  ;;  %v9613_v54 = vpop.permute.xlu2 %4315 }
 0xc98   :  { %v4403_v51 = vsel %vm970_vm3, %v9560_v24, %v4402_v0  ;;  %v4406_v61 = vsel %vm970_vm3, %v4402_v0, %v9571_v43  ;;  %v4326_v38 = vsel %vm802_vm7, %v9593_v27, %v9613_v54  ;;  %v4325_v27 = vsel %vm802_vm7, %v9613_v54, %v9575_v57  ;;  %vm10519_vm7 = vmmov %vm10509_vm2 }
 0xc99   :  { %v4413_v52 = vmul.f32 %v4409_v6, %v4403_v51  ;;  %v4414_v60 = vmul.f32 %v4410_v47, %v4406_v61  ;;  %v9621_v33 = vpop.permute.xlu1 %4301  ;;  %v4385_v6 = vsel %vm928_vm4, %v9562_v23, %v4378_v63  ;;  %v4310_v47 = vld [vmem:[#allocation6 + $0x38] sm:$0xff]  ;;  %v4408_v51 = vld [vmem:[#allocation6 + $0xe8] sm:$0xff]  ;;  %v4441_v61 = vpack.c.bf16 %v4353_v40, %v4333_v8 }
 0xc9a   :  { %v4303_v32 = vsel %vm10509_vm2, %v9589_v34, %v9621_v33  ;;  %v4391_v23 = vmul.f32 %v4387_v5, %v4385_v6  ;;  %v4328_v8 = vld [vmem:[#allocation6 + $0x48] sm:$0xff] }
 0xc9b   :  { %v4449_v36 = vpack.c.bf16 %v4413_v52, %v4393_v22  ;;  %v4450_v11 = vpack.c.bf16 %v4414_v60, %v4394_v59  ;;  %v4442_v22 = vpack.c.bf16 %v4354_v4, %v4334_v35  ;;  %v4437_v59 = vpack.c.bf16 %v4313_v20, %v4293_v46  ;;  %v4388_v52 = vld [vmem:[#allocation6 + $0xc8] sm:$0xff]  ;;  %v9706_v4 = vld [vmem:[%s10296_s9 + $0x18] sm:$0xff]  ;;  %v4347_v35 = vld [vmem:[#allocation6 + $0x60] sm:$0xff] }
 0xc9c   :  { %v4283_v60 = vsel %vm10510_vm14, %v9579_v1, %v9605_v45  ;;  %v4314_v34 = vmul.f32 %v4310_v47, %v4303_v32  ;;  %v10512_v1 = vld [vmem:[#allocation28_spill] sm:$0xff]  ;;  %v4348_v5 = vld [vmem:[#allocation6 + $0x68] sm:$0xff]  ;;  %v4332_v32 = vmul.f32 %v4328_v8, %v4325_v27 }
 0xc9d   :  { %4523 = vmatpush.bf16.msra.mxu2 %v4449_v36  ;;  %4537 = vmatpush.bf16.msra.mxu3 %v4450_v11 }
 0xc9f   :  { %v4362_v21 = vpop.permute.xlu0 %4361  ;;  %v9635_v17 = vpop.permute.xlu2 %4295 }
 0xca0   :  { %v4363_v41 = vsel %vm886_vm5, %v9569_v58, %v4362_v21  ;;  %v4366_v42 = vsel %vm886_vm5, %v4362_v21, %v9577_v53 }
 0xca1   :  { %v4373_v55 = vmul.f32 %v4369_v30, %v4363_v41  ;;  %v4374_v7 = vmul.f32 %v4370_v14, %v4366_v42  ;;  %v4358_v0 = vpop.permute.xlu1 %4357  ;;  %v4368_v41 = vld [vmem:[#allocation6 + $0xa8] sm:$0xff] }
 0xca2   :  { %v4365_v36 = vsel %vm886_vm5, %v9577_v53, %v4358_v0 }
 0xca3   :  { %v4445_v56 = vpack.c.bf16 %v4373_v55, %v9457_v25  ;;  %v4446_v13 = vpack.c.bf16 %v4374_v7, %v9481_v26  ;;  %v4384_v25 = vsel %vm928_vm4, %v4378_v63, %v9552_v16  ;;  %v4407_v26 = vld [vmem:[#allocation6 + $0xe0] sm:$0xff]  ;;  %v4290_v16 = vld [vmem:[#allocation6 + $0x18] sm:$0xff]  ;;  %v4371_v40 = vmul.f32 %v4367_v29, %v4365_v36  ;;  %vm10516_vm4 = vmmov %vm10508_vm0 }
 0xca4   :  { %v4294_v50 = vmul.f32 %v4290_v16, %v4283_v60  ;;  %v4327_v7 = vld [vmem:[#allocation6 + $0x40] sm:$0xff]  ;;  %v4308_v36 = vld [vmem:[#allocation6 + $0x28] sm:$0xff] }
 0xca5   :  { %4524 = vmatpush.bf16.msra.mxu2 %v4445_v56  ;;  %4538 = vmatpush.bf16.msra.mxu3 %v4446_v13  ;;  %v4331_v6 = vmul.f32 %v4327_v7, %v4326_v38  ;;  %v4443_v54 = vpack.c.bf16 %v4371_v40, %v9451_v2 }
 0xca6   :  { %v4438_v13 = vpack.c.bf16 %v4314_v34, %v4294_v50 }
 0xca7   :  { %v4398_v11 = vpop.permute.xlu0 %4397  ;;  %v224_v30 = vpop.permute.xlu2 %223 }
 0xca8   :  { %v4404_v63 = vsel %vm970_vm3, %v4398_v11, %v9560_v24  ;;  %v4405_v14 = vsel %vm970_vm3, %v9571_v43, %v4398_v11  ;;  %v9681_v12 = vadd.f32 %v10511_v10, %v224_v30  ;;  %v9684_v3 = vadd.f32 %v10512_v1, %v224_v30 }
 0xca9   :  { %v4411_v31 = vmul.f32 %v4407_v26, %v4405_v14  ;;  %v4412_v53 = vmul.f32 %v4408_v51, %v4404_v63  ;;  %v9687_v21 = vadd.f32 %v10513_v9, %v224_v30  ;;  %v9690_v15 = vadd.f32 %v10514_v48, %v224_v30  ;;  %4525 = vmatpush.bf16.msra.mxu2 %v4441_v61  ;;  %v4276_v46 = vpop.permute.xlu1 %4275 }
 0xcaa   :  { %v4392_v24 = vmul.f32 %v4388_v52, %v4384_v25  ;;  %v4364_v43 = vsel %vm886_vm5, %v4358_v0, %v9569_v58  ;;  %v5352_v42 = vmul.f32 -1.442695, %v9681_v12  ;;  %v5353_v19 = vmul.f32 -1.442695, %v9684_v3  ;;  %4539 = vmatpush.bf16.msra.mxu3 %v4442_v22  ;;  %v4287_v25 = vld [vmem:[#allocation6] sm:$0xff]  ;;  %vm10517_vm5 = vmmov %vm10508_vm0 }
 0xcab   :  { %v5354_v39 = vmul.f32 -1.442695, %v9687_v21  ;;  %v5355_v55 = vmul.f32 -1.442695, %v9690_v15  ;;  %v4447_v20 = vpack.c.bf16 %v4411_v31, %v4391_v23  ;;  %v4372_v56 = vmul.f32 %v4368_v41, %v4364_v43  ;;  %v4307_v52 = vld [vmem:[#allocation6 + $0x20] sm:$0xff] }
 0xcac   :  { %5841 = vpow2.f32 %v5352_v42  ;;  %v4448_v58 = vpack.c.bf16 %v4412_v53, %v4392_v24  ;;  %vm10515_vm3 = vcmask 588800   ;;  %v4286_v26 = vsel %vm10516_vm4, %v9605_v45, %v4276_v46 }
 0xcad   :  { %5843 = vpow2.f32 %v5353_v19  ;;  %4526 = vmatpush.bf16.msra.mxu2 %v4437_v59  ;;  %4495 = vmatpush.bf16.msra.mxu0 %v4447_v20  ;;  %v4444_v22 = vpack.c.bf16 %v4372_v56, %v9472_v37  ;;  %v4306_v45 = vsel %vm10519_vm7, %v9621_v33, %v9635_v17  ;;  %v4291_v30 = vmul.f32 %v4287_v25, %v4286_v26  ;;  %vm10525_vm1 = vmmov %vm10515_vm3 }
 0xcae   :  { %5845 = vpow2.f32 %v5354_v39  ;;  %4509 = vmatpush.bf16.msra.mxu1 %v4448_v58  ;;  %4540 = vmatpush.bf16.msra.mxu3 %v4438_v13  ;;  %v4311_v14 = vmul.f32 %v4307_v52, %v4306_v45  ;;  %vm10528_vm2 = vmmov %vm10525_vm1 }
 0xcaf   :  { %5847 = vpow2.f32 %v5355_v55  ;;  %v4336_v47 = vpop.permute.xlu0 %4335 }
 0xcb0   :  { %v4345_v0 = vsel %vm844_vm6, %v4336_v47, %v9581_v62  ;;  %v4346_v57 = vsel %vm844_vm6, %v9601_v28, %v4336_v47  ;;  %5480 = vmatmul.msk.bf16.vlgmr.msra.gmra.mxu2 %vm10515_vm3, %v9706_v4  ;;  %v4288_v62 = vld [vmem:[#allocation6 + $0x8] sm:$0xff]  ;;  %v4285_v28 = vsel %vm10517_vm5, %v4276_v46, %v9591_v18  ;;  %vm10518_vm6 = vmmov %vm10515_vm3  ;;  %v4305_v18 = vsel %vm10520_vm11, %v9635_v17, %v9595_v44 }
 0xcb1   :  { %v4351_v51 = vmul.f32 %v4347_v35, %v4346_v57  ;;  %v4352_v61 = vmul.f32 %v4348_v5, %v4345_v0  ;;  %5481 = vmatmul.msk.bf16.vlgmr.msra.gmra.mxu3 %vm10518_vm6, %v9706_v4  ;;  %4496 = vmatpush.bf16.msra.mxu0 %v4443_v54  ;;  %v4292_v33 = vmul.f32 %v4288_v62, %v4285_v28  ;;  %v10529_v0 = vld [vmem:[#allocation30_spill] sm:$0xff]  ;;  %v10530_v54 = vld [vmem:[#allocation31_spill] sm:$0xff] }
 0xcb2   :  { %v5842_v59 = vpop.eup %5841  ;;  %4510 = vmatpush.bf16.msra.mxu1 %v4444_v22  ;;  %v4312_v1 = vmul.f32 %v4308_v36, %v4305_v18  ;;  %v4435_v29 = vpack.c.bf16 %v4311_v14, %v4291_v30 }
 0xcb3   :  { %v5844_v2 = vpop.eup %5843  ;;  %v9734_v23 = vadd.f32 1.0, %v5842_v59  ;;  %v4439_v37 = vpack.c.bf16 %v4351_v51, %v4331_v6  ;;  %v4440_v60 = vpack.c.bf16 %v4352_v61, %v4332_v32  ;;  %v10532_v59 = vld [vmem:[#allocation35_spill] sm:$0xff] }
 0xcb4   :  { %v5846_v34 = vpop.eup %5845  ;;  %v9740_v11 = vadd.f32 1.0, %v5844_v2  ;;  %v4436_v9 = vpack.c.bf16 %v4312_v1, %v4292_v33 }
 0xcb5   :  { %v5848_v16 = vpop.eup %5847  ;;  %v9742_v63 = vadd.f32 1.0, %v5846_v34  ;;  %5849 = vrcp.f32 %v9734_v23  ;;  %4497 = vmatpush.bf16.msra.mxu0 %v4439_v37  ;;  %v336_v44 = vand.u32 2147483647, %v9734_v23  ;;  %v338_v17 = vand.u32 2147483648, %v9734_v23 }
 0xcb6   :  { %v9745_v10 = vadd.f32 1.0, %v5848_v16  ;;  %5851 = vrcp.f32 %v9740_v11  ;;  %4511 = vmatpush.bf16.msra.mxu1 %v4440_v60  ;;  %v351_v31 = vand.u32 2147483647, %v9740_v11  ;;  %v353_v53 = vand.u32 2147483648, %v9740_v11 }
 0xcb7   :  { %5853 = vrcp.f32 %v9742_v63  ;;  %v9749_v49 = vpop.permute.xlu0 %4463  ;;  %v366_v48 = vand.u32 2147483647, %v9742_v63  ;;  %v368_v24 = vand.u32 2147483648, %v9742_v63  ;;  %vm332_vm12 = vweird.f32 %v9734_v23 }
 0xcb8   :  { %5855 = vrcp.f32 %v9745_v10  ;;  %vm9760_vm8 = vcmp.eq.f32.partialorder %v336_v44, 8.507059e+37  ;;  %v339_v50 = vor.u32 1.1754944e-38, %v338_v17  ;;  %vm347_vm9 = vweird.f32 %v9740_v11 }
 0xcb9   :  { %4498 = vmatpush.bf16.msra.mxu0 %v4435_v29  ;;  %vm9766_vm13 = vcmp.eq.f32.partialorder %v351_v31, 8.507059e+37  ;;  %v354_v7 = vor.u32 1.1754944e-38, %v353_v53  ;;  %vm362_vm15 = vweird.f32 %v9742_v63  ;;  %vm9774_vm10 = vcmp.eq.f32.partialorder %v366_v48, 8.507059e+37 }
 0xcba   :  { %4512 = vmatpush.bf16.msra.mxu1 %v4436_v9  ;;  %v369_v8 = vor.u32 1.1754944e-38, %v368_v24  ;;  %vm377_vm0 = vweird.f32 %v9745_v10  ;;  %v381_v27 = vand.u32 2147483647, %v9745_v10  ;;  %v383_v46 = vand.u32 2147483648, %v9745_v10 }
 0xcbb   :  { %v5850_v41 = vpop.eup %5849 }
 0xcbc   :  { %v5852_v43 = vpop.eup %5851  ;;  %v328_v42 = vmul.f32 %v5850_v41, %v9734_v23  ;;  %5478 = vmatmul.msk.bf16.vlgmr.msra.gmra.mxu0 %vm10525_vm1, %v9706_v4  ;;  %vm333_vm14 = vweird.f32 %v5850_v41  ;;  %v384_v1 = vor.u32 1.1754944e-38, %v383_v46 }
 0xcbd   :  { %v5854_v38 = vpop.eup %5853  ;;  %v343_v39 = vmul.f32 %v5852_v43, %v9740_v11  ;;  %5479 = vmatmul.msk.bf16.vlgmr.msra.gmra.mxu1 %vm10528_vm2, %v9706_v4  ;;  %vm348_vm3 = vweird.f32 %v5852_v43  ;;  %v10531_v4 = vld [vmem:[#allocation33_spill] sm:$0xff]  ;;  %vm334_vm5 = vmor %vm332_vm12, %vm333_vm14 }
 0xcbe   :  { %v329_v40 = vsub.f32 1.0, %v328_v42  ;;  %v358_v20 = vmul.f32 %v5854_v38, %v9742_v63  ;;  %v5856_v56 = vpop.eup %5855  ;;  %vm363_vm4 = vweird.f32 %v5854_v38  ;;  %vm349_vm7 = vmor %vm347_vm9, %vm348_vm3 }
 0xcbf   :  { %v344_v13 = vsub.f32 1.0, %v343_v39  ;;  %v229_v35 = vpop.permute.xlu0 %228  ;;  %v373_v47 = vmul.f32 %v5856_v56, %v9745_v10  ;;  %vm378_vm6 = vweird.f32 %v5856_v56  ;;  %vm364_vm11 = vmor %vm362_vm15, %vm363_vm4 }
 0xcc0   :  { %v330_v5 = vmul.f32 %v5850_v41, %v329_v40  ;;  %v359_v6 = vsub.f32 1.0, %v358_v20  ;;  %v9785_v57 = vadd.f32 %v10529_v0, %v229_v35  ;;  %v9788_v25 = vadd.f32 %v10530_v54, %v229_v35  ;;  %vm379_vm12 = vmor %vm377_vm0, %vm378_vm6 }
 0xcc1   :  { %v345_v32 = vmul.f32 %v5852_v43, %v344_v13  ;;  %v9791_v26 = vadd.f32 %v10531_v4, %v229_v35  ;;  %v374_v22 = vsub.f32 1.0, %v373_v47  ;;  %v9794_v62 = vadd.f32 %v10532_v59, %v229_v35 }
 0xcc2   :  { %v331_v51 = vadd.f32 %v5850_v41, %v330_v5  ;;  %v360_v61 = vmul.f32 %v5854_v38, %v359_v6  ;;  %v5356_v2 = vmul.f32 -1.442695, %v9785_v57  ;;  %v5357_v52 = vmul.f32 -1.442695, %v9788_v25 }
 0xcc3   :  { %v346_v28 = vadd.f32 %v5852_v43, %v345_v32  ;;  %v375_v60 = vmul.f32 %v5856_v56, %v374_v22  ;;  %v5358_v34 = vmul.f32 -1.442695, %v9791_v26  ;;  %v5359_v18 = vmul.f32 -1.442695, %v9794_v62 }
 0xcc4   :  { %v335_v45 = vsel %vm334_vm5, %v5850_v41, %v331_v51  ;;  %v361_v37 = vadd.f32 %v5854_v38, %v360_v61  ;;  %5857 = vpow2.f32 %v5356_v2 }
 0xcc5   :  { %v340_v36 = vsel %vm9760_vm8, %v339_v50, %v335_v45  ;;  %v350_v23 = vsel %vm349_vm7, %v5852_v43, %v346_v28  ;;  %v376_v16 = vadd.f32 %v5856_v56, %v375_v60  ;;  %5859 = vpow2.f32 %v5357_v52 }
 0xcc6   :  { %v355_v30 = vsel %vm9766_vm13, %v354_v7, %v350_v23  ;;  %v365_v11 = vsel %vm364_vm11, %v5854_v38, %v361_v37  ;;  %v447_v33 = vmul.f32 %v340_v36, %v9681_v12  ;;  %vm382_vm8 = vcmp.eq.f32.partialorder %v381_v27, 8.507059e+37 }
 0xcc7   :  { %v370_v14 = vsel %vm9774_vm10, %v369_v8, %v365_v11  ;;  %v448_v63 = vmul.f32 %v355_v30, %v9684_v3  ;;  %v380_v44 = vsel %vm379_vm12, %v5856_v56, %v376_v16  ;;  %5861 = vpow2.f32 %v5358_v34 }
 0xcc8   :  { %v449_v17 = vmul.f32 %v370_v14, %v9687_v21  ;;  %v385_v29 = vsel %vm382_vm8, %v384_v1, %v380_v44  ;;  %5863 = vpow2.f32 %v5359_v18 }
 0xcc9   :  { %v455_v31 = vpack.c.bf16 %v448_v63, %v447_v33  ;;  %v450_v12 = vmul.f32 %v385_v29, %v9690_v15 }
 0xcca   :  { %v5858_v53 = vpop.eup %5857 }
 0xccb   :  { %459 = vst [vmem:[#allocation2] sm:$0xff] %v455_v31  ;;  %v456_v9 = vpack.c.bf16 %v450_v12, %v449_v17  ;;  %v323_v48 = vadd.f32 1.0, %v5858_v53  ;;  %v5860_v10 = vpop.eup %5859 }
 0xccc   :  { %v324_v41 = vadd.f32 1.0, %v5860_v10 }
 0xccd   :  { %v5862_v24 = vpop.eup %5861  ;;  %460 = vst [vmem:[#allocation2 + $0x8] sm:$0xff] %v456_v9  ;;  %5865 = vrcp.f32 %v323_v48  ;;  %v396_v21 = vand.u32 2147483647, %v323_v48  ;;  %v398_v50 = vand.u32 2147483648, %v323_v48  ;;  %vm392_vm9 = vweird.f32 %v323_v48 }
 0xcce   :  { %v5864_v3 = vpop.eup %5863  ;;  %v325_v43 = vadd.f32 1.0, %v5862_v24  ;;  %5867 = vrcp.f32 %v324_v41  ;;  %v411_v39 = vand.u32 2147483647, %v324_v41  ;;  %vm407_vm15 = vweird.f32 %v324_v41 }
 0xccf   :  { %v326_v42 = vadd.f32 1.0, %v5864_v3  ;;  %vm9822_vm13 = vcmp.eq.f32.partialorder %v396_v21, 8.507059e+37  ;;  %v399_v8 = vor.u32 1.1754944e-38, %v398_v50  ;;  %v413_v27 = vand.u32 2147483648, %v324_v41 }
 0xcd0   :  { %5869 = vrcp.f32 %v325_v43  ;;  %vm422_vm1 = vweird.f32 %v325_v43  ;;  %vm9826_vm0 = vcmp.eq.f32.partialorder %v411_v39, 8.507059e+37  ;;  %v426_v47 = vand.u32 2147483647, %v325_v43 }
 0xcd1   :  { %5871 = vrcp.f32 %v326_v42  ;;  %v428_v32 = vand.u32 2147483648, %v325_v43  ;;  %v441_v61 = vand.u32 2147483647, %v326_v42  ;;  %v443_v22 = vand.u32 2147483648, %v326_v42 }
 0xcd2   :  { %v414_v45 = vor.u32 1.1754944e-38, %v413_v27  ;;  %vm437_vm6 = vweird.f32 %v326_v42  ;;  %vm427_vm11 = vcmp.eq.f32.partialorder %v426_v47, 8.507059e+37 }
 0xcd3   :  { %v5866_v19 = vpop.eup %5865  ;;  %v429_v34 = vor.u32 1.1754944e-38, %v428_v32  ;;  %v444_v11 = vor.u32 1.1754944e-38, %v443_v22  ;;  %vm442_vm8 = vcmp.eq.f32.partialorder %v441_v61, 8.507059e+37 }
 0xcd4   :  { %v388_v38 = vmul.f32 %v5866_v19, %v323_v48  ;;  %v5868_v15 = vpop.eup %5867  ;;  %vm393_vm10 = vweird.f32 %v5866_v19 }
 0xcd5   :  { %v403_v20 = vmul.f32 %v5868_v15, %v324_v41  ;;  %vm408_vm2 = vweird.f32 %v5868_v15  ;;  %vm394_vm14 = vmor %vm392_vm9, %vm393_vm10 }
 0xcd6   :  { %v5870_v55 = vpop.eup %5869  ;;  %v389_v7 = vsub.f32 1.0, %v388_v38  ;;  %vm409_vm5 = vmor %vm407_vm15, %vm408_vm2 }
 0xcd7   :  { %v5872_v58 = vpop.eup %5871  ;;  %v418_v56 = vmul.f32 %v5870_v55, %v325_v43  ;;  %v404_v46 = vsub.f32 1.0, %v403_v20  ;;  %vm423_vm3 = vweird.f32 %v5870_v55 }
 0xcd8   :  { %v390_v13 = vmul.f32 %v5866_v19, %v389_v7  ;;  %v433_v35 = vmul.f32 %v5872_v58, %v326_v42  ;;  %vm438_vm4 = vweird.f32 %v5872_v58  ;;  %vm424_vm7 = vmor %vm422_vm1, %vm423_vm3 }
 0xcd9   :  { %v419_v6 = vsub.f32 1.0, %v418_v56  ;;  %v405_v54 = vmul.f32 %v5868_v15, %v404_v46  ;;  %vm439_vm12 = vmor %vm437_vm6, %vm438_vm4 }
 0xcda   :  { %v391_v0 = vadd.f32 %v5866_v19, %v390_v13  ;;  %v434_v4 = vsub.f32 1.0, %v433_v35 }
 0xcdb   :  { %v420_v51 = vmul.f32 %v5870_v55, %v419_v6  ;;  %v406_v28 = vadd.f32 %v5868_v15, %v405_v54 }
 0xcdc   :  { %v395_v59 = vsel %vm394_vm14, %v5866_v19, %v391_v0  ;;  %v435_v2 = vmul.f32 %v5872_v58, %v434_v4 }
 0xcdd   :  { %v400_v52 = vsel %vm9822_vm13, %v399_v8, %v395_v59  ;;  %v421_v37 = vadd.f32 %v5870_v55, %v420_v51  ;;  %v410_v60 = vsel %vm409_vm5, %v5868_v15, %v406_v28 }
 0xcde   :  { %v436_v36 = vadd.f32 %v5872_v58, %v435_v2  ;;  %v451_v23 = vmul.f32 %v400_v52, %v9785_v57  ;;  %v415_v18 = vsel %vm9826_vm0, %v414_v45, %v410_v60 }
 0xcdf   :  { %v425_v30 = vsel %vm424_vm7, %v5870_v55, %v421_v37  ;;  %v452_v14 = vmul.f32 %v415_v18, %v9788_v25 }
 0xce0   :  { %v430_v16 = vsel %vm427_vm11, %v429_v34, %v425_v30  ;;  %v440_v33 = vsel %vm439_vm12, %v5872_v58, %v436_v36 }
 0xce1   :  { %v445_v1 = vsel %vm442_vm8, %v444_v11, %v440_v33  ;;  %v453_v63 = vmul.f32 %v430_v16, %v9791_v26  ;;  %v457_v17 = vpack.c.bf16 %v452_v14, %v451_v23  ;;  %v4469_v26 = vpop.permute.xlu1 %4468 }
 0xce2   :  { %v454_v44 = vmul.f32 %v445_v1, %v9794_v62 }
 0xce3   :  { %461 = vst [vmem:[#allocation2 + $0x10] sm:$0xff] %v457_v17 }
 0xce4   :  { %v458_v29 = vpack.c.bf16 %v454_v44, %v453_v63 }
 0xce6   :  { %462 = vst [vmem:[#allocation2 + $0x18] sm:$0xff] %v458_v29 }
 0xd33   :  { %v4528_v57 = vpop.f32.mrf.mxu2 }
 0xd34   :  { %v9842_v31 = vadd.f32 %v4528_v57, %v9749_v49  ;;  %v4542_v12 = vpop.f32.mrf.mxu3 }
 0xd35   :  { %v9846_v9 = vadd.f32 %v4542_v12, %v9749_v49 }
 0xd36   :  { %v5484_v53 = vmul.f32 -1.442695, %v9842_v31 }
 0xd37   :  { %v5485_v25 = vmul.f32 -1.442695, %v9846_v9 }
 0xd38   :  { %5873 = vpow2.f32 %v5484_v53 }
 0xd39   :  { %5875 = vpow2.f32 %v5485_v25  ;;  %v4500_v62 = vpop.f32.mrf.mxu0 }
 0xd3a   :  { %v9850_v48 = vadd.f32 %v4500_v62, %v9749_v49  ;;  %v4514_v10 = vpop.f32.mrf.mxu1 }
 0xd3b   :  { %v4530_v24 = vpop.f32.mrf.mxu2  ;;  %v9853_v41 = vadd.f32 %v4514_v10, %v9749_v49 }
 0xd3c   :  { %v9855_v3 = vadd.f32 %v4530_v24, %v4469_v26  ;;  %v5482_v43 = vmul.f32 -1.442695, %v9850_v48  ;;  %v4544_v42 = vpop.f32.mrf.mxu3 }
 0xd3d   :  { %v5483_v19 = vmul.f32 -1.442695, %v9853_v41  ;;  %v9860_v38 = vadd.f32 %v4544_v42, %v4469_v26 }
 0xd3e   :  { %v5874_v21 = vpop.eup %5873  ;;  %v5488_v50 = vmul.f32 -1.442695, %v9855_v3  ;;  %5877 = vpow2.f32 %v5482_v43 }
 0xd3f   :  { %v4573_v15 = vadd.f32 1.0, %v5874_v21  ;;  %v5876_v39 = vpop.eup %5875  ;;  %5879 = vpow2.f32 %v5483_v19  ;;  %v5489_v49 = vmul.f32 -1.442695, %v9860_v38 }
 0xd40   :  { %v4574_v55 = vadd.f32 1.0, %v5876_v39 }
 0xd41   :  { %5881 = vrcp.f32 %v4573_v15  ;;  %v4502_v7 = vpop.f32.mrf.mxu0  ;;  %v4618_v56 = vand.u32 2147483647, %v4573_v15  ;;  %v4620_v35 = vand.u32 2147483648, %v4573_v15  ;;  %vm4614_vm9 = vweird.f32 %v4573_v15 }
 0xd42   :  { %5883 = vpow2.f32 %v5488_v50  ;;  %v9863_v40 = vadd.f32 %v4502_v7, %v4469_v26  ;;  %v4516_v8 = vpop.f32.mrf.mxu1  ;;  %v4633_v5 = vand.u32 2147483647, %v4574_v55  ;;  %v4635_v54 = vand.u32 2147483648, %v4574_v55 }
 0xd43   :  { %5885 = vrcp.f32 %v4574_v55  ;;  %v9871_v0 = vadd.f32 %v4516_v8, %v4469_v26  ;;  %vm9874_vm13 = vcmp.eq.f32.partialorder %v4618_v56, 8.507059e+37  ;;  %v4621_v28 = vor.u32 1.1754944e-38, %v4620_v35 }
 0xd44   :  { %v5878_v20 = vpop.eup %5877  ;;  %5887 = vpow2.f32 %v5489_v49  ;;  %v5486_v58 = vmul.f32 -1.442695, %v9863_v40  ;;  %vm4629_vm15 = vweird.f32 %v4574_v55  ;;  %vm9880_vm1 = vcmp.eq.f32.partialorder %v4633_v5, 8.507059e+37 }
 0xd45   :  { %v5880_v27 = vpop.eup %5879  ;;  %v9866_v13 = vadd.f32 1.0, %v5878_v20  ;;  %v5487_v37 = vmul.f32 -1.442695, %v9871_v0  ;;  %v4636_v36 = vor.u32 1.1754944e-38, %v4635_v54 }
 0xd46   :  { %v9868_v6 = vadd.f32 1.0, %v5880_v27  ;;  %5889 = vpow2.f32 %v5486_v58 }
 0xd47   :  { %v5882_v46 = vpop.eup %5881  ;;  %5891 = vrcp.f32 %v9866_v13  ;;  %vm4584_vm0 = vweird.f32 %v9866_v13  ;;  %v4588_v23 = vand.u32 2147483647, %v9866_v13  ;;  %v4590_v11 = vand.u32 2147483648, %v9866_v13 }
 0xd48   :  { %v5884_v47 = vpop.eup %5883  ;;  %v4610_v32 = vmul.f32 %v5882_v46, %v4573_v15  ;;  %5893 = vrcp.f32 %v9868_v6  ;;  %vm4615_vm10 = vweird.f32 %v5882_v46  ;;  %vm4599_vm2 = vweird.f32 %v9868_v6 }
 0xd49   :  { %v5886_v4 = vpop.eup %5885  ;;  %v9878_v22 = vadd.f32 1.0, %v5884_v47  ;;  %vm4616_vm14 = vmor %vm4614_vm9, %vm4615_vm10  ;;  %v4603_v63 = vand.u32 2147483647, %v9868_v6  ;;  %vm9902_vm6 = vcmp.eq.f32.partialorder %v4588_v23, 8.507059e+37  ;;  %v4605_v10 = vand.u32 2147483648, %v9868_v6 }
 0xd4a   :  { %v4611_v51 = vsub.f32 1.0, %v4610_v32  ;;  %v5888_v59 = vpop.eup %5887  ;;  %v4625_v2 = vmul.f32 %v5886_v4, %v4574_v55  ;;  %vm4630_vm3 = vweird.f32 %v5886_v4  ;;  %v4591_v50 = vor.u32 1.1754944e-38, %v4590_v11 }
 0xd4b   :  { %5895 = vrcp.f32 %v9878_v22  ;;  %v9890_v16 = vadd.f32 1.0, %v5888_v59  ;;  %vm4631_vm4 = vmor %vm4629_vm15, %vm4630_vm3  ;;  %v4606_v20 = vor.u32 1.1754944e-38, %v4605_v10  ;;  %v4678_v58 = vand.u32 2147483647, %v9878_v22 }
 0xd4c   :  { %v4612_v45 = vmul.f32 %v5882_v46, %v4611_v51  ;;  %v5890_v60 = vpop.eup %5889  ;;  %v4626_v34 = vsub.f32 1.0, %v4625_v2  ;;  %5897 = vpow2.f32 %v5487_v37  ;;  %v4680_v8 = vand.u32 2147483648, %v9878_v22 }
 0xd4d   :  { %v5892_v18 = vpop.eup %5891  ;;  %v9896_v29 = vadd.f32 1.0, %v5890_v60  ;;  %5899 = vrcp.f32 %v9890_v16  ;;  %vm4604_vm9 = vcmp.eq.f32.partialorder %v4603_v63, 8.507059e+37  ;;  %v4693_v2 = vand.u32 2147483647, %v9890_v16 }
 0xd4e   :  { %v4613_v30 = vadd.f32 %v5882_v46, %v4612_v45  ;;  %v5894_v33 = vpop.eup %5893  ;;  %v4627_v14 = vmul.f32 %v5886_v4, %v4626_v34  ;;  %v4580_v1 = vmul.f32 %v5892_v18, %v9866_v13  ;;  %vm4585_vm5 = vweird.f32 %v5892_v18 }
 0xd4f   :  { %v4595_v17 = vmul.f32 %v5894_v33, %v9868_v6  ;;  %vm4600_vm7 = vweird.f32 %v5894_v33  ;;  %5901 = vrcp.f32 %v9896_v29  ;;  %vm4586_vm11 = vmor %vm4584_vm0, %vm4585_vm5  ;;  %v4695_v52 = vand.u32 2147483648, %v9890_v16 }
 0xd50   :  { %v4617_v44 = vsel %vm4616_vm14, %v5882_v46, %v4613_v30  ;;  %v4628_v12 = vadd.f32 %v5886_v4, %v4627_v14  ;;  %v4581_v53 = vsub.f32 1.0, %v4580_v1  ;;  %vm4601_vm12 = vmor %vm4599_vm2, %vm4600_vm7  ;;  %vm4689_vm0 = vweird.f32 %v9890_v16 }
 0xd51   :  { %v4622_v57 = vsel %vm9874_vm13, %v4621_v28, %v4617_v44  ;;  %v5896_v25 = vpop.eup %5895  ;;  %v4596_v62 = vsub.f32 1.0, %v4595_v17  ;;  %vm4674_vm13 = vweird.f32 %v9878_v22  ;;  %v4681_v28 = vor.u32 1.1754944e-38, %v4680_v8  ;;  %v5623_v8 = vld [vmem:[#allocation2 + $0x54] sm:$0xf0] }
 0xd52   :  { %v4701_v24 = vmul.f32 %v4622_v57, %v9842_v31  ;;  %v4632_v43 = vsel %vm4631_vm4, %v5886_v4, %v4628_v12  ;;  %v4582_v42 = vmul.f32 %v5892_v18, %v4581_v53  ;;  %v4670_v21 = vmul.f32 %v5896_v25, %v9878_v22  ;;  %v5898_v7 = vpop.eup %5897 }
 0xd53   :  { %v4637_v19 = vsel %vm9880_vm1, %v4636_v36, %v4632_v43  ;;  %v4597_v15 = vmul.f32 %v5894_v33, %v4596_v62  ;;  %v5900_v27 = vpop.eup %5899  ;;  %vm4675_vm8 = vweird.f32 %v5896_v25  ;;  %vm4679_vm1 = vcmp.eq.f32.partialorder %v4678_v58, 8.507059e+37 }
 0xd54   :  { %v4702_v39 = vmul.f32 %v4637_v19, %v9846_v9  ;;  %v4583_v49 = vadd.f32 %v5892_v18, %v4582_v42  ;;  %v4671_v55 = vsub.f32 1.0, %v4670_v21  ;;  %v4685_v13 = vmul.f32 %v5900_v27, %v9890_v16  ;;  %vm4676_vm15 = vmor %vm4674_vm13, %vm4675_vm8 }
 0xd55   :  { %v4598_v31 = vadd.f32 %v5894_v33, %v4597_v15  ;;  %v4576_v51 = vadd.f32 1.0, %v5898_v7  ;;  %v5902_v61 = vpop.eup %5901  ;;  %vm4690_vm10 = vweird.f32 %v5900_v27  ;;  %v4696_v34 = vor.u32 1.1754944e-38, %v4695_v52 }
 0xd56   :  { %v4708_v56 = vpack.c.bf16 %v4702_v39, %v4701_v24  ;;  %v4587_v46 = vsel %vm4586_vm11, %v5892_v18, %v4583_v49  ;;  %v4672_v9 = vmul.f32 %v5896_v25, %v4671_v55  ;;  %v4686_v6 = vsub.f32 1.0, %v4685_v13  ;;  %vm4691_vm2 = vmor %vm4689_vm0, %vm4690_vm10  ;;  %v5627_v49 = vld [vmem:[#allocation2 + $0x74] sm:$0xf0]  ;;  %v5558_v55 = vld [vmem:[#allocation2 + $0x78] sm:$0xf0] }
 0xd57   :  { %v4592_v35 = vsel %vm9902_vm6, %v4591_v50, %v4587_v46  ;;  %v4602_v5 = vsel %vm4601_vm12, %v5894_v33, %v4598_v31  ;;  %5903 = vrcp.f32 %v4576_v51  ;;  %vm4694_vm14 = vcmp.eq.f32.partialorder %v4693_v2, 8.507059e+37  ;;  %v5556_v31 = vld [vmem:[#allocation2 + $0x68] sm:$0xf]  ;;  %v5621_v46 = vld [vmem:[#allocation2 + $0x4c] sm:$0xf] }
 0xd58   :  { %4712 = vst [vmem:[#allocation2 + $0x88] sm:$0xff] %v4708_v56  ;;  %v4699_v47 = vmul.f32 %v4592_v35, %v9850_v48  ;;  %v4607_v32 = vsel %vm4604_vm9, %v4606_v20, %v4602_v5  ;;  %v4673_v54 = vadd.f32 %v5896_v25, %v4672_v9  ;;  %v4687_v37 = vmul.f32 %v5900_v27, %v4686_v6  ;;  %v5625_v20 = vld [vmem:[#allocation2 + $0x6c] sm:$0xf]  ;;  %v5540_v56 = vld [vmem:[#allocation2 + $0x48] sm:$0xf] }
 0xd59   :  { %v4700_v4 = vmul.f32 %v4607_v32, %v9853_v41  ;;  %v4640_v48 = vmul.f32 %v5902_v61, %v9896_v29  ;;  %vm4645_vm3 = vweird.f32 %v5902_v61  ;;  %v4650_v1 = vand.u32 2147483648, %v9896_v29  ;;  %v5619_v5 = vld [vmem:[#allocation2 + $0x34] sm:$0xf0]  ;;  %v5526_v13 = vld [vmem:[#allocation2 + $0x38] sm:$0xf0] }
 0xd5a   :  { %v4677_v59 = vsel %vm4676_vm15, %v5896_v25, %v4673_v54  ;;  %v4688_v41 = vadd.f32 %v5900_v27, %v4687_v37  ;;  %vm4644_vm4 = vweird.f32 %v9896_v29  ;;  %v4648_v16 = vand.u32 2147483647, %v9896_v29  ;;  %v5510_v37 = vld [vmem:[#allocation2 + $0x18] sm:$0xf0] }
 0xd5b   :  { %v4707_v45 = vpack.c.bf16 %v4700_v4, %v4699_v47  ;;  %v4682_v60 = vsel %vm4679_vm1, %v4681_v28, %v4677_v59  ;;  %v4641_v22 = vsub.f32 1.0, %v4640_v48  ;;  %vm4646_vm5 = vmor %vm4644_vm4, %vm4645_vm3  ;;  %v4651_v57 = vor.u32 1.1754944e-38, %v4650_v1  ;;  %v5626_v59 = vld [vmem:[#allocation2 + $0x6c] sm:$0xf0]  ;;  %v5550_v28 = vld [vmem:[#allocation2 + $0x70] sm:$0xf0] }
 0xd5c   :  { %v4705_v36 = vmul.f32 %v4682_v60, %v9855_v3  ;;  %v4692_v23 = vsel %vm4691_vm2, %v5900_v27, %v4688_v41  ;;  %v4665_v12 = vand.u32 2147483648, %v4576_v51  ;;  %vm4649_vm6 = vcmp.eq.f32.partialorder %v4648_v16, 8.507059e+37  ;;  %v5542_v27 = vld [vmem:[#allocation2 + $0x58] sm:$0xf0]  ;;  %v5548_v48 = vld [vmem:[#allocation2 + $0x60] sm:$0xf] }
 0xd5d   :  { %4711 = vst [vmem:[#allocation2 + $0x80] sm:$0xff] %v4707_v45  ;;  %v4642_v18 = vmul.f32 %v5902_v61, %v4641_v22  ;;  %v4697_v30 = vsel %vm4694_vm14, %v4696_v34, %v4692_v23  ;;  %v5904_v14 = vpop.eup %5903  ;;  %vm4659_vm11 = vweird.f32 %v4576_v51  ;;  %v5561_v58 = vor.u32 %v5625_v20, %v5558_v55  ;;  %v5615_v45 = vld [vmem:[#allocation2 + $0x14] sm:$0xf0]  ;;  %v5624_v60 = vld [vmem:[#allocation2 + $0x64] sm:$0xf] }
 0xd5e   :  { %v4706_v11 = vmul.f32 %v4697_v30, %v9860_v38  ;;  %v4655_v44 = vmul.f32 %v5904_v14, %v4576_v51  ;;  %vm4660_vm7 = vweird.f32 %v5904_v14  ;;  %v4663_v38 = vand.u32 2147483647, %v4576_v51  ;;  %v5524_v51 = vld [vmem:[#allocation2 + $0x28] sm:$0xf]  ;;  %v5622_v23 = vld [vmem:[#allocation2 + $0x4c] sm:$0xf0] }
 0xd5f   :  { %v4643_v33 = vadd.f32 %v5902_v61, %v4642_v18  ;;  %vm4661_vm12 = vmor %vm4659_vm11, %vm4660_vm7  ;;  %v4666_v62 = vor.u32 1.1754944e-38, %v4665_v12  ;;  %v5572_v29 = vld [vmem:[#allocation2 + $0x88] sm:$0xf]  ;;  %v5629_v21 = vld [vmem:[#allocation2 + $0x8c] sm:$0xf]  ;;  %v5541_v9 = vor.u32 %v5623_v8, %v5540_v56  ;;  %v5525_v2 = vor.u32 %v5619_v5, %v5524_v51 }
 0xd60   :  { %v4710_v63 = vpack.c.bf16 %v4706_v11, %v4705_v36  ;;  %v4656_v17 = vsub.f32 1.0, %v4655_v44  ;;  %vm4664_vm8 = vcmp.eq.f32.partialorder %v4663_v38, 8.507059e+37  ;;  %v5549_v41 = vor.u32 %v5626_v59, %v5548_v48  ;;  %v5508_v34 = vld [vmem:[#allocation2 + $0x8] sm:$0xf]  ;;  %v5613_v36 = vld [vmem:[#allocation2 + $0xc] sm:$0xf] }
 0xd61   :  { %v4647_v3 = vsel %vm4646_vm5, %v5902_v61, %v4643_v33  ;;  %v5617_v61 = vld [vmem:[#allocation2 + $0x2c] sm:$0xf]  ;;  %v5553_v22 = vor.u32 %v5624_v60, %v5550_v28  ;;  %v5534_v18 = vld [vmem:[#allocation2 + $0x50] sm:$0xf0]  ;;  %v5509_v30 = vor.u32 %v5615_v45, %v5508_v34  ;;  %v5513_v11 = vor.u32 %v5613_v36, %v5510_v37  ;;  %v5532_v33 = vld [vmem:[#allocation2 + $0x40] sm:$0xf] }
 0xd62   :  { %4714 = vst [vmem:[#allocation2 + $0x98] sm:$0xff] %v4710_v63  ;;  %v4657_v53 = vmul.f32 %v5904_v14, %v4656_v17  ;;  %v4652_v25 = vsel %vm4649_vm6, %v4651_v57, %v4647_v3  ;;  %v5529_v52 = vor.u32 %v5617_v61, %v5526_v13  ;;  %v5610_v1 = vld [vmem:[%s10298_s11] sm:$0xff]  ;;  %v5533_v63 = vor.u32 %v5622_v23, %v5532_v33  ;;  %v5618_v44 = vld [vmem:[#allocation2 + $0x2c] sm:$0xf0]  ;;  %v5518_v3 = vld [vmem:[#allocation2 + $0x30] sm:$0xf0] }
 0xd63   :  { %v4703_v10 = vmul.f32 %v4652_v25, %v9863_v40  ;;  %v5557_v40 = vor.u32 %v5627_v49, %v5556_v31  ;;  %vm4873_vm9 = vcmask 654336   ;;  %v5516_v17 = vld [vmem:[#allocation2 + $0x20] sm:$0xf]  ;;  %v5616_v57 = vld [vmem:[#allocation2 + $0x24] sm:$0xf]  ;;  %v9957_v49 = vpop.permute.xlu0 %4755  ;;  %v10544_v28 = vld [vmem:[#allocation13_spill] sm:$0xff] }
 0xd64   :  { %v4658_v26 = vadd.f32 %v5904_v14, %v4657_v53  ;;  %v5564_v35 = vld [vmem:[#allocation2 + $0x80] sm:$0xf]  ;;  %v5628_v32 = vld [vmem:[#allocation2 + $0x84] sm:$0xf]  ;;  %v5517_v12 = vor.u32 %v5618_v44, %v5516_v17  ;;  %v5521_v53 = vor.u32 %v5616_v57, %v5518_v3  ;;  %v5614_v38 = vld [vmem:[#allocation2 + $0xc] sm:$0xf0] }
 0xd65   :  { %v5502_v25 = vld [vmem:[#allocation2 + $0x10] sm:$0xf0]  ;;  %v10543_v61 = vld [vmem:[#allocation12_spill] sm:$0xff]  ;;  %v10547_v23 = vld [vmem:[#allocation19_spill] sm:$0xff] }
 0xd66   :  { %v4662_v24 = vsel %vm4661_vm12, %v5904_v14, %v4658_v26  ;;  %v5620_v14 = vld [vmem:[#allocation2 + $0x44] sm:$0xf]  ;;  %v5500_v26 = vld [vmem:[#allocation2] sm:$0xf]  ;;  %v10545_v48 = vld [vmem:[#allocation14_spill] sm:$0xff] }
 0xd67   :  { %v4667_v43 = vsel %vm4664_vm8, %v4666_v62, %v4662_v24  ;;  %v5537_v16 = vor.u32 %v5620_v14, %v5534_v18  ;;  %v5612_v62 = vld [vmem:[#allocation2 + $0x4] sm:$0xf]  ;;  %v10551_v57 = vld [vmem:[#allocation18_spill] sm:$0xff] }
 0xd68   :  { %v4704_v50 = vmul.f32 %v4667_v43, %v9871_v0  ;;  %v5545_v0 = vor.u32 %v5621_v46, %v5542_v27  ;;  %v5505_v24 = vor.u32 %v5612_v62, %v5502_v25  ;;  %v4746_v43 = vpop.permute.xlu1 %4745 }
 0xd69   :  { %v5631_v42 = vld [vmem:[#allocation2 + $0x94] sm:$0xf0]  ;;  %v5574_v19 = vld [vmem:[#allocation2 + $0x98] sm:$0xf0] }
 0xd6a   :  { %v5573_v15 = vor.u32 %v5631_v42, %v5572_v29  ;;  %v5577_v39 = vor.u32 %v5629_v21, %v5574_v19  ;;  %v4709_v7 = vpack.c.bf16 %v4704_v50, %v4703_v10  ;;  %v5501_v10 = vor.u32 %v5614_v38, %v5500_v26  ;;  %v5611_v29 = vld [vmem:[%s10298_s11 + $0x8] sm:$0xff]  ;;  %v4751_v19 = vpop.permute.xlu2 %4750  ;;  %s6060_s11 = smov [#allocation8]  }
 0xd6b   :  { %s5312_s21 = sshll.u32 %s6060_s11, 4  ;;  %s5313_s21 = int_to_ptr.vmem [resolvable:$true] %s5312_s21 }
 0xd6c   :  { %4921 = vmatpush.bf16.msrb.mxu2 %v5573_v15  ;;  %4940 = vmatpush.bf16.msrb.mxu3 %v5577_v39  ;;  %4713 = vst [vmem:[#allocation2 + $0x90] sm:$0xff] %v4709_v7 }
 0xd70   :  { %4922 = vmatpush.bf16.msrb.mxu2 %v5557_v40  ;;  %4941 = vmatpush.bf16.msrb.mxu3 %v5561_v58  ;;  %v9955_v39 = vpop.permute.xlu1 %4760 }
 0xd73   :  { %v5630_v47 = vld [vmem:[#allocation2 + $0x8c] sm:$0xf0]  ;;  %v5566_v54 = vld [vmem:[#allocation2 + $0x90] sm:$0xf0] }
 0xd74   :  { %4923 = vmatpush.bf16.msrb.mxu2 %v5541_v9  ;;  %4942 = vmatpush.bf16.msrb.mxu3 %v5545_v0  ;;  %v5565_v4 = vor.u32 %v5630_v47, %v5564_v35  ;;  %v5569_v6 = vor.u32 %v5628_v32, %v5566_v54  ;;  %v107_v0 = vpop.permute.xlu2 %106 }
 0xd75   :  { %v9979_v59 = vadd.f32 %v10543_v61, %v107_v0  ;;  %v9990_v60 = vadd.f32 %v10545_v48, %v107_v0 }
 0xd76   :  { %4883 = vmatpush.bf16.msrb.mxu0 %v5565_v4  ;;  %4902 = vmatpush.bf16.msrb.mxu1 %v5569_v6 }
 0xd78   :  { %4924 = vmatpush.bf16.msrb.mxu2 %v5525_v2  ;;  %4943 = vmatpush.bf16.msrb.mxu3 %v5529_v52  ;;  %v9972_v4 = vpop.permute.xlu1 %116  ;;  %v9982_v2 = vadd.f32 %v10544_v28, %v107_v0  ;;  %v9984_v52 = vpop.permute.xlu0 %111 }
 0xd79   :  { %v10000_v18 = vadd.f32 %v10547_v23, %v9972_v4 }
 0xd7a   :  { %4884 = vmatpush.bf16.msrb.mxu0 %v5549_v41  ;;  %4903 = vmatpush.bf16.msrb.mxu1 %v5553_v22  ;;  %v10546_v41 = vld [vmem:[#allocation17_spill] sm:$0xff] }
 0xd7b   :  { %v9993_v22 = vadd.f32 %v10546_v41, %v107_v0 }
 0xd7c   :  { %4925 = vmatpush.bf16.msrb.mxu2 %v5509_v30  ;;  %4944 = vmatpush.bf16.msrb.mxu3 %v5513_v11  ;;  %v10548_v30 = vld [vmem:[#allocation20_spill] sm:$0xff] }
 0xd7d   :  { %v10004_v11 = vadd.f32 %v10548_v30, %v9972_v4 }
 0xd7e   :  { %4885 = vmatpush.bf16.msrb.mxu0 %v5533_v63  ;;  %4904 = vmatpush.bf16.msrb.mxu1 %v5537_v16  ;;  %v10550_v16 = vld [vmem:[#allocation16_spill] sm:$0xff] }
 0xd7f   :  { %5582 = vmatmul.msk.bf16.vlgmr.msrb.gmra.mxu2 %vm4873_vm9, %v5610_v1  ;;  %5584 = vmatmul.msk.bf16.vlgmr.msrb.gmra.mxu3 %vm4873_vm9, %v5610_v1  ;;  %v10015_v44 = vadd.f32 %v10550_v16, %v9984_v52 }
 0xd82   :  { %4886 = vmatpush.bf16.msrb.mxu0 %v5517_v12  ;;  %4905 = vmatpush.bf16.msrb.mxu1 %v5521_v53  ;;  %v10022_v12 = vadd.f32 %v10551_v57, %v9984_v52 }
 0xd86   :  { %4887 = vmatpush.bf16.msrb.mxu0 %v5501_v10  ;;  %4906 = vmatpush.bf16.msrb.mxu1 %v5505_v24 }
 0xd89   :  { %5578 = vmatmul.msk.bf16.vlgmr.msrb.gmra.mxu0 %vm4873_vm9, %v5610_v1  ;;  %5580 = vmatmul.msk.bf16.vlgmr.msrb.gmra.mxu1 %vm4873_vm9, %v5610_v1  ;;  %v10549_v1 = vld [vmem:[#allocation15_spill] sm:$0xff] }
 0xd8a   :  { %v10011_v63 = vadd.f32 %v10549_v1, %v9984_v52 }
 0xd8f   :  { %5583 = vmatmul.msk.bf16.gmra.mxu2 %vm4873_vm9, %v5611_v29  ;;  %5585 = vmatmul.msk.bf16.gmra.mxu3 %vm4873_vm9, %v5611_v29 }
 0xd99   :  { %5579 = vmatmul.msk.bf16.gmra.mxu0 %vm4873_vm9, %v5611_v29  ;;  %5581 = vmatmul.msk.bf16.gmra.mxu1 %vm4873_vm9, %v5611_v29 }
 0xe02   :  { %v4927_v42 = vpop.f32.mrf.mxu2  ;;  %v4946_v21 = vpop.f32.mrf.mxu3 }
 0xe03   :  { %v9951_v50 = vadd.f32 %v4927_v42, %v4746_v43  ;;  %v9953_v15 = vadd.f32 %v4946_v21, %v4746_v43 }
 0xe05   :  { %v5588_v55 = vmul.f32 -1.442695, %v9951_v50  ;;  %v5589_v7 = vmul.f32 -1.442695, %v9953_v15 }
 0xe06   :  { %v4889_v31 = vpop.f32.mrf.mxu0  ;;  %v4908_v20 = vpop.f32.mrf.mxu1 }
 0xe07   :  { %v9961_v40 = vadd.f32 %v4889_v31, %v4746_v43  ;;  %v9963_v58 = vadd.f32 %v4908_v20, %v4746_v43  ;;  %5905 = vpow2.f32 %v5588_v55 }
 0xe08   :  { %5907 = vpow2.f32 %v5589_v7 }
 0xe09   :  { %v5586_v8 = vmul.f32 -1.442695, %v9961_v40  ;;  %v5587_v27 = vmul.f32 -1.442695, %v9963_v58 }
 0xe0a   :  { %v4929_v56 = vpop.f32.mrf.mxu2  ;;  %v4948_v5 = vpop.f32.mrf.mxu3 }
 0xe0b   :  { %5909 = vpow2.f32 %v5586_v8  ;;  %v9967_v46 = vadd.f32 %v4929_v56, %v4751_v19  ;;  %v9987_v45 = vadd.f32 %v4948_v5, %v4751_v19 }
 0xe0c   :  { %5911 = vpow2.f32 %v5587_v27 }
 0xe0d   :  { %v5906_v9 = vpop.eup %5905  ;;  %v5592_v35 = vmul.f32 -1.442695, %v9967_v46  ;;  %v5593_v38 = vmul.f32 -1.442695, %v9987_v45 }
 0xe0e   :  { %v5908_v13 = vpop.eup %5907  ;;  %v9970_v47 = vadd.f32 1.0, %v5906_v9  ;;  %v4891_v32 = vpop.f32.mrf.mxu0 }
 0xe0f   :  { %v4910_v54 = vpop.f32.mrf.mxu1  ;;  %v9974_v6 = vadd.f32 1.0, %v5908_v13  ;;  %v9976_v51 = vadd.f32 %v4891_v32, %v4751_v19  ;;  %5913 = vpow2.f32 %v5592_v35 }
 0xe10   :  { %5915 = vrcp.f32 %v9970_v47  ;;  %v9996_v34 = vadd.f32 %v4910_v54, %v4751_v19  ;;  %v5059_v17 = vand.u32 2147483647, %v9970_v47  ;;  %v5061_v53 = vand.u32 2147483648, %v9970_v47 }
 0xe11   :  { %v5910_v37 = vpop.eup %5909  ;;  %5917 = vrcp.f32 %v9974_v6  ;;  %v5590_v14 = vmul.f32 -1.442695, %v9976_v51  ;;  %v5074_v26 = vand.u32 2147483647, %v9974_v6  ;;  %v5076_v62 = vand.u32 2147483648, %v9974_v6 }
 0xe12   :  { %v5912_v36 = vpop.eup %5911  ;;  %v10006_v33 = vadd.f32 1.0, %v5910_v37  ;;  %v5591_v10 = vmul.f32 -1.442695, %v9996_v34  ;;  %vm5055_vm13 = vweird.f32 %v9970_v47  ;;  %vm5070_vm15 = vweird.f32 %v9974_v6  ;;  %v4951_v48 = vpop.f32.mrf.mxu3 }
 0xe13   :  { %v10017_v3 = vadd.f32 1.0, %v5912_v36  ;;  %vm10038_vm1 = vcmp.eq.f32.partialorder %v5059_v17, 8.507059e+37  ;;  %v5062_v20 = vor.u32 1.1754944e-38, %v5061_v53  ;;  %vm10045_vm10 = vcmp.eq.f32.partialorder %v5074_v26, 8.507059e+37 }
 0xe14   :  { %5919 = vrcp.f32 %v10006_v33  ;;  %v5029_v42 = vand.u32 2147483647, %v10006_v33  ;;  %v5031_v21 = vand.u32 2147483648, %v10006_v33  ;;  %v5077_v9 = vor.u32 1.1754944e-38, %v5076_v62 }
 0xe15   :  { %v5914_v25 = vpop.eup %5913  ;;  %5921 = vrcp.f32 %v10017_v3  ;;  %v5044_v7 = vand.u32 2147483647, %v10017_v3  ;;  %v5046_v31 = vand.u32 2147483648, %v10017_v3  ;;  %vm5025_vm0 = vweird.f32 %v10006_v33 }
 0xe16   :  { %v5916_v24 = vpop.eup %5915  ;;  %5923 = vpow2.f32 %v5590_v14  ;;  %v10033_v29 = vadd.f32 1.0, %v5914_v25  ;;  %vm5040_vm2 = vweird.f32 %v10017_v3  ;;  %vm10053_vm14 = vcmp.eq.f32.partialorder %v5029_v42, 8.507059e+37  ;;  %v4894_v25 = vpop.f32.mrf.mxu0 }
 0xe17   :  { %v5918_v43 = vpop.eup %5917  ;;  %v5051_v19 = vmul.f32 %v5916_v24, %v9970_v47  ;;  %5925 = vpow2.f32 %v5591_v10  ;;  %v5032_v54 = vor.u32 1.1754944e-38, %v5031_v21  ;;  %vm5056_vm3 = vweird.f32 %v5916_v24  ;;  %v4913_v47 = vpop.f32.mrf.mxu1 }
 0xe18   :  { %v5066_v8 = vmul.f32 %v5918_v43, %v9974_v6  ;;  %5927 = vrcp.f32 %v10033_v29  ;;  %vm10058_vm4 = vcmp.eq.f32.partialorder %v5044_v7, 8.507059e+37  ;;  %v5047_v41 = vor.u32 1.1754944e-38, %v5046_v31  ;;  %vm10067_vm6 = vmor %vm5055_vm13, %vm5056_vm3 }
 0xe19   :  { %v5052_v27 = vsub.f32 1.0, %v5051_v19  ;;  %vm5071_vm5 = vweird.f32 %v5918_v43  ;;  %v5119_v1 = vand.u32 2147483647, %v10033_v29  ;;  %v5121_v53 = vand.u32 2147483648, %v10033_v29 }
 0xe1a   :  { %v5920_v0 = vpop.eup %5919  ;;  %v5067_v35 = vsub.f32 1.0, %v5066_v8  ;;  %5929 = vpow2.f32 %v5593_v38  ;;  %vm5072_vm11 = vmor %vm5070_vm15, %vm5071_vm5  ;;  %v10086_v6 = vadd.f32 %v4894_v25, %v9957_v49  ;;  %v10094_v55 = vadd.f32 %v4913_v47, %v9957_v49 }
 0xe1b   :  { %v5922_v5 = vpop.eup %5921  ;;  %v5021_v13 = vmul.f32 %v5920_v0, %v10006_v33  ;;  %v5053_v61 = vmul.f32 %v5916_v24, %v5052_v27  ;;  %vm5026_vm7 = vweird.f32 %v5920_v0  ;;  %vm5115_vm13 = vweird.f32 %v10033_v29 }
 0xe1c   :  { %v5924_v28 = vpop.eup %5923  ;;  %v5036_v37 = vmul.f32 %v5922_v5, %v10017_v3  ;;  %v5068_v36 = vmul.f32 %v5918_v43, %v5067_v35  ;;  %vm5041_vm12 = vweird.f32 %v5922_v5  ;;  %vm5027_vm8 = vmor %vm5025_vm0, %vm5026_vm7  ;;  %v5122_v33 = vor.u32 1.1754944e-38, %v5121_v53 }
 0xe1d   :  { %v5022_v23 = vsub.f32 1.0, %v5021_v13  ;;  %v5054_v30 = vadd.f32 %v5916_v24, %v5053_v61  ;;  %v10062_v14 = vadd.f32 1.0, %v5924_v28  ;;  %v5926_v26 = vpop.eup %5925  ;;  %vm5042_vm9 = vmor %vm5040_vm2, %vm5041_vm12  ;;  %vm10109_vm15 = vcmp.eq.f32.partialorder %v5119_v1, 8.507059e+37 }
 0xe1e   :  { %v5037_v16 = vsub.f32 1.0, %v5036_v37  ;;  %v5069_v57 = vadd.f32 %v5918_v43, %v5068_v36  ;;  %v10078_v42 = vpop.eup %5927  ;;  %v10091_v35 = vadd.f32 1.0, %v5926_v26  ;;  %v5594_v37 = vmul.f32 -1.442695, %v10086_v6 }
 0xe1f   :  { %v5023_v62 = vmul.f32 %v5920_v0, %v5022_v23  ;;  %v5058_v10 = vsel %vm10067_vm6, %v5916_v24, %v5054_v30  ;;  %5931 = vrcp.f32 %v10062_v14  ;;  %v5111_v56 = vmul.f32 %v10078_v42, %v10033_v29 }
 0xe20   :  { %v5038_v21 = vmul.f32 %v5922_v5, %v5037_v16  ;;  %v5063_v38 = vsel %vm10038_vm1, %v5062_v20, %v5058_v10  ;;  %v5073_v19 = vsel %vm5072_vm11, %v5918_v43, %v5069_v57  ;;  %v4932_v43 = vpop.f32.mrf.mxu2  ;;  %5933 = vrcp.f32 %v10091_v35  ;;  %v4896_v10 = vpop.f32.mrf.mxu0 }
 0xe21   :  { %v5024_v7 = vadd.f32 %v5920_v0, %v5023_v62  ;;  %v5262_v31 = vmul.f32 %v5063_v38, %v9951_v50  ;;  %v5078_v24 = vsel %vm10045_vm10, %v5077_v9, %v5073_v19  ;;  %v5930_v9 = vpop.eup %5929  ;;  %v10115_v32 = vadd.f32 %v4932_v43, %v9957_v49 }
 0xe22   :  { %v5039_v8 = vadd.f32 %v5922_v5, %v5038_v21  ;;  %v5263_v27 = vmul.f32 %v5078_v24, %v9953_v15  ;;  %vm5085_vm1 = vweird.f32 %v10062_v14  ;;  %v5091_v36 = vand.u32 2147483648, %v10062_v14 }
 0xe23   :  { %v5028_v20 = vsel %vm5027_vm8, %v5920_v0, %v5024_v7  ;;  %v5278_v50 = vadd.f32 %v5262_v31, %v9990_v60  ;;  %v5112_v23 = vsub.f32 1.0, %v5111_v56  ;;  %vm5116_vm10 = vweird.f32 %v10078_v42 }
 0xe24   :  { %v5033_v15 = vsel %vm10053_vm14, %v5032_v54, %v5028_v20  ;;  %v5043_v13 = vsel %vm5042_vm9, %v5922_v5, %v5039_v8  ;;  %v5279_v61 = vadd.f32 %v5263_v27, %v9993_v22  ;;  %v5595_v54 = vmul.f32 -1.442695, %v10094_v55  ;;  %vm5117_vm3 = vmor %vm5115_vm13, %vm5116_vm10 }
 0xe25   :  { %v5932_v0 = vpop.eup %5931  ;;  %v5260_v3 = vmul.f32 %v5033_v15, %v9961_v40  ;;  %v5048_v60 = vsel %vm10058_vm4, %v5047_v41, %v5043_v13  ;;  %5294 = vst [vmem:[#allocation8 + $0x10] sm:$0xff] %v5278_v50  ;;  %v5089_v40 = vand.u32 2147483647, %v10062_v14  ;;  %v5113_v16 = vmul.f32 %v10078_v42, %v5112_v23  ;;  %v10568_v23 = vld [vmem:[#allocation22_spill] sm:$0xff] }
 0xe26   :  { %v5261_v22 = vmul.f32 %v5048_v60, %v9963_v58  ;;  %5295 = vst [vmem:[#allocation8 + $0x18] sm:$0xff] %v5279_v61  ;;  %v5081_v5 = vmul.f32 %v5932_v0, %v10062_v14  ;;  %v10126_v58 = vadd.f32 1.0, %v5930_v9  ;;  %5935 = vpow2.f32 %v5594_v37  ;;  %v5934_v57 = vpop.eup %5933 }
 0xe27   :  { %v5276_v41 = vadd.f32 %v5260_v3, %v9979_v59  ;;  %v5596_v17 = vmul.f32 -1.442695, %v10115_v32  ;;  %v10131_v59 = vadd.f32 %v4951_v48, %v9957_v49  ;;  %vm5086_vm0 = vweird.f32 %v5932_v0 }
 0xe28   :  { %v5277_v30 = vadd.f32 %v5261_v22, %v9982_v2  ;;  %v5082_v1 = vsub.f32 1.0, %v5081_v5  ;;  %vm10133_vm2 = vcmp.eq.f32.partialorder %v5089_v40, 8.507059e+37  ;;  %5937 = vrcp.f32 %v10126_v58  ;;  %vm5087_vm4 = vmor %vm5085_vm1, %vm5086_vm0 }
 0xe29   :  { %5292 = vst [vmem:[#allocation8] sm:$0xff] %v5276_v41  ;;  %v5092_v25 = vor.u32 1.1754944e-38, %v5091_v36  ;;  %v5096_v26 = vmul.f32 %v5934_v57, %v10091_v35  ;;  %vm5100_vm14 = vweird.f32 %v10091_v35  ;;  %v5114_v62 = vadd.f32 %v10078_v42, %v5113_v16  ;;  %v4915_v41 = vpop.f32.mrf.mxu1  ;;  %v4934_v36 = vpop.f32.mrf.mxu2 }
 0xe2a   :  { %5293 = vst [vmem:[#allocation8 + $0x8] sm:$0xff] %v5277_v30  ;;  %v5083_v53 = vmul.f32 %v5932_v0, %v5082_v1  ;;  %v5104_v47 = vand.u32 2147483647, %v10091_v35  ;;  %5939 = vpow2.f32 %v5595_v54  ;;  %v5597_v21 = vmul.f32 -1.442695, %v10131_v59  ;;  %v10569_v1 = vld [vmem:[#allocation21_spill] sm:$0xff] }
 0xe2b   :  { %v5097_v38 = vsub.f32 1.0, %v5096_v26  ;;  %v5106_v19 = vand.u32 2147483648, %v10091_v35  ;;  %v5118_v7 = vsel %vm5117_vm3, %v10078_v42, %v5114_v62  ;;  %5941 = vpow2.f32 %v5596_v17 }
 0xe2c   :  { %v5084_v49 = vadd.f32 %v5932_v0, %v5083_v53  ;;  %vm5101_vm5 = vweird.f32 %v5934_v57  ;;  %v5123_v24 = vsel %vm10109_vm15, %v5122_v33, %v5118_v7  ;;  %v10154_v29 = vadd.f32 %v4896_v10, %v9955_v39  ;;  %v5936_v8 = vpop.eup %5935 }
 0xe2d   :  { %v5098_v14 = vmul.f32 %v5934_v57, %v5097_v38  ;;  %v5266_v43 = vmul.f32 %v5123_v24, %v9967_v46  ;;  %5943 = vpow2.f32 %v5597_v21  ;;  %vm10160_vm6 = vcmp.eq.f32.partialorder %v5104_v47, 8.507059e+37  ;;  %vm5102_vm7 = vmor %vm5100_vm14, %vm5101_vm5 }
 0xe2e   :  { %v5088_v31 = vsel %vm5087_vm4, %v5932_v0, %v5084_v49  ;;  %v5938_v20 = vpop.eup %5937  ;;  %v10164_v56 = vadd.f32 1.0, %v5936_v8  ;;  %v5598_v33 = vmul.f32 -1.442695, %v10154_v29  ;;  %v5107_v15 = vor.u32 1.1754944e-38, %v5106_v19 }
 0xe2f   :  { %v5093_v27 = vsel %vm10133_vm2, %v5092_v25, %v5088_v31  ;;  %v5099_v9 = vadd.f32 %v5934_v57, %v5098_v14  ;;  %v5282_v13 = vadd.f32 %v5266_v43, %v10022_v12  ;;  %v5126_v61 = vmul.f32 %v5938_v20, %v10126_v58 }
 0xe30   :  { %v5264_v42 = vmul.f32 %v5093_v27, %v9976_v51  ;;  %v5940_v0 = vpop.eup %5939  ;;  %v5134_v51 = vand.u32 2147483647, %v10126_v58  ;;  %v5136_v3 = vand.u32 2147483648, %v10126_v58  ;;  %5945 = vrcp.f32 %v10164_v56 }
 0xe31   :  { %v5942_v60 = vpop.eup %5941  ;;  %v5103_v28 = vsel %vm5102_vm7, %v5934_v57, %v5099_v9  ;;  %5298 = vst [vmem:[#allocation8 + $0x30] sm:$0xff] %v5282_v13  ;;  %v5127_v37 = vsub.f32 1.0, %v5126_v61  ;;  %vm5131_vm11 = vweird.f32 %v5938_v20  ;;  %v10176_v12 = vadd.f32 1.0, %v5940_v0 }
 0xe32   :  { %v5280_v46 = vadd.f32 %v5264_v42, %v10011_v63  ;;  %v5108_v63 = vsel %vm10160_vm6, %v5107_v15, %v5103_v28  ;;  %v5149_v35 = vand.u32 2147483647, %v10164_v56  ;;  %v10181_v22 = vadd.f32 1.0, %v5942_v60 }
 0xe33   :  { %5947 = vpow2.f32 %v5598_v33  ;;  %v5944_v5 = vpop.eup %5943  ;;  %v5265_v40 = vmul.f32 %v5108_v63, %v9996_v34  ;;  %v5128_v54 = vmul.f32 %v5938_v20, %v5127_v37  ;;  %v5151_v48 = vand.u32 2147483648, %v10164_v56  ;;  %v4953_v37 = vpop.f32.mrf.mxu3 }
 0xe34   :  { %5296 = vst [vmem:[#allocation8 + $0x20] sm:$0xff] %v5280_v46  ;;  %5949 = vrcp.f32 %v10176_v12  ;;  %v10188_v30 = vadd.f32 %v10568_v23, %v9972_v4  ;;  %v210_v16 = vadd.f32 %v10569_v1, %v9984_v52  ;;  %vm5130_vm12 = vweird.f32 %v10126_v58 }
 0xe35   :  { %5951 = vrcp.f32 %v10181_v22  ;;  %v5281_v34 = vadd.f32 %v5265_v40, %v10015_v44  ;;  %v5129_v17 = vadd.f32 %v5938_v20, %v5128_v54  ;;  %vm5135_vm8 = vcmp.eq.f32.partialorder %v5134_v51, 8.507059e+37  ;;  %vm5132_vm9 = vmor %vm5130_vm12, %vm5131_vm11 }
 0xe36   :  { %v5137_v57 = vor.u32 1.1754944e-38, %v5136_v3  ;;  %v5946_v53 = vpop.eup %5945  ;;  %vm5145_vm13 = vweird.f32 %v10164_v56  ;;  %v10197_v2 = vadd.f32 1.0, %v5944_v5  ;;  %v10200_v25 = vadd.f32 %v4915_v41, %v9955_v39 }
 0xe37   :  { %v10203_v52 = vadd.f32 %v4934_v36, %v9955_v39  ;;  %5297 = vst [vmem:[#allocation8 + $0x28] sm:$0xff] %v5281_v34  ;;  %v5133_v58 = vsel %vm5132_vm9, %v5938_v20, %v5129_v17  ;;  %v5141_v44 = vmul.f32 %v5946_v53, %v10164_v56  ;;  %vm10206_vm15 = vcmp.eq.f32.partialorder %v5149_v35, 8.507059e+37 }
 0xe38   :  { %v5152_v62 = vor.u32 1.1754944e-38, %v5151_v48  ;;  %v5138_v49 = vsel %vm5135_vm8, %v5137_v57, %v5133_v58  ;;  %vm5160_vm1 = vweird.f32 %v10176_v12  ;;  %v5164_v47 = vand.u32 2147483647, %v10176_v12 }
 0xe39   :  { %v5948_v10 = vpop.eup %5947  ;;  %5953 = vrcp.f32 %v10197_v2  ;;  %v5267_v38 = vmul.f32 %v5138_v49, %v9987_v45  ;;  %v5142_v19 = vsub.f32 1.0, %v5141_v44  ;;  %v5166_v7 = vand.u32 2147483648, %v10176_v12 }
 0xe3a   :  { %v5950_v21 = vpop.eup %5949  ;;  %v5179_v31 = vand.u32 2147483647, %v10181_v22  ;;  %vm5175_vm10 = vweird.f32 %v10181_v22  ;;  %v10218_v27 = vadd.f32 1.0, %v5948_v10  ;;  %v5599_v14 = vmul.f32 -1.442695, %v10200_v25 }
 0xe3b   :  { %v5952_v24 = vpop.eup %5951  ;;  %v5156_v8 = vmul.f32 %v5950_v21, %v10176_v12  ;;  %v5283_v43 = vadd.f32 %v5267_v38, %v210_v16  ;;  %v5143_v20 = vmul.f32 %v5946_v53, %v5142_v19  ;;  %vm5146_vm0 = vweird.f32 %v5946_v53 }
 0xe3c   :  { %v5171_v42 = vmul.f32 %v5952_v24, %v10181_v22  ;;  %vm10222_vm2 = vcmp.eq.f32.partialorder %v5164_v47, 8.507059e+37  ;;  %v5181_v33 = vand.u32 2147483648, %v10181_v22  ;;  %5955 = vrcp.f32 %v10218_v27  ;;  %vm5147_vm3 = vmor %vm5145_vm13, %vm5146_vm0 }
 0xe3d   :  { %v5157_v45 = vsub.f32 1.0, %v5156_v8  ;;  %5299 = vst [vmem:[#allocation8 + $0x38] sm:$0xff] %v5283_v43  ;;  %v5144_v9 = vadd.f32 %v5946_v53, %v5143_v20  ;;  %v5167_v15 = vor.u32 1.1754944e-38, %v5166_v7  ;;  %vm10228_vm14 = vcmp.eq.f32.partialorder %v5179_v31, 8.507059e+37 }
 0xe3e   :  { %v5172_v13 = vsub.f32 1.0, %v5171_v42  ;;  %vm5161_vm4 = vweird.f32 %v5950_v21  ;;  %5957 = vpow2.f32 %v5599_v14  ;;  %v5600_v51 = vmul.f32 -1.442695, %v10203_v52 }
 0xe3f   :  { %v5954_v0 = vpop.eup %5953  ;;  %v5158_v46 = vmul.f32 %v5950_v21, %v5157_v45  ;;  %v5148_v3 = vsel %vm5147_vm3, %v5946_v53, %v5144_v9  ;;  %vm5176_vm5 = vweird.f32 %v5952_v24  ;;  %v5182_v5 = vor.u32 1.1754944e-38, %v5181_v33  ;;  %vm5162_vm6 = vmor %vm5160_vm1, %vm5161_vm4 }
 0xe40   :  { %v5173_v60 = vmul.f32 %v5952_v24, %v5172_v13  ;;  %v5186_v28 = vmul.f32 %v5954_v0, %v10197_v2  ;;  %v5153_v63 = vsel %vm10206_vm15, %v5152_v62, %v5148_v3  ;;  %v5194_v40 = vand.u32 2147483647, %v10197_v2  ;;  %vm5177_vm7 = vmor %vm5175_vm10, %vm5176_vm5 }
 0xe41   :  { %v5159_v35 = vadd.f32 %v5950_v21, %v5158_v46  ;;  %v5268_v56 = vmul.f32 %v5153_v63, %v10086_v6  ;;  %5959 = vpow2.f32 %v5600_v51  ;;  %vm5191_vm11 = vweird.f32 %v5954_v0 }
 0xe42   :  { %v5174_v54 = vadd.f32 %v5952_v24, %v5173_v60  ;;  %v5187_v48 = vsub.f32 1.0, %v5186_v28  ;;  %v5956_v41 = vpop.eup %5955  ;;  %v5196_v23 = vand.u32 2147483648, %v10197_v2  ;;  %v10246_v1 = vadd.f32 %v4953_v37, %v9955_v39 }
 0xe43   :  { %v5163_v36 = vsel %vm5162_vm6, %v5950_v21, %v5159_v35  ;;  %v5284_v16 = vadd.f32 %v5268_v56, %v10000_v18  ;;  %vm5190_vm12 = vweird.f32 %v10197_v2  ;;  %v5201_v53 = vmul.f32 %v5956_v41, %v10218_v27  ;;  %v10578_v56 = vld [vmem:[#allocation24_spill] sm:$0xff] }
 0xe44   :  { %v5168_v6 = vsel %vm10222_vm2, %v5167_v15, %v5163_v36  ;;  %v5178_v12 = vsel %vm5177_vm7, %v5952_v24, %v5174_v54  ;;  %v5188_v34 = vmul.f32 %v5954_v0, %v5187_v48  ;;  %v5958_v17 = vpop.eup %5957  ;;  %v5601_v44 = vmul.f32 -1.442695, %v10246_v1  ;;  %vm5192_vm8 = vmor %vm5190_vm12, %vm5191_vm11 }
 0xe45   :  { %v5269_v57 = vmul.f32 %v5168_v6, %v10094_v55  ;;  %v5183_v22 = vsel %vm10228_vm14, %v5182_v5, %v5178_v12  ;;  %5300 = vst [vmem:[#allocation8 + $0x40] sm:$0xff] %v5284_v16  ;;  %v5017_v18 = vadd.f32 1.0, %v5958_v17  ;;  %vm5195_vm9 = vcmp.eq.f32.partialorder %v5194_v40, 8.507059e+37  ;;  %v10579_v17 = vld [vmem:[#allocation25_spill] sm:$0xff] }
 0xe46   :  { %v5270_v39 = vmul.f32 %v5183_v22, %v10115_v32  ;;  %v5189_v58 = vadd.f32 %v5954_v0, %v5188_v34  ;;  %v5197_v55 = vor.u32 1.1754944e-38, %v5196_v23  ;;  %v5202_v62 = vsub.f32 1.0, %v5201_v53 }
 0xe47   :  { %v5285_v26 = vadd.f32 %v5269_v57, %v10004_v11  ;;  %v5960_v10 = vpop.eup %5959  ;;  %v5211_v47 = vand.u32 2147483648, %v10218_v27  ;;  %5961 = vrcp.f32 %v5017_v18  ;;  %vm5206_vm13 = vweird.f32 %v5956_v41  ;;  %v10576_v11 = vld [vmem:[#allocation26_spill] sm:$0xff] }
 0xe48   :  { %v5286_v49 = vadd.f32 %v5270_v39, %v10188_v30  ;;  %v5193_v2 = vsel %vm5192_vm8, %v5954_v0, %v5189_v58  ;;  %v5203_v21 = vmul.f32 %v5956_v41, %v5202_v62  ;;  %v5209_v38 = vand.u32 2147483647, %v10218_v27  ;;  %v10267_v30 = vpop.permute.xlu2 %121 }
 0xe49   :  { %5301 = vst [vmem:[#allocation8 + $0x48] sm:$0xff] %v5285_v26  ;;  %v5198_v32 = vsel %vm5195_vm9, %v5197_v55, %v5193_v2  ;;  %v213_v19 = vadd.f32 %v10576_v11, %v9972_v4  ;;  %v5018_v31 = vadd.f32 1.0, %v5960_v10  ;;  %5963 = vpow2.f32 %v5601_v44  ;;  %v10577_v4 = vld [vmem:[#allocation23_spill] sm:$0xff] }
 0xe4a   :  { %5302 = vst [vmem:[#allocation8 + $0x50] sm:$0xff] %v5286_v49  ;;  %v5271_v7 = vmul.f32 %v5198_v32, %v10131_v59  ;;  %v5204_v24 = vadd.f32 %v5956_v41, %v5203_v21  ;;  %vm5205_vm15 = vweird.f32 %v10218_v27  ;;  %v5212_v14 = vor.u32 1.1754944e-38, %v5211_v47 }
 0xe4b   :  { %vm5207_vm1 = vmor %vm5205_vm15, %vm5206_vm13  ;;  %5965 = vrcp.f32 %v5018_v31  ;;  %vm5210_vm10 = vcmp.eq.f32.partialorder %v5209_v38, 8.507059e+37  ;;  %v158_v45 = vadd.f32 %v10577_v4, %v10267_v30  ;;  %v5224_v61 = vand.u32 2147483647, %v5017_v18 }
 0xe4c   :  { %v5287_v8 = vadd.f32 %v5271_v7, %v213_v19  ;;  %v5208_v43 = vsel %vm5207_vm1, %v5956_v41, %v5204_v24  ;;  %v5226_v0 = vand.u32 2147483648, %v5017_v18  ;;  %vm5220_vm2 = vweird.f32 %v5017_v18 }
 0xe4d   :  { %v5962_v20 = vpop.eup %5961  ;;  %v5213_v42 = vsel %vm5210_vm10, %v5212_v14, %v5208_v43  ;;  %vm5225_vm3 = vcmp.eq.f32.partialorder %v5224_v61, 8.507059e+37  ;;  %v5239_v35 = vand.u32 2147483647, %v5018_v31  ;;  %v177_v54 = vadd.f32 %v10578_v56, %v10267_v30 }
 0xe4e   :  { %5303 = vst [vmem:[#allocation8 + $0x58] sm:$0xff] %v5287_v8  ;;  %v5272_v59 = vmul.f32 %v5213_v42, %v10154_v29  ;;  %v5216_v50 = vmul.f32 %v5962_v20, %v5017_v18  ;;  %vm5221_vm0 = vweird.f32 %v5962_v20  ;;  %v5227_v28 = vor.u32 1.1754944e-38, %v5226_v0 }
 0xe4f   :  { %v5964_v33 = vpop.eup %5963  ;;  %vm5222_vm14 = vmor %vm5220_vm2, %vm5221_vm0  ;;  %v5241_v29 = vand.u32 2147483648, %v5018_v31  ;;  %vm5235_vm5 = vweird.f32 %v5018_v31  ;;  %vm5240_vm7 = vcmp.eq.f32.partialorder %v5239_v35, 8.507059e+37  ;;  %v196_v57 = vadd.f32 %v10579_v17, %v10267_v30 }
 0xe50   :  { %v5288_v9 = vadd.f32 %v5272_v59, %v158_v45  ;;  %v5217_v27 = vsub.f32 1.0, %v5216_v50  ;;  %v5019_v15 = vadd.f32 1.0, %v5964_v33 }
 0xe51   :  { %v5966_v13 = vpop.eup %5965  ;;  %v5242_v36 = vor.u32 1.1754944e-38, %v5241_v29 }
 0xe52   :  { %5304 = vst [vmem:[#allocation8 + $0x60] sm:$0xff] %v5288_v9  ;;  %v5218_v46 = vmul.f32 %v5962_v20, %v5217_v27  ;;  %v5231_v51 = vmul.f32 %v5966_v13, %v5018_v31  ;;  %5967 = vrcp.f32 %v5019_v15  ;;  %vm5236_vm4 = vweird.f32 %v5966_v13 }
 0xe53   :  { %vm5237_vm6 = vmor %vm5235_vm5, %vm5236_vm4  ;;  %v5256_v53 = vand.u32 2147483648, %v5019_v15  ;;  %vm5250_vm12 = vweird.f32 %v5019_v15 }
 0xe54   :  { %v5219_v3 = vadd.f32 %v5962_v20, %v5218_v46  ;;  %v5232_v60 = vsub.f32 1.0, %v5231_v51 }
 0xe55   :  { %v5257_v44 = vor.u32 1.1754944e-38, %v5256_v53 }
 0xe56   :  { %v5223_v37 = vsel %vm5222_vm14, %v5962_v20, %v5219_v3  ;;  %v5233_v63 = vmul.f32 %v5966_v13, %v5232_v60 }
 0xe57   :  { %v5228_v5 = vsel %vm5225_vm3, %v5227_v28, %v5223_v37 }
 0xe58   :  { %v5968_v40 = vpop.eup %5967  ;;  %v5273_v48 = vmul.f32 %v5228_v5, %v10200_v25  ;;  %v5234_v41 = vadd.f32 %v5966_v13, %v5233_v63  ;;  %v5254_v25 = vand.u32 2147483647, %v5019_v15 }
 0xe59   :  { %v5246_v23 = vmul.f32 %v5968_v40, %v5019_v15  ;;  %vm5251_vm11 = vweird.f32 %v5968_v40 }
 0xe5a   :  { %v5289_v16 = vadd.f32 %v5273_v48, %v177_v54  ;;  %v5238_v6 = vsel %vm5237_vm6, %v5966_v13, %v5234_v41  ;;  %vm5252_vm8 = vmor %vm5250_vm12, %vm5251_vm11  ;;  %vm5255_vm9 = vcmp.eq.f32.partialorder %v5254_v25, 8.507059e+37 }
 0xe5b   :  { %v5243_v12 = vsel %vm5240_vm7, %v5242_v36, %v5238_v6  ;;  %v5247_v34 = vsub.f32 1.0, %v5246_v23 }
 0xe5c   :  { %5305 = vst [vmem:[#allocation8 + $0x68] sm:$0xff] %v5289_v16  ;;  %v5274_v22 = vmul.f32 %v5243_v12, %v10203_v52  ;;  %v10580_v52 = vld [vmem:[#allocation32_spill] sm:$0xff] }
 0xe5d   :  { %v5248_v39 = vmul.f32 %v5968_v40, %v5247_v34  ;;  %v215_v62 = vadd.f32 %v10580_v52, %v10267_v30 }
 0xe5e   :  { %v5290_v58 = vadd.f32 %v5274_v22, %v196_v57 }
 0xe5f   :  { %v5249_v18 = vadd.f32 %v5968_v40, %v5248_v39 }
 0xe60   :  { %5306 = vst [vmem:[#allocation8 + $0x70] sm:$0xff] %v5290_v58 }
 0xe61   :  { %v5253_v26 = vsel %vm5252_vm8, %v5968_v40, %v5249_v18 }
 0xe62   :  { %v5258_v55 = vsel %vm5255_vm9, %v5257_v44, %v5253_v26 }
 0xe63   :  { %v5275_v10 = vmul.f32 %v5258_v55, %v10246_v1 }
 0xe65   :  { %v5291_v49 = vadd.f32 %v5275_v10, %v215_v62 }
 0xe67   :  { %5307 = vst [vmem:[#allocation8 + $0x78] sm:$0xff] %v5291_v49 }
 0xe68   :  { %5320 = dma.vmem_to_hbm [thread:$0]  %s5313_s21, 2048, %s5315_s29, [#allocation5], %s6048_s26, %s6048_s26, %s6049_s27  }
 0xe69   :  { %6045 = dma.done.wait [#allocation5], 2048  }
 0xe6a   :  { %6046 = vsyncadd [#allocation5], 4294965248 }
 0xe6b   :  { %5325 = vsyncpa [#allocation4], 1 }
 0xe6c   :  { %5326 = vsyncpa [#allocation7], 1 }
 0xe6d   :  { %5327 = vsyncpa [#allocation5], 1 }

</bundles_post_ra>
